<compile_context>
chip_gen: v7x
topology: tpu7x:2x2x1
jax: 0.10.0
libtpu: 0.0.40
codegen_flags: <defaults>
</compile_context>

<pallas_src>
import functools
import math

import jax
import jax.numpy as jnp
from jax.experimental import pallas as pl
from jax.experimental.pallas import tpu as pltpu

# ---------------- hyper-parameters (params.GM.*) ----------------
BATCH = 2
NUM_POINTS = 16
FEATURE_CHANNEL = 32      # params.GM.FEATURE_CHANNEL (DGCNN emb_dims / GNN width)
PROJ_FEAT = 32            # params.GM.PROJ_FEAT
NEIGHBORS = 4             # params.GM.NEIGHBORSNUM
NATTEND = 1               # params.GM.NATTEND
OT_ITERS = 3              # params.GM.OT_ITER_NUM
NUM_HEADS = 4             # fixed to 4 in AttentionalGNN
HEAD_DIM = FEATURE_CHANNEL // NUM_HEADS
BN_EPS = 1e-5
GNN_NAMES = ['self', 'cross'] * NATTEND
NEG_BIG = -1e30
_F32 = jnp.float32
# params.GM.ALPHASCORE = False, params.GM.SKADDCR = True -> sinkhorn_rpm(slack=True)


def _full_spec(a):
    """BlockSpec covering the full array (single block), for a 1-length grid."""
    return pl.BlockSpec(a.shape, lambda i, _nd=a.ndim: (0,) * _nd)


# =====================================================================
# The single fused kernel
# =====================================================================

def _superglue_kernel(x_ref,
                      w1e_ref, w2e_ref, w3e_ref, w4e_ref, w5e_ref,
                      wqkv_ref, bqkv_ref, wm_ref, bm_ref,
                      wh_ref, bh_ref, wo_ref, bo_ref,
                      wp_ref, bp_ref,
                      p_ref, src_ref, reft_ref,
                      *, n_pts, n_batch, k_nbrs, n_heads, head_dim,
                      ot_iters, layer_names):
    P = 2 * n_batch * n_pts                       # folded lane dim (2B*N)
    D = FEATURE_CHANNEL
    shift = n_pts.bit_length() - 1                # N is a power of two (16)

    # ----- chunk-id masks over the folded lane axis -----
    # lane layout: [desc0_b0 | desc0_b1 | ... | desc1_b0 | desc1_b1 | ...]
    ri = jax.lax.broadcasted_iota(jnp.int32, (P, P), 0)
    ci = jax.lax.broadcasted_iota(jnp.int32, (P, P), 1)
    rc = jnp.right_shift(ri, shift)               # chunk index of the row
    cc = jnp.right_shift(ci, shift)               # chunk index of the column
    same_chunk = rc == cc                         # self-attention / per-cloud knn
    rc_cross = jnp.where(rc < n_batch, rc + n_batch, rc - n_batch)
    cross_chunk = rc_cross == cc                  # cross-attention pairing
    ci_f = ci.astype(_F32)

    # =================================================================
    # DGCNN encoder: knn + graph features + conv1..4 + max-over-k + conv5
    # =================================================================
    x_all = x_ref[...]                                            # (3, P)
    gram = jax.lax.dot_general(x_all, x_all, (((0,), (0,)), ((), ())),
                               preferred_element_type=_F32)       # (P, P)
    xx = jnp.sum(x_all * x_all, axis=0, keepdims=True)            # (1, P)
    # score[i, j] = pairwise_distance[i, j] + const(i): same top-k ordering.
    score = jnp.where(same_chunk, 2.0 * gram - xx, NEG_BIG)

    w1e, w2e = w1e_ref[...], w2e_ref[...]
    w3e, w4e = w3e_ref[...], w4e_ref[...]

    x1 = x2 = x3 = x4 = None
    for t in range(k_nbrs):                       # static unroll: masked-argmax top-k
        m = jnp.max(score, axis=1, keepdims=True)                 # (P, 1)
        cand = jnp.where(score == m, ci_f, float(P))
        sel = jnp.min(cand, axis=1, keepdims=True)                # argmax col per row
        onehot = (ci_f == sel).astype(_F32)                       # (P, P), one per row
        nbr = jax.lax.dot_general(x_all, onehot, (((1,), (1,)), ((), ())),
                                  preferred_element_type=_F32)    # (3, P) gathered nbrs
        gt = jnp.concatenate([nbr, x_all], axis=0)                # (6, P) [nbr, center]
        h1 = jnp.maximum(jnp.dot(w1e, gt, preferred_element_type=_F32), 0.0)
        h2 = jnp.maximum(jnp.dot(w2e, h1, preferred_element_type=_F32), 0.0)
        h3 = jnp.maximum(jnp.dot(w3e, h2, preferred_element_type=_F32), 0.0)
        h4 = jnp.maximum(jnp.dot(w4e, h3, preferred_element_type=_F32), 0.0)
        if t == 0:
            x1, x2, x3, x4 = h1, h2, h3, h4
        else:
            x1 = jnp.maximum(x1, h1)              # max-pool over k neighbours
            x2 = jnp.maximum(x2, h2)
            x3 = jnp.maximum(x3, h3)
            x4 = jnp.maximum(x4, h4)
        score = jnp.where(ci_f == sel, NEG_BIG, score)            # mask chosen nbr

    xcat = jnp.concatenate([x1, x2, x3, x4], axis=0)              # (256, P) sublane cat
    desc = jnp.maximum(jnp.dot(w5e_ref[...], xcat,
                               preferred_element_type=_F32), 0.0)  # (D, P)

    # =================================================================
    # AttentionalGNN: both (self, cross) layers fused, desc stays in VMEM
    # =================================================================
    inv_sqrt_dh = 1.0 / math.sqrt(head_dim)
    for l, name in enumerate(layer_names):        # static unroll over layers
        mask = same_chunk if name == 'self' else cross_chunk
        qkv = jnp.dot(wqkv_ref[l], desc, preferred_element_type=_F32) + bqkv_ref[l]
        q = qkv[0:D]                              # (D, P) head-contiguous rows
        kk = qkv[D:2 * D]
        v = qkv[2 * D:3 * D]

        head_outs = []
        for h in range(n_heads):                  # unrolled head loop
            lo = h * head_dim
            qh = q[lo:lo + head_dim]              # (dh, P)
            kh = kk[lo:lo + head_dim]
            vh = v[lo:lo + head_dim]
            sc = jax.lax.dot_general(qh, kh, (((0,), (0,)), ((), ())),
                                     preferred_element_type=_F32) * inv_sqrt_dh
            sc = jnp.where(mask, sc, NEG_BIG)     # restrict to the source block
            mx = jnp.max(sc, axis=-1, keepdims=True)
            e = jnp.exp(sc - mx)
            prob = e / jnp.sum(e, axis=-1, keepdims=True)         # exact softmax
            oh = jax.lax.dot_general(vh, prob, (((1,), (1,)), ((), ())),
                                     preferred_element_type=_F32)  # (dh, P)
            head_outs.append(oh)
        attn = jnp.concatenate(head_outs, axis=0)                  # (D, P)
        message = jnp.dot(wm_ref[l], attn, preferred_element_type=_F32) + bm_ref[l]

        cat_xm = jnp.concatenate([desc, message], axis=0)          # (2D, P)
        hid = jnp.maximum(jnp.dot(wh_ref[l], cat_xm,
                                  preferred_element_type=_F32) + bh_ref[l], 0.0)
        delta = jnp.dot(wo_ref[l], hid, preferred_element_type=_F32) + bo_ref[l]
        desc = desc + delta                       # residual

    # =================================================================
    # Final projection + scores + slack Sinkhorn-RPM + exp + inlier sums
    # =================================================================
    md = jnp.dot(wp_ref[...], desc, preferred_element_type=_F32) + bp_ref[...]
    inv_sqrt_pf = 1.0 / math.sqrt(PROJ_FEAT)
    np1 = n_pts + 1
    r17 = jax.lax.broadcasted_iota(jnp.int32, (np1, np1), 0)
    c17 = jax.lax.broadcasted_iota(jnp.int32, (np1, np1), 1)
    zcol = jnp.zeros((n_pts, 1), _F32)
    zrow = jnp.zeros((1, np1), _F32)

    for b in range(n_batch):                      # static unroll over batch
        md0 = md[:, b * n_pts:(b + 1) * n_pts]
        md1 = md[:, (n_batch + b) * n_pts:(n_batch + b + 1) * n_pts]
        scb = jax.lax.dot_general(md0, md1, (((0,), (0,)), ((), ())),
                                  preferred_element_type=_F32) * inv_sqrt_pf
        # slack zero-padding built in-kernel
        z = jnp.concatenate([jnp.concatenate([scb, zcol], axis=1), zrow], axis=0)
        for _ in range(ot_iters):                 # sinkhorn_rpm, slack=True
            mx = jnp.max(z, axis=1, keepdims=True)
            lse = mx + jnp.log(jnp.sum(jnp.exp(z - mx), axis=1, keepdims=True))
            z = jnp.where(r17 < n_pts, z - lse, z)
            mx = jnp.max(z, axis=0, keepdims=True)
            lse = mx + jnp.log(jnp.sum(jnp.exp(z - mx), axis=0, keepdims=True))
            z = jnp.where(c17 < n_pts, z - lse, z)
        s = jnp.exp(z[0:n_pts, 0:n_pts])
        p_ref[b] = s
        src_ref[b] = jnp.sum(s, axis=1, keepdims=True)     # row sums  (N, 1)
        reft_ref[b] = jnp.sum(s, axis=0, keepdims=True)    # col sums  (1, N)


def superglue_pallas(kp, x_all):
    B, N = BATCH, NUM_POINTS
    args = (x_all,
            kp['w1e'], kp['w2e'], kp['w3e'], kp['w4e'], kp['w5e'],
            kp['wqkv'], kp['bqkv'], kp['wm'], kp['bm'],
            kp['wh'], kp['bh'], kp['wo'], kp['bo'],
            kp['wp'], kp['bp'])
    kern = functools.partial(
        _superglue_kernel, n_pts=N, n_batch=B, k_nbrs=NEIGHBORS,
        n_heads=NUM_HEADS, head_dim=HEAD_DIM, ot_iters=OT_ITERS,
        layer_names=tuple(GNN_NAMES))
    return pl.pallas_call(
        kern,
        out_shape=(jax.ShapeDtypeStruct((B, N, N), _F32),
                   jax.ShapeDtypeStruct((B, N, 1), _F32),
                   jax.ShapeDtypeStruct((B, 1, N), _F32)),
        grid=(1,),
        in_specs=[_full_spec(a) for a in args],
        out_specs=(pl.BlockSpec((B, N, N), lambda i: (0, 0, 0)),
                   pl.BlockSpec((B, N, 1), lambda i: (0, 0, 0)),
                   pl.BlockSpec((B, 1, N), lambda i: (0, 0, 0))),
        compiler_params=pltpu.CompilerParams(dimension_semantics=("arbitrary",)),
    )(*args)


# =====================================================================
# Parameter preparation (BN folding, head permutation, weight stacking)
# =====================================================================

def prepare_params(params):
    """Fold eval-default BatchNorm into conv weights, permute attention-head
    channels to be contiguous, stack Wq/Wk/Wv, and stack both GNN layers."""
    bn_scale = 1.0 / math.sqrt(1.0 + BN_EPS)

    enc = params['enc']
    kp = {'w1e': enc['conv1_w'] * bn_scale,
          'w2e': enc['conv2_w'] * bn_scale,
          'w3e': enc['conv3_w'] * bn_scale,
          'w4e': enc['conv4_w'] * bn_scale,
          'w5e': enc['conv5_w'] * bn_scale}   # unsplit (D, 256); biases are 0

    D, H, dh = FEATURE_CHANNEL, NUM_HEADS, HEAD_DIM
    # original attention channel d = i*H + h  ->  new channel h*dh + i
    perm = (jnp.arange(dh)[None, :] * H + jnp.arange(H)[:, None]).reshape(-1)

    wqkv, bqkv, wm, bm, wh, bh, wo, bo = ([] for _ in range(8))
    for lp in params['gnn']:
        wqkv.append(jnp.concatenate(
            [lp['q_w'][perm], lp['k_w'][perm], lp['v_w'][perm]], axis=0))   # (3D, D)
        bqkv.append(jnp.concatenate(
            [lp['q_b'][perm], lp['k_b'][perm], lp['v_b'][perm]], axis=0).reshape(3 * D, 1))
        wm.append(lp['merge_w'][:, perm])                 # head-contiguous columns
        bm.append(lp['merge_b'].reshape(D, 1))
        wh.append(lp['mlp_w1'] * bn_scale)                # fold hidden-layer BN scale
        bh.append((lp['mlp_b1'] * bn_scale).reshape(2 * D, 1))
        wo.append(lp['mlp_w2'])
        bo.append(lp['mlp_b2'].reshape(D, 1))

    kp.update(wqkv=jnp.stack(wqkv), bqkv=jnp.stack(bqkv),
              wm=jnp.stack(wm), bm=jnp.stack(bm),
              wh=jnp.stack(wh), bh=jnp.stack(bh),
              wo=jnp.stack(wo), bo=jnp.stack(bo))
    kp['wp'] = params['proj_w']
    kp['bp'] = params['proj_b'].reshape(PROJ_FEAT, 1)
    return kp


# =====================================================================
# Forward pass (single pallas_call; wrapper does only layout plumbing)
# =====================================================================

def superglue_forward(params, P_src, P_tgt, A_src=None, A_tgt=None):
    kp = prepare_params(params)
    B, N, _ = P_src.shape
    # fold {src/tgt, batch, point} onto lanes: [d0_b0 | d0_b1 | d1_b0 | d1_b1]
    pts = jnp.concatenate([P_src, P_tgt], axis=0)                  # (2B, N, 3)
    x_all = jnp.transpose(pts, (2, 0, 1)).reshape(3, 2 * B * N)    # (3, 2B*N)

    P, src_inlier, ref_t = superglue_pallas(kp, x_all)
    return {'P': P, 'G': None,
            'SrcInlier': src_inlier,
            'RefInlier': jnp.transpose(ref_t, (0, 2, 1))}


# =====================================================================
# Deterministic parameter initialization (PyTorch-default-style)
# =====================================================================

def _uniform(key, shape, bound):
    return jax.random.uniform(key, shape, _F32, -bound, bound)


def init_params(key):
    """Parameters in the PyTorch module's native layout (Conv weights (Cout,Cin));
    BatchNorm layers are left at default eval statistics."""
    keys = iter(jax.random.split(key, 128))
    p = {}

    enc = {}
    for name, (cout, cin) in dict(conv1=(32, 6), conv2=(32, 32), conv3=(64, 32),
                                  conv4=(128, 64),
                                  conv5=(FEATURE_CHANNEL, 256)).items():
        enc[name + '_w'] = _uniform(next(keys), (cout, cin), 1.0 / math.sqrt(cin))
    p['enc'] = enc

    D = FEATURE_CHANNEL
    layers = []
    for _ in GNN_NAMES:
        lp = {}
        for nm in ('q', 'k', 'v', 'merge'):
            lp[nm + '_w'] = _uniform(next(keys), (D, D), 1.0 / math.sqrt(D))
            lp[nm + '_b'] = _uniform(next(keys), (D,), 1.0 / math.sqrt(D))
        lp['mlp_w1'] = _uniform(next(keys), (2 * D, 2 * D), 1.0 / math.sqrt(2 * D))
        lp['mlp_b1'] = _uniform(next(keys), (2 * D,), 1.0 / math.sqrt(2 * D))
        lp['mlp_w2'] = _uniform(next(keys), (D, 2 * D), 1.0 / math.sqrt(2 * D))
        lp['mlp_b2'] = jnp.zeros((D,), _F32)       # nn.init.constant_(mlp[-1].bias, 0)
        layers.append(lp)
    p['gnn'] = layers

    p['proj_w'] = _uniform(next(keys), (PROJ_FEAT, FEATURE_CHANNEL),
                           1.0 / math.sqrt(FEATURE_CHANNEL))
    p['proj_b'] = _uniform(next(keys), (PROJ_FEAT,), 1.0 / math.sqrt(FEATURE_CHANNEL))
    return p


if __name__ == "__main__":
    key = jax.random.PRNGKey(0)
    kinit, k1, k2 = jax.random.split(key, 3)
    params = init_params(kinit)
    P_src = jax.random.normal(k1, (BATCH, NUM_POINTS, 3), _F32)
    P_tgt = jax.random.normal(k2, (BATCH, NUM_POINTS, 3), _F32)
    A_src = jnp.zeros((BATCH, NUM_POINTS, NUM_POINTS), _F32)   # unused in forward
    A_tgt = jnp.zeros((BATCH, NUM_POINTS, NUM_POINTS), _F32)   # unused in forward

    out = jax.jit(superglue_forward)(params, P_src, P_tgt, A_src, A_tgt)
    jax.block_until_ready(out['P'])

    assert out['P'].shape == (BATCH, NUM_POINTS, NUM_POINTS)
    assert out['SrcInlier'].shape == (BATCH, NUM_POINTS, 1)
    assert out['RefInlier'].shape == (BATCH, NUM_POINTS, 1)
    assert bool(jnp.all(jnp.isfinite(out['P'])))
    print("KERNEL_OK")
</pallas_src>

<mosaic_0001>
module attributes {stable_mosaic.version = 11 : i64} {
  func.func @_superglue_kernel(%arg0: i32, %arg1: memref<3x64xf32, #tpu.memory_space<vmem>>, %arg2: memref<32x6xf32, #tpu.memory_space<vmem>>, %arg3: memref<32x32xf32, #tpu.memory_space<vmem>>, %arg4: memref<64x32xf32, #tpu.memory_space<vmem>>, %arg5: memref<128x64xf32, #tpu.memory_space<vmem>>, %arg6: memref<32x256xf32, #tpu.memory_space<vmem>>, %arg7: memref<2x96x32xf32, #tpu.memory_space<vmem>>, %arg8: memref<2x96x1xf32, #tpu.memory_space<vmem>>, %arg9: memref<2x32x32xf32, #tpu.memory_space<vmem>>, %arg10: memref<2x32x1xf32, #tpu.memory_space<vmem>>, %arg11: memref<2x64x64xf32, #tpu.memory_space<vmem>>, %arg12: memref<2x64x1xf32, #tpu.memory_space<vmem>>, %arg13: memref<2x32x64xf32, #tpu.memory_space<vmem>>, %arg14: memref<2x32x1xf32, #tpu.memory_space<vmem>>, %arg15: memref<32x32xf32, #tpu.memory_space<vmem>>, %arg16: memref<32x1xf32, #tpu.memory_space<vmem>>, %arg17: memref<2x16x16xf32, #tpu.memory_space<vmem>>, %arg18: memref<2x16x1xf32, #tpu.memory_space<vmem>>, %arg19: memref<2x1x16xf32, #tpu.memory_space<vmem>>) attributes {dimension_semantics = [#tpu.dimension_semantics<arbitrary>], iteration_bounds = array<i64: 1>, scalar_prefetch = 0 : i64, scratch_operands = 0 : i64, tpu.core_type = #tpu.core_type<tc>, window_params = [{pipeline_mode = #tpu.pipeline_mode<synchronous>, transform_indices = @transform_0, window_bounds = array<i64: 3, 64>}, {pipeline_mode = #tpu.pipeline_mode<synchronous>, transform_indices = @transform_1, window_bounds = array<i64: 32, 6>}, {pipeline_mode = #tpu.pipeline_mode<synchronous>, transform_indices = @transform_2, window_bounds = array<i64: 32, 32>}, {pipeline_mode = #tpu.pipeline_mode<synchronous>, transform_indices = @transform_3, window_bounds = array<i64: 64, 32>}, {pipeline_mode = #tpu.pipeline_mode<synchronous>, transform_indices = @transform_4, window_bounds = array<i64: 128, 64>}, {pipeline_mode = #tpu.pipeline_mode<synchronous>, transform_indices = @transform_5, window_bounds = array<i64: 32, 256>}, {pipeline_mode = #tpu.pipeline_mode<synchronous>, transform_indices = @transform_6, window_bounds = array<i64: 2, 96, 32>}, {pipeline_mode = #tpu.pipeline_mode<synchronous>, transform_indices = @transform_7, window_bounds = array<i64: 2, 96, 1>}, {pipeline_mode = #tpu.pipeline_mode<synchronous>, transform_indices = @transform_8, window_bounds = array<i64: 2, 32, 32>}, {pipeline_mode = #tpu.pipeline_mode<synchronous>, transform_indices = @transform_9, window_bounds = array<i64: 2, 32, 1>}, {pipeline_mode = #tpu.pipeline_mode<synchronous>, transform_indices = @transform_10, window_bounds = array<i64: 2, 64, 64>}, {pipeline_mode = #tpu.pipeline_mode<synchronous>, transform_indices = @transform_11, window_bounds = array<i64: 2, 64, 1>}, {pipeline_mode = #tpu.pipeline_mode<synchronous>, transform_indices = @transform_12, window_bounds = array<i64: 2, 32, 64>}, {pipeline_mode = #tpu.pipeline_mode<synchronous>, transform_indices = @transform_13, window_bounds = array<i64: 2, 32, 1>}, {pipeline_mode = #tpu.pipeline_mode<synchronous>, transform_indices = @transform_14, window_bounds = array<i64: 32, 32>}, {pipeline_mode = #tpu.pipeline_mode<synchronous>, transform_indices = @transform_15, window_bounds = array<i64: 32, 1>}, {pipeline_mode = #tpu.pipeline_mode<synchronous>, transform_indices = @transform_16, window_bounds = array<i64: 2, 16, 16>}, {pipeline_mode = #tpu.pipeline_mode<synchronous>, transform_indices = @transform_17, window_bounds = array<i64: 2, 16, 1>}, {pipeline_mode = #tpu.pipeline_mode<synchronous>, transform_indices = @transform_18, window_bounds = array<i64: 2, 1, 16>}]} {
    %0 = tpu.iota {dimensions = array<i32: 0>} : vector<64x64xi32>
    %1 = tpu.iota {dimensions = array<i32: 1>} : vector<64x64xi32>
    %c4_i32 = arith.constant 4 : i32
    %2 = vector.broadcast %c4_i32 : i32 to vector<64x64xi32>
    %3 = arith.shrsi %0, %2 : vector<64x64xi32>
    %c4_i32_0 = arith.constant 4 : i32
    %4 = vector.broadcast %c4_i32_0 : i32 to vector<64x64xi32>
    %5 = arith.shrsi %1, %4 : vector<64x64xi32>
    %6 = arith.cmpi eq, %3, %5 : vector<64x64xi32>
    %c2_i32 = arith.constant 2 : i32
    %7 = vector.broadcast %c2_i32 : i32 to vector<64x64xi32>
    %8 = arith.cmpi slt, %3, %7 : vector<64x64xi32>
    %c2_i32_1 = arith.constant 2 : i32
    %9 = vector.broadcast %c2_i32_1 : i32 to vector<64x64xi32>
    %10 = arith.addi %3, %9 : vector<64x64xi32>
    %c2_i32_2 = arith.constant 2 : i32
    %11 = vector.broadcast %c2_i32_2 : i32 to vector<64x64xi32>
    %12 = arith.subi %3, %11 : vector<64x64xi32>
    %13 = arith.select %8, %10, %12 : vector<64x64xi1>, vector<64x64xi32>
    %14 = arith.cmpi eq, %13, %5 : vector<64x64xi32>
    %15 = arith.sitofp %1 : vector<64x64xi32> to vector<64x64xf32>
    %c0 = arith.constant 0 : index
    %c0_3 = arith.constant 0 : index
    %16 = vector.load %arg1[%c0, %c0_3] : memref<3x64xf32, #tpu.memory_space<vmem>>, vector<3x64xf32>
    %cst = arith.constant dense<0.000000e+00> : vector<64x64xf32>
    %17 = tpu.matmul %16, %16, %cst {dimension_numbers = #tpu.dot_dimension_numbers<[0], [0], [1], [1], [0, 1, 1, 1], [], []>} : vector<3x64xf32>, vector<3x64xf32>, vector<64x64xf32> -> vector<64x64xf32>
    %18 = arith.mulf %16, %16 : vector<3x64xf32>
    %cst_4 = arith.constant dense<0.000000e+00> : vector<64xf32>
    %19 = vector.multi_reduction <add>, %18, %cst_4 [0] : vector<3x64xf32> to vector<64xf32>
    %20 = vector.shape_cast %19 : vector<64xf32> to vector<1x64xf32>
    %cst_5 = arith.constant 2.000000e+00 : f32
    %21 = vector.broadcast %cst_5 : f32 to vector<64x64xf32>
    %22 = arith.mulf %21, %17 : vector<64x64xf32>
    %23 = vector.broadcast %20 : vector<1x64xf32> to vector<64x64xf32>
    %24 = arith.subf %22, %23 : vector<64x64xf32>
    %cst_6 = arith.constant -1.000000e+30 : f32
    %25 = vector.broadcast %cst_6 : f32 to vector<64x64xf32>
    %26 = arith.select %6, %24, %25 : vector<64x64xi1>, vector<64x64xf32>
    %c0_7 = arith.constant 0 : index
    %c0_8 = arith.constant 0 : index
    %27 = vector.load %arg2[%c0_7, %c0_8] : memref<32x6xf32, #tpu.memory_space<vmem>>, vector<32x6xf32>
    %c0_9 = arith.constant 0 : index
    %c0_10 = arith.constant 0 : index
    %28 = vector.load %arg3[%c0_9, %c0_10] : memref<32x32xf32, #tpu.memory_space<vmem>>, vector<32x32xf32>
    %c0_11 = arith.constant 0 : index
    %c0_12 = arith.constant 0 : index
    %29 = vector.load %arg4[%c0_11, %c0_12] : memref<64x32xf32, #tpu.memory_space<vmem>>, vector<64x32xf32>
    %c0_13 = arith.constant 0 : index
    %c0_14 = arith.constant 0 : index
    %30 = vector.load %arg5[%c0_13, %c0_14] : memref<128x64xf32, #tpu.memory_space<vmem>>, vector<128x64xf32>
    %cst_15 = arith.constant dense<0xFF800000> : vector<64xf32>
    %31 = vector.multi_reduction <maximumf>, %26, %cst_15 [1] : vector<64x64xf32> to vector<64xf32>
    %32 = vector.shape_cast %31 : vector<64xf32> to vector<64x1xf32>
    %33 = vector.broadcast %32 : vector<64x1xf32> to vector<64x64xf32>
    %34 = arith.cmpf oeq, %26, %33 : vector<64x64xf32>
    %cst_16 = arith.constant 6.400000e+01 : f32
    %35 = vector.broadcast %cst_16 : f32 to vector<64x64xf32>
    %36 = arith.select %34, %15, %35 : vector<64x64xi1>, vector<64x64xf32>
    %cst_17 = arith.constant dense<0x7F800000> : vector<64xf32>
    %37 = vector.multi_reduction <minimumf>, %36, %cst_17 [1] : vector<64x64xf32> to vector<64xf32>
    %38 = vector.shape_cast %37 : vector<64xf32> to vector<64x1xf32>
    %39 = vector.broadcast %38 : vector<64x1xf32> to vector<64x64xf32>
    %40 = arith.cmpf oeq, %15, %39 : vector<64x64xf32>
    %41 = arith.extui %40 : vector<64x64xi1> to vector<64x64xi32>
    %42 = arith.sitofp %41 : vector<64x64xi32> to vector<64x64xf32>
    %cst_18 = arith.constant dense<0.000000e+00> : vector<3x64xf32>
    %43 = tpu.matmul %16, %42, %cst_18 {dimension_numbers = #tpu.dot_dimension_numbers<[1], [1], [0], [0], [0, 0, 1, 0], [], []>} : vector<3x64xf32>, vector<64x64xf32>, vector<3x64xf32> -> vector<3x64xf32>
    %44 = tpu.concatenate %43, %16 in 0 : vector<3x64xf32>, vector<3x64xf32> -> vector<6x64xf32>
    %cst_19 = arith.constant dense<0.000000e+00> : vector<32x64xf32>
    %45 = tpu.matmul %27, %44, %cst_19 {dimension_numbers = #tpu.dot_dimension_numbers<[1], [0], [0], [1], [0, 0, 1, 1], [], []>} : vector<32x6xf32>, vector<6x64xf32>, vector<32x64xf32> -> vector<32x64xf32>
    %cst_20 = arith.constant 0.000000e+00 : f32
    %46 = vector.broadcast %cst_20 : f32 to vector<32x64xf32>
    %47 = arith.maximumf %45, %46 : vector<32x64xf32>
    %cst_21 = arith.constant dense<0.000000e+00> : vector<32x64xf32>
    %48 = tpu.matmul %28, %47, %cst_21 {dimension_numbers = #tpu.dot_dimension_numbers<[1], [0], [0], [1], [0, 0, 1, 1], [], []>} : vector<32x32xf32>, vector<32x64xf32>, vector<32x64xf32> -> vector<32x64xf32>
    %cst_22 = arith.constant 0.000000e+00 : f32
    %49 = vector.broadcast %cst_22 : f32 to vector<32x64xf32>
    %50 = arith.maximumf %48, %49 : vector<32x64xf32>
    %cst_23 = arith.constant dense<0.000000e+00> : vector<64x64xf32>
    %51 = tpu.matmul %29, %50, %cst_23 {dimension_numbers = #tpu.dot_dimension_numbers<[1], [0], [0], [1], [0, 0, 1, 1], [], []>} : vector<64x32xf32>, vector<32x64xf32>, vector<64x64xf32> -> vector<64x64xf32>
    %cst_24 = arith.constant 0.000000e+00 : f32
    %52 = vector.broadcast %cst_24 : f32 to vector<64x64xf32>
    %53 = arith.maximumf %51, %52 : vector<64x64xf32>
    %cst_25 = arith.constant dense<0.000000e+00> : vector<128x64xf32>
    %54 = tpu.matmul %30, %53, %cst_25 {dimension_numbers = #tpu.dot_dimension_numbers<[1], [0], [0], [1], [0, 0, 1, 1], [], []>} : vector<128x64xf32>, vector<64x64xf32>, vector<128x64xf32> -> vector<128x64xf32>
    %cst_26 = arith.constant 0.000000e+00 : f32
    %55 = vector.broadcast %cst_26 : f32 to vector<128x64xf32>
    %56 = arith.maximumf %54, %55 : vector<128x64xf32>
    %57 = vector.broadcast %38 : vector<64x1xf32> to vector<64x64xf32>
    %58 = arith.cmpf oeq, %15, %57 : vector<64x64xf32>
    %cst_27 = arith.constant -1.000000e+30 : f32
    %59 = vector.broadcast %cst_27 : f32 to vector<64x64xf32>
    %60 = arith.select %58, %59, %26 : vector<64x64xi1>, vector<64x64xf32>
    %cst_28 = arith.constant dense<0xFF800000> : vector<64xf32>
    %61 = vector.multi_reduction <maximumf>, %60, %cst_28 [1] : vector<64x64xf32> to vector<64xf32>
    %62 = vector.shape_cast %61 : vector<64xf32> to vector<64x1xf32>
    %63 = vector.broadcast %62 : vector<64x1xf32> to vector<64x64xf32>
    %64 = arith.cmpf oeq, %60, %63 : vector<64x64xf32>
    %cst_29 = arith.constant 6.400000e+01 : f32
    %65 = vector.broadcast %cst_29 : f32 to vector<64x64xf32>
    %66 = arith.select %64, %15, %65 : vector<64x64xi1>, vector<64x64xf32>
    %cst_30 = arith.constant dense<0x7F800000> : vector<64xf32>
    %67 = vector.multi_reduction <minimumf>, %66, %cst_30 [1] : vector<64x64xf32> to vector<64xf32>
    %68 = vector.shape_cast %67 : vector<64xf32> to vector<64x1xf32>
    %69 = vector.broadcast %68 : vector<64x1xf32> to vector<64x64xf32>
    %70 = arith.cmpf oeq, %15, %69 : vector<64x64xf32>
    %71 = arith.extui %70 : vector<64x64xi1> to vector<64x64xi32>
    %72 = arith.sitofp %71 : vector<64x64xi32> to vector<64x64xf32>
    %cst_31 = arith.constant dense<0.000000e+00> : vector<3x64xf32>
    %73 = tpu.matmul %16, %72, %cst_31 {dimension_numbers = #tpu.dot_dimension_numbers<[1], [1], [0], [0], [0, 0, 1, 0], [], []>} : vector<3x64xf32>, vector<64x64xf32>, vector<3x64xf32> -> vector<3x64xf32>
    %74 = tpu.concatenate %73, %16 in 0 : vector<3x64xf32>, vector<3x64xf32> -> vector<6x64xf32>
    %cst_32 = arith.constant dense<0.000000e+00> : vector<32x64xf32>
    %75 = tpu.matmul %27, %74, %cst_32 {dimension_numbers = #tpu.dot_dimension_numbers<[1], [0], [0], [1], [0, 0, 1, 1], [], []>} : vector<32x6xf32>, vector<6x64xf32>, vector<32x64xf32> -> vector<32x64xf32>
    %cst_33 = arith.constant 0.000000e+00 : f32
    %76 = vector.broadcast %cst_33 : f32 to vector<32x64xf32>
    %77 = arith.maximumf %75, %76 : vector<32x64xf32>
    %cst_34 = arith.constant dense<0.000000e+00> : vector<32x64xf32>
    %78 = tpu.matmul %28, %77, %cst_34 {dimension_numbers = #tpu.dot_dimension_numbers<[1], [0], [0], [1], [0, 0, 1, 1], [], []>} : vector<32x32xf32>, vector<32x64xf32>, vector<32x64xf32> -> vector<32x64xf32>
    %cst_35 = arith.constant 0.000000e+00 : f32
    %79 = vector.broadcast %cst_35 : f32 to vector<32x64xf32>
    %80 = arith.maximumf %78, %79 : vector<32x64xf32>
    %cst_36 = arith.constant dense<0.000000e+00> : vector<64x64xf32>
    %81 = tpu.matmul %29, %80, %cst_36 {dimension_numbers = #tpu.dot_dimension_numbers<[1], [0], [0], [1], [0, 0, 1, 1], [], []>} : vector<64x32xf32>, vector<32x64xf32>, vector<64x64xf32> -> vector<64x64xf32>
    %cst_37 = arith.constant 0.000000e+00 : f32
    %82 = vector.broadcast %cst_37 : f32 to vector<64x64xf32>
    %83 = arith.maximumf %81, %82 : vector<64x64xf32>
    %cst_38 = arith.constant dense<0.000000e+00> : vector<128x64xf32>
    %84 = tpu.matmul %30, %83, %cst_38 {dimension_numbers = #tpu.dot_dimension_numbers<[1], [0], [0], [1], [0, 0, 1, 1], [], []>} : vector<128x64xf32>, vector<64x64xf32>, vector<128x64xf32> -> vector<128x64xf32>
    %cst_39 = arith.constant 0.000000e+00 : f32
    %85 = vector.broadcast %cst_39 : f32 to vector<128x64xf32>
    %86 = arith.maximumf %84, %85 : vector<128x64xf32>
    %87 = arith.maximumf %47, %77 : vector<32x64xf32>
    %88 = arith.maximumf %50, %80 : vector<32x64xf32>
    %89 = arith.maximumf %53, %83 : vector<64x64xf32>
    %90 = arith.maximumf %56, %86 : vector<128x64xf32>
    %91 = vector.broadcast %68 : vector<64x1xf32> to vector<64x64xf32>
    %92 = arith.cmpf oeq, %15, %91 : vector<64x64xf32>
    %cst_40 = arith.constant -1.000000e+30 : f32
    %93 = vector.broadcast %cst_40 : f32 to vector<64x64xf32>
    %94 = arith.select %92, %93, %60 : vector<64x64xi1>, vector<64x64xf32>
    %cst_41 = arith.constant dense<0xFF800000> : vector<64xf32>
    %95 = vector.multi_reduction <maximumf>, %94, %cst_41 [1] : vector<64x64xf32> to vector<64xf32>
    %96 = vector.shape_cast %95 : vector<64xf32> to vector<64x1xf32>
    %97 = vector.broadcast %96 : vector<64x1xf32> to vector<64x64xf32>
    %98 = arith.cmpf oeq, %94, %97 : vector<64x64xf32>
    %cst_42 = arith.constant 6.400000e+01 : f32
    %99 = vector.broadcast %cst_42 : f32 to vector<64x64xf32>
    %100 = arith.select %98, %15, %99 : vector<64x64xi1>, vector<64x64xf32>
    %cst_43 = arith.constant dense<0x7F800000> : vector<64xf32>
    %101 = vector.multi_reduction <minimumf>, %100, %cst_43 [1] : vector<64x64xf32> to vector<64xf32>
    %102 = vector.shape_cast %101 : vector<64xf32> to vector<64x1xf32>
    %103 = vector.broadcast %102 : vector<64x1xf32> to vector<64x64xf32>
    %104 = arith.cmpf oeq, %15, %103 : vector<64x64xf32>
    %105 = arith.extui %104 : vector<64x64xi1> to vector<64x64xi32>
    %106 = arith.sitofp %105 : vector<64x64xi32> to vector<64x64xf32>
    %cst_44 = arith.constant dense<0.000000e+00> : vector<3x64xf32>
    %107 = tpu.matmul %16, %106, %cst_44 {dimension_numbers = #tpu.dot_dimension_numbers<[1], [1], [0], [0], [0, 0, 1, 0], [], []>} : vector<3x64xf32>, vector<64x64xf32>, vector<3x64xf32> -> vector<3x64xf32>
    %108 = tpu.concatenate %107, %16 in 0 : vector<3x64xf32>, vector<3x64xf32> -> vector<6x64xf32>
    %cst_45 = arith.constant dense<0.000000e+00> : vector<32x64xf32>
    %109 = tpu.matmul %27, %108, %cst_45 {dimension_numbers = #tpu.dot_dimension_numbers<[1], [0], [0], [1], [0, 0, 1, 1], [], []>} : vector<32x6xf32>, vector<6x64xf32>, vector<32x64xf32> -> vector<32x64xf32>
    %cst_46 = arith.constant 0.000000e+00 : f32
    %110 = vector.broadcast %cst_46 : f32 to vector<32x64xf32>
    %111 = arith.maximumf %109, %110 : vector<32x64xf32>
    %cst_47 = arith.constant dense<0.000000e+00> : vector<32x64xf32>
    %112 = tpu.matmul %28, %111, %cst_47 {dimension_numbers = #tpu.dot_dimension_numbers<[1], [0], [0], [1], [0, 0, 1, 1], [], []>} : vector<32x32xf32>, vector<32x64xf32>, vector<32x64xf32> -> vector<32x64xf32>
    %cst_48 = arith.constant 0.000000e+00 : f32
    %113 = vector.broadcast %cst_48 : f32 to vector<32x64xf32>
    %114 = arith.maximumf %112, %113 : vector<32x64xf32>
    %cst_49 = arith.constant dense<0.000000e+00> : vector<64x64xf32>
    %115 = tpu.matmul %29, %114, %cst_49 {dimension_numbers = #tpu.dot_dimension_numbers<[1], [0], [0], [1], [0, 0, 1, 1], [], []>} : vector<64x32xf32>, vector<32x64xf32>, vector<64x64xf32> -> vector<64x64xf32>
    %cst_50 = arith.constant 0.000000e+00 : f32
    %116 = vector.broadcast %cst_50 : f32 to vector<64x64xf32>
    %117 = arith.maximumf %115, %116 : vector<64x64xf32>
    %cst_51 = arith.constant dense<0.000000e+00> : vector<128x64xf32>
    %118 = tpu.matmul %30, %117, %cst_51 {dimension_numbers = #tpu.dot_dimension_numbers<[1], [0], [0], [1], [0, 0, 1, 1], [], []>} : vector<128x64xf32>, vector<64x64xf32>, vector<128x64xf32> -> vector<128x64xf32>
    %cst_52 = arith.constant 0.000000e+00 : f32
    %119 = vector.broadcast %cst_52 : f32 to vector<128x64xf32>
    %120 = arith.maximumf %118, %119 : vector<128x64xf32>
    %121 = arith.maximumf %87, %111 : vector<32x64xf32>
    %122 = arith.maximumf %88, %114 : vector<32x64xf32>
    %123 = arith.maximumf %89, %117 : vector<64x64xf32>
    %124 = arith.maximumf %90, %120 : vector<128x64xf32>
    %125 = vector.broadcast %102 : vector<64x1xf32> to vector<64x64xf32>
    %126 = arith.cmpf oeq, %15, %125 : vector<64x64xf32>
    %cst_53 = arith.constant -1.000000e+30 : f32
    %127 = vector.broadcast %cst_53 : f32 to vector<64x64xf32>
    %128 = arith.select %126, %127, %94 : vector<64x64xi1>, vector<64x64xf32>
    %cst_54 = arith.constant dense<0xFF800000> : vector<64xf32>
    %129 = vector.multi_reduction <maximumf>, %128, %cst_54 [1] : vector<64x64xf32> to vector<64xf32>
    %130 = vector.shape_cast %129 : vector<64xf32> to vector<64x1xf32>
    %131 = vector.broadcast %130 : vector<64x1xf32> to vector<64x64xf32>
    %132 = arith.cmpf oeq, %128, %131 : vector<64x64xf32>
    %cst_55 = arith.constant 6.400000e+01 : f32
    %133 = vector.broadcast %cst_55 : f32 to vector<64x64xf32>
    %134 = arith.select %132, %15, %133 : vector<64x64xi1>, vector<64x64xf32>
    %cst_56 = arith.constant dense<0x7F800000> : vector<64xf32>
    %135 = vector.multi_reduction <minimumf>, %134, %cst_56 [1] : vector<64x64xf32> to vector<64xf32>
    %136 = vector.shape_cast %135 : vector<64xf32> to vector<64x1xf32>
    %137 = vector.broadcast %136 : vector<64x1xf32> to vector<64x64xf32>
    %138 = arith.cmpf oeq, %15, %137 : vector<64x64xf32>
    %139 = arith.extui %138 : vector<64x64xi1> to vector<64x64xi32>
    %140 = arith.sitofp %139 : vector<64x64xi32> to vector<64x64xf32>
    %cst_57 = arith.constant dense<0.000000e+00> : vector<3x64xf32>
    %141 = tpu.matmul %16, %140, %cst_57 {dimension_numbers = #tpu.dot_dimension_numbers<[1], [1], [0], [0], [0, 0, 1, 0], [], []>} : vector<3x64xf32>, vector<64x64xf32>, vector<3x64xf32> -> vector<3x64xf32>
    %142 = tpu.concatenate %141, %16 in 0 : vector<3x64xf32>, vector<3x64xf32> -> vector<6x64xf32>
    %cst_58 = arith.constant dense<0.000000e+00> : vector<32x64xf32>
    %143 = tpu.matmul %27, %142, %cst_58 {dimension_numbers = #tpu.dot_dimension_numbers<[1], [0], [0], [1], [0, 0, 1, 1], [], []>} : vector<32x6xf32>, vector<6x64xf32>, vector<32x64xf32> -> vector<32x64xf32>
    %cst_59 = arith.constant 0.000000e+00 : f32
    %144 = vector.broadcast %cst_59 : f32 to vector<32x64xf32>
    %145 = arith.maximumf %143, %144 : vector<32x64xf32>
    %cst_60 = arith.constant dense<0.000000e+00> : vector<32x64xf32>
    %146 = tpu.matmul %28, %145, %cst_60 {dimension_numbers = #tpu.dot_dimension_numbers<[1], [0], [0], [1], [0, 0, 1, 1], [], []>} : vector<32x32xf32>, vector<32x64xf32>, vector<32x64xf32> -> vector<32x64xf32>
    %cst_61 = arith.constant 0.000000e+00 : f32
    %147 = vector.broadcast %cst_61 : f32 to vector<32x64xf32>
    %148 = arith.maximumf %146, %147 : vector<32x64xf32>
    %cst_62 = arith.constant dense<0.000000e+00> : vector<64x64xf32>
    %149 = tpu.matmul %29, %148, %cst_62 {dimension_numbers = #tpu.dot_dimension_numbers<[1], [0], [0], [1], [0, 0, 1, 1], [], []>} : vector<64x32xf32>, vector<32x64xf32>, vector<64x64xf32> -> vector<64x64xf32>
    %cst_63 = arith.constant 0.000000e+00 : f32
    %150 = vector.broadcast %cst_63 : f32 to vector<64x64xf32>
    %151 = arith.maximumf %149, %150 : vector<64x64xf32>
    %cst_64 = arith.constant dense<0.000000e+00> : vector<128x64xf32>
    %152 = tpu.matmul %30, %151, %cst_64 {dimension_numbers = #tpu.dot_dimension_numbers<[1], [0], [0], [1], [0, 0, 1, 1], [], []>} : vector<128x64xf32>, vector<64x64xf32>, vector<128x64xf32> -> vector<128x64xf32>
    %cst_65 = arith.constant 0.000000e+00 : f32
    %153 = vector.broadcast %cst_65 : f32 to vector<128x64xf32>
    %154 = arith.maximumf %152, %153 : vector<128x64xf32>
    %155 = arith.maximumf %121, %145 : vector<32x64xf32>
    %156 = arith.maximumf %122, %148 : vector<32x64xf32>
    %157 = arith.maximumf %123, %151 : vector<64x64xf32>
    %158 = arith.maximumf %124, %154 : vector<128x64xf32>
    %159 = tpu.concatenate %155, %156, %157, %158 in 0 : vector<32x64xf32>, vector<32x64xf32>, vector<64x64xf32>, vector<128x64xf32> -> vector<256x64xf32>
    %c0_66 = arith.constant 0 : index
    %c0_67 = arith.constant 0 : index
    %160 = vector.load %arg6[%c0_66, %c0_67] : memref<32x256xf32, #tpu.memory_space<vmem>>, vector<32x256xf32>
    %cst_68 = arith.constant dense<0.000000e+00> : vector<32x64xf32>
    %161 = tpu.matmul %160, %159, %cst_68 {dimension_numbers = #tpu.dot_dimension_numbers<[1], [0], [0], [1], [0, 0, 1, 1], [], []>} : vector<32x256xf32>, vector<256x64xf32>, vector<32x64xf32> -> vector<32x64xf32>
    %cst_69 = arith.constant 0.000000e+00 : f32
    %162 = vector.broadcast %cst_69 : f32 to vector<32x64xf32>
    %163 = arith.maximumf %161, %162 : vector<32x64xf32>
    %c0_70 = arith.constant 0 : index
    %c0_71 = arith.constant 0 : index
    %c0_72 = arith.constant 0 : index
    %164 = vector.load %arg7[%c0_70, %c0_71, %c0_72] : memref<2x96x32xf32, #tpu.memory_space<vmem>>, vector<1x96x32xf32>
    %165 = vector.shape_cast %164 : vector<1x96x32xf32> to vector<96x32xf32>
    %cst_73 = arith.constant dense<0.000000e+00> : vector<96x64xf32>
    %166 = tpu.matmul %165, %163, %cst_73 {dimension_numbers = #tpu.dot_dimension_numbers<[1], [0], [0], [1], [0, 0, 1, 1], [], []>} : vector<96x32xf32>, vector<32x64xf32>, vector<96x64xf32> -> vector<96x64xf32>
    %c0_74 = arith.constant 0 : index
    %c0_75 = arith.constant 0 : index
    %c0_76 = arith.constant 0 : index
    %167 = vector.load %arg8[%c0_74, %c0_75, %c0_76] : memref<2x96x1xf32, #tpu.memory_space<vmem>>, vector<1x96x1xf32>
    %168 = vector.shape_cast %167 : vector<1x96x1xf32> to vector<96x1xf32>
    %169 = vector.broadcast %168 : vector<96x1xf32> to vector<96x64xf32>
    %170 = arith.addf %166, %169 : vector<96x64xf32>
    %171 = vector.extract_strided_slice %170 {offsets = [0, 0], sizes = [32, 64], strides = [1, 1]} : vector<96x64xf32> to vector<32x64xf32>
    %172 = vector.extract_strided_slice %170 {offsets = [32, 0], sizes = [32, 64], strides = [1, 1]} : vector<96x64xf32> to vector<32x64xf32>
    %173 = vector.extract_strided_slice %170 {offsets = [64, 0], sizes = [32, 64], strides = [1, 1]} : vector<96x64xf32> to vector<32x64xf32>
    %174 = vector.extract_strided_slice %171 {offsets = [0, 0], sizes = [8, 64], strides = [1, 1]} : vector<32x64xf32> to vector<8x64xf32>
    %175 = vector.extract_strided_slice %172 {offsets = [0, 0], sizes = [8, 64], strides = [1, 1]} : vector<32x64xf32> to vector<8x64xf32>
    %176 = vector.extract_strided_slice %173 {offsets = [0, 0], sizes = [8, 64], strides = [1, 1]} : vector<32x64xf32> to vector<8x64xf32>
    %cst_77 = arith.constant dense<0.000000e+00> : vector<64x64xf32>
    %177 = tpu.matmul %174, %175, %cst_77 {dimension_numbers = #tpu.dot_dimension_numbers<[0], [0], [1], [1], [0, 1, 1, 1], [], []>} : vector<8x64xf32>, vector<8x64xf32>, vector<64x64xf32> -> vector<64x64xf32>
    %cst_78 = arith.constant 0.353553385 : f32
    %178 = vector.broadcast %cst_78 : f32 to vector<64x64xf32>
    %179 = arith.mulf %177, %178 : vector<64x64xf32>
    %cst_79 = arith.constant -1.000000e+30 : f32
    %180 = vector.broadcast %cst_79 : f32 to vector<64x64xf32>
    %181 = arith.select %6, %179, %180 : vector<64x64xi1>, vector<64x64xf32>
    %cst_80 = arith.constant dense<0xFF800000> : vector<64xf32>
    %182 = vector.multi_reduction <maximumf>, %181, %cst_80 [1] : vector<64x64xf32> to vector<64xf32>
    %183 = vector.shape_cast %182 : vector<64xf32> to vector<64x1xf32>
    %184 = vector.broadcast %183 : vector<64x1xf32> to vector<64x64xf32>
    %185 = arith.subf %181, %184 : vector<64x64xf32>
    %186 = math.exp %185 : vector<64x64xf32>
    %cst_81 = arith.constant dense<0.000000e+00> : vector<64xf32>
    %187 = vector.multi_reduction <add>, %186, %cst_81 [1] : vector<64x64xf32> to vector<64xf32>
    %188 = vector.shape_cast %187 : vector<64xf32> to vector<64x1xf32>
    %189 = vector.broadcast %188 : vector<64x1xf32> to vector<64x64xf32>
    %190 = arith.divf %186, %189 : vector<64x64xf32>
    %cst_82 = arith.constant dense<0.000000e+00> : vector<8x64xf32>
    %191 = tpu.matmul %176, %190, %cst_82 {dimension_numbers = #tpu.dot_dimension_numbers<[1], [1], [0], [0], [0, 0, 1, 0], [], []>} : vector<8x64xf32>, vector<64x64xf32>, vector<8x64xf32> -> vector<8x64xf32>
    %192 = vector.extract_strided_slice %171 {offsets = [8, 0], sizes = [8, 64], strides = [1, 1]} : vector<32x64xf32> to vector<8x64xf32>
    %193 = vector.extract_strided_slice %172 {offsets = [8, 0], sizes = [8, 64], strides = [1, 1]} : vector<32x64xf32> to vector<8x64xf32>
    %194 = vector.extract_strided_slice %173 {offsets = [8, 0], sizes = [8, 64], strides = [1, 1]} : vector<32x64xf32> to vector<8x64xf32>
    %cst_83 = arith.constant dense<0.000000e+00> : vector<64x64xf32>
    %195 = tpu.matmul %192, %193, %cst_83 {dimension_numbers = #tpu.dot_dimension_numbers<[0], [0], [1], [1], [0, 1, 1, 1], [], []>} : vector<8x64xf32>, vector<8x64xf32>, vector<64x64xf32> -> vector<64x64xf32>
    %cst_84 = arith.constant 0.353553385 : f32
    %196 = vector.broadcast %cst_84 : f32 to vector<64x64xf32>
    %197 = arith.mulf %195, %196 : vector<64x64xf32>
    %cst_85 = arith.constant -1.000000e+30 : f32
    %198 = vector.broadcast %cst_85 : f32 to vector<64x64xf32>
    %199 = arith.select %6, %197, %198 : vector<64x64xi1>, vector<64x64xf32>
    %cst_86 = arith.constant dense<0xFF800000> : vector<64xf32>
    %200 = vector.multi_reduction <maximumf>, %199, %cst_86 [1] : vector<64x64xf32> to vector<64xf32>
    %201 = vector.shape_cast %200 : vector<64xf32> to vector<64x1xf32>
    %202 = vector.broadcast %201 : vector<64x1xf32> to vector<64x64xf32>
    %203 = arith.subf %199, %202 : vector<64x64xf32>
    %204 = math.exp %203 : vector<64x64xf32>
    %cst_87 = arith.constant dense<0.000000e+00> : vector<64xf32>
    %205 = vector.multi_reduction <add>, %204, %cst_87 [1] : vector<64x64xf32> to vector<64xf32>
    %206 = vector.shape_cast %205 : vector<64xf32> to vector<64x1xf32>
    %207 = vector.broadcast %206 : vector<64x1xf32> to vector<64x64xf32>
    %208 = arith.divf %204, %207 : vector<64x64xf32>
    %cst_88 = arith.constant dense<0.000000e+00> : vector<8x64xf32>
    %209 = tpu.matmul %194, %208, %cst_88 {dimension_numbers = #tpu.dot_dimension_numbers<[1], [1], [0], [0], [0, 0, 1, 0], [], []>} : vector<8x64xf32>, vector<64x64xf32>, vector<8x64xf32> -> vector<8x64xf32>
    %210 = vector.extract_strided_slice %171 {offsets = [16, 0], sizes = [8, 64], strides = [1, 1]} : vector<32x64xf32> to vector<8x64xf32>
    %211 = vector.extract_strided_slice %172 {offsets = [16, 0], sizes = [8, 64], strides = [1, 1]} : vector<32x64xf32> to vector<8x64xf32>
    %212 = vector.extract_strided_slice %173 {offsets = [16, 0], sizes = [8, 64], strides = [1, 1]} : vector<32x64xf32> to vector<8x64xf32>
    %cst_89 = arith.constant dense<0.000000e+00> : vector<64x64xf32>
    %213 = tpu.matmul %210, %211, %cst_89 {dimension_numbers = #tpu.dot_dimension_numbers<[0], [0], [1], [1], [0, 1, 1, 1], [], []>} : vector<8x64xf32>, vector<8x64xf32>, vector<64x64xf32> -> vector<64x64xf32>
    %cst_90 = arith.constant 0.353553385 : f32
    %214 = vector.broadcast %cst_90 : f32 to vector<64x64xf32>
    %215 = arith.mulf %213, %214 : vector<64x64xf32>
    %cst_91 = arith.constant -1.000000e+30 : f32
    %216 = vector.broadcast %cst_91 : f32 to vector<64x64xf32>
    %217 = arith.select %6, %215, %216 : vector<64x64xi1>, vector<64x64xf32>
    %cst_92 = arith.constant dense<0xFF800000> : vector<64xf32>
    %218 = vector.multi_reduction <maximumf>, %217, %cst_92 [1] : vector<64x64xf32> to vector<64xf32>
    %219 = vector.shape_cast %218 : vector<64xf32> to vector<64x1xf32>
    %220 = vector.broadcast %219 : vector<64x1xf32> to vector<64x64xf32>
    %221 = arith.subf %217, %220 : vector<64x64xf32>
    %222 = math.exp %221 : vector<64x64xf32>
    %cst_93 = arith.constant dense<0.000000e+00> : vector<64xf32>
    %223 = vector.multi_reduction <add>, %222, %cst_93 [1] : vector<64x64xf32> to vector<64xf32>
    %224 = vector.shape_cast %223 : vector<64xf32> to vector<64x1xf32>
    %225 = vector.broadcast %224 : vector<64x1xf32> to vector<64x64xf32>
    %226 = arith.divf %222, %225 : vector<64x64xf32>
    %cst_94 = arith.constant dense<0.000000e+00> : vector<8x64xf32>
    %227 = tpu.matmul %212, %226, %cst_94 {dimension_numbers = #tpu.dot_dimension_numbers<[1], [1], [0], [0], [0, 0, 1, 0], [], []>} : vector<8x64xf32>, vector<64x64xf32>, vector<8x64xf32> -> vector<8x64xf32>
    %228 = vector.extract_strided_slice %171 {offsets = [24, 0], sizes = [8, 64], strides = [1, 1]} : vector<32x64xf32> to vector<8x64xf32>
    %229 = vector.extract_strided_slice %172 {offsets = [24, 0], sizes = [8, 64], strides = [1, 1]} : vector<32x64xf32> to vector<8x64xf32>
    %230 = vector.extract_strided_slice %173 {offsets = [24, 0], sizes = [8, 64], strides = [1, 1]} : vector<32x64xf32> to vector<8x64xf32>
    %cst_95 = arith.constant dense<0.000000e+00> : vector<64x64xf32>
    %231 = tpu.matmul %228, %229, %cst_95 {dimension_numbers = #tpu.dot_dimension_numbers<[0], [0], [1], [1], [0, 1, 1, 1], [], []>} : vector<8x64xf32>, vector<8x64xf32>, vector<64x64xf32> -> vector<64x64xf32>
    %cst_96 = arith.constant 0.353553385 : f32
    %232 = vector.broadcast %cst_96 : f32 to vector<64x64xf32>
    %233 = arith.mulf %231, %232 : vector<64x64xf32>
    %cst_97 = arith.constant -1.000000e+30 : f32
    %234 = vector.broadcast %cst_97 : f32 to vector<64x64xf32>
    %235 = arith.select %6, %233, %234 : vector<64x64xi1>, vector<64x64xf32>
    %cst_98 = arith.constant dense<0xFF800000> : vector<64xf32>
    %236 = vector.multi_reduction <maximumf>, %235, %cst_98 [1] : vector<64x64xf32> to vector<64xf32>
    %237 = vector.shape_cast %236 : vector<64xf32> to vector<64x1xf32>
    %238 = vector.broadcast %237 : vector<64x1xf32> to vector<64x64xf32>
    %239 = arith.subf %235, %238 : vector<64x64xf32>
    %240 = math.exp %239 : vector<64x64xf32>
    %cst_99 = arith.constant dense<0.000000e+00> : vector<64xf32>
    %241 = vector.multi_reduction <add>, %240, %cst_99 [1] : vector<64x64xf32> to vector<64xf32>
    %242 = vector.shape_cast %241 : vector<64xf32> to vector<64x1xf32>
    %243 = vector.broadcast %242 : vector<64x1xf32> to vector<64x64xf32>
    %244 = arith.divf %240, %243 : vector<64x64xf32>
    %cst_100 = arith.constant dense<0.000000e+00> : vector<8x64xf32>
    %245 = tpu.matmul %230, %244, %cst_100 {dimension_numbers = #tpu.dot_dimension_numbers<[1], [1], [0], [0], [0, 0, 1, 0], [], []>} : vector<8x64xf32>, vector<64x64xf32>, vector<8x64xf32> -> vector<8x64xf32>
    %246 = tpu.concatenate %191, %209, %227, %245 in 0 : vector<8x64xf32>, vector<8x64xf32>, vector<8x64xf32>, vector<8x64xf32> -> vector<32x64xf32>
    %c0_101 = arith.constant 0 : index
    %c0_102 = arith.constant 0 : index
    %c0_103 = arith.constant 0 : index
    %247 = vector.load %arg9[%c0_101, %c0_102, %c0_103] : memref<2x32x32xf32, #tpu.memory_space<vmem>>, vector<1x32x32xf32>
    %248 = vector.shape_cast %247 : vector<1x32x32xf32> to vector<32x32xf32>
    %cst_104 = arith.constant dense<0.000000e+00> : vector<32x64xf32>
    %249 = tpu.matmul %248, %246, %cst_104 {dimension_numbers = #tpu.dot_dimension_numbers<[1], [0], [0], [1], [0, 0, 1, 1], [], []>} : vector<32x32xf32>, vector<32x64xf32>, vector<32x64xf32> -> vector<32x64xf32>
    %c0_105 = arith.constant 0 : index
    %c0_106 = arith.constant 0 : index
    %c0_107 = arith.constant 0 : index
    %250 = vector.load %arg10[%c0_105, %c0_106, %c0_107] : memref<2x32x1xf32, #tpu.memory_space<vmem>>, vector<1x32x1xf32>
    %251 = vector.shape_cast %250 : vector<1x32x1xf32> to vector<32x1xf32>
    %252 = vector.broadcast %251 : vector<32x1xf32> to vector<32x64xf32>
    %253 = arith.addf %249, %252 : vector<32x64xf32>
    %254 = tpu.concatenate %163, %253 in 0 : vector<32x64xf32>, vector<32x64xf32> -> vector<64x64xf32>
    %c0_108 = arith.constant 0 : index
    %c0_109 = arith.constant 0 : index
    %c0_110 = arith.constant 0 : index
    %255 = vector.load %arg11[%c0_108, %c0_109, %c0_110] : memref<2x64x64xf32, #tpu.memory_space<vmem>>, vector<1x64x64xf32>
    %256 = vector.shape_cast %255 : vector<1x64x64xf32> to vector<64x64xf32>
    %cst_111 = arith.constant dense<0.000000e+00> : vector<64x64xf32>
    %257 = tpu.matmul %256, %254, %cst_111 {dimension_numbers = #tpu.dot_dimension_numbers<[1], [0], [0], [1], [0, 0, 1, 1], [], []>} : vector<64x64xf32>, vector<64x64xf32>, vector<64x64xf32> -> vector<64x64xf32>
    %c0_112 = arith.constant 0 : index
    %c0_113 = arith.constant 0 : index
    %c0_114 = arith.constant 0 : index
    %258 = vector.load %arg12[%c0_112, %c0_113, %c0_114] : memref<2x64x1xf32, #tpu.memory_space<vmem>>, vector<1x64x1xf32>
    %259 = vector.shape_cast %258 : vector<1x64x1xf32> to vector<64x1xf32>
    %260 = vector.broadcast %259 : vector<64x1xf32> to vector<64x64xf32>
    %261 = arith.addf %257, %260 : vector<64x64xf32>
    %cst_115 = arith.constant 0.000000e+00 : f32
    %262 = vector.broadcast %cst_115 : f32 to vector<64x64xf32>
    %263 = arith.maximumf %261, %262 : vector<64x64xf32>
    %c0_116 = arith.constant 0 : index
    %c0_117 = arith.constant 0 : index
    %c0_118 = arith.constant 0 : index
    %264 = vector.load %arg13[%c0_116, %c0_117, %c0_118] : memref<2x32x64xf32, #tpu.memory_space<vmem>>, vector<1x32x64xf32>
    %265 = vector.shape_cast %264 : vector<1x32x64xf32> to vector<32x64xf32>
    %cst_119 = arith.constant dense<0.000000e+00> : vector<32x64xf32>
    %266 = tpu.matmul %265, %263, %cst_119 {dimension_numbers = #tpu.dot_dimension_numbers<[1], [0], [0], [1], [0, 0, 1, 1], [], []>} : vector<32x64xf32>, vector<64x64xf32>, vector<32x64xf32> -> vector<32x64xf32>
    %c0_120 = arith.constant 0 : index
    %c0_121 = arith.constant 0 : index
    %c0_122 = arith.constant 0 : index
    %267 = vector.load %arg14[%c0_120, %c0_121, %c0_122] : memref<2x32x1xf32, #tpu.memory_space<vmem>>, vector<1x32x1xf32>
    %268 = vector.shape_cast %267 : vector<1x32x1xf32> to vector<32x1xf32>
    %269 = vector.broadcast %268 : vector<32x1xf32> to vector<32x64xf32>
    %270 = arith.addf %266, %269 : vector<32x64xf32>
    %271 = arith.addf %163, %270 : vector<32x64xf32>
    %c1 = arith.constant 1 : index
    %c0_123 = arith.constant 0 : index
    %c0_124 = arith.constant 0 : index
    %272 = vector.load %arg7[%c1, %c0_123, %c0_124] : memref<2x96x32xf32, #tpu.memory_space<vmem>>, vector<1x96x32xf32>
    %273 = vector.shape_cast %272 : vector<1x96x32xf32> to vector<96x32xf32>
    %cst_125 = arith.constant dense<0.000000e+00> : vector<96x64xf32>
    %274 = tpu.matmul %273, %271, %cst_125 {dimension_numbers = #tpu.dot_dimension_numbers<[1], [0], [0], [1], [0, 0, 1, 1], [], []>} : vector<96x32xf32>, vector<32x64xf32>, vector<96x64xf32> -> vector<96x64xf32>
    %c1_126 = arith.constant 1 : index
    %c0_127 = arith.constant 0 : index
    %c0_128 = arith.constant 0 : index
    %275 = vector.load %arg8[%c1_126, %c0_127, %c0_128] : memref<2x96x1xf32, #tpu.memory_space<vmem>>, vector<1x96x1xf32>
    %276 = vector.shape_cast %275 : vector<1x96x1xf32> to vector<96x1xf32>
    %277 = vector.broadcast %276 : vector<96x1xf32> to vector<96x64xf32>
    %278 = arith.addf %274, %277 : vector<96x64xf32>
    %279 = vector.extract_strided_slice %278 {offsets = [0, 0], sizes = [32, 64], strides = [1, 1]} : vector<96x64xf32> to vector<32x64xf32>
    %280 = vector.extract_strided_slice %278 {offsets = [32, 0], sizes = [32, 64], strides = [1, 1]} : vector<96x64xf32> to vector<32x64xf32>
    %281 = vector.extract_strided_slice %278 {offsets = [64, 0], sizes = [32, 64], strides = [1, 1]} : vector<96x64xf32> to vector<32x64xf32>
    %282 = vector.extract_strided_slice %279 {offsets = [0, 0], sizes = [8, 64], strides = [1, 1]} : vector<32x64xf32> to vector<8x64xf32>
    %283 = vector.extract_strided_slice %280 {offsets = [0, 0], sizes = [8, 64], strides = [1, 1]} : vector<32x64xf32> to vector<8x64xf32>
    %284 = vector.extract_strided_slice %281 {offsets = [0, 0], sizes = [8, 64], strides = [1, 1]} : vector<32x64xf32> to vector<8x64xf32>
    %cst_129 = arith.constant dense<0.000000e+00> : vector<64x64xf32>
    %285 = tpu.matmul %282, %283, %cst_129 {dimension_numbers = #tpu.dot_dimension_numbers<[0], [0], [1], [1], [0, 1, 1, 1], [], []>} : vector<8x64xf32>, vector<8x64xf32>, vector<64x64xf32> -> vector<64x64xf32>
    %cst_130 = arith.constant 0.353553385 : f32
    %286 = vector.broadcast %cst_130 : f32 to vector<64x64xf32>
    %287 = arith.mulf %285, %286 : vector<64x64xf32>
    %cst_131 = arith.constant -1.000000e+30 : f32
    %288 = vector.broadcast %cst_131 : f32 to vector<64x64xf32>
    %289 = arith.select %14, %287, %288 : vector<64x64xi1>, vector<64x64xf32>
    %cst_132 = arith.constant dense<0xFF800000> : vector<64xf32>
    %290 = vector.multi_reduction <maximumf>, %289, %cst_132 [1] : vector<64x64xf32> to vector<64xf32>
    %291 = vector.shape_cast %290 : vector<64xf32> to vector<64x1xf32>
    %292 = vector.broadcast %291 : vector<64x1xf32> to vector<64x64xf32>
    %293 = arith.subf %289, %292 : vector<64x64xf32>
    %294 = math.exp %293 : vector<64x64xf32>
    %cst_133 = arith.constant dense<0.000000e+00> : vector<64xf32>
    %295 = vector.multi_reduction <add>, %294, %cst_133 [1] : vector<64x64xf32> to vector<64xf32>
    %296 = vector.shape_cast %295 : vector<64xf32> to vector<64x1xf32>
    %297 = vector.broadcast %296 : vector<64x1xf32> to vector<64x64xf32>
    %298 = arith.divf %294, %297 : vector<64x64xf32>
    %cst_134 = arith.constant dense<0.000000e+00> : vector<8x64xf32>
    %299 = tpu.matmul %284, %298, %cst_134 {dimension_numbers = #tpu.dot_dimension_numbers<[1], [1], [0], [0], [0, 0, 1, 0], [], []>} : vector<8x64xf32>, vector<64x64xf32>, vector<8x64xf32> -> vector<8x64xf32>
    %300 = vector.extract_strided_slice %279 {offsets = [8, 0], sizes = [8, 64], strides = [1, 1]} : vector<32x64xf32> to vector<8x64xf32>
    %301 = vector.extract_strided_slice %280 {offsets = [8, 0], sizes = [8, 64], strides = [1, 1]} : vector<32x64xf32> to vector<8x64xf32>
    %302 = vector.extract_strided_slice %281 {offsets = [8, 0], sizes = [8, 64], strides = [1, 1]} : vector<32x64xf32> to vector<8x64xf32>
    %cst_135 = arith.constant dense<0.000000e+00> : vector<64x64xf32>
    %303 = tpu.matmul %300, %301, %cst_135 {dimension_numbers = #tpu.dot_dimension_numbers<[0], [0], [1], [1], [0, 1, 1, 1], [], []>} : vector<8x64xf32>, vector<8x64xf32>, vector<64x64xf32> -> vector<64x64xf32>
    %cst_136 = arith.constant 0.353553385 : f32
    %304 = vector.broadcast %cst_136 : f32 to vector<64x64xf32>
    %305 = arith.mulf %303, %304 : vector<64x64xf32>
    %cst_137 = arith.constant -1.000000e+30 : f32
    %306 = vector.broadcast %cst_137 : f32 to vector<64x64xf32>
    %307 = arith.select %14, %305, %306 : vector<64x64xi1>, vector<64x64xf32>
    %cst_138 = arith.constant dense<0xFF800000> : vector<64xf32>
    %308 = vector.multi_reduction <maximumf>, %307, %cst_138 [1] : vector<64x64xf32> to vector<64xf32>
    %309 = vector.shape_cast %308 : vector<64xf32> to vector<64x1xf32>
    %310 = vector.broadcast %309 : vector<64x1xf32> to vector<64x64xf32>
    %311 = arith.subf %307, %310 : vector<64x64xf32>
    %312 = math.exp %311 : vector<64x64xf32>
    %cst_139 = arith.constant dense<0.000000e+00> : vector<64xf32>
    %313 = vector.multi_reduction <add>, %312, %cst_139 [1] : vector<64x64xf32> to vector<64xf32>
    %314 = vector.shape_cast %313 : vector<64xf32> to vector<64x1xf32>
    %315 = vector.broadcast %314 : vector<64x1xf32> to vector<64x64xf32>
    %316 = arith.divf %312, %315 : vector<64x64xf32>
    %cst_140 = arith.constant dense<0.000000e+00> : vector<8x64xf32>
    %317 = tpu.matmul %302, %316, %cst_140 {dimension_numbers = #tpu.dot_dimension_numbers<[1], [1], [0], [0], [0, 0, 1, 0], [], []>} : vector<8x64xf32>, vector<64x64xf32>, vector<8x64xf32> -> vector<8x64xf32>
    %318 = vector.extract_strided_slice %279 {offsets = [16, 0], sizes = [8, 64], strides = [1, 1]} : vector<32x64xf32> to vector<8x64xf32>
    %319 = vector.extract_strided_slice %280 {offsets = [16, 0], sizes = [8, 64], strides = [1, 1]} : vector<32x64xf32> to vector<8x64xf32>
    %320 = vector.extract_strided_slice %281 {offsets = [16, 0], sizes = [8, 64], strides = [1, 1]} : vector<32x64xf32> to vector<8x64xf32>
    %cst_141 = arith.constant dense<0.000000e+00> : vector<64x64xf32>
    %321 = tpu.matmul %318, %319, %cst_141 {dimension_numbers = #tpu.dot_dimension_numbers<[0], [0], [1], [1], [0, 1, 1, 1], [], []>} : vector<8x64xf32>, vector<8x64xf32>, vector<64x64xf32> -> vector<64x64xf32>
    %cst_142 = arith.constant 0.353553385 : f32
    %322 = vector.broadcast %cst_142 : f32 to vector<64x64xf32>
    %323 = arith.mulf %321, %322 : vector<64x64xf32>
    %cst_143 = arith.constant -1.000000e+30 : f32
    %324 = vector.broadcast %cst_143 : f32 to vector<64x64xf32>
    %325 = arith.select %14, %323, %324 : vector<64x64xi1>, vector<64x64xf32>
    %cst_144 = arith.constant dense<0xFF800000> : vector<64xf32>
    %326 = vector.multi_reduction <maximumf>, %325, %cst_144 [1] : vector<64x64xf32> to vector<64xf32>
    %327 = vector.shape_cast %326 : vector<64xf32> to vector<64x1xf32>
    %328 = vector.broadcast %327 : vector<64x1xf32> to vector<64x64xf32>
    %329 = arith.subf %325, %328 : vector<64x64xf32>
    %330 = math.exp %329 : vector<64x64xf32>
    %cst_145 = arith.constant dense<0.000000e+00> : vector<64xf32>
    %331 = vector.multi_reduction <add>, %330, %cst_145 [1] : vector<64x64xf32> to vector<64xf32>
    %332 = vector.shape_cast %331 : vector<64xf32> to vector<64x1xf32>
    %333 = vector.broadcast %332 : vector<64x1xf32> to vector<64x64xf32>
    %334 = arith.divf %330, %333 : vector<64x64xf32>
    %cst_146 = arith.constant dense<0.000000e+00> : vector<8x64xf32>
    %335 = tpu.matmul %320, %334, %cst_146 {dimension_numbers = #tpu.dot_dimension_numbers<[1], [1], [0], [0], [0, 0, 1, 0], [], []>} : vector<8x64xf32>, vector<64x64xf32>, vector<8x64xf32> -> vector<8x64xf32>
    %336 = vector.extract_strided_slice %279 {offsets = [24, 0], sizes = [8, 64], strides = [1, 1]} : vector<32x64xf32> to vector<8x64xf32>
    %337 = vector.extract_strided_slice %280 {offsets = [24, 0], sizes = [8, 64], strides = [1, 1]} : vector<32x64xf32> to vector<8x64xf32>
    %338 = vector.extract_strided_slice %281 {offsets = [24, 0], sizes = [8, 64], strides = [1, 1]} : vector<32x64xf32> to vector<8x64xf32>
    %cst_147 = arith.constant dense<0.000000e+00> : vector<64x64xf32>
    %339 = tpu.matmul %336, %337, %cst_147 {dimension_numbers = #tpu.dot_dimension_numbers<[0], [0], [1], [1], [0, 1, 1, 1], [], []>} : vector<8x64xf32>, vector<8x64xf32>, vector<64x64xf32> -> vector<64x64xf32>
    %cst_148 = arith.constant 0.353553385 : f32
    %340 = vector.broadcast %cst_148 : f32 to vector<64x64xf32>
    %341 = arith.mulf %339, %340 : vector<64x64xf32>
    %cst_149 = arith.constant -1.000000e+30 : f32
    %342 = vector.broadcast %cst_149 : f32 to vector<64x64xf32>
    %343 = arith.select %14, %341, %342 : vector<64x64xi1>, vector<64x64xf32>
    %cst_150 = arith.constant dense<0xFF800000> : vector<64xf32>
    %344 = vector.multi_reduction <maximumf>, %343, %cst_150 [1] : vector<64x64xf32> to vector<64xf32>
    %345 = vector.shape_cast %344 : vector<64xf32> to vector<64x1xf32>
    %346 = vector.broadcast %345 : vector<64x1xf32> to vector<64x64xf32>
    %347 = arith.subf %343, %346 : vector<64x64xf32>
    %348 = math.exp %347 : vector<64x64xf32>
    %cst_151 = arith.constant dense<0.000000e+00> : vector<64xf32>
    %349 = vector.multi_reduction <add>, %348, %cst_151 [1] : vector<64x64xf32> to vector<64xf32>
    %350 = vector.shape_cast %349 : vector<64xf32> to vector<64x1xf32>
    %351 = vector.broadcast %350 : vector<64x1xf32> to vector<64x64xf32>
    %352 = arith.divf %348, %351 : vector<64x64xf32>
    %cst_152 = arith.constant dense<0.000000e+00> : vector<8x64xf32>
    %353 = tpu.matmul %338, %352, %cst_152 {dimension_numbers = #tpu.dot_dimension_numbers<[1], [1], [0], [0], [0, 0, 1, 0], [], []>} : vector<8x64xf32>, vector<64x64xf32>, vector<8x64xf32> -> vector<8x64xf32>
    %354 = tpu.concatenate %299, %317, %335, %353 in 0 : vector<8x64xf32>, vector<8x64xf32>, vector<8x64xf32>, vector<8x64xf32> -> vector<32x64xf32>
    %c1_153 = arith.constant 1 : index
    %c0_154 = arith.constant 0 : index
    %c0_155 = arith.constant 0 : index
    %355 = vector.load %arg9[%c1_153, %c0_154, %c0_155] : memref<2x32x32xf32, #tpu.memory_space<vmem>>, vector<1x32x32xf32>
    %356 = vector.shape_cast %355 : vector<1x32x32xf32> to vector<32x32xf32>
    %cst_156 = arith.constant dense<0.000000e+00> : vector<32x64xf32>
    %357 = tpu.matmul %356, %354, %cst_156 {dimension_numbers = #tpu.dot_dimension_numbers<[1], [0], [0], [1], [0, 0, 1, 1], [], []>} : vector<32x32xf32>, vector<32x64xf32>, vector<32x64xf32> -> vector<32x64xf32>
    %c1_157 = arith.constant 1 : index
    %c0_158 = arith.constant 0 : index
    %c0_159 = arith.constant 0 : index
    %358 = vector.load %arg10[%c1_157, %c0_158, %c0_159] : memref<2x32x1xf32, #tpu.memory_space<vmem>>, vector<1x32x1xf32>
    %359 = vector.shape_cast %358 : vector<1x32x1xf32> to vector<32x1xf32>
    %360 = vector.broadcast %359 : vector<32x1xf32> to vector<32x64xf32>
    %361 = arith.addf %357, %360 : vector<32x64xf32>
    %362 = tpu.concatenate %271, %361 in 0 : vector<32x64xf32>, vector<32x64xf32> -> vector<64x64xf32>
    %c1_160 = arith.constant 1 : index
    %c0_161 = arith.constant 0 : index
    %c0_162 = arith.constant 0 : index
    %363 = vector.load %arg11[%c1_160, %c0_161, %c0_162] : memref<2x64x64xf32, #tpu.memory_space<vmem>>, vector<1x64x64xf32>
    %364 = vector.shape_cast %363 : vector<1x64x64xf32> to vector<64x64xf32>
    %cst_163 = arith.constant dense<0.000000e+00> : vector<64x64xf32>
    %365 = tpu.matmul %364, %362, %cst_163 {dimension_numbers = #tpu.dot_dimension_numbers<[1], [0], [0], [1], [0, 0, 1, 1], [], []>} : vector<64x64xf32>, vector<64x64xf32>, vector<64x64xf32> -> vector<64x64xf32>
    %c1_164 = arith.constant 1 : index
    %c0_165 = arith.constant 0 : index
    %c0_166 = arith.constant 0 : index
    %366 = vector.load %arg12[%c1_164, %c0_165, %c0_166] : memref<2x64x1xf32, #tpu.memory_space<vmem>>, vector<1x64x1xf32>
    %367 = vector.shape_cast %366 : vector<1x64x1xf32> to vector<64x1xf32>
    %368 = vector.broadcast %367 : vector<64x1xf32> to vector<64x64xf32>
    %369 = arith.addf %365, %368 : vector<64x64xf32>
    %cst_167 = arith.constant 0.000000e+00 : f32
    %370 = vector.broadcast %cst_167 : f32 to vector<64x64xf32>
    %371 = arith.maximumf %369, %370 : vector<64x64xf32>
    %c1_168 = arith.constant 1 : index
    %c0_169 = arith.constant 0 : index
    %c0_170 = arith.constant 0 : index
    %372 = vector.load %arg13[%c1_168, %c0_169, %c0_170] : memref<2x32x64xf32, #tpu.memory_space<vmem>>, vector<1x32x64xf32>
    %373 = vector.shape_cast %372 : vector<1x32x64xf32> to vector<32x64xf32>
    %cst_171 = arith.constant dense<0.000000e+00> : vector<32x64xf32>
    %374 = tpu.matmul %373, %371, %cst_171 {dimension_numbers = #tpu.dot_dimension_numbers<[1], [0], [0], [1], [0, 0, 1, 1], [], []>} : vector<32x64xf32>, vector<64x64xf32>, vector<32x64xf32> -> vector<32x64xf32>
    %c1_172 = arith.constant 1 : index
    %c0_173 = arith.constant 0 : index
    %c0_174 = arith.constant 0 : index
    %375 = vector.load %arg14[%c1_172, %c0_173, %c0_174] : memref<2x32x1xf32, #tpu.memory_space<vmem>>, vector<1x32x1xf32>
    %376 = vector.shape_cast %375 : vector<1x32x1xf32> to vector<32x1xf32>
    %377 = vector.broadcast %376 : vector<32x1xf32> to vector<32x64xf32>
    %378 = arith.addf %374, %377 : vector<32x64xf32>
    %379 = arith.addf %271, %378 : vector<32x64xf32>
    %c0_175 = arith.constant 0 : index
    %c0_176 = arith.constant 0 : index
    %380 = vector.load %arg15[%c0_175, %c0_176] : memref<32x32xf32, #tpu.memory_space<vmem>>, vector<32x32xf32>
    %cst_177 = arith.constant dense<0.000000e+00> : vector<32x64xf32>
    %381 = tpu.matmul %380, %379, %cst_177 {dimension_numbers = #tpu.dot_dimension_numbers<[1], [0], [0], [1], [0, 0, 1, 1], [], []>} : vector<32x32xf32>, vector<32x64xf32>, vector<32x64xf32> -> vector<32x64xf32>
    %c0_178 = arith.constant 0 : index
    %c0_179 = arith.constant 0 : index
    %382 = vector.load %arg16[%c0_178, %c0_179] : memref<32x1xf32, #tpu.memory_space<vmem>>, vector<32x1xf32>
    %383 = vector.broadcast %382 : vector<32x1xf32> to vector<32x64xf32>
    %384 = arith.addf %381, %383 : vector<32x64xf32>
    %385 = tpu.iota {dimensions = array<i32: 0>} : vector<17x17xi32>
    %386 = tpu.iota {dimensions = array<i32: 1>} : vector<17x17xi32>
    %cst_180 = arith.constant 0.000000e+00 : f32
    %387 = vector.broadcast %cst_180 : f32 to vector<16x1xf32>
    %cst_181 = arith.constant 0.000000e+00 : f32
    %388 = vector.broadcast %cst_181 : f32 to vector<1x17xf32>
    %389 = vector.extract_strided_slice %384 {offsets = [0, 0], sizes = [32, 16], strides = [1, 1]} : vector<32x64xf32> to vector<32x16xf32>
    %390 = vector.extract_strided_slice %384 {offsets = [0, 32], sizes = [32, 16], strides = [1, 1]} : vector<32x64xf32> to vector<32x16xf32>
    %cst_182 = arith.constant dense<0.000000e+00> : vector<16x16xf32>
    %391 = tpu.matmul %389, %390, %cst_182 {dimension_numbers = #tpu.dot_dimension_numbers<[0], [0], [1], [1], [0, 1, 1, 1], [], []>} : vector<32x16xf32>, vector<32x16xf32>, vector<16x16xf32> -> vector<16x16xf32>
    %cst_183 = arith.constant 0.176776692 : f32
    %392 = vector.broadcast %cst_183 : f32 to vector<16x16xf32>
    %393 = arith.mulf %391, %392 : vector<16x16xf32>
    %394 = tpu.concatenate %393, %387 in 1 : vector<16x16xf32>, vector<16x1xf32> -> vector<16x17xf32>
    %395 = tpu.concatenate %394, %388 in 0 : vector<16x17xf32>, vector<1x17xf32> -> vector<17x17xf32>
    %cst_184 = arith.constant dense<0xFF800000> : vector<17xf32>
    %396 = vector.multi_reduction <maximumf>, %395, %cst_184 [1] : vector<17x17xf32> to vector<17xf32>
    %397 = vector.shape_cast %396 : vector<17xf32> to vector<17x1xf32>
    %398 = vector.broadcast %397 : vector<17x1xf32> to vector<17x17xf32>
    %399 = arith.subf %395, %398 : vector<17x17xf32>
    %400 = math.exp %399 : vector<17x17xf32>
    %cst_185 = arith.constant dense<0.000000e+00> : vector<17xf32>
    %401 = vector.multi_reduction <add>, %400, %cst_185 [1] : vector<17x17xf32> to vector<17xf32>
    %402 = vector.shape_cast %401 : vector<17xf32> to vector<17x1xf32>
    %403 = math.log %402 : vector<17x1xf32>
    %404 = arith.addf %397, %403 : vector<17x1xf32>
    %c16_i32 = arith.constant 16 : i32
    %405 = vector.broadcast %c16_i32 : i32 to vector<17x17xi32>
    %406 = arith.cmpi slt, %385, %405 : vector<17x17xi32>
    %407 = vector.broadcast %404 : vector<17x1xf32> to vector<17x17xf32>
    %408 = arith.subf %395, %407 : vector<17x17xf32>
    %409 = arith.select %406, %408, %395 : vector<17x17xi1>, vector<17x17xf32>
    %cst_186 = arith.constant dense<0xFF800000> : vector<17xf32>
    %410 = vector.multi_reduction <maximumf>, %409, %cst_186 [0] : vector<17x17xf32> to vector<17xf32>
    %411 = vector.shape_cast %410 : vector<17xf32> to vector<1x17xf32>
    %412 = vector.broadcast %411 : vector<1x17xf32> to vector<17x17xf32>
    %413 = arith.subf %409, %412 : vector<17x17xf32>
    %414 = math.exp %413 : vector<17x17xf32>
    %cst_187 = arith.constant dense<0.000000e+00> : vector<17xf32>
    %415 = vector.multi_reduction <add>, %414, %cst_187 [0] : vector<17x17xf32> to vector<17xf32>
    %416 = vector.shape_cast %415 : vector<17xf32> to vector<1x17xf32>
    %417 = math.log %416 : vector<1x17xf32>
    %418 = arith.addf %411, %417 : vector<1x17xf32>
    %c16_i32_188 = arith.constant 16 : i32
    %419 = vector.broadcast %c16_i32_188 : i32 to vector<17x17xi32>
    %420 = arith.cmpi slt, %386, %419 : vector<17x17xi32>
    %421 = vector.broadcast %418 : vector<1x17xf32> to vector<17x17xf32>
    %422 = arith.subf %409, %421 : vector<17x17xf32>
    %423 = arith.select %420, %422, %409 : vector<17x17xi1>, vector<17x17xf32>
    %cst_189 = arith.constant dense<0xFF800000> : vector<17xf32>
    %424 = vector.multi_reduction <maximumf>, %423, %cst_189 [1] : vector<17x17xf32> to vector<17xf32>
    %425 = vector.shape_cast %424 : vector<17xf32> to vector<17x1xf32>
    %426 = vector.broadcast %425 : vector<17x1xf32> to vector<17x17xf32>
    %427 = arith.subf %423, %426 : vector<17x17xf32>
    %428 = math.exp %427 : vector<17x17xf32>
    %cst_190 = arith.constant dense<0.000000e+00> : vector<17xf32>
    %429 = vector.multi_reduction <add>, %428, %cst_190 [1] : vector<17x17xf32> to vector<17xf32>
    %430 = vector.shape_cast %429 : vector<17xf32> to vector<17x1xf32>
    %431 = math.log %430 : vector<17x1xf32>
    %432 = arith.addf %425, %431 : vector<17x1xf32>
    %c16_i32_191 = arith.constant 16 : i32
    %433 = vector.broadcast %c16_i32_191 : i32 to vector<17x17xi32>
    %434 = arith.cmpi slt, %385, %433 : vector<17x17xi32>
    %435 = vector.broadcast %432 : vector<17x1xf32> to vector<17x17xf32>
    %436 = arith.subf %423, %435 : vector<17x17xf32>
    %437 = arith.select %434, %436, %423 : vector<17x17xi1>, vector<17x17xf32>
    %cst_192 = arith.constant dense<0xFF800000> : vector<17xf32>
    %438 = vector.multi_reduction <maximumf>, %437, %cst_192 [0] : vector<17x17xf32> to vector<17xf32>
    %439 = vector.shape_cast %438 : vector<17xf32> to vector<1x17xf32>
    %440 = vector.broadcast %439 : vector<1x17xf32> to vector<17x17xf32>
    %441 = arith.subf %437, %440 : vector<17x17xf32>
    %442 = math.exp %441 : vector<17x17xf32>
    %cst_193 = arith.constant dense<0.000000e+00> : vector<17xf32>
    %443 = vector.multi_reduction <add>, %442, %cst_193 [0] : vector<17x17xf32> to vector<17xf32>
    %444 = vector.shape_cast %443 : vector<17xf32> to vector<1x17xf32>
    %445 = math.log %444 : vector<1x17xf32>
    %446 = arith.addf %439, %445 : vector<1x17xf32>
    %c16_i32_194 = arith.constant 16 : i32
    %447 = vector.broadcast %c16_i32_194 : i32 to vector<17x17xi32>
    %448 = arith.cmpi slt, %386, %447 : vector<17x17xi32>
    %449 = vector.broadcast %446 : vector<1x17xf32> to vector<17x17xf32>
    %450 = arith.subf %437, %449 : vector<17x17xf32>
    %451 = arith.select %448, %450, %437 : vector<17x17xi1>, vector<17x17xf32>
    %cst_195 = arith.constant dense<0xFF800000> : vector<17xf32>
    %452 = vector.multi_reduction <maximumf>, %451, %cst_195 [1] : vector<17x17xf32> to vector<17xf32>
    %453 = vector.shape_cast %452 : vector<17xf32> to vector<17x1xf32>
    %454 = vector.broadcast %453 : vector<17x1xf32> to vector<17x17xf32>
    %455 = arith.subf %451, %454 : vector<17x17xf32>
    %456 = math.exp %455 : vector<17x17xf32>
    %cst_196 = arith.constant dense<0.000000e+00> : vector<17xf32>
    %457 = vector.multi_reduction <add>, %456, %cst_196 [1] : vector<17x17xf32> to vector<17xf32>
    %458 = vector.shape_cast %457 : vector<17xf32> to vector<17x1xf32>
    %459 = math.log %458 : vector<17x1xf32>
    %460 = arith.addf %453, %459 : vector<17x1xf32>
    %c16_i32_197 = arith.constant 16 : i32
    %461 = vector.broadcast %c16_i32_197 : i32 to vector<17x17xi32>
    %462 = arith.cmpi slt, %385, %461 : vector<17x17xi32>
    %463 = vector.broadcast %460 : vector<17x1xf32> to vector<17x17xf32>
    %464 = arith.subf %451, %463 : vector<17x17xf32>
    %465 = arith.select %462, %464, %451 : vector<17x17xi1>, vector<17x17xf32>
    %cst_198 = arith.constant dense<0xFF800000> : vector<17xf32>
    %466 = vector.multi_reduction <maximumf>, %465, %cst_198 [0] : vector<17x17xf32> to vector<17xf32>
    %467 = vector.shape_cast %466 : vector<17xf32> to vector<1x17xf32>
    %468 = vector.broadcast %467 : vector<1x17xf32> to vector<17x17xf32>
    %469 = arith.subf %465, %468 : vector<17x17xf32>
    %470 = math.exp %469 : vector<17x17xf32>
    %cst_199 = arith.constant dense<0.000000e+00> : vector<17xf32>
    %471 = vector.multi_reduction <add>, %470, %cst_199 [0] : vector<17x17xf32> to vector<17xf32>
    %472 = vector.shape_cast %471 : vector<17xf32> to vector<1x17xf32>
    %473 = math.log %472 : vector<1x17xf32>
    %474 = arith.addf %467, %473 : vector<1x17xf32>
    %c16_i32_200 = arith.constant 16 : i32
    %475 = vector.broadcast %c16_i32_200 : i32 to vector<17x17xi32>
    %476 = arith.cmpi slt, %386, %475 : vector<17x17xi32>
    %477 = vector.broadcast %474 : vector<1x17xf32> to vector<17x17xf32>
    %478 = arith.subf %465, %477 : vector<17x17xf32>
    %479 = arith.select %476, %478, %465 : vector<17x17xi1>, vector<17x17xf32>
    %480 = vector.extract_strided_slice %479 {offsets = [0, 0], sizes = [16, 16], strides = [1, 1]} : vector<17x17xf32> to vector<16x16xf32>
    %481 = math.exp %480 : vector<16x16xf32>
    %c0_201 = arith.constant 0 : index
    %c0_202 = arith.constant 0 : index
    %c0_203 = arith.constant 0 : index
    %482 = vector.load %arg17[%c0_201, %c0_202, %c0_203] : memref<2x16x16xf32, #tpu.memory_space<vmem>>, vector<1x16x16xf32>
    %483 = vector.shape_cast %482 : vector<1x16x16xf32> to vector<16x16xf32>
    %484 = vector.shape_cast %481 : vector<16x16xf32> to vector<1x16x16xf32>
    tpu.vector_store %arg17[%c0_201, %c0_202, %c0_203], %484 {strides = array<i32>} : memref<2x16x16xf32, #tpu.memory_space<vmem>>, vector<1x16x16xf32>,
    %cst_204 = arith.constant dense<0.000000e+00> : vector<16xf32>
    %485 = vector.multi_reduction <add>, %481, %cst_204 [1] : vector<16x16xf32> to vector<16xf32>
    %486 = vector.shape_cast %485 : vector<16xf32> to vector<16x1xf32>
    %c0_205 = arith.constant 0 : index
    %c0_206 = arith.constant 0 : index
    %c0_207 = arith.constant 0 : index
    %487 = vector.load %arg18[%c0_205, %c0_206, %c0_207] : memref<2x16x1xf32, #tpu.memory_space<vmem>>, vector<1x16x1xf32>
    %488 = vector.shape_cast %487 : vector<1x16x1xf32> to vector<16x1xf32>
    %489 = vector.shape_cast %486 : vector<16x1xf32> to vector<1x16x1xf32>
    tpu.vector_store %arg18[%c0_205, %c0_206, %c0_207], %489 {strides = array<i32>} : memref<2x16x1xf32, #tpu.memory_space<vmem>>, vector<1x16x1xf32>,
    %cst_208 = arith.constant dense<0.000000e+00> : vector<16xf32>
    %490 = vector.multi_reduction <add>, %481, %cst_208 [0] : vector<16x16xf32> to vector<16xf32>
    %491 = vector.shape_cast %490 : vector<16xf32> to vector<1x16xf32>
    %c0_209 = arith.constant 0 : index
    %c0_210 = arith.constant 0 : index
    %c0_211 = arith.constant 0 : index
    %492 = vector.load %arg19[%c0_209, %c0_210, %c0_211] : memref<2x1x16xf32, #tpu.memory_space<vmem>>, vector<1x1x16xf32>
    %493 = vector.shape_cast %492 : vector<1x1x16xf32> to vector<1x16xf32>
    %494 = vector.shape_cast %491 : vector<1x16xf32> to vector<1x1x16xf32>
    tpu.vector_store %arg19[%c0_209, %c0_210, %c0_211], %494 {strides = array<i32>} : memref<2x1x16xf32, #tpu.memory_space<vmem>>, vector<1x1x16xf32>,
    %495 = vector.extract_strided_slice %384 {offsets = [0, 16], sizes = [32, 16], strides = [1, 1]} : vector<32x64xf32> to vector<32x16xf32>
    %496 = vector.extract_strided_slice %384 {offsets = [0, 48], sizes = [32, 16], strides = [1, 1]} : vector<32x64xf32> to vector<32x16xf32>
    %cst_212 = arith.constant dense<0.000000e+00> : vector<16x16xf32>
    %497 = tpu.matmul %495, %496, %cst_212 {dimension_numbers = #tpu.dot_dimension_numbers<[0], [0], [1], [1], [0, 1, 1, 1], [], []>} : vector<32x16xf32>, vector<32x16xf32>, vector<16x16xf32> -> vector<16x16xf32>
    %cst_213 = arith.constant 0.176776692 : f32
    %498 = vector.broadcast %cst_213 : f32 to vector<16x16xf32>
    %499 = arith.mulf %497, %498 : vector<16x16xf32>
    %500 = tpu.concatenate %499, %387 in 1 : vector<16x16xf32>, vector<16x1xf32> -> vector<16x17xf32>
    %501 = tpu.concatenate %500, %388 in 0 : vector<16x17xf32>, vector<1x17xf32> -> vector<17x17xf32>
    %cst_214 = arith.constant dense<0xFF800000> : vector<17xf32>
    %502 = vector.multi_reduction <maximumf>, %501, %cst_214 [1] : vector<17x17xf32> to vector<17xf32>
    %503 = vector.shape_cast %502 : vector<17xf32> to vector<17x1xf32>
    %504 = vector.broadcast %503 : vector<17x1xf32> to vector<17x17xf32>
    %505 = arith.subf %501, %504 : vector<17x17xf32>
    %506 = math.exp %505 : vector<17x17xf32>
    %cst_215 = arith.constant dense<0.000000e+00> : vector<17xf32>
    %507 = vector.multi_reduction <add>, %506, %cst_215 [1] : vector<17x17xf32> to vector<17xf32>
    %508 = vector.shape_cast %507 : vector<17xf32> to vector<17x1xf32>
    %509 = math.log %508 : vector<17x1xf32>
    %510 = arith.addf %503, %509 : vector<17x1xf32>
    %c16_i32_216 = arith.constant 16 : i32
    %511 = vector.broadcast %c16_i32_216 : i32 to vector<17x17xi32>
    %512 = arith.cmpi slt, %385, %511 : vector<17x17xi32>
    %513 = vector.broadcast %510 : vector<17x1xf32> to vector<17x17xf32>
    %514 = arith.subf %501, %513 : vector<17x17xf32>
    %515 = arith.select %512, %514, %501 : vector<17x17xi1>, vector<17x17xf32>
    %cst_217 = arith.constant dense<0xFF800000> : vector<17xf32>
    %516 = vector.multi_reduction <maximumf>, %515, %cst_217 [0] : vector<17x17xf32> to vector<17xf32>
    %517 = vector.shape_cast %516 : vector<17xf32> to vector<1x17xf32>
    %518 = vector.broadcast %517 : vector<1x17xf32> to vector<17x17xf32>
    %519 = arith.subf %515, %518 : vector<17x17xf32>
    %520 = math.exp %519 : vector<17x17xf32>
    %cst_218 = arith.constant dense<0.000000e+00> : vector<17xf32>
    %521 = vector.multi_reduction <add>, %520, %cst_218 [0] : vector<17x17xf32> to vector<17xf32>
    %522 = vector.shape_cast %521 : vector<17xf32> to vector<1x17xf32>
    %523 = math.log %522 : vector<1x17xf32>
    %524 = arith.addf %517, %523 : vector<1x17xf32>
    %c16_i32_219 = arith.constant 16 : i32
    %525 = vector.broadcast %c16_i32_219 : i32 to vector<17x17xi32>
    %526 = arith.cmpi slt, %386, %525 : vector<17x17xi32>
    %527 = vector.broadcast %524 : vector<1x17xf32> to vector<17x17xf32>
    %528 = arith.subf %515, %527 : vector<17x17xf32>
    %529 = arith.select %526, %528, %515 : vector<17x17xi1>, vector<17x17xf32>
    %cst_220 = arith.constant dense<0xFF800000> : vector<17xf32>
    %530 = vector.multi_reduction <maximumf>, %529, %cst_220 [1] : vector<17x17xf32> to vector<17xf32>
    %531 = vector.shape_cast %530 : vector<17xf32> to vector<17x1xf32>
    %532 = vector.broadcast %531 : vector<17x1xf32> to vector<17x17xf32>
    %533 = arith.subf %529, %532 : vector<17x17xf32>
    %534 = math.exp %533 : vector<17x17xf32>
    %cst_221 = arith.constant dense<0.000000e+00> : vector<17xf32>
    %535 = vector.multi_reduction <add>, %534, %cst_221 [1] : vector<17x17xf32> to vector<17xf32>
    %536 = vector.shape_cast %535 : vector<17xf32> to vector<17x1xf32>
    %537 = math.log %536 : vector<17x1xf32>
    %538 = arith.addf %531, %537 : vector<17x1xf32>
    %c16_i32_222 = arith.constant 16 : i32
    %539 = vector.broadcast %c16_i32_222 : i32 to vector<17x17xi32>
    %540 = arith.cmpi slt, %385, %539 : vector<17x17xi32>
    %541 = vector.broadcast %538 : vector<17x1xf32> to vector<17x17xf32>
    %542 = arith.subf %529, %541 : vector<17x17xf32>
    %543 = arith.select %540, %542, %529 : vector<17x17xi1>, vector<17x17xf32>
    %cst_223 = arith.constant dense<0xFF800000> : vector<17xf32>
    %544 = vector.multi_reduction <maximumf>, %543, %cst_223 [0] : vector<17x17xf32> to vector<17xf32>
    %545 = vector.shape_cast %544 : vector<17xf32> to vector<1x17xf32>
    %546 = vector.broadcast %545 : vector<1x17xf32> to vector<17x17xf32>
    %547 = arith.subf %543, %546 : vector<17x17xf32>
    %548 = math.exp %547 : vector<17x17xf32>
    %cst_224 = arith.constant dense<0.000000e+00> : vector<17xf32>
    %549 = vector.multi_reduction <add>, %548, %cst_224 [0] : vector<17x17xf32> to vector<17xf32>
    %550 = vector.shape_cast %549 : vector<17xf32> to vector<1x17xf32>
    %551 = math.log %550 : vector<1x17xf32>
    %552 = arith.addf %545, %551 : vector<1x17xf32>
    %c16_i32_225 = arith.constant 16 : i32
    %553 = vector.broadcast %c16_i32_225 : i32 to vector<17x17xi32>
    %554 = arith.cmpi slt, %386, %553 : vector<17x17xi32>
    %555 = vector.broadcast %552 : vector<1x17xf32> to vector<17x17xf32>
    %556 = arith.subf %543, %555 : vector<17x17xf32>
    %557 = arith.select %554, %556, %543 : vector<17x17xi1>, vector<17x17xf32>
    %cst_226 = arith.constant dense<0xFF800000> : vector<17xf32>
    %558 = vector.multi_reduction <maximumf>, %557, %cst_226 [1] : vector<17x17xf32> to vector<17xf32>
    %559 = vector.shape_cast %558 : vector<17xf32> to vector<17x1xf32>
    %560 = vector.broadcast %559 : vector<17x1xf32> to vector<17x17xf32>
    %561 = arith.subf %557, %560 : vector<17x17xf32>
    %562 = math.exp %561 : vector<17x17xf32>
    %cst_227 = arith.constant dense<0.000000e+00> : vector<17xf32>
    %563 = vector.multi_reduction <add>, %562, %cst_227 [1] : vector<17x17xf32> to vector<17xf32>
    %564 = vector.shape_cast %563 : vector<17xf32> to vector<17x1xf32>
    %565 = math.log %564 : vector<17x1xf32>
    %566 = arith.addf %559, %565 : vector<17x1xf32>
    %c16_i32_228 = arith.constant 16 : i32
    %567 = vector.broadcast %c16_i32_228 : i32 to vector<17x17xi32>
    %568 = arith.cmpi slt, %385, %567 : vector<17x17xi32>
    %569 = vector.broadcast %566 : vector<17x1xf32> to vector<17x17xf32>
    %570 = arith.subf %557, %569 : vector<17x17xf32>
    %571 = arith.select %568, %570, %557 : vector<17x17xi1>, vector<17x17xf32>
    %cst_229 = arith.constant dense<0xFF800000> : vector<17xf32>
    %572 = vector.multi_reduction <maximumf>, %571, %cst_229 [0] : vector<17x17xf32> to vector<17xf32>
    %573 = vector.shape_cast %572 : vector<17xf32> to vector<1x17xf32>
    %574 = vector.broadcast %573 : vector<1x17xf32> to vector<17x17xf32>
    %575 = arith.subf %571, %574 : vector<17x17xf32>
    %576 = math.exp %575 : vector<17x17xf32>
    %cst_230 = arith.constant dense<0.000000e+00> : vector<17xf32>
    %577 = vector.multi_reduction <add>, %576, %cst_230 [0] : vector<17x17xf32> to vector<17xf32>
    %578 = vector.shape_cast %577 : vector<17xf32> to vector<1x17xf32>
    %579 = math.log %578 : vector<1x17xf32>
    %580 = arith.addf %573, %579 : vector<1x17xf32>
    %c16_i32_231 = arith.constant 16 : i32
    %581 = vector.broadcast %c16_i32_231 : i32 to vector<17x17xi32>
    %582 = arith.cmpi slt, %386, %581 : vector<17x17xi32>
    %583 = vector.broadcast %580 : vector<1x17xf32> to vector<17x17xf32>
    %584 = arith.subf %571, %583 : vector<17x17xf32>
    %585 = arith.select %582, %584, %571 : vector<17x17xi1>, vector<17x17xf32>
    %586 = vector.extract_strided_slice %585 {offsets = [0, 0], sizes = [16, 16], strides = [1, 1]} : vector<17x17xf32> to vector<16x16xf32>
    %587 = math.exp %586 : vector<16x16xf32>
    %c1_232 = arith.constant 1 : index
    %c0_233 = arith.constant 0 : index
    %c0_234 = arith.constant 0 : index
    %588 = vector.load %arg17[%c1_232, %c0_233, %c0_234] : memref<2x16x16xf32, #tpu.memory_space<vmem>>, vector<1x16x16xf32>
    %589 = vector.shape_cast %588 : vector<1x16x16xf32> to vector<16x16xf32>
    %590 = vector.shape_cast %587 : vector<16x16xf32> to vector<1x16x16xf32>
    tpu.vector_store %arg17[%c1_232, %c0_233, %c0_234], %590 {strides = array<i32>} : memref<2x16x16xf32, #tpu.memory_space<vmem>>, vector<1x16x16xf32>,
    %cst_235 = arith.constant dense<0.000000e+00> : vector<16xf32>
    %591 = vector.multi_reduction <add>, %587, %cst_235 [1] : vector<16x16xf32> to vector<16xf32>
    %592 = vector.shape_cast %591 : vector<16xf32> to vector<16x1xf32>
    %c1_236 = arith.constant 1 : index
    %c0_237 = arith.constant 0 : index
    %c0_238 = arith.constant 0 : index
    %593 = vector.load %arg18[%c1_236, %c0_237, %c0_238] : memref<2x16x1xf32, #tpu.memory_space<vmem>>, vector<1x16x1xf32>
    %594 = vector.shape_cast %593 : vector<1x16x1xf32> to vector<16x1xf32>
    %595 = vector.shape_cast %592 : vector<16x1xf32> to vector<1x16x1xf32>
    tpu.vector_store %arg18[%c1_236, %c0_237, %c0_238], %595 {strides = array<i32>} : memref<2x16x1xf32, #tpu.memory_space<vmem>>, vector<1x16x1xf32>,
    %cst_239 = arith.constant dense<0.000000e+00> : vector<16xf32>
    %596 = vector.multi_reduction <add>, %587, %cst_239 [0] : vector<16x16xf32> to vector<16xf32>
    %597 = vector.shape_cast %596 : vector<16xf32> to vector<1x16xf32>
    %c1_240 = arith.constant 1 : index
    %c0_241 = arith.constant 0 : index
    %c0_242 = arith.constant 0 : index
    %598 = vector.load %arg19[%c1_240, %c0_241, %c0_242] : memref<2x1x16xf32, #tpu.memory_space<vmem>>, vector<1x1x16xf32>
    %599 = vector.shape_cast %598 : vector<1x1x16xf32> to vector<1x16xf32>
    %600 = vector.shape_cast %597 : vector<1x16xf32> to vector<1x1x16xf32>
    tpu.vector_store %arg19[%c1_240, %c0_241, %c0_242], %600 {strides = array<i32>} : memref<2x1x16xf32, #tpu.memory_space<vmem>>, vector<1x1x16xf32>,
    return
  }
  func.func @transform_0(%arg0: i32) -> (i32, i32) {
    %c0_i32 = arith.constant 0 : i32
    %c0_i32_0 = arith.constant 0 : i32
    %c0_i32_1 = arith.constant 0 : i32
    return %c0_i32, %c0_i32_0 : i32, i32
  }
  func.func @transform_1(%arg0: i32) -> (i32, i32) {
    %c0_i32 = arith.constant 0 : i32
    %c0_i32_0 = arith.constant 0 : i32
    %c0_i32_1 = arith.constant 0 : i32
    return %c0_i32, %c0_i32_0 : i32, i32
  }
  func.func @transform_2(%arg0: i32) -> (i32, i32) {
    %c0_i32 = arith.constant 0 : i32
    %c0_i32_0 = arith.constant 0 : i32
    %c0_i32_1 = arith.constant 0 : i32
    return %c0_i32, %c0_i32_0 : i32, i32
  }
  func.func @transform_3(%arg0: i32) -> (i32, i32) {
    %c0_i32 = arith.constant 0 : i32
    %c0_i32_0 = arith.constant 0 : i32
    %c0_i32_1 = arith.constant 0 : i32
    return %c0_i32, %c0_i32_0 : i32, i32
  }
  func.func @transform_4(%arg0: i32) -> (i32, i32) {
    %c0_i32 = arith.constant 0 : i32
    %c0_i32_0 = arith.constant 0 : i32
    %c0_i32_1 = arith.constant 0 : i32
    return %c0_i32, %c0_i32_0 : i32, i32
  }
  func.func @transform_5(%arg0: i32) -> (i32, i32) {
    %c0_i32 = arith.constant 0 : i32
    %c0_i32_0 = arith.constant 0 : i32
    %c0_i32_1 = arith.constant 0 : i32
    return %c0_i32, %c0_i32_0 : i32, i32
  }
  func.func @transform_6(%arg0: i32) -> (i32, i32, i32) {
    %c0_i32 = arith.constant 0 : i32
    %c0_i32_0 = arith.constant 0 : i32
    %c0_i32_1 = arith.constant 0 : i32
    %c0_i32_2 = arith.constant 0 : i32
    return %c0_i32, %c0_i32_0, %c0_i32_1 : i32, i32, i32
  }
  func.func @transform_7(%arg0: i32) -> (i32, i32, i32) {
    %c0_i32 = arith.constant 0 : i32
    %c0_i32_0 = arith.constant 0 : i32
    %c0_i32_1 = arith.constant 0 : i32
    %c0_i32_2 = arith.constant 0 : i32
    return %c0_i32, %c0_i32_0, %c0_i32_1 : i32, i32, i32
  }
  func.func @transform_8(%arg0: i32) -> (i32, i32, i32) {
    %c0_i32 = arith.constant 0 : i32
    %c0_i32_0 = arith.constant 0 : i32
    %c0_i32_1 = arith.constant 0 : i32
    %c0_i32_2 = arith.constant 0 : i32
    return %c0_i32, %c0_i32_0, %c0_i32_1 : i32, i32, i32
  }
  func.func @transform_9(%arg0: i32) -> (i32, i32, i32) {
    %c0_i32 = arith.constant 0 : i32
    %c0_i32_0 = arith.constant 0 : i32
    %c0_i32_1 = arith.constant 0 : i32
    %c0_i32_2 = arith.constant 0 : i32
    return %c0_i32, %c0_i32_0, %c0_i32_1 : i32, i32, i32
  }
  func.func @transform_10(%arg0: i32) -> (i32, i32, i32) {
    %c0_i32 = arith.constant 0 : i32
    %c0_i32_0 = arith.constant 0 : i32
    %c0_i32_1 = arith.constant 0 : i32
    %c0_i32_2 = arith.constant 0 : i32
    return %c0_i32, %c0_i32_0, %c0_i32_1 : i32, i32, i32
  }
  func.func @transform_11(%arg0: i32) -> (i32, i32, i32) {
    %c0_i32 = arith.constant 0 : i32
    %c0_i32_0 = arith.constant 0 : i32
    %c0_i32_1 = arith.constant 0 : i32
    %c0_i32_2 = arith.constant 0 : i32
    return %c0_i32, %c0_i32_0, %c0_i32_1 : i32, i32, i32
  }
  func.func @transform_12(%arg0: i32) -> (i32, i32, i32) {
    %c0_i32 = arith.constant 0 : i32
    %c0_i32_0 = arith.constant 0 : i32
    %c0_i32_1 = arith.constant 0 : i32
    %c0_i32_2 = arith.constant 0 : i32
    return %c0_i32, %c0_i32_0, %c0_i32_1 : i32, i32, i32
  }
  func.func @transform_13(%arg0: i32) -> (i32, i32, i32) {
    %c0_i32 = arith.constant 0 : i32
    %c0_i32_0 = arith.constant 0 : i32
    %c0_i32_1 = arith.constant 0 : i32
    %c0_i32_2 = arith.constant 0 : i32
    return %c0_i32, %c0_i32_0, %c0_i32_1 : i32, i32, i32
  }
  func.func @transform_14(%arg0: i32) -> (i32, i32) {
    %c0_i32 = arith.constant 0 : i32
    %c0_i32_0 = arith.constant 0 : i32
    %c0_i32_1 = arith.constant 0 : i32
    return %c0_i32, %c0_i32_0 : i32, i32
  }
  func.func @transform_15(%arg0: i32) -> (i32, i32) {
    %c0_i32 = arith.constant 0 : i32
    %c0_i32_0 = arith.constant 0 : i32
    %c0_i32_1 = arith.constant 0 : i32
    return %c0_i32, %c0_i32_0 : i32, i32
  }
  func.func @transform_16(%arg0: i32) -> (i32, i32, i32) {
    %c0_i32 = arith.constant 0 : i32
    %c0_i32_0 = arith.constant 0 : i32
    %c0_i32_1 = arith.constant 0 : i32
    %c0_i32_2 = arith.constant 0 : i32
    return %c0_i32, %c0_i32_0, %c0_i32_1 : i32, i32, i32
  }
  func.func @transform_17(%arg0: i32) -> (i32, i32, i32) {
    %c0_i32 = arith.constant 0 : i32
    %c0_i32_0 = arith.constant 0 : i32
    %c0_i32_1 = arith.constant 0 : i32
    %c0_i32_2 = arith.constant 0 : i32
    return %c0_i32, %c0_i32_0, %c0_i32_1 : i32, i32, i32
  }
  func.func @transform_18(%arg0: i32) -> (i32, i32, i32) {
    %c0_i32 = arith.constant 0 : i32
    %c0_i32_0 = arith.constant 0 : i32
    %c0_i32_1 = arith.constant 0 : i32
    %c0_i32_2 = arith.constant 0 : i32
    return %c0_i32, %c0_i32_0, %c0_i32_1 : i32, i32, i32
  }
}

</mosaic_0001>

<bundles_post_ra>
// kernel: superglue_forward.1
= control target key start
LH: loop header
LB: loop body
LE: loop exit
PB: predicated region body
PF: predicated region fallthrough
CT: control target
= control target key end

     0   :  { %s14895_s0 = inlined_call_operand.vmem [shape: f32[3,64], index: 0, kind: input, shape index: {}]   ;;  %s14896_s1 = inlined_call_operand.vmem [shape: f32[32,6], index: 1, kind: input, shape index: {}]   ;;  %s14897_s2 = inlined_call_operand.vmem [shape: f32[32,32], index: 2, kind: input, shape index: {}]   ;;  %s14898_s3 = inlined_call_operand.vmem [shape: f32[64,32], index: 3, kind: input, shape index: {}]   ;;  %s14899_s4 = inlined_call_operand.vmem [shape: f32[128,64], index: 4, kind: input, shape index: {}]   ;;  %s14900_s5 = inlined_call_operand.vmem [shape: f32[32,256], index: 5, kind: input, shape index: {}]   ;;  %s14901_s6 = inlined_call_operand.vmem [shape: f32[2,96,32], index: 6, kind: input, shape index: {}]   ;;  %s14902_s7 = inlined_call_operand.vmem [shape: f32[2,96,1], index: 7, kind: input, shape index: {}]   ;;  %s14903_s8 = inlined_call_operand.vmem [shape: f32[2,32,32], index: 8, kind: input, shape index: {}]   ;;  %s14904_s9 = inlined_call_operand.vmem [shape: f32[2,32,1], index: 9, kind: input, shape index: {}]   ;;  %s14905_s10 = inlined_call_operand.vmem [shape: f32[2,64,64], index: 10, kind: input, shape index: {}]   ;;  %s14906_s11 = inlined_call_operand.vmem [shape: f32[2,64,1], index: 11, kind: input, shape index: {}]   ;;  %s14907_s12 = inlined_call_operand.vmem [shape: f32[2,32,64], index: 12, kind: input, shape index: {}]   ;;  %s14908_s13 = inlined_call_operand.vmem [shape: f32[2,32,1], index: 13, kind: input, shape index: {}]   ;;  %s14909_s14 = inlined_call_operand.vmem [shape: f32[32,32], index: 14, kind: input, shape index: {}]   ;;  %s14910_s15 = inlined_call_operand.vmem [shape: f32[32,1], index: 15, kind: input, shape index: {}]   ;;  %s14911_s16 = inlined_call_operand.hbm [shape: f32[2,16,16], index: 16, kind: output, shape index: {0}]   ;;  %s14912_s17 = inlined_call_operand.vmem [shape: f32[2,16,1], index: 17, kind: output, shape index: {1}]   ;;  %s14913_s18 = inlined_call_operand.hbm [shape: f32[2,1,16], index: 18, kind: output, shape index: {2}]  }
   0x1   :  { %14998 = sst [smem:[#allocation51_spill]] %s14895_s0 }
   0x2   :  { %14999 = sst [smem:[#allocation52_spill]] %s14896_s1 }
   0x3   :  { %15000 = sst [smem:[#allocation53_spill]] %s14897_s2 }
   0x4   :  { %24 = vsyncpa [#allocation3], 0  ;;  %s15001_s29 = sld [smem:[#allocation51_spill]] }
   0xa   :  { %v11467_v0 = vld [vmem:[%s15001_s29] sm:$0x7] }
   0xb   :  { %25 = vsyncpa [#allocation5], 0  ;;  %128 = vxpose.xlu0.b32.start.end [1/1] (short) (narrow) %v11467_v0, 64  ;;  %vm14920_vm0 = vcmask 1042432   ;;  %vm160_vm1 = vcmask 23552   ;;  %v294_v9 = vmul.f32 %v11467_v0, %v11467_v0  ;;  %vm295_vm2 = vcmask 518144  }
   0xc   :  { %9513 = vmatprep.subr.msk.mxu1 %vm14920_vm0, %v11467_v0  ;;  %v58_v13 = vlaneseq  ;;  %v15006_v28 = vmov 0  ;;  %vm14984_vm4 = vcmask 523264   ;;  %v15009_v31 = vmov 0  ;;  %s15038_s19 = sld [smem:[#allocation52_spill]]  ;;  %s15040_s26 = sld [smem:[#allocation53_spill]] }
   0xd   :  { %9514 = vmatpush3.msk.msra.mxu1 %vm14920_vm0, %v11467_v0  ;;  %v296_v10 = vsel %vm295_vm2, %v294_v9, 0.0  ;;  %v15014_v44 = vmov 0  ;;  %v15017_v48 = vmov 0  ;;  %v15022_v60 = vmov 0  ;;  %s11359_s1 = smov 112   ;;  %s11364_s20 = smov [#allocation4]  }
   0xe   :  { %v297_v11 = vrot.slane %v296_v10, 4  ;;  %v59_v15 = vshrl.u32 %v58_v13, 7  ;;  %v11484_v18 = vand.u32 127, %v58_v13  ;;  %v15030_v13 = vmov 0 }
  0x10   :  { %v298_v12 = vadd.f32 %v297_v11, %v296_v10  ;;  %v60_v17 = vadd.s32 8, %v59_v15  ;;  %15002 = vst [vmem:[#allocation8_spill] sm:$0xff] %v11484_v18  ;;  %v11489_v21 = vshra.s32 %v11484_v18, 4  ;;  %v11493_v23 = vshra.s32 %v59_v15, 4 }
  0x11   :  { %v62_v29 = vadd.s32 24, %v59_v15  ;;  %v61_v33 = vadd.s32 16, %v59_v15  ;;  %v64_v45 = vadd.s32 40, %v59_v15  ;;  %v63_v49 = vadd.s32 32, %v59_v15 }
  0x12   :  { %v299_v14 = vrot.slane %v298_v12, 2  ;;  %v11486_v20 = vshra.s32 %v60_v17, 4  ;;  %15004 = vst [vmem:[#allocation10_spill] sm:$0xff] %v11489_v21  ;;  %15005 = vst [vmem:[#allocation11_spill] sm:$0xff] %v11493_v23  ;;  %vm11504_vm5 = vcmp.eq.s32.totalorder %v11493_v23, %v11489_v21  ;;  %v65_v62 = vadd.s32 48, %v59_v15 }
  0x13   :  { %v15010_v31 = vsel %vm11504_vm5, 4294967295, %v15009_v31  ;;  %v11519_v37 = vshra.s32 %v62_v29, 4  ;;  %v11523_v40 = vshra.s32 %v61_v33, 4  ;;  %v11545_v52 = vshra.s32 %v64_v45, 4 }
  0x14   :  { %v300_v16 = vadd.f32 %v299_v14, %v298_v12  ;;  %15003 = vst [vmem:[#allocation9_spill] sm:$0xff] %v11486_v20  ;;  %vm11497_vm3 = vcmp.eq.s32.totalorder %v11486_v20, %v11489_v21  ;;  %15011 = vst [vmem:[#allocation13_spill] sm:$0xff] %v15010_v31  ;;  %v11551_v55 = vshra.s32 %v63_v49, 4 }
  0x15   :  { %v15007_v28 = vsel %vm11497_vm3, 4294967295, %v15006_v28  ;;  %15012 = vst [vmem:[#allocation14_spill] sm:$0xff] %v11519_v37  ;;  %15013 = vst [vmem:[#allocation15_spill] sm:$0xff] %v11523_v40  ;;  %vm11527_vm6 = vcmp.eq.s32.totalorder %v11519_v37, %v11489_v21  ;;  %vm11535_vm7 = vcmp.eq.s32.totalorder %v11523_v40, %v11489_v21  ;;  %vm11557_vm8 = vcmp.eq.s32.totalorder %v11545_v52, %v11489_v21 }
  0x16   :  { %v301_v19 = vrot.slane %v300_v16, 1  ;;  %15008 = vst [vmem:[#allocation12_spill] sm:$0xff] %v15007_v28  ;;  %v15015_v44 = vsel %vm11527_vm6, 4294967295, %v15014_v44  ;;  %v15018_v48 = vsel %vm11535_vm7, 4294967295, %v15017_v48  ;;  %15020 = vst [vmem:[#allocation18_spill] sm:$0xff] %v11545_v52  ;;  %v15023_v60 = vsel %vm11557_vm8, 4294967295, %v15022_v60 }
  0x17   :  { %15016 = vst [vmem:[#allocation16_spill] sm:$0xff] %v15015_v44  ;;  %15019 = vst [vmem:[#allocation17_spill] sm:$0xff] %v15018_v48  ;;  %vm11565_vm9 = vcmp.eq.s32.totalorder %v11551_v55, %v11489_v21  ;;  %v15042_v37 = vmov 0.0|0.0  }
  0x18   :  { %v11491_v22 = vadd.f32 %v301_v19, %v300_v16  ;;  %15021 = vst [vmem:[#allocation19_spill] sm:$0xff] %v11551_v55  ;;  %15024 = vst [vmem:[#allocation20_spill] sm:$0xff] %v15023_v60  ;;  %v15033_v16 = vmov 0 }
  0x8b   :  { %v144_v1 = vpop.trf.xlu0 }
  0x8c   :  { %9515 = vmatprep.mubr.msk.f32.mxu1 %vm160_vm1, %v144_v1  ;;  %v15025_v1 = vmov 0 }
  0x8d   :  { %v15026_v1 = vsel %vm11565_vm9, 4294967295, %v15025_v1 }
  0x8e   :  { %15027 = vst [vmem:[#allocation21_spill] sm:$0xff] %v15026_v1 }
  0x8f   :  { %v145_v2 = vpop.trf.xlu0 }
  0x90   :  { %9516 = vmatmul.mubr.msk.f32.vlgmr.msra.gmra.mrb[0].mxu1 %vm160_vm1, %v145_v2 }
  0x93   :  { %v146_v3 = vpop.trf.xlu0 }
  0x94   :  { %9518 = vmatprep.mubr.msk.f32.mxu1 %vm160_vm1, %v146_v3  ;;  %v66_v3 = vadd.s32 56, %v59_v15 }
  0x96   :  { %v11581_v10 = vshra.s32 %v66_v3, 4  ;;  %v14927_v3 = vmov 0.0  }
  0x97   :  { %v147_v4 = vpop.trf.xlu0 }
  0x98   :  { %9519 = vmatmul.mubr.msk.f32.gmra.mrb[2].mxu1 %vm160_vm1, %v147_v4  ;;  %15029 = vst [vmem:[#allocation23_spill] sm:$0xff] %v11581_v10  ;;  %vm11595_vm11 = vcmp.eq.s32.totalorder %v11581_v10, %v11489_v21 }
  0x99   :  { %v15034_v16 = vsel %vm11595_vm11, 4294967295, %v15033_v16 }
  0x9a   :  { %15035 = vst [vmem:[#allocation25_spill] sm:$0xff] %v15034_v16 }
  0x9b   :  { %v148_v5 = vpop.trf.xlu0 }
  0x9c   :  { %9521 = vmatprep.mubr.msk.f32.mxu1 %vm160_vm1, %v148_v5 }
  0x9f   :  { %v149_v6 = vpop.trf.xlu0 }
  0xa0   :  { %9522 = vmatmul.mubr.msk.f32.gmra.mrb[4].mxu1 %vm160_vm1, %v149_v6  ;;  %v11579_v6 = vshra.s32 %v65_v62, 4 }
  0xa2   :  { %15028 = vst [vmem:[#allocation22_spill] sm:$0xff] %v11579_v6  ;;  %vm11587_vm10 = vcmp.eq.s32.totalorder %v11579_v6, %v11489_v21  ;;  %v12076_v21 = vld [vmem:[%s14898_s3 + $0x30] sm:$0xff] }
  0xa3   :  { %v150_v7 = vpop.trf.xlu0  ;;  %v15031_v13 = vsel %vm11587_vm10, 4294967295, %v15030_v13 }
  0xa4   :  { %9524 = vmatprep.mubr.msk.f32.mxu1 %vm160_vm1, %v150_v7  ;;  %15032 = vst [vmem:[#allocation24_spill] sm:$0xff] %v15031_v13 }
  0xa7   :  { %v151_v8 = vpop.trf.xlu0 }
  0xa8   :  { %9525 = vmatmul.mubr.msk.f32.gmra.mrb[6].mxu1 %vm160_vm1, %v151_v8 }
 0x163   :  { %v9517_v24 = vpop.f32.mrb[0].mxu1 }
 0x164   :  { %v304_v25 = vmul.f32 2.0, %v9517_v24  ;;  %v255_v26 = vpop.f32.mrb[1].mxu1 }
 0x165   :  { %v303_v27 = vmul.f32 2.0, %v255_v26 }
 0x166   :  { %v312_v30 = vsub.f32 %v304_v25, %v11491_v22  ;;  %v11612_v25 = vcvt.s32.f32 %v11484_v18 }
 0x167   :  { %v311_v32 = vsub.f32 %v303_v27, %v11491_v22 }
 0x168   :  { %v11511_v34 = vsel %vm11497_vm3, %v312_v30, -1e+30 }
 0x169   :  { %v363_v35 = vsel %vm14984_vm4, %v11511_v34, -inf  ;;  %v11517_v36 = vsel %vm11504_vm5, %v311_v32, -1e+30 }
 0x16a   :  { %364 = vmax.xlane.f32.xlu1 %v363_v35  ;;  %v360_v38 = vsel %vm14984_vm4, %v11517_v36, -inf }
 0x16b   :  { %v9520_v39 = vpop.f32.mrb[2].mxu1  ;;  %361 = vmax.xlane.f32.xlu0 %v360_v38 }
 0x16c   :  { %v306_v41 = vmul.f32 2.0, %v9520_v39  ;;  %v265_v42 = vpop.f32.mrb[3].mxu1 }
 0x16d   :  { %v305_v43 = vmul.f32 2.0, %v265_v42 }
 0x16e   :  { %v314_v46 = vsub.f32 %v306_v41, %v11491_v22 }
 0x16f   :  { %v313_v47 = vsub.f32 %v305_v43, %v11491_v22 }
 0x170   :  { %v11541_v50 = vsel %vm11527_vm6, %v314_v46, -1e+30 }
 0x171   :  { %v369_v51 = vsel %vm14984_vm4, %v11541_v50, -inf  ;;  %v11549_v53 = vsel %vm11535_vm7, %v313_v47, -1e+30 }
 0x172   :  { %370 = vmax.xlane.f32.xlu1 %v369_v51  ;;  %v366_v59 = vsel %vm14984_vm4, %v11549_v53, -inf }
 0x173   :  { %v9523_v54 = vpop.f32.mrb[4].mxu1 }
 0x174   :  { %v308_v56 = vmul.f32 2.0, %v9523_v54  ;;  %v275_v57 = vpop.f32.mrb[5].mxu1 }
 0x175   :  { %v307_v58 = vmul.f32 2.0, %v275_v57  ;;  %v14925_v57 = vmov 0.0|0.0  }
 0x176   :  { %v316_v61 = vsub.f32 %v308_v56, %v11491_v22  ;;  %367 = vmax.xlane.f32.xlu1 %v366_v59  ;;  %10411 = vmatprep.subr.bf16.mxu1 %v14925_v57 }
 0x177   :  { %v315_v63 = vsub.f32 %v307_v58, %v11491_v22 }
 0x178   :  { %v11571_v2 = vsel %vm11557_vm8, %v316_v61, -1e+30 }
 0x179   :  { %v375_v4 = vsel %vm14984_vm4, %v11571_v2, -inf  ;;  %v11577_v5 = vsel %vm11565_vm9, %v315_v63, -1e+30 }
 0x17a   :  { %376 = vmax.xlane.f32.xlu1 %v375_v4  ;;  %v372_v12 = vsel %vm14984_vm4, %v11577_v5, -inf }
 0x17b   :  { %v9526_v7 = vpop.f32.mrb[6].mxu1 }
 0x17c   :  { %v310_v8 = vmul.f32 2.0, %v9526_v7  ;;  %v285_v9 = vpop.f32.mrb[7].mxu1 }
 0x17d   :  { %v309_v11 = vmul.f32 2.0, %v285_v9 }
 0x17e   :  { %373 = vmax.xlane.f32.xlu1 %v372_v12  ;;  %v318_v14 = vsub.f32 %v310_v8, %v11491_v22 }
 0x17f   :  { %v317_v15 = vsub.f32 %v309_v11, %v11491_v22 }
 0x180   :  { %v11607_v24 = vsel %vm11595_vm11, %v318_v14, -1e+30 }
 0x181   :  { %v11601_v17 = vsel %vm11587_vm10, %v317_v15, -1e+30  ;;  %v381_v22 = vsel %vm14984_vm4, %v11607_v24, -inf  ;;  %v8903_v15 = vld [vmem:[%s14903_s8 + $0x28] sm:$0xff] }
 0x182   :  { %v378_v19 = vsel %vm14984_vm4, %v11601_v17, -inf }
 0x183   :  { %379 = vmax.xlane.f32.xlu1 %v378_v19 }
 0x187   :  { %382 = vmax.xlane.f32.xlu1 %v381_v22 }
 0x1f7   :  { %v365_v26 = vpop.xlane.xlu1 %364 }
 0x1f8   :  { %vm385_vm12 = vcmp.eq.f32.partialorder %v11511_v34, %v365_v26  ;;  %v362_v27 = vpop.xlane.xlu0 %361 }
 0x1f9   :  { %vm384_vm13 = vcmp.eq.f32.partialorder %v11517_v36, %v362_v27  ;;  %v393_v29 = vsel %vm385_vm12, %v11612_v25, 64.0 }
 0x1fa   :  { %v403_v30 = vsel %vm14984_vm4, %v393_v29, inf  ;;  %v392_v32 = vsel %vm384_vm13, %v11612_v25, 64.0 }
 0x1fb   :  { %404 = vmin.xlane.f32.xlu1 %v403_v30  ;;  %v400_v33 = vsel %vm14984_vm4, %v392_v32, inf }
 0x1ff   :  { %401 = vmin.xlane.f32.xlu1 %v400_v33  ;;  %v371_v35 = vpop.xlane.xlu1 %370 }
 0x200   :  { %vm387_vm14 = vcmp.eq.f32.partialorder %v11541_v50, %v371_v35 }
 0x201   :  { %v395_v38 = vsel %vm387_vm14, %v11612_v25, 64.0  ;;  %vm14917_vm14 = vmmov 0  }
 0x202   :  { %v409_v39 = vsel %vm14984_vm4, %v395_v38, inf  ;;  %9543 = vmatprep.mubr.msk.f32.mxu1 %vm14917_vm14, %v14927_v3 }
 0x203   :  { %410 = vmin.xlane.f32.xlu1 %v409_v39  ;;  %v368_v41 = vpop.xlane.xlu1 %367 }
 0x204   :  { %vm386_vm15 = vcmp.eq.f32.partialorder %v11549_v53, %v368_v41 }
 0x205   :  { %v394_v42 = vsel %vm386_vm15, %v11612_v25, 64.0 }
 0x206   :  { %v406_v43 = vsel %vm14984_vm4, %v394_v42, inf }
 0x207   :  { %407 = vmin.xlane.f32.xlu1 %v406_v43  ;;  %v377_v45 = vpop.xlane.xlu1 %376 }
 0x208   :  { %vm389_vm1 = vcmp.eq.f32.partialorder %v11571_v2, %v377_v45 }
 0x209   :  { %v397_v46 = vsel %vm389_vm1, %v11612_v25, 64.0 }
 0x20a   :  { %v415_v47 = vsel %vm14984_vm4, %v397_v46, inf }
 0x20b   :  { %416 = vmin.xlane.f32.xlu1 %v415_v47  ;;  %v374_v49 = vpop.xlane.xlu1 %373 }
 0x20c   :  { %vm388_vm2 = vcmp.eq.f32.partialorder %v11577_v5, %v374_v49 }
 0x20d   :  { %v396_v51 = vsel %vm388_vm2, %v11612_v25, 64.0  ;;  %vm11655_vm2 = vmpackc.low %vm14984_vm4, %vm14984_vm4 }
 0x20e   :  { %v412_v54 = vsel %vm14984_vm4, %v396_v51, inf }
 0x20f   :  { %413 = vmin.xlane.f32.xlu1 %v412_v54 }
 0x210   :  { %v380_v56 = vpop.xlane.xlu1 %379 }
 0x211   :  { %vm390_vm12 = vcmp.eq.f32.partialorder %v11601_v17, %v380_v56 }
 0x212   :  { %v398_v58 = vsel %vm390_vm12, %v11612_v25, 64.0 }
 0x213   :  { %v418_v59 = vsel %vm14984_vm4, %v398_v58, inf }
 0x214   :  { %419 = vmin.xlane.f32.xlu1 %v418_v59  ;;  %v383_v61 = vpop.xlane.xlu1 %382 }
 0x215   :  { %vm391_vm13 = vcmp.eq.f32.partialorder %v11607_v24, %v383_v61 }
 0x216   :  { %v399_v62 = vsel %vm391_vm13, %v11612_v25, 64.0 }
 0x217   :  { %v421_v63 = vsel %vm14984_vm4, %v399_v62, inf }
 0x218   :  { %422 = vmin.xlane.f32.xlu1 %v421_v63 }
 0x288   :  { %v405_v4 = vpop.xlane.xlu1 %404 }
 0x289   :  { %vm425_vm15 = vcmp.eq.f32.partialorder %v11612_v25, %v405_v4 }
 0x28a   :  { %v11643_v7 = vsel %vm425_vm15, -1e+30, %v11511_v34  ;;  %v8503_v11 = vsel %vm425_vm15, 1.0, %v14927_v3 }
 0x28b   :  { %v1112_v8 = vsel %vm14984_vm4, %v11643_v7, -inf }
 0x28c   :  { %1113 = vmax.xlane.f32.xlu1 %v1112_v8  ;;  %v402_v9 = vpop.xlane.xlu1 %401 }
 0x28d   :  { %vm424_vm1 = vcmp.eq.f32.partialorder %v11612_v25, %v402_v9 }
 0x28e   :  { %v8502_v12 = vsel %vm424_vm1, 1.0, %v14927_v3  ;;  %v11651_v14 = vsel %vm424_vm1, -1e+30, %v11517_v36 }
 0x28f   :  { %v10412_v34 = vpack.c.bf16 %v8503_v11, %v8502_v12  ;;  %v1109_v19 = vsel %vm14984_vm4, %v11651_v14, -inf }
 0x290   :  { %1110 = vmax.xlane.f32.xlu1 %v1109_v19  ;;  %v411_v22 = vpop.xlane.xlu1 %410 }
 0x291   :  { %10414 = vmatpush3.bf16.xpose.msk.msra.mxu1 %vm11655_vm2, %v10412_v34  ;;  %vm427_vm12 = vcmp.eq.f32.partialorder %v11612_v25, %v411_v22 }
 0x292   :  { %10415 = vmatprep.subr.bf16.mxu1 %v14925_v57  ;;  %v8505_v26 = vsel %vm427_vm12, 1.0, %v14927_v3  ;;  %v11674_v35 = vsel %vm427_vm12, -1e+30, %v11541_v50 }
 0x294   :  { %v408_v36 = vpop.xlane.xlu1 %407 }
 0x295   :  { %vm426_vm13 = vcmp.eq.f32.partialorder %v11612_v25, %v408_v36 }
 0x296   :  { %v8504_v27 = vsel %vm426_vm13, 1.0, %v14927_v3  ;;  %v11669_v29 = vsel %vm426_vm13, -1e+30, %v11549_v53  ;;  %v1118_v53 = vsel %vm14984_vm4, %v11674_v35, -inf }
 0x297   :  { %v10416_v30 = vpack.c.bf16 %v8505_v26, %v8504_v27  ;;  %v1115_v32 = vsel %vm14984_vm4, %v11669_v29, -inf }
 0x298   :  { %1116 = vmax.xlane.f32.xlu1 %v1115_v32  ;;  %v417_v33 = vpop.xlane.xlu1 %416 }
 0x299   :  { %vm429_vm15 = vcmp.eq.f32.partialorder %v11612_v25, %v417_v33  ;;  %10418 = vmatpush3.bf16.xpose.msk.msra.mxu1 %vm11655_vm2, %v10416_v30 }
 0x29a   :  { %v11680_v38 = vsel %vm429_vm15, -1e+30, %v11571_v2  ;;  %10419 = vmatprep.subr.bf16.mxu1 %v14925_v57  ;;  %v8507_v41 = vsel %vm429_vm15, 1.0, %v14927_v3  ;;  %vm14985_vm15 = vcmask 48128  }
 0x29b   :  { %v1124_v39 = vsel %vm14984_vm4, %v11680_v38, -inf }
 0x29c   :  { %1119 = vmax.xlane.f32.xlu1 %v1118_v53  ;;  %1125 = vmax.xlane.f32.xlu0 %v1124_v39  ;;  %v414_v50 = vpop.xlane.xlu1 %413 }
 0x29d   :  { %vm428_vm1 = vcmp.eq.f32.partialorder %v11612_v25, %v414_v50 }
 0x29e   :  { %v8506_v42 = vsel %vm428_vm1, 1.0, %v14927_v3  ;;  %v11691_v2 = vsel %vm428_vm1, -1e+30, %v11577_v5 }
 0x29f   :  { %v10420_v43 = vpack.c.bf16 %v8507_v41, %v8506_v42  ;;  %v1121_v45 = vsel %vm14984_vm4, %v11691_v2, -inf }
 0x2a0   :  { %1122 = vmax.xlane.f32.xlu1 %v1121_v45  ;;  %v11748_v45 = vrot.slane %v11467_v0, 5 }
 0x2a1   :  { %10422 = vmatpush3.bf16.xpose.msk.msra.mxu1 %vm11655_vm2, %v10420_v43  ;;  %v420_v46 = vpop.xlane.xlu1 %419 }
 0x2a2   :  { %vm430_vm12 = vcmp.eq.f32.partialorder %v11612_v25, %v420_v46  ;;  %10423 = vmatprep.subr.bf16.mxu1 %v14925_v57  ;;  %15039 = vst [vmem:[#allocation26_spill] sm:$0xff] %v11748_v45 }
 0x2a3   :  { %v11700_v47 = vsel %vm430_vm12, -1e+30, %v11601_v17  ;;  %v8508_v51 = vsel %vm430_vm12, 1.0, %v14927_v3  ;;  %v11719_v17 = vld [vmem:[%s15038_s19] sm:$0xff] }
 0x2a4   :  { %v1127_v5 = vsel %vm14984_vm4, %v11700_v47, -inf  ;;  %9548 = vmatprep.mubr.msk.f32.mxu0 %vm14985_vm15, %v11719_v17 }
 0x2a5   :  { %1128 = vmax.xlane.f32.xlu1 %v1127_v5  ;;  %v423_v49 = vpop.xlane.xlu1 %422 }
 0x2a6   :  { %vm431_vm13 = vcmp.eq.f32.partialorder %v11612_v25, %v423_v49 }
 0x2a7   :  { %v8509_v54 = vsel %vm431_vm13, 1.0, %v14927_v3  ;;  %v11708_v56 = vsel %vm431_vm13, -1e+30, %v11607_v24 }
 0x2a8   :  { %v10424_v58 = vpack.c.bf16 %v8509_v54, %v8508_v51  ;;  %v1130_v59 = vsel %vm14984_vm4, %v11708_v56, -inf  ;;  %v11755_v51 = vld [vmem:[%s15038_s19 + $0x8] sm:$0xff]  ;;  %v11761_v54 = vld [vmem:[%s15038_s19 + $0x10] sm:$0xff] }
 0x2a9   :  { %1131 = vmax.xlane.f32.xlu0 %v1130_v59 }
 0x2aa   :  { %10426 = vmatpush3.bf16.xpose.msk.msra.mxu1 %vm11655_vm2, %v10424_v58  ;;  %v11771_v58 = vld [vmem:[%s15038_s19 + $0x18] sm:$0xff] }
 0x2b1   :  { %9544 = vmatmul.mubr.msk.f32.vlgmr.msra.gmra.mrb[8].mxu1 %vm14984_vm4, %v11467_v0 }
 0x319   :  { %v1114_v24 = vpop.xlane.xlu1 %1113 }
 0x31a   :  { %vm1134_vm1 = vcmp.eq.f32.partialorder %v11643_v7, %v1114_v24 }
 0x31b   :  { %v1142_v61 = vsel %vm1134_vm1, %v11612_v25, 64.0 }
 0x31c   :  { %v1152_v62 = vsel %vm14984_vm4, %v1142_v61, inf }
 0x31d   :  { %1153 = vmin.xlane.f32.xlu0 %v1152_v62  ;;  %v1111_v63 = vpop.xlane.xlu1 %1110 }
 0x31e   :  { %vm1133_vm12 = vcmp.eq.f32.partialorder %v11651_v14, %v1111_v63 }
 0x31f   :  { %v1141_v4 = vsel %vm1133_vm12, %v11612_v25, 64.0 }
 0x320   :  { %v1149_v8 = vsel %vm14984_vm4, %v1141_v4, inf }
 0x321   :  { %1150 = vmin.xlane.f32.xlu1 %v1149_v8 }
 0x325   :  { %v1117_v9 = vpop.xlane.xlu1 %1116 }
 0x326   :  { %vm1135_vm13 = vcmp.eq.f32.partialorder %v11669_v29, %v1117_v9 }
 0x327   :  { %v1143_v11 = vsel %vm1135_vm13, %v11612_v25, 64.0 }
 0x328   :  { %v1155_v12 = vsel %vm14984_vm4, %v1143_v11, inf }
 0x329   :  { %v1126_v34 = vpop.xlane.xlu0 %1125  ;;  %1156 = vmin.xlane.f32.xlu1 %v1155_v12  ;;  %v1120_v19 = vpop.xlane.xlu1 %1119 }
 0x32a   :  { %vm1138_vm1 = vcmp.eq.f32.partialorder %v11680_v38, %v1126_v34  ;;  %vm1136_vm14 = vcmp.eq.f32.partialorder %v11674_v35, %v1120_v19 }
 0x32b   :  { %v1144_v22 = vsel %vm1136_vm14, %v11612_v25, 64.0  ;;  %v1146_v27 = vsel %vm1138_vm1, %v11612_v25, 64.0  ;;  %vm14919_vm1 = vcmask 1045504  }
 0x32c   :  { %v1158_v36 = vsel %vm14984_vm4, %v1144_v22, inf  ;;  %v1164_v32 = vsel %vm14984_vm4, %v1146_v27, inf }
 0x32d   :  { %1159 = vmin.xlane.f32.xlu0 %v1158_v36  ;;  %v1123_v26 = vpop.xlane.xlu1 %1122 }
 0x32e   :  { %vm1137_vm12 = vcmp.eq.f32.partialorder %v11691_v2, %v1123_v26 }
 0x32f   :  { %v1145_v30 = vsel %vm1137_vm12, %v11612_v25, 64.0 }
 0x330   :  { %v1161_v33 = vsel %vm14984_vm4, %v1145_v30, inf }
 0x331   :  { %1165 = vmin.xlane.f32.xlu0 %v1164_v32  ;;  %1162 = vmin.xlane.f32.xlu1 %v1161_v33 }
 0x332   :  { %v1129_v53 = vpop.xlane.xlu1 %1128 }
 0x333   :  { %vm1139_vm13 = vcmp.eq.f32.partialorder %v11700_v47, %v1129_v53 }
 0x334   :  { %v1147_v39 = vsel %vm1139_vm13, %v11612_v25, 64.0 }
 0x335   :  { %v1167_v50 = vsel %vm14984_vm4, %v1147_v39, inf }
 0x336   :  { %v1132_v41 = vpop.xlane.xlu0 %1131  ;;  %1168 = vmin.xlane.f32.xlu1 %v1167_v50 }
 0x337   :  { %vm1140_vm14 = vcmp.eq.f32.partialorder %v11708_v56, %v1132_v41 }
 0x338   :  { %v1148_v42 = vsel %vm1140_vm14, %v11612_v25, 64.0 }
 0x339   :  { %v1170_v43 = vsel %vm14984_vm4, %v1148_v42, inf }
 0x33a   :  { %1171 = vmin.xlane.f32.xlu0 %v1170_v43 }
 0x384   :  { %v540_v46 = vpop.f32.mrb[8].mxu1 }
 0x385   :  { %v9545_v5 = vpop.f32.mrb[9].mxu1  ;;  %v546_v49 = vsel %vm14920_vm0, %v540_v46, %v11748_v45 }
 0x386   :  { %9546 = vmatprep.subr.msk.mxu0 %vm14919_vm1, %v546_v49 }
 0x387   :  { %9547 = vmatpush3.msk.msra.mxu0 %vm14919_vm1, %v546_v49 }
 0x388   :  { %9549 = vmatmul.mubr.msk.f32.vlgmr.msra.gmra.mrb[0].mxu0 %vm14985_vm15, %v11755_v51 }
 0x389   :  { %9551 = vmatprep.mubr.msk.f32.mxu0 %vm14985_vm15, %v11761_v54 }
 0x38c   :  { %9552 = vmatmul.mubr.msk.f32.gmra.mrb[2].mxu0 %vm14985_vm15, %v11771_v58 }
 0x3aa   :  { %v1154_v59 = vpop.xlane.xlu0 %1153 }
 0x3ab   :  { %vm1174_vm12 = vcmp.eq.f32.partialorder %v11612_v25, %v1154_v59 }
 0x3ac   :  { %v11777_v24 = vsel %vm1174_vm12, -1e+30, %v11643_v7  ;;  %v11783_v63 = vsel %vm1174_vm12, 1.0, %v14927_v3 }
 0x3ad   :  { %v1790_v61 = vsel %vm14984_vm4, %v11777_v24, -inf }
 0x3ae   :  { %1791 = vmax.xlane.f32.xlu0 %v1790_v61  ;;  %v1151_v62 = vpop.xlane.xlu1 %1150  ;;  %v11858_v61 = vld [vmem:[%s15040_s26] sm:$0xff] }
 0x3af   :  { %vm1173_vm13 = vcmp.eq.f32.partialorder %v11612_v25, %v1151_v62 }
 0x3b0   :  { %v11786_v4 = vsel %vm1173_vm13, 1.0, %v14927_v3  ;;  %v11789_v8 = vsel %vm1173_vm13, -1e+30, %v11651_v14 }
 0x3b1   :  { %v1787_v9 = vsel %vm14984_vm4, %v11789_v8, -inf }
 0x3b2   :  { %1788 = vmax.xlane.f32.xlu1 %v1787_v9 }
 0x3b6   :  { %v1157_v11 = vpop.xlane.xlu1 %1156 }
 0x3b7   :  { %vm1175_vm14 = vcmp.eq.f32.partialorder %v11612_v25, %v1157_v11 }
 0x3b8   :  { %v11797_v12 = vsel %vm1175_vm14, -1e+30, %v11669_v29  ;;  %v11803_v14 = vsel %vm1175_vm14, 1.0, %v14927_v3 }
 0x3b9   :  { %v1793_v34 = vsel %vm14984_vm4, %v11797_v12, -inf }
 0x3ba   :  { %v1160_v19 = vpop.xlane.xlu0 %1159  ;;  %1794 = vmax.xlane.f32.xlu1 %v1793_v34 }
 0x3bb   :  { %vm1176_vm12 = vcmp.eq.f32.partialorder %v11612_v25, %v1160_v19 }
 0x3bc   :  { %v11806_v22 = vsel %vm1176_vm12, 1.0, %v14927_v3  ;;  %v11809_v36 = vsel %vm1176_vm12, -1e+30, %v11674_v35 }
 0x3bd   :  { %v1796_v26 = vsel %vm14984_vm4, %v11809_v36, -inf }
 0x3be   :  { %1797 = vmax.xlane.f32.xlu0 %v1796_v26  ;;  %v1166_v27 = vpop.xlane.xlu0 %1165  ;;  %v1163_v30 = vpop.xlane.xlu1 %1162 }
 0x3bf   :  { %vm1178_vm13 = vcmp.eq.f32.partialorder %v11612_v25, %v1166_v27  ;;  %vm1177_vm14 = vcmp.eq.f32.partialorder %v11612_v25, %v1163_v30 }
 0x3c0   :  { %v11818_v32 = vsel %vm1178_vm13, 1.0, %v14927_v3  ;;  %v11821_v33 = vsel %vm1178_vm13, -1e+30, %v11680_v38  ;;  %v11824_v35 = vsel %vm1177_vm14, 1.0, %v14927_v3  ;;  %v11827_v53 = vsel %vm1177_vm14, -1e+30, %v11691_v2 }
 0x3c1   :  { %v1802_v50 = vsel %vm14984_vm4, %v11821_v33, -inf  ;;  %v1799_v41 = vsel %vm14984_vm4, %v11827_v53, -inf  ;;  %vm14955_vm14 = vcmask 261120   ;;  %v15046_v20 = vpack.c.bf16 %v11818_v32, %v11824_v35 }
 0x3c2   :  { %1803 = vmax.xlane.f32.xlu0 %v1802_v50  ;;  %1800 = vmax.xlane.f32.xlu1 %v1799_v41 }
 0x3c3   :  { %v1169_v42 = vpop.xlane.xlu1 %1168  ;;  %9562 = vmatprep.mubr.msk.f32.mxu1 %vm14955_vm14, %v11858_v61 }
 0x3c4   :  { %vm1179_vm12 = vcmp.eq.f32.partialorder %v11612_v25, %v1169_v42 }
 0x3c5   :  { %v11837_v38 = vsel %vm1179_vm12, -1e+30, %v11700_v47  ;;  %v11843_v46 = vsel %vm1179_vm12, 1.0, %v14927_v3 }
 0x3c6   :  { %v1805_v2 = vsel %vm14984_vm4, %v11837_v38, -inf }
 0x3c7   :  { %v1172_v43 = vpop.xlane.xlu0 %1171  ;;  %1806 = vmax.xlane.f32.xlu1 %v1805_v2 }
 0x3c8   :  { %vm1180_vm13 = vcmp.eq.f32.partialorder %v11612_v25, %v1172_v43 }
 0x3c9   :  { %v11846_v5 = vsel %vm1180_vm13, 1.0, %v14927_v3  ;;  %v11849_v49 = vsel %vm1180_vm13, -1e+30, %v11708_v56 }
 0x3ca   :  { %v1808_v59 = vsel %vm14984_vm4, %v11849_v49, -inf }
 0x3cb   :  { %1809 = vmax.xlane.f32.xlu0 %v1808_v59 }
 0x43b   :  { %v1792_v62 = vpop.xlane.xlu0 %1791 }
 0x43c   :  { %vm1812_vm12 = vcmp.eq.f32.partialorder %v11777_v24, %v1792_v62 }
 0x43d   :  { %v1820_v56 = vsel %vm1812_vm12, %v11612_v25, 64.0 }
 0x43e   :  { %v1830_v9 = vsel %vm14984_vm4, %v1820_v56, inf }
 0x43f   :  { %1831 = vmin.xlane.f32.xlu0 %v1830_v9  ;;  %v1789_v11 = vpop.xlane.xlu1 %1788 }
 0x440   :  { %vm1811_vm13 = vcmp.eq.f32.partialorder %v11789_v8, %v1789_v11 }
 0x441   :  { %v1819_v34 = vsel %vm1811_vm13, %v11612_v25, 64.0 }
 0x442   :  { %v1827_v19 = vsel %vm14984_vm4, %v1819_v34, inf }
 0x443   :  { %1828 = vmin.xlane.f32.xlu1 %v1827_v19 }
 0x447   :  { %v1795_v26 = vpop.xlane.xlu1 %1794 }
 0x448   :  { %vm1813_vm1 = vcmp.eq.f32.partialorder %v11797_v12, %v1795_v26 }
 0x449   :  { %v1821_v27 = vsel %vm1813_vm1, %v11612_v25, 64.0 }
 0x44a   :  { %v1833_v30 = vsel %vm14984_vm4, %v1821_v27, inf }
 0x44b   :  { %v1798_v50 = vpop.xlane.xlu0 %1797  ;;  %1834 = vmin.xlane.f32.xlu1 %v1833_v30 }
 0x44c   :  { %vm1814_vm12 = vcmp.eq.f32.partialorder %v11809_v36, %v1798_v50 }
 0x44d   :  { %v1822_v41 = vsel %vm1814_vm12, %v11612_v25, 64.0 }
 0x44e   :  { %v1836_v42 = vsel %vm14984_vm4, %v1822_v41, inf }
 0x44f   :  { %1837 = vmin.xlane.f32.xlu0 %v1836_v42  ;;  %v1804_v2 = vpop.xlane.xlu0 %1803  ;;  %v1801_v43 = vpop.xlane.xlu1 %1800 }
 0x450   :  { %vm1816_vm13 = vcmp.eq.f32.partialorder %v11821_v33, %v1804_v2  ;;  %vm1815_vm0 = vcmp.eq.f32.partialorder %v11827_v53, %v1801_v43 }
 0x451   :  { %v1824_v59 = vsel %vm1816_vm13, %v11612_v25, 64.0  ;;  %v1823_v62 = vsel %vm1815_vm0, %v11612_v25, 64.0 }
 0x452   :  { %v1842_v56 = vsel %vm14984_vm4, %v1824_v59, inf  ;;  %v1839_v9 = vsel %vm14984_vm4, %v1823_v62, inf }
 0x453   :  { %1843 = vmin.xlane.f32.xlu0 %v1842_v56  ;;  %1840 = vmin.xlane.f32.xlu1 %v1839_v9 }
 0x454   :  { %v1807_v11 = vpop.xlane.xlu1 %1806 }
 0x455   :  { %vm1817_vm1 = vcmp.eq.f32.partialorder %v11837_v38, %v1807_v11 }
 0x456   :  { %v1825_v34 = vsel %vm1817_vm1, %v11612_v25, 64.0 }
 0x457   :  { %v1845_v19 = vsel %vm14984_vm4, %v1825_v34, inf  ;;  %v11909_v34 = vld [vmem:[%s15040_s26 + $0x8] sm:$0xff] }
 0x458   :  { %v1810_v26 = vpop.xlane.xlu0 %1809  ;;  %1846 = vmin.xlane.f32.xlu1 %v1845_v19  ;;  %v11914_v19 = vld [vmem:[%s15040_s26 + $0x10] sm:$0xff] }
 0x459   :  { %vm1818_vm12 = vcmp.eq.f32.partialorder %v11849_v49, %v1810_v26  ;;  %v11923_v26 = vld [vmem:[%s15040_s26 + $0x18] sm:$0xff] }
 0x45a   :  { %v1826_v27 = vsel %vm1818_vm12, %v11612_v25, 64.0 }
 0x45b   :  { %v11885_v30 = vpop.f32.mrb[0].mxu0  ;;  %v1848_v50 = vsel %vm14984_vm4, %v1826_v27, inf  ;;  %v11930_v27 = vld [vmem:[%s14898_s3] sm:$0xff] }
 0x45c   :  { %v14924_v41 = vmax.f32 %v11885_v30, 0.0  ;;  %v11889_v42 = vpop.f32.mrb[1].mxu0  ;;  %1849 = vmin.xlane.f32.xlu0 %v1848_v50  ;;  %9576 = vmatprep.mubr.msk.f32.mxu0 %vm14955_vm14, %v11930_v27 }
 0x45d   :  { %v14923_v2 = vmax.f32 %v11889_v42, 0.0 }
 0x45f   :  { %v10427_v43 = vpack.c.bf16 %v14924_v41, %v14923_v2  ;;  %v11896_v59 = vpop.f32.mrb[2].mxu0 }
 0x460   :  { %v14922_v62 = vmax.f32 %v11896_v59, 0.0  ;;  %v11899_v56 = vpop.f32.mrb[3].mxu0 }
 0x461   :  { %v14921_v9 = vmax.f32 %v11899_v56, 0.0  ;;  %10428 = vmatprep.subr.bf16.mxu1 %v10427_v43 }
 0x462   :  { %10430 = vmatpush3.bf16.msra.mxu1 %v10427_v43 }
 0x463   :  { %v10431_v11 = vpack.c.bf16 %v14922_v62, %v14921_v9 }
 0x465   :  { %10432 = vmatprep.subr.bf16.mxu1 %v10431_v11 }
 0x466   :  { %10434 = vmatpush3.bf16.msra.mxu1 %v10431_v11 }
 0x469   :  { %9563 = vmatmul.mubr.msk.f32.vlgmr.msra.gmra.mrb[10].mxu1 %vm14955_vm14, %v11909_v34 }
 0x46a   :  { %9565 = vmatprep.mubr.msk.f32.mxu1 %vm14955_vm14, %v11914_v19 }
 0x46d   :  { %9566 = vmatmul.mubr.msk.f32.gmra.mrb[12].mxu1 %vm14955_vm14, %v11923_v26 }
 0x4cc   :  { %v1832_v50 = vpop.xlane.xlu0 %1831 }
 0x4cd   :  { %vm1852_vm0 = vcmp.eq.f32.partialorder %v11612_v25, %v1832_v50 }
 0x4ce   :  { %v11936_v43 = vsel %vm1852_vm0, -1e+30, %v11777_v24  ;;  %v11942_v62 = vsel %vm1852_vm0, 1.0, %v14927_v3 }
 0x4cf   :  { %v2468_v11 = vsel %vm14984_vm4, %v11936_v43, -inf }
 0x4d0   :  { %2469 = vmax.xlane.f32.xlu0 %v2468_v11  ;;  %v1829_v9 = vpop.xlane.xlu1 %1828 }
 0x4d1   :  { %vm1851_vm13 = vcmp.eq.f32.partialorder %v11612_v25, %v1829_v9 }
 0x4d2   :  { %v11945_v2 = vsel %vm1851_vm13, 1.0, %v14927_v3  ;;  %v11948_v41 = vsel %vm1851_vm13, -1e+30, %v11789_v8 }
 0x4d3   :  { %v2465_v50 = vsel %vm14984_vm4, %v11948_v41, -inf }
 0x4d4   :  { %2466 = vmax.xlane.f32.xlu1 %v2465_v50 }
 0x4d8   :  { %v1835_v11 = vpop.xlane.xlu1 %1834 }
 0x4d9   :  { %vm1853_vm1 = vcmp.eq.f32.partialorder %v11612_v25, %v1835_v11 }
 0x4da   :  { %v11956_v9 = vsel %vm1853_vm1, -1e+30, %v11797_v12  ;;  %v11962_v8 = vsel %vm1853_vm1, 1.0, %v14927_v3 }
 0x4db   :  { %v2471_v47 = vsel %vm14984_vm4, %v11956_v9, -inf }
 0x4dc   :  { %v1838_v39 = vpop.xlane.xlu0 %1837  ;;  %2472 = vmax.xlane.f32.xlu1 %v2471_v47 }
 0x4dd   :  { %vm1854_vm12 = vcmp.eq.f32.partialorder %v11612_v25, %v1838_v39 }
 0x4de   :  { %v11965_v24 = vsel %vm1854_vm12, 1.0, %v14927_v3  ;;  %v11968_v50 = vsel %vm1854_vm12, -1e+30, %v11809_v36 }
 0x4df   :  { %v2474_v11 = vsel %vm14984_vm4, %v11968_v50, -inf }
 0x4e0   :  { %2475 = vmax.xlane.f32.xlu0 %v2474_v11  ;;  %v1844_v29 = vpop.xlane.xlu0 %1843  ;;  %v1841_v47 = vpop.xlane.xlu1 %1840  ;;  %v15041_v11 = vmov 0.0  }
 0x4e1   :  { %vm1856_vm0 = vcmp.eq.f32.partialorder %v11612_v25, %v1844_v29  ;;  %vm1855_vm13 = vcmp.eq.f32.partialorder %v11612_v25, %v1841_v47 }
 0x4e2   :  { %v11977_v39 = vsel %vm1856_vm0, 1.0, %v14927_v3  ;;  %v11980_v7 = vsel %vm1855_vm13, 1.0, %v14927_v3  ;;  %v11983_v36 = vsel %vm1856_vm0, -1e+30, %v11821_v33  ;;  %v11986_v12 = vsel %vm1855_vm13, -1e+30, %v11827_v53 }
 0x4e3   :  { %v2480_v29 = vsel %vm14984_vm4, %v11983_v36, -inf  ;;  %v2477_v47 = vsel %vm14984_vm4, %v11986_v12, -inf  ;;  %vm15044_vm0 = vmmov 0  }
 0x4e4   :  { %2481 = vmax.xlane.f32.xlu0 %v2480_v29  ;;  %2478 = vmax.xlane.f32.xlu1 %v2477_v47 }
 0x4e5   :  { %v1847_v57 = vpop.xlane.xlu1 %1846 }
 0x4e6   :  { %vm1857_vm1 = vcmp.eq.f32.partialorder %v11612_v25, %v1847_v57 }
 0x4e7   :  { %v11996_v33 = vsel %vm1857_vm1, -1e+30, %v11837_v38  ;;  %v12002_v18 = vsel %vm1857_vm1, 1.0, %v15041_v11 }
 0x4e8   :  { %v2483_v53 = vsel %vm14984_vm4, %v11996_v33, -inf }
 0x4e9   :  { %v1850_v3 = vpop.xlane.xlu0 %1849  ;;  %2484 = vmax.xlane.f32.xlu1 %v2483_v53 }
 0x4ea   :  { %vm1858_vm12 = vcmp.eq.f32.partialorder %v11612_v25, %v1850_v3 }
 0x4eb   :  { %v12005_v6 = vsel %vm1858_vm12, 1.0, %v15041_v11  ;;  %v12008_v29 = vsel %vm1858_vm12, -1e+30, %v11849_v49 }
 0x4ec   :  { %v2486_v38 = vsel %vm14984_vm4, %v12008_v29, -inf }
 0x4ed   :  { %2487 = vmax.xlane.f32.xlu0 %v2486_v38 }
 0x53c   :  { %v12014_v47 = vpop.f32.mrb[10].mxu1 }
 0x53d   :  { %v14942_v3 = vmax.f32 %v12014_v47, 0.0  ;;  %v12017_v53 = vpop.f32.mrb[11].mxu1 }
 0x53e   :  { %v14941_v10 = vmax.f32 %v12017_v53, 0.0 }
 0x540   :  { %v10435_v49 = vpack.c.bf16 %v14942_v3, %v14941_v10  ;;  %v12024_v55 = vpop.f32.mrb[12].mxu1  ;;  %v12037_v10 = vld [vmem:[%s14898_s3 + $0x8] sm:$0xff]  ;;  %v12042_v3 = vld [vmem:[%s14898_s3 + $0x10] sm:$0xff] }
 0x541   :  { %v14946_v57 = vmax.f32 %v12024_v55, 0.0  ;;  %v12027_v52 = vpop.f32.mrb[13].mxu1 }
 0x542   :  { %v14945_v38 = vmax.f32 %v12027_v52, 0.0  ;;  %10436 = vmatprep.subr.bf16.mxu0 %v10435_v49 }
 0x543   :  { %10438 = vmatpush3.bf16.msra.mxu0 %v10435_v49  ;;  %v12057_v49 = vld [vmem:[%s14898_s3 + $0x20] sm:$0xff] }
 0x544   :  { %v10439_v40 = vpack.c.bf16 %v14946_v57, %v14945_v38  ;;  %v12066_v38 = vld [vmem:[%s14898_s3 + $0x28] sm:$0xff]  ;;  %v15043_v57 = vpack.c.bf16 %v11783_v63, %v11786_v4  ;;  %v12086_v63 = vld [vmem:[%s14898_s3 + $0x38] sm:$0xff]  ;;  %v15045_v4 = vpack.c.bf16 %v11806_v22, %v11803_v14 }
 0x546   :  { %10440 = vmatprep.subr.bf16.mxu0 %v10439_v40 }
 0x547   :  { %10442 = vmatpush3.bf16.msra.mxu0 %v10439_v40  ;;  %v12052_v40 = vld [vmem:[%s14898_s3 + $0x18] sm:$0xff] }
 0x548   :  { %10459 = vmatprep.subr.bf16.mxu0 %v15042_v37 }
 0x54a   :  { %9577 = vmatmul.mubr.msk.f32.vlgmr.msra.gmra.mrb[4].mxu0 %vm14955_vm14, %v12037_v10 }
 0x54b   :  { %9579 = vmatprep.mubr.msk.f32.mxu0 %vm14955_vm14, %v12042_v3 }
 0x54e   :  { %9580 = vmatmul.mubr.msk.f32.gmra.mrb[6].mxu0 %vm14955_vm14, %v12052_v40 }
 0x54f   :  { %9582 = vmatprep.mubr.msk.f32.mxu0 %vm14955_vm14, %v12057_v49 }
 0x550   :  { %10462 = vmatpush3.bf16.xpose.msk.msra.mxu0 %vm11655_vm2, %v15043_v57 }
 0x551   :  { %10463 = vmatprep.subr.bf16.mxu0 %v15042_v37 }
 0x552   :  { %9583 = vmatmul.mubr.msk.f32.gmra.mrb[8].mxu0 %vm14955_vm14, %v12066_v38 }
 0x553   :  { %9585 = vmatprep.mubr.msk.f32.mxu0 %vm14955_vm14, %v12076_v21 }
 0x556   :  { %9586 = vmatmul.mubr.msk.f32.gmra.mrb[10].mxu0 %vm14955_vm14, %v12086_v63 }
 0x557   :  { %9644 = vmatprep.mubr.msk.f32.mxu0 %vm15044_vm0, %v15041_v11 }
 0x558   :  { %10466 = vmatpush3.bf16.xpose.msk.msra.mxu0 %vm11655_vm2, %v15045_v4  ;;  %v15047_v4 = vpack.c.bf16 %v11846_v5, %v11843_v46 }
 0x559   :  { %10467 = vmatprep.subr.bf16.mxu0 %v15042_v37 }
 0x55d   :  { %v2470_v57 = vpop.xlane.xlu0 %2469 }
 0x55e   :  { %vm2490_vm13 = vcmp.eq.f32.partialorder %v11936_v43, %v2470_v57 }
 0x55f   :  { %v2498_v23 = vsel %vm2490_vm13, %v11612_v25, 64.0 }
 0x560   :  { %10470 = vmatpush3.bf16.xpose.msk.msra.mxu0 %vm11655_vm2, %v15046_v20  ;;  %v2508_v13 = vsel %vm14984_vm4, %v2498_v23, inf }
 0x561   :  { %2509 = vmin.xlane.f32.xlu0 %v2508_v13  ;;  %v2467_v14 = vpop.xlane.xlu1 %2466  ;;  %10471 = vmatprep.subr.bf16.mxu0 %v15042_v37 }
 0x562   :  { %vm2489_vm1 = vcmp.eq.f32.partialorder %v11948_v41, %v2467_v14 }
 0x563   :  { %v2497_v22 = vsel %vm2489_vm1, %v11612_v25, 64.0 }
 0x564   :  { %v2505_v43 = vsel %vm14984_vm4, %v2497_v22, inf }
 0x565   :  { %2506 = vmin.xlane.f32.xlu1 %v2505_v43 }
 0x568   :  { %10474 = vmatpush3.bf16.xpose.msk.msra.mxu0 %vm11655_vm2, %v15047_v4 }
 0x569   :  { %v2473_v20 = vpop.xlane.xlu1 %2472 }
 0x56a   :  { %vm2491_vm12 = vcmp.eq.f32.partialorder %v11956_v9, %v2473_v20  ;;  %v12140_v20 = vld [vmem:[%s14899_s4] sm:$0xff] }
 0x56b   :  { %v2499_v23 = vsel %vm2491_vm12, %v11612_v25, 64.0  ;;  %9604 = vmatprep.mubr.msk.f32.mxu1 %vm14984_vm4, %v12140_v20 }
 0x56c   :  { %v2511_v13 = vsel %vm14984_vm4, %v2499_v23, inf }
 0x56d   :  { %v2476_v32 = vpop.xlane.xlu0 %2475  ;;  %2512 = vmin.xlane.f32.xlu1 %v2511_v13 }
 0x56e   :  { %vm2492_vm13 = vcmp.eq.f32.partialorder %v11968_v50, %v2476_v32 }
 0x56f   :  { %9645 = vmatmul.mubr.msk.f32.vlgmr.msra.gmra.mrb[12].mxu0 %vm14984_vm4, %v11467_v0  ;;  %v2500_v35 = vsel %vm2492_vm13, %v11612_v25, 64.0 }
 0x570   :  { %v2514_v46 = vsel %vm14984_vm4, %v2500_v35, inf  ;;  %9649 = vmatprep.mubr.msk.f32.mxu0 %vm14985_vm15, %v11719_v17 }
 0x571   :  { %2515 = vmin.xlane.f32.xlu0 %v2514_v46  ;;  %v2482_v5 = vpop.xlane.xlu0 %2481  ;;  %v2479_v41 = vpop.xlane.xlu1 %2478 }
 0x572   :  { %vm2494_vm1 = vcmp.eq.f32.partialorder %v11983_v36, %v2482_v5  ;;  %vm2493_vm12 = vcmp.eq.f32.partialorder %v11986_v12, %v2479_v41 }
 0x573   :  { %v2502_v9 = vsel %vm2494_vm1, %v11612_v25, 64.0  ;;  %v2501_v50 = vsel %vm2493_vm12, %v11612_v25, 64.0  ;;  %vm15059_vm1 = vcmask 1045504  }
 0x574   :  { %v2520_v0 = vsel %vm14984_vm4, %v2502_v9, inf  ;;  %v2517_v57 = vsel %vm14984_vm4, %v2501_v50, inf  ;;  %vm15060_vm12 = vmmov %vm15059_vm1 }
 0x575   :  { %2521 = vmin.xlane.f32.xlu0 %v2520_v0  ;;  %2518 = vmin.xlane.f32.xlu1 %v2517_v57 }
 0x576   :  { %v2485_v14 = vpop.xlane.xlu1 %2484 }
 0x577   :  { %vm2495_vm13 = vcmp.eq.f32.partialorder %v11996_v33, %v2485_v14 }
 0x578   :  { %v2503_v22 = vsel %vm2495_vm13, %v11612_v25, 64.0  ;;  %vm15062_vm13 = vcmask 261120  }
 0x579   :  { %v2523_v43 = vsel %vm14984_vm4, %v2503_v22, inf }
 0x57a   :  { %v2488_v36 = vpop.xlane.xlu0 %2487  ;;  %2524 = vmin.xlane.f32.xlu1 %v2523_v43 }
 0x57b   :  { %vm2496_vm14 = vcmp.eq.f32.partialorder %v12008_v29, %v2488_v36 }
 0x57c   :  { %v2504_v12 = vsel %vm2496_vm14, %v11612_v25, 64.0  ;;  %vm15058_vm14 = vcmask 1042432  }
 0x57d   :  { %v2526_v4 = vsel %vm14984_vm4, %v2504_v12, inf }
 0x57e   :  { %2527 = vmin.xlane.f32.xlu0 %v2526_v4 }
 0x61d   :  { %v12144_v33 = vpop.f32.mrb[4].mxu0 }
 0x61e   :  { %15048 = vst [vmem:[#allocation27_spill] sm:$0xff] %v12144_v33  ;;  %v14963_v23 = vmax.f32 %v12144_v33, 0.0  ;;  %v12147_v13 = vpop.f32.mrb[5].mxu0 }
 0x61f   :  { %15049 = vst [vmem:[#allocation28_spill] sm:$0xff] %v12147_v13  ;;  %v14962_v29 = vmax.f32 %v12147_v13, 0.0 }
 0x621   :  { %v10443_v32 = vpack.c.bf16 %v14963_v23, %v14962_v29  ;;  %v12154_v35 = vpop.f32.mrb[6].mxu0 }
 0x622   :  { %15050 = vst [vmem:[#allocation29_spill] sm:$0xff] %v12154_v35  ;;  %v14961_v46 = vmax.f32 %v12154_v35, 0.0  ;;  %v12157_v5 = vpop.f32.mrb[7].mxu0 }
 0x623   :  { %15051 = vst [vmem:[#allocation30_spill] sm:$0xff] %v12157_v5  ;;  %v14960_v41 = vmax.f32 %v12157_v5, 0.0  ;;  %10444 = vmatprep.subr.bf16.mxu1 %v10443_v32 }
 0x624   :  { %10446 = vmatpush3.bf16.msra.mxu1 %v10443_v32 }
 0x625   :  { %v10447_v9 = vpack.c.bf16 %v14961_v46, %v14960_v41  ;;  %v12164_v50 = vpop.f32.mrb[8].mxu0  ;;  %v15057_v41 = vpack.c.bf16 %v11965_v24, %v11962_v8  ;;  %v12260_v46 = vld [vmem:[%s14899_s4 + $0x50] sm:$0xff]  ;;  %v12273_v24 = vld [vmem:[%s14899_s4 + $0x58] sm:$0xff]  ;;  %v12279_v8 = vld [vmem:[%s14899_s4 + $0x60] sm:$0xff] }
 0x626   :  { %15052 = vst [vmem:[#allocation31_spill] sm:$0xff] %v12164_v50  ;;  %v14959_v0 = vmax.f32 %v12164_v50, 0.0  ;;  %v12167_v57 = vpop.f32.mrb[9].mxu0 }
 0x627   :  { %15053 = vst [vmem:[#allocation32_spill] sm:$0xff] %v12167_v57  ;;  %v14956_v14 = vmax.f32 %v12167_v57, 0.0  ;;  %10448 = vmatprep.subr.bf16.mxu1 %v10447_v9 }
 0x628   :  { %10450 = vmatpush3.bf16.msra.mxu1 %v10447_v9  ;;  %v12187_v9 = vld [vmem:[%s14899_s4 + $0x8] sm:$0xff] }
 0x629   :  { %v10451_v22 = vpack.c.bf16 %v14959_v0, %v14956_v14  ;;  %v12174_v43 = vpop.f32.mrb[10].mxu0  ;;  %v12193_v14 = vld [vmem:[%s14899_s4 + $0x10] sm:$0xff] }
 0x62a   :  { %15054 = vst [vmem:[#allocation33_spill] sm:$0xff] %v12174_v43  ;;  %v14958_v36 = vmax.f32 %v12174_v43, 0.0  ;;  %v12177_v12 = vpop.f32.mrb[11].mxu0  ;;  %v12226_v0 = vld [vmem:[%s14899_s4 + $0x30] sm:$0xff] }
 0x62b   :  { %15055 = vst [vmem:[#allocation34_spill] sm:$0xff] %v12177_v12  ;;  %v14957_v4 = vmax.f32 %v12177_v12, 0.0  ;;  %10452 = vmatprep.subr.bf16.mxu1 %v10451_v22 }
 0x62c   :  { %10454 = vmatpush3.bf16.msra.mxu1 %v10451_v22  ;;  %v12202_v22 = vld [vmem:[%s14899_s4 + $0x18] sm:$0xff] }
 0x62d   :  { %v10455_v32 = vpack.c.bf16 %v14958_v36, %v14957_v4  ;;  %v12216_v4 = vld [vmem:[%s14899_s4 + $0x28] sm:$0xff]  ;;  %v15056_v36 = vpack.c.bf16 %v11942_v62, %v11945_v2  ;;  %v12236_v2 = vld [vmem:[%s14899_s4 + $0x38] sm:$0xff]  ;;  %v12241_v62 = vld [vmem:[%s14899_s4 + $0x40] sm:$0xff] }
 0x62f   :  { %10456 = vmatprep.subr.bf16.mxu1 %v10455_v32 }
 0x630   :  { %10458 = vmatpush3.bf16.msra.mxu1 %v10455_v32  ;;  %v12207_v32 = vld [vmem:[%s14899_s4 + $0x20] sm:$0xff] }
 0x631   :  { %10507 = vmatprep.subr.bf16.mxu1 %v15042_v37 }
 0x633   :  { %9605 = vmatmul.mubr.msk.f32.vlgmr.msra.gmra.mrb[14].mxu1 %vm14984_vm4, %v12187_v9 }
 0x634   :  { %9607 = vmatprep.mubr.msk.f32.mxu1 %vm14984_vm4, %v12193_v14 }
 0x637   :  { %9608 = vmatmul.mubr.msk.f32.gmra.mrb[16].mxu1 %vm14984_vm4, %v12202_v22 }
 0x638   :  { %9610 = vmatprep.mubr.msk.f32.mxu1 %vm14984_vm4, %v12207_v32 }
 0x639   :  { %10510 = vmatpush3.bf16.xpose.msk.msra.mxu1 %vm11655_vm2, %v15056_v36  ;;  %v12250_v36 = vld [vmem:[%s14899_s4 + $0x48] sm:$0xff] }
 0x63a   :  { %10511 = vmatprep.subr.bf16.mxu1 %v15042_v37 }
 0x63b   :  { %9611 = vmatmul.mubr.msk.f32.gmra.mrb[18].mxu1 %vm14984_vm4, %v12216_v4 }
 0x63c   :  { %9613 = vmatprep.mubr.msk.f32.mxu1 %vm14984_vm4, %v12226_v0 }
 0x63f   :  { %9614 = vmatmul.mubr.msk.f32.gmra.mrb[20].mxu1 %vm14984_vm4, %v12236_v2 }
 0x640   :  { %9616 = vmatprep.mubr.msk.f32.mxu1 %vm14984_vm4, %v12241_v62 }
 0x641   :  { %10514 = vmatpush3.bf16.xpose.msk.msra.mxu1 %vm11655_vm2, %v15057_v41  ;;  %v12330_v41 = vld [vmem:[%s15001_s29] sm:$0x7] }
 0x642   :  { %v1287_v29 = vpop.f32.mrb[12].mxu0  ;;  %10515 = vmatprep.subr.bf16.mxu1 %v15042_v37 }
 0x643   :  { %v1291_v23 = vsel %vm15058_vm14, %v1287_v29, %v11748_v45  ;;  %v9646_v16 = vpop.f32.mrb[13].mxu0  ;;  %9617 = vmatmul.mubr.msk.f32.gmra.mrb[22].mxu1 %vm14984_vm4, %v12250_v36  ;;  %v12302_v29 = vld [vmem:[%s14899_s4 + $0x70] sm:$0xff]  ;;  %vm15080_vm14 = vmmov %vm15062_vm13 }
 0x644   :  { %9647 = vmatprep.subr.msk.mxu0 %vm15059_vm1, %v1291_v23  ;;  %9619 = vmatprep.mubr.msk.f32.mxu1 %vm14984_vm4, %v12260_v46  ;;  %v12292_v16 = vld [vmem:[%s14899_s4 + $0x68] sm:$0xff]  ;;  %vm15081_vm1 = vmmov %vm15062_vm13 }
 0x645   :  { %9648 = vmatpush3.msk.msra.mxu0 %vm15060_vm12, %v1291_v23  ;;  %v15061_v23 = vpack.c.bf16 %v11977_v39, %v11980_v7  ;;  %v12316_v7 = vld [vmem:[%s14899_s4 + $0x78] sm:$0xff]  ;;  %v15063_v39 = vpack.c.bf16 %v12005_v6, %v12002_v18  ;;  %vm15082_vm12 = vmmov %vm15081_vm1 }
 0x646   :  { %9650 = vmatmul.mubr.msk.f32.vlgmr.msra.gmra.mrb[14].mxu0 %vm14985_vm15, %v11755_v51 }
 0x647   :  { %9652 = vmatprep.mubr.msk.f32.mxu0 %vm14985_vm15, %v11761_v54  ;;  %9620 = vmatmul.mubr.msk.f32.gmra.mrb[24].mxu1 %vm14984_vm4, %v12273_v24 }
 0x648   :  { %9622 = vmatprep.mubr.msk.f32.mxu1 %vm14984_vm4, %v12279_v8 }
 0x649   :  { %10518 = vmatpush3.bf16.xpose.msk.msra.mxu1 %vm11655_vm2, %v15061_v23 }
 0x64a   :  { %9653 = vmatmul.mubr.msk.f32.gmra.mrb[16].mxu0 %vm14985_vm15, %v11771_v58  ;;  %10519 = vmatprep.subr.bf16.mxu1 %v15042_v37 }
 0x64b   :  { %9623 = vmatmul.mubr.msk.f32.gmra.mrb[26].mxu1 %vm14984_vm4, %v12292_v16  ;;  %9663 = vmatprep.mubr.msk.f32.mxu0 %vm15062_vm13, %v11858_v61  ;;  %vm15083_vm13 = vcmask 1042432  }
 0x64c   :  { %9625 = vmatprep.mubr.msk.f32.mxu1 %vm14984_vm4, %v12302_v29 }
 0x64f   :  { %9626 = vmatmul.mubr.msk.f32.gmra.mrb[28].mxu1 %vm14984_vm4, %v12316_v7 }
 0x650   :  { %9745 = vmatprep.mubr.msk.f32.mxu1 %vm15044_vm0, %v15041_v11 }
 0x651   :  { %10522 = vmatpush3.bf16.xpose.msk.msra.mxu1 %vm11655_vm2, %v15063_v39 }
 0x658   :  { %9746 = vmatmul.mubr.msk.f32.vlgmr.msra.gmra.mrb[30].mxu1 %vm14984_vm4, %v12330_v41  ;;  %vm15084_vm4 = vmmov %vm15081_vm1 }
 0x659   :  { %9750 = vmatprep.mubr.msk.f32.mxu1 %vm14985_vm15, %v11719_v17  ;;  %vm15085_vm15 = vcmask 1045504   ;;  %vm15090_vm11 = vmmov %vm15084_vm4 }
 0x65a   :  { %vm15086_vm10 = vmmov %vm15085_vm15 }
 0x706   :  { %v12336_v23 = vpop.f32.mrb[14].mxu1 }
 0x707   :  { %15064 = vst [vmem:[#allocation35_spill] sm:$0xff] %v12336_v23  ;;  %v12338_v1 = vpop.f32.mrb[15].mxu1 }
 0x708   :  { %15065 = vst [vmem:[#allocation36_spill] sm:$0xff] %v12338_v1 }
 0x70a   :  { %v12340_v60 = vpop.f32.mrb[16].mxu1 }
 0x70b   :  { %15066 = vst [vmem:[#allocation37_spill] sm:$0xff] %v12340_v60  ;;  %v12342_v18 = vpop.f32.mrb[17].mxu1 }
 0x70c   :  { %15067 = vst [vmem:[#allocation38_spill] sm:$0xff] %v12342_v18 }
 0x70e   :  { %v12344_v6 = vpop.f32.mrb[18].mxu1 }
 0x70f   :  { %15068 = vst [vmem:[#allocation39_spill] sm:$0xff] %v12344_v6  ;;  %v12346_v39 = vpop.f32.mrb[19].mxu1 }
 0x710   :  { %15069 = vst [vmem:[#allocation40_spill] sm:$0xff] %v12346_v39 }
 0x712   :  { %v12348_v48 = vpop.f32.mrb[20].mxu1 }
 0x713   :  { %15070 = vst [vmem:[#allocation41_spill] sm:$0xff] %v12348_v48  ;;  %v12350_v44 = vpop.f32.mrb[21].mxu1 }
 0x714   :  { %15071 = vst [vmem:[#allocation42_spill] sm:$0xff] %v12350_v44 }
 0x716   :  { %v12352_v31 = vpop.f32.mrb[22].mxu1 }
 0x717   :  { %15072 = vst [vmem:[#allocation43_spill] sm:$0xff] %v12352_v31  ;;  %v12354_v28 = vpop.f32.mrb[23].mxu1 }
 0x718   :  { %15073 = vst [vmem:[#allocation44_spill] sm:$0xff] %v12354_v28 }
 0x719   :  { %v9651_v17 = vpop.f32.mrb[14].mxu0 }
 0x71a   :  { %v1381_v12 = vmax.f32 %v9651_v17, 0.0  ;;  %v1361_v43 = vpop.f32.mrb[15].mxu0  ;;  %v12356_v57 = vpop.f32.mrb[24].mxu1 }
 0x71b   :  { %15074 = vst [vmem:[#allocation45_spill] sm:$0xff] %v12356_v57  ;;  %v1380_v50 = vmax.f32 %v1361_v43, 0.0  ;;  %v12358_v5 = vpop.f32.mrb[25].mxu1 }
 0x71c   :  { %15075 = vst [vmem:[#allocation46_spill] sm:$0xff] %v12358_v5 }
 0x71d   :  { %v10475_v35 = vpack.c.bf16 %v1381_v12, %v1380_v50  ;;  %v9654_v6 = vpop.f32.mrb[16].mxu0 }
 0x71e   :  { %v1383_v18 = vmax.f32 %v9654_v6, 0.0  ;;  %v1371_v39 = vpop.f32.mrb[17].mxu0  ;;  %v12360_v60 = vpop.f32.mrb[26].mxu1 }
 0x71f   :  { %15076 = vst [vmem:[#allocation47_spill] sm:$0xff] %v12360_v60  ;;  %v1382_v48 = vmax.f32 %v1371_v39, 0.0  ;;  %10476 = vmatprep.subr.bf16.mxu0 %v10475_v35  ;;  %v12362_v44 = vpop.f32.mrb[27].mxu1  ;;  %v15092_v60 = vmax.f32 %v11889_v42, 0.0 }
 0x720   :  { %15077 = vst [vmem:[#allocation48_spill] sm:$0xff] %v12362_v44  ;;  %10478 = vmatpush3.bf16.msra.mxu0 %v10475_v35 }
 0x721   :  { %v10479_v28 = vpack.c.bf16 %v1383_v18, %v1382_v48  ;;  %v1747_v5 = vmax.f32 %v15092_v60, %v1380_v50 }
 0x722   :  { %v12364_v31 = vpop.f32.mrb[28].mxu1 }
 0x723   :  { %15078 = vst [vmem:[#allocation49_spill] sm:$0xff] %v12364_v31  ;;  %10480 = vmatprep.subr.bf16.mxu0 %v10479_v28  ;;  %v12366_v17 = vpop.f32.mrb[29].mxu1 }
 0x724   :  { %15079 = vst [vmem:[#allocation50_spill] sm:$0xff] %v12366_v17  ;;  %10482 = vmatpush3.bf16.msra.mxu0 %v10479_v28  ;;  %v15091_v17 = vmax.f32 %v11885_v30, 0.0 }
 0x726   :  { %v1748_v31 = vmax.f32 %v15091_v17, %v1381_v12  ;;  %v15094_v12 = vmax.f32 %v11899_v56, 0.0 }
 0x727   :  { %9664 = vmatmul.mubr.msk.f32.vlgmr.msra.gmra.mrb[18].mxu0 %vm15080_vm14, %v11909_v34  ;;  %vm15087_vm14 = vcmask 48128  }
 0x728   :  { %9666 = vmatprep.mubr.msk.f32.mxu0 %vm15081_vm1, %v11914_v19  ;;  %vm15088_vm1 = vmmov %vm15087_vm14  ;;  %v1749_v17 = vmax.f32 %v15094_v12, %v1382_v48 }
 0x72b   :  { %9667 = vmatmul.mubr.msk.f32.gmra.mrb[20].mxu0 %vm15082_vm12, %v11923_v26  ;;  %v1965_v43 = vpop.f32.mrb[30].mxu1  ;;  %vm15089_vm12 = vmmov %vm15088_vm1 }
 0x72c   :  { %v1969_v35 = vsel %vm15083_vm13, %v1965_v43, %v11748_v45  ;;  %v9747_v6 = vpop.f32.mrb[31].mxu1  ;;  %9677 = vmatprep.mubr.msk.f32.mxu0 %vm15084_vm4, %v11930_v27  ;;  %vm15098_vm13 = vmmov %vm15084_vm4 }
 0x72d   :  { %9748 = vmatprep.subr.msk.mxu1 %vm15085_vm15, %v1969_v35  ;;  %vm15097_vm15 = vmmov %vm15084_vm4 }
 0x72e   :  { %9749 = vmatpush3.msk.msra.mxu1 %vm15086_vm10, %v1969_v35  ;;  %vm15095_vm10 = vmmov %vm15084_vm4 }
 0x72f   :  { %9751 = vmatmul.mubr.msk.f32.vlgmr.msra.gmra.mrb[32].mxu1 %vm15087_vm14, %v11755_v51  ;;  %vm15099_vm14 = vmmov %vm15084_vm4 }
 0x730   :  { %9753 = vmatprep.mubr.msk.f32.mxu1 %vm15088_vm1, %v11761_v54  ;;  %vm15100_vm1 = vmmov %vm15084_vm4 }
 0x733   :  { %9754 = vmatmul.mubr.msk.f32.gmra.mrb[34].mxu1 %vm15089_vm12, %v11771_v58  ;;  %vm15101_vm12 = vmmov %vm15100_vm1 }
 0x734   :  { %9764 = vmatprep.mubr.msk.f32.mxu1 %vm15090_vm11, %v11858_v61  ;;  %vm15096_vm11 = vmmov %vm15084_vm4 }
 0x7fa   :  { %v12388_v28 = vpop.f32.mrb[18].mxu0 }
 0x7fb   :  { %v1470_v39 = vmax.f32 %v12388_v28, 0.0  ;;  %v12391_v43 = vpop.f32.mrb[19].mxu0 }
 0x7fc   :  { %v14991_v35 = vmax.f32 %v12391_v43, 0.0 }
 0x7fe   :  { %v10483_v51 = vpack.c.bf16 %v1470_v39, %v14991_v35  ;;  %v12396_v6 = vpop.f32.mrb[20].mxu0 }
 0x7ff   :  { %v14995_v54 = vmax.f32 %v12396_v6, 0.0  ;;  %v12399_v45 = vpop.f32.mrb[21].mxu0 }
 0x800   :  { %v14994_v58 = vmax.f32 %v12399_v45, 0.0  ;;  %10484 = vmatprep.subr.bf16.mxu0 %v10483_v51 }
 0x801   :  { %10486 = vmatpush3.bf16.msra.mxu0 %v10483_v51 }
 0x802   :  { %v10487_v61 = vpack.c.bf16 %v14995_v54, %v14994_v58  ;;  %v9752_v28 = vpop.f32.mrb[32].mxu1  ;;  %v15093_v58 = vmax.f32 %v11896_v59, 0.0 }
 0x803   :  { %v2059_v35 = vmax.f32 %v9752_v28, 0.0  ;;  %v2039_v44 = vpop.f32.mrb[33].mxu1 }
 0x804   :  { %v2058_v57 = vmax.f32 %v2039_v44, 0.0  ;;  %10488 = vmatprep.subr.bf16.mxu0 %v10487_v61  ;;  %v1750_v54 = vmax.f32 %v15093_v58, %v1383_v18 }
 0x805   :  { %v12410_v13 = vmax.f32 %v1748_v31, %v2059_v35  ;;  %10490 = vmatpush3.bf16.msra.mxu0 %v10487_v61 }
 0x806   :  { %v10523_v51 = vpack.c.bf16 %v2059_v35, %v2058_v57  ;;  %v12412_v33 = vmax.f32 %v1747_v5, %v2058_v57  ;;  %v9755_v1 = vpop.f32.mrb[34].mxu1 }
 0x807   :  { %v2061_v23 = vmax.f32 %v9755_v1, 0.0  ;;  %v2049_v30 = vpop.f32.mrb[35].mxu1 }
 0x808   :  { %v2060_v28 = vmax.f32 %v2049_v30, 0.0  ;;  %9678 = vmatmul.mubr.msk.f32.vlgmr.msra.gmra.mrb[22].mxu0 %vm15084_vm4, %v12037_v10  ;;  %10524 = vmatprep.subr.bf16.mxu1 %v10523_v51  ;;  %vm15102_vm4 = vmmov %vm15100_vm1  ;;  %v15108_v30 = vmax.f32 %v12017_v53, 0.0  ;;  %v15109_v53 = vmax.f32 %v12396_v6, 0.0 }
 0x809   :  { %v12420_v31 = vmax.f32 %v1750_v54, %v2061_v23  ;;  %10526 = vmatpush3.bf16.msra.mxu1 %v10523_v51  ;;  %9680 = vmatprep.mubr.msk.f32.mxu0 %vm15095_vm10, %v12042_v3  ;;  %vm15103_vm10 = vmmov %vm15100_vm1  ;;  %v15107_v51 = vmax.f32 %v12391_v43, 0.0 }
 0x80a   :  { %v10527_v44 = vpack.c.bf16 %v2061_v23, %v2060_v28  ;;  %v12424_v60 = vmax.f32 %v1749_v17, %v2060_v28  ;;  %v15106_v23 = vmax.f32 %v12014_v47, 0.0 }
 0x80b   :  { %v1751_v12 = vmax.f32 %v15108_v30, %v15107_v51 }
 0x80c   :  { %9681 = vmatmul.mubr.msk.f32.gmra.mrb[24].mxu0 %vm15096_vm11, %v12052_v40  ;;  %10528 = vmatprep.subr.bf16.mxu1 %v10527_v44  ;;  %vm15104_vm11 = vmmov %vm15100_vm1  ;;  %v1752_v18 = vmax.f32 %v15106_v23, %v1470_v39  ;;  %v15110_v23 = vmax.f32 %v12024_v55, 0.0 }
 0x80d   :  { %10530 = vmatpush3.bf16.msra.mxu1 %v10527_v44  ;;  %9683 = vmatprep.mubr.msk.f32.mxu0 %vm15097_vm15, %v12057_v49  ;;  %vm15105_vm15 = vcmask 523264  }
 0x810   :  { %9684 = vmatmul.mubr.msk.f32.gmra.mrb[26].mxu0 %vm15098_vm13, %v12066_v38  ;;  %9765 = vmatmul.mubr.msk.f32.vlgmr.msra.gmra.mrb[36].mxu1 %vm15099_vm14, %v11909_v34 }
 0x811   :  { %9686 = vmatprep.mubr.msk.f32.mxu0 %vm15100_vm1, %v12076_v21  ;;  %9767 = vmatprep.mubr.msk.f32.mxu1 %vm15101_vm12, %v11914_v19  ;;  %vm15113_vm12 = vmmov %vm15105_vm15 }
 0x814   :  { %9687 = vmatmul.mubr.msk.f32.gmra.mrb[28].mxu0 %vm15102_vm4, %v12086_v63  ;;  %9768 = vmatmul.mubr.msk.f32.gmra.mrb[38].mxu1 %vm15103_vm10, %v11923_v26  ;;  %vm15114_vm4 = vmmov %vm15100_vm1 }
 0x815   :  { %9778 = vmatprep.mubr.msk.f32.mxu1 %vm15104_vm11, %v11930_v27  ;;  %9705 = vmatprep.mubr.msk.f32.mxu0 %vm15105_vm15, %v12140_v20  ;;  %vm15115_vm10 = vmmov %vm15113_vm12 }
 0x816   :  { %vm15116_vm11 = vmmov %vm15100_vm1 }
 0x817   :  { %vm15117_vm15 = vmmov %vm15115_vm10 }
 0x8db   :  { %v12446_v48 = vpop.f32.mrb[22].mxu0 }
 0x8dc   :  { %v1579_v1 = vmax.f32 %v12446_v48, 0.0  ;;  %v12449_v42 = vpop.f32.mrb[23].mxu0  ;;  %v15141_v48 = vld [vmem:[#allocation38_spill] sm:$0xff] }
 0x8dd   :  { %v1578_v59 = vmax.f32 %v12449_v42, 0.0 }
 0x8df   :  { %v10491_v56 = vpack.c.bf16 %v1579_v1, %v1578_v59  ;;  %v12456_v34 = vpop.f32.mrb[24].mxu0 }
 0x8e0   :  { %v1581_v19 = vmax.f32 %v12456_v34, 0.0  ;;  %v12459_v26 = vpop.f32.mrb[25].mxu0 }
 0x8e1   :  { %v14996_v27 = vmax.f32 %v12459_v26, 0.0  ;;  %10492 = vmatprep.subr.bf16.mxu0 %v10491_v56 }
 0x8e2   :  { %10494 = vmatpush3.bf16.msra.mxu0 %v10491_v56 }
 0x8e3   :  { %v10495_v5 = vpack.c.bf16 %v1581_v19, %v14996_v27  ;;  %v12466_v50 = vpop.f32.mrb[26].mxu0  ;;  %v9766_v57 = vpop.f32.mrb[36].mxu1  ;;  %v15111_v27 = vmax.f32 %v12399_v45, 0.0 }
 0x8e4   :  { %v1583_v35 = vmax.f32 %v12466_v50, 0.0  ;;  %v2148_v54 = vmax.f32 %v9766_v57, 0.0  ;;  %v12471_v58 = vpop.f32.mrb[27].mxu0  ;;  %v2128_v61 = vpop.f32.mrb[37].mxu1 }
 0x8e5   :  { %v14997_v17 = vmax.f32 %v12471_v58, 0.0  ;;  %v2147_v28 = vmax.f32 %v2128_v61, 0.0  ;;  %10496 = vmatprep.subr.bf16.mxu0 %v10495_v5  ;;  %v1754_v61 = vmax.f32 %v15110_v23, %v15109_v53  ;;  %v2507_v45 = vpop.xlane.xlu1 %2506 }
 0x8e6   :  { %v12478_v44 = vmax.f32 %v1752_v18, %v2148_v54  ;;  %10498 = vmatpush3.bf16.msra.mxu0 %v10495_v5  ;;  %vm2529_vm13 = vcmp.eq.f32.partialorder %v11612_v25, %v2507_v45  ;;  %v15135_v45 = vld [vmem:[#allocation36_spill] sm:$0xff] }
 0x8e7   :  { %v10499_v47 = vpack.c.bf16 %v1583_v35, %v14997_v17  ;;  %v10531_v39 = vpack.c.bf16 %v2148_v54, %v2147_v28  ;;  %v12484_v56 = vmax.f32 %v1751_v12, %v2147_v28  ;;  %v12486_v57 = vpop.f32.mrb[28].mxu0  ;;  %v9769_v43 = vpop.f32.mrb[38].mxu1  ;;  %v15112_v54 = vmax.f32 %v12027_v52, 0.0 }
 0x8e8   :  { %v1585_v18 = vmax.f32 %v12486_v57, 0.0  ;;  %v2150_v51 = vmax.f32 %v9769_v43, 0.0  ;;  %v12493_v5 = vpop.f32.mrb[29].mxu0  ;;  %v2138_v30 = vpop.f32.mrb[39].mxu1 }
 0x8e9   :  { %v1753_v12 = vmax.f32 %v15112_v54, %v15111_v27  ;;  %v1584_v28 = vmax.f32 %v12493_v5, 0.0  ;;  %v2149_v17 = vmax.f32 %v2138_v30, 0.0  ;;  %10500 = vmatprep.subr.bf16.mxu0 %v10499_v47  ;;  %10532 = vmatprep.subr.bf16.mxu1 %v10531_v39  ;;  %v2510_v52 = vpop.xlane.xlu0 %2509  ;;  %v8652_v27 = vsel %vm2529_vm13, 1.0, %v15041_v11  ;;  %vm15118_vm13 = vmmov %vm15115_vm10 }
 0x8ea   :  { %v12500_v6 = vmax.f32 %v1754_v61, %v2150_v51  ;;  %10502 = vmatpush3.bf16.msra.mxu0 %v10499_v47  ;;  %10534 = vmatpush3.bf16.msra.mxu1 %v10531_v39  ;;  %vm2530_vm14 = vcmp.eq.f32.partialorder %v11612_v25, %v2510_v52  ;;  %v1085_v52 = vmax.f32 %v15135_v45, 0.0 }
 0x8eb   :  { %v10503_v55 = vpack.c.bf16 %v1585_v18, %v1584_v28  ;;  %v10535_v43 = vpack.c.bf16 %v2150_v51, %v2149_v17  ;;  %v12506_v53 = vmax.f32 %v1753_v12, %v2149_v17  ;;  %v8653_v17 = vsel %vm2530_vm14, 1.0, %v15041_v11 }
 0x8ec   :  { %v10556_v39 = vpack.c.bf16 %v8653_v17, %v8652_v27 }
 0x8ed   :  { %10504 = vmatprep.subr.bf16.mxu0 %v10503_v55  ;;  %10536 = vmatprep.subr.bf16.mxu1 %v10535_v43  ;;  %v2516_v47 = vpop.xlane.xlu0 %2515 }
 0x8ee   :  { %10506 = vmatpush3.bf16.msra.mxu0 %v10503_v55  ;;  %10538 = vmatpush3.bf16.msra.mxu1 %v10535_v43  ;;  %v15134_v55 = vld [vmem:[#allocation35_spill] sm:$0xff] }
 0x8ef   :  { %10555 = vmatprep.subr.bf16.mxu0 %v15042_v37  ;;  %v1086_v43 = vmax.f32 %v15134_v55, 0.0 }
 0x8f1   :  { %9779 = vmatmul.mubr.msk.f32.vlgmr.msra.gmra.mrb[40].mxu1 %vm15100_vm1, %v12037_v10  ;;  %9706 = vmatmul.mubr.msk.f32.vlgmr.msra.gmra.mrb[30].mxu0 %vm15113_vm12, %v12187_v9  ;;  %v2513_v10 = vpop.xlane.xlu1 %2512  ;;  %vm2532_vm12 = vcmp.eq.f32.partialorder %v11612_v25, %v2516_v47  ;;  %v15136_v47 = vld [vmem:[#allocation27_spill] sm:$0xff] }
 0x8f2   :  { %9781 = vmatprep.mubr.msk.f32.mxu1 %vm15114_vm4, %v12042_v3  ;;  %9708 = vmatprep.mubr.msk.f32.mxu0 %vm15115_vm10, %v12193_v14  ;;  %vm2531_vm14 = vcmp.eq.f32.partialorder %v11612_v25, %v2513_v10  ;;  %vm15119_vm4 = vmmov %vm15100_vm1  ;;  %v8655_v3 = vsel %vm2532_vm12, 1.0, %v15041_v11 }
 0x8f5   :  { %9782 = vmatmul.mubr.msk.f32.gmra.mrb[42].mxu1 %vm15116_vm11, %v12052_v40  ;;  %9709 = vmatmul.mubr.msk.f32.gmra.mrb[32].mxu0 %vm15117_vm15, %v12202_v22  ;;  %vm15120_vm11 = vmmov %vm15100_vm1  ;;  %v8654_v40 = vsel %vm2531_vm14, 1.0, %v15041_v11  ;;  %v2519_v23 = vpop.xlane.xlu1 %2518 }
 0x8f6   :  { %9784 = vmatprep.mubr.msk.f32.mxu1 %vm15100_vm1, %v12057_v49  ;;  %9711 = vmatprep.mubr.msk.f32.mxu0 %vm15118_vm13, %v12207_v32  ;;  %vm15121_vm15 = vmmov %vm15115_vm10  ;;  %v2522_v49 = vpop.xlane.xlu0 %2521  ;;  %v10560_v61 = vpack.c.bf16 %v8655_v3, %v8654_v40 }
 0x8f7   :  { %10558 = vmatpush3.bf16.xpose.msk.msra.mxu0 %vm11655_vm2, %v10556_v39  ;;  %vm15122_vm13 = vmmov %vm15115_vm10  ;;  %v15137_v39 = vmax.f32 %v15136_v47, 0.0 }
 0x8f8   :  { %10559 = vmatprep.subr.bf16.mxu0 %v15042_v37 }
 0x8f9   :  { %9785 = vmatmul.mubr.msk.f32.gmra.mrb[44].mxu1 %vm15119_vm4, %v12066_v38  ;;  %9712 = vmatmul.mubr.msk.f32.gmra.mrb[34].mxu0 %vm15115_vm10, %v12216_v4  ;;  %vm15123_vm4 = vmmov %vm15115_vm10  ;;  %vm2534_vm10 = vcmp.eq.f32.partialorder %v11612_v25, %v2522_v49  ;;  %v2525_v51 = vpop.xlane.xlu1 %2524  ;;  %v1756_v10 = vmax.f32 %v15137_v39, %v1579_v1 }
 0x8fa   :  { %9787 = vmatprep.mubr.msk.f32.mxu1 %vm15120_vm11, %v12076_v21  ;;  %9714 = vmatprep.mubr.msk.f32.mxu0 %vm15121_vm15, %v12226_v0  ;;  %vm15124_vm12 = vmmov %vm15123_vm4  ;;  %vm2533_vm11 = vcmp.eq.f32.partialorder %v11612_v25, %v2519_v23  ;;  %v8657_v21 = vsel %vm2534_vm10, 1.0, %v15041_v11  ;;  %v15138_v23 = vld [vmem:[#allocation28_spill] sm:$0xff] }
 0x8fb   :  { %vm15125_vm14 = vmmov %vm15123_vm4  ;;  %v8656_v38 = vsel %vm2533_vm11, 1.0, %v15041_v11 }
 0x8fc   :  { %vm15126_vm15 = vmmov %vm15123_vm4 }
 0x8fd   :  { %9788 = vmatmul.mubr.msk.f32.gmra.mrb[46].mxu1 %vm15100_vm1, %v12086_v63  ;;  %9715 = vmatmul.mubr.msk.f32.gmra.mrb[36].mxu0 %vm15122_vm13, %v12236_v2  ;;  %v2528_v63 = vpop.xlane.xlu0 %2527  ;;  %vm15127_vm1 = vmmov %vm15123_vm4 }
 0x8fe   :  { %9717 = vmatprep.mubr.msk.f32.mxu0 %vm15123_vm4, %v12241_v62  ;;  %9806 = vmatprep.mubr.msk.f32.mxu1 %vm15124_vm12, %v12140_v20  ;;  %v10564_v20 = vpack.c.bf16 %v8657_v21, %v8656_v38  ;;  %vm15128_vm13 = vmmov %vm15127_vm1  ;;  %vm2536_vm4 = vcmp.eq.f32.partialorder %v11612_v25, %v2528_v63  ;;  %vm2535_vm12 = vcmp.eq.f32.partialorder %v11612_v25, %v2525_v51  ;;  %v11280_v25 = vld [vmem:[%s15038_s19] sm:$0xff] }
 0x8ff   :  { %10562 = vmatpush3.bf16.xpose.msk.msra.mxu0 %vm11655_vm2, %v10560_v61  ;;  %vm15129_vm10 = vmmov %vm15127_vm1  ;;  %v8659_v30 = vsel %vm2536_vm4, 1.0, %v15041_v11  ;;  %v8658_v54 = vsel %vm2535_vm12, 1.0, %v15041_v11  ;;  %v15139_v61 = vmax.f32 %v15138_v23, 0.0 }
 0x900   :  { %10563 = vmatprep.subr.bf16.mxu0 %v15042_v37  ;;  %vm15130_vm11 = vmmov %vm15127_vm1  ;;  %v10568_v12 = vpack.c.bf16 %v8659_v30, %v8658_v54 }
 0x901   :  { %9718 = vmatmul.mubr.msk.f32.gmra.mrb[38].mxu0 %vm15125_vm14, %v12250_v36  ;;  %vm15131_vm14 = vmmov %vm15127_vm1  ;;  %v1755_v21 = vmax.f32 %v15139_v61, %v1578_v59  ;;  %v15142_v59 = vld [vmem:[#allocation29_spill] sm:$0xff]  ;;  %v15147_v61 = vld [vmem:[#allocation39_spill] sm:$0xff] }
 0x902   :  { %9720 = vmatprep.mubr.msk.f32.mxu0 %vm15126_vm15, %v12260_v46  ;;  %vm15132_vm15 = vmmov %vm15127_vm1 }
 0x903   :  { %vm15166_vm4 = vmmov %vm15129_vm10 }
 0x904   :  { %vm15168_vm12 = vmmov %vm15166_vm4 }
 0x905   :  { %9721 = vmatmul.mubr.msk.f32.gmra.mrb[40].mxu0 %vm15127_vm1, %v12273_v24  ;;  %vm15133_vm1 = vcmask 48128  }
 0x906   :  { %9723 = vmatprep.mubr.msk.f32.mxu0 %vm15128_vm13, %v12279_v8  ;;  %vm15164_vm13 = vmmov %vm15129_vm10 }
 0x907   :  { %10566 = vmatpush3.bf16.xpose.msk.msra.mxu0 %vm11655_vm2, %v10564_v20  ;;  %v15140_v20 = vld [vmem:[#allocation37_spill] sm:$0xff] }
 0x908   :  { %10567 = vmatprep.subr.bf16.mxu0 %v15042_v37  ;;  %v1088_v51 = vmax.f32 %v15140_v20, 0.0 }
 0x909   :  { %9724 = vmatmul.mubr.msk.f32.gmra.mrb[42].mxu0 %vm15129_vm10, %v12292_v16  ;;  %vm15170_vm10 = vmmov %vm15166_vm4 }
 0x90a   :  { %9726 = vmatprep.mubr.msk.f32.mxu0 %vm15130_vm11, %v12302_v29  ;;  %vm15172_vm11 = vmmov %vm15166_vm4 }
 0x90d   :  { %9727 = vmatmul.mubr.msk.f32.gmra.mrb[44].mxu0 %vm15131_vm14, %v12316_v7  ;;  %vm15173_vm14 = vmmov %vm15166_vm4 }
 0x90e   :  { %9846 = vmatprep.mubr.msk.f32.mxu0 %vm15044_vm0, %v15041_v11 }
 0x90f   :  { %10570 = vmatpush3.bf16.xpose.msk.msra.mxu0 %vm11655_vm2, %v10568_v12  ;;  %v1087_v12 = vmax.f32 %v15141_v48, 0.0 }
 0x916   :  { %9847 = vmatmul.mubr.msk.f32.vlgmr.msra.gmra.mrb[46].mxu0 %vm15132_vm15, %v12330_v41  ;;  %vm15174_vm15 = vmmov %vm15166_vm4 }
 0x917   :  { %9851 = vmatprep.mubr.msk.f32.mxu0 %vm15133_vm1, %v11280_v25  ;;  %vm15175_vm1 = vmmov %vm15166_vm4 }
 0x9c4   :  { %v9780_v27 = vpop.f32.mrb[40].mxu1  ;;  %v9707_v17 = vpop.f32.mrb[30].mxu0 }
 0x9c5   :  { %v2257_v3 = vmax.f32 %v9780_v27, 0.0  ;;  %v2217_v40 = vpop.f32.mrb[41].mxu1  ;;  %v1732_v41 = vmax.f32 %v9707_v17, 0.0  ;;  %v1652_v49 = vpop.f32.mrb[31].mxu0  ;;  %v15143_v27 = vmax.f32 %v15142_v59, 0.0  ;;  %v15149_v59 = vld [vmem:[#allocation31_spill] sm:$0xff] }
 0x9c6   :  { %v2256_v38 = vmax.f32 %v2217_v40, 0.0  ;;  %v1731_v63 = vmax.f32 %v1652_v49, 0.0 }
 0x9c7   :  { %v12601_v30 = vmax.f32 %v1756_v10, %v2257_v3  ;;  %v12603_v54 = vmax.f32 %v1086_v43, %v1732_v41  ;;  %v1758_v17 = vmax.f32 %v15143_v27, %v1581_v19  ;;  %v15144_v43 = vmax.f32 %v12459_v26, 0.0  ;;  %v15145_v41 = vld [vmem:[#allocation30_spill] sm:$0xff]  ;;  %v15148_v19 = vld [vmem:[#allocation40_spill] sm:$0xff] }
 0x9c8   :  { %v10539_v1 = vpack.c.bf16 %v2257_v3, %v2256_v38  ;;  %v12606_v25 = vmax.f32 %v1755_v21, %v2256_v38  ;;  %v12608_v55 = vmax.f32 %v1085_v52, %v1731_v63  ;;  %v9783_v45 = vpop.f32.mrb[42].mxu1  ;;  %v9710_v42 = vpop.f32.mrb[32].mxu0  ;;  %v15146_v49 = vmax.f32 %v15145_v41, 0.0 }
 0x9c9   :  { %v2259_v47 = vmax.f32 %v9783_v45, 0.0  ;;  %v2227_v39 = vpop.f32.mrb[43].mxu1  ;;  %v1734_v10 = vmax.f32 %v9710_v42, 0.0  ;;  %v1662_v40 = vpop.f32.mrb[33].mxu0  ;;  %v1090_v21 = vmax.f32 %v15147_v61, 0.0  ;;  %v1089_v63 = vmax.f32 %v15148_v19, 0.0 }
 0x9ca   :  { %v1757_v3 = vmax.f32 %v15146_v49, %v15144_v43  ;;  %v2258_v23 = vmax.f32 %v2227_v39, 0.0  ;;  %10540 = vmatprep.subr.bf16.mxu1 %v10539_v1  ;;  %v1733_v52 = vmax.f32 %v1662_v40, 0.0  ;;  %v15150_v27 = vmax.f32 %v15149_v59, 0.0 }
 0x9cb   :  { %v12619_v38 = vmax.f32 %v1758_v17, %v2259_v47  ;;  %v12621_v34 = vmax.f32 %v1088_v51, %v1734_v10  ;;  %10542 = vmatpush3.bf16.msra.mxu1 %v10539_v1  ;;  %v15151_v1 = vmax.f32 %v12471_v58, 0.0  ;;  %v15152_v10 = vld [vmem:[#allocation32_spill] sm:$0xff] }
 0x9cc   :  { %v10543_v20 = vpack.c.bf16 %v2259_v47, %v2258_v23  ;;  %v12624_v48 = vmax.f32 %v1757_v3, %v2258_v23  ;;  %v12626_v45 = vmax.f32 %v1087_v12, %v1733_v52  ;;  %v9786_v26 = vpop.f32.mrb[44].mxu1  ;;  %v9713_v42 = vpop.f32.mrb[34].mxu0  ;;  %v1760_v39 = vmax.f32 %v15150_v27, %v1583_v35  ;;  %v15154_v3 = vld [vmem:[#allocation41_spill] sm:$0xff]  ;;  %v15155_v35 = vld [vmem:[#allocation42_spill] sm:$0xff] }
 0x9cd   :  { %v2261_v40 = vmax.f32 %v9786_v26, 0.0  ;;  %v2237_v17 = vpop.f32.mrb[45].mxu1  ;;  %v1736_v43 = vmax.f32 %v9713_v42, 0.0  ;;  %v1672_v51 = vpop.f32.mrb[35].mxu0  ;;  %v15153_v41 = vmax.f32 %v15152_v10, 0.0  ;;  %v1092_v23 = vmax.f32 %v15154_v3, 0.0 }
 0x9ce   :  { %v2260_v49 = vmax.f32 %v2237_v17, 0.0  ;;  %10544 = vmatprep.subr.bf16.mxu1 %v10543_v20  ;;  %v1735_v12 = vmax.f32 %v1672_v51, 0.0  ;;  %v1091_v61 = vmax.f32 %v15155_v35, 0.0  ;;  %v15156_v27 = vld [vmem:[#allocation33_spill] sm:$0xff] }
 0x9cf   :  { %v1759_v47 = vmax.f32 %v15153_v41, %v15151_v1  ;;  %v12637_v52 = vmax.f32 %v1760_v39, %v2261_v40  ;;  %v12639_v50 = vmax.f32 %v1090_v21, %v1736_v43  ;;  %10546 = vmatpush3.bf16.msra.mxu1 %v10543_v20  ;;  %v15157_v17 = vmax.f32 %v15156_v27, 0.0  ;;  %v15158_v20 = vld [vmem:[#allocation34_spill] sm:$0xff] }
 0x9d0   :  { %v10547_v19 = vpack.c.bf16 %v2261_v40, %v2260_v49  ;;  %v12644_v42 = vmax.f32 %v1089_v63, %v1735_v12  ;;  %v9789_v58 = vpop.f32.mrb[46].mxu1  ;;  %v9716_v59 = vpop.f32.mrb[36].mxu0  ;;  %v15159_v43 = vmax.f32 %v15158_v20, 0.0 }
 0x9d1   :  { %v12642_v26 = vmax.f32 %v1759_v47, %v2260_v49  ;;  %v1762_v51 = vmax.f32 %v15157_v17, %v1585_v18  ;;  %v2263_v1 = vmax.f32 %v9789_v58, 0.0  ;;  %v2247_v39 = vpop.f32.mrb[47].mxu1  ;;  %v1738_v10 = vmax.f32 %v9716_v59, 0.0  ;;  %v1682_v21 = vpop.f32.mrb[37].mxu0  ;;  %v15160_v47 = vld [vmem:[#allocation43_spill] sm:$0xff]  ;;  %v15161_v18 = vld [vmem:[#allocation44_spill] sm:$0xff] }
 0x9d2   :  { %v1761_v40 = vmax.f32 %v15159_v43, %v1584_v28  ;;  %v2262_v41 = vmax.f32 %v2247_v39, 0.0  ;;  %10548 = vmatprep.subr.bf16.mxu1 %v10547_v19  ;;  %v1737_v63 = vmax.f32 %v1682_v21, 0.0  ;;  %v1094_v49 = vmax.f32 %v15160_v47, 0.0  ;;  %v15162_v39 = vld [vmem:[#allocation45_spill] sm:$0xff]  ;;  %v15167_v47 = vld [vmem:[#allocation48_spill] sm:$0xff] }
 0x9d3   :  { %v12655_v12 = vmax.f32 %v1762_v51, %v2263_v1  ;;  %v12657_v57 = vmax.f32 %v1092_v23, %v1738_v10  ;;  %10550 = vmatpush3.bf16.msra.mxu1 %v10547_v19  ;;  %v1093_v3 = vmax.f32 %v15161_v18, 0.0  ;;  %v1096_v21 = vmax.f32 %v15162_v39, 0.0  ;;  %v15163_v23 = vld [vmem:[#allocation46_spill] sm:$0xff] }
 0x9d4   :  { %v10551_v35 = vpack.c.bf16 %v2263_v1, %v2262_v41  ;;  %v12660_v58 = vmax.f32 %v1761_v40, %v2262_v41  ;;  %v12662_v59 = vmax.f32 %v1091_v61, %v1737_v63  ;;  %v9719_v5 = vpop.f32.mrb[38].mxu0  ;;  %v1095_v51 = vmax.f32 %v15163_v23, 0.0  ;;  %v15165_v40 = vld [vmem:[#allocation47_spill] sm:$0xff]  ;;  %v15171_v39 = vld [vmem:[#allocation50_spill] sm:$0xff] }
 0x9d5   :  { %v1740_v27 = vmax.f32 %v9719_v5, 0.0  ;;  %v1692_v28 = vpop.f32.mrb[39].mxu0  ;;  %v1098_v41 = vmax.f32 %v15165_v40, 0.0 }
 0x9d6   :  { %10552 = vmatprep.subr.bf16.mxu1 %v10551_v35  ;;  %v1739_v17 = vmax.f32 %v1692_v28, 0.0 }
 0x9d7   :  { %v12665_v20 = vmax.f32 %v1094_v49, %v1740_v27  ;;  %10554 = vmatpush3.bf16.msra.mxu1 %v10551_v35  ;;  %v1097_v49 = vmax.f32 %v15167_v47, 0.0 }
 0x9d8   :  { %v12668_v19 = vmax.f32 %v1093_v3, %v1739_v17  ;;  %v9722_v10 = vpop.f32.mrb[40].mxu0 }
 0x9d9   :  { %v1742_v1 = vmax.f32 %v9722_v10, 0.0  ;;  %v1702_v43 = vpop.f32.mrb[41].mxu0 }
 0x9da   :  { %9807 = vmatmul.mubr.msk.f32.vlgmr.msra.gmra.mrb[48].mxu1 %vm15164_vm13, %v12187_v9  ;;  %v1741_v61 = vmax.f32 %v1702_v43, 0.0  ;;  %v15169_v9 = vld [vmem:[#allocation49_spill] sm:$0xff]  ;;  %vm15177_vm13 = vcmask 1042432  }
 0x9db   :  { %v12673_v63 = vmax.f32 %v1096_v21, %v1742_v1  ;;  %9809 = vmatprep.mubr.msk.f32.mxu1 %vm15166_vm4, %v12193_v14  ;;  %v1100_v28 = vmax.f32 %v15169_v9, 0.0  ;;  %v1099_v14 = vmax.f32 %v15171_v39, 0.0  ;;  %vm15178_vm4 = vmmov %vm15175_vm1 }
 0x9dc   :  { %v12678_v18 = vmax.f32 %v1095_v51, %v1741_v61  ;;  %v9725_v3 = vpop.f32.mrb[42].mxu0  ;;  %v15176_v61 = vld [vmem:[#allocation26_spill] sm:$0xff] }
 0x9dd   :  { %v1744_v35 = vmax.f32 %v9725_v3, 0.0  ;;  %v1712_v5 = vpop.f32.mrb[43].mxu0 }
 0x9de   :  { %9810 = vmatmul.mubr.msk.f32.gmra.mrb[50].mxu1 %vm15168_vm12, %v12202_v22  ;;  %v1743_v27 = vmax.f32 %v1712_v5, 0.0  ;;  %vm15179_vm12 = vcmask 1045504  }
 0x9df   :  { %v12683_v17 = vmax.f32 %v1098_v41, %v1744_v35  ;;  %9812 = vmatprep.mubr.msk.f32.mxu1 %vm15170_vm10, %v12207_v32  ;;  %vm15180_vm10 = vmmov %vm15175_vm1 }
 0x9e0   :  { %v12688_v21 = vmax.f32 %v1097_v49, %v1743_v27  ;;  %v9728_v23 = vpop.f32.mrb[44].mxu0 }
 0x9e1   :  { %v1746_v51 = vmax.f32 %v9728_v23, 0.0  ;;  %v1722_v10 = vpop.f32.mrb[45].mxu0 }
 0x9e2   :  { %9813 = vmatmul.mubr.msk.f32.gmra.mrb[52].mxu1 %vm15172_vm11, %v12216_v4  ;;  %v1745_v1 = vmax.f32 %v1722_v10, 0.0  ;;  %vm15181_vm11 = vmmov %vm15179_vm12 }
 0x9e3   :  { %v12692_v22 = vmax.f32 %v1100_v28, %v1746_v51  ;;  %9815 = vmatprep.mubr.msk.f32.mxu1 %vm15173_vm14, %v12226_v0  ;;  %v11281_v0 = vld [vmem:[%s15038_s19 + $0x8] sm:$0xff]  ;;  %vm15182_vm14 = vcmask 48128  }
 0x9e4   :  { %v12696_v43 = vmax.f32 %v1099_v14, %v1745_v1 }
 0x9e6   :  { %9816 = vmatmul.mubr.msk.f32.gmra.mrb[54].mxu1 %vm15174_vm15, %v12236_v2  ;;  %vm15183_vm15 = vmmov %vm15175_vm1  ;;  %v11282_v2 = vld [vmem:[%s15038_s19 + $0x10] sm:$0xff] }
 0x9e7   :  { %9818 = vmatprep.mubr.msk.f32.mxu1 %vm15175_vm1, %v12241_v62  ;;  %vm15184_vm1 = vmmov %vm15182_vm14  ;;  %v11284_v62 = vld [vmem:[%s15040_s26] sm:$0xff] }
 0x9e9   :  { %v2643_v32 = vpop.f32.mrb[46].mxu0 }
 0x9ea   :  { %v2647_v40 = vsel %vm15177_vm13, %v2643_v32, %v15176_v61  ;;  %9819 = vmatmul.mubr.msk.f32.gmra.mrb[56].mxu1 %vm15178_vm4, %v12250_v36  ;;  %v9848_v4 = vpop.f32.mrb[47].mxu0  ;;  %vm15185_vm13 = vmmov %vm15178_vm4 }
 0x9eb   :  { %9849 = vmatprep.subr.msk.mxu0 %vm15179_vm12, %v2647_v40  ;;  %9821 = vmatprep.mubr.msk.f32.mxu1 %vm15180_vm10, %v12260_v46  ;;  %v11283_v46 = vld [vmem:[%s15038_s19 + $0x18] sm:$0xff]  ;;  %vm15186_vm4 = vmmov %vm15184_vm1  ;;  %s11361_s19 = smov 96  }
 0x9ec   :  { %9850 = vmatpush3.msk.msra.mxu0 %vm15181_vm11, %v2647_v40  ;;  %vm15187_vm12 = vmmov %vm15180_vm10  ;;  %vm15188_vm10 = vcmask 261120  }
 0x9ed   :  { %9852 = vmatmul.mubr.msk.f32.vlgmr.msra.gmra.mrb[48].mxu0 %vm15182_vm14, %v11281_v0  ;;  %vm15189_vm11 = vmmov %vm15187_vm12 }
 0x9ee   :  { %9822 = vmatmul.mubr.msk.f32.gmra.mrb[58].mxu1 %vm15183_vm15, %v12273_v24  ;;  %9854 = vmatprep.mubr.msk.f32.mxu0 %vm15184_vm1, %v11282_v2  ;;  %vm15190_vm14 = vmmov %vm15189_vm11 }
 0x9ef   :  { %9824 = vmatprep.mubr.msk.f32.mxu1 %vm15185_vm13, %v12279_v8  ;;  %vm15191_vm15 = vmmov %vm15188_vm10 }
 0x9f0   :  { %vm15192_vm1 = vmmov %vm15188_vm10 }
 0x9f1   :  { %9855 = vmatmul.mubr.msk.f32.gmra.mrb[50].mxu0 %vm15186_vm4, %v11283_v46  ;;  %vm15193_vm13 = vmmov %vm15192_vm1 }
 0x9f2   :  { %9825 = vmatmul.mubr.msk.f32.gmra.mrb[60].mxu1 %vm15187_vm12, %v12292_v16  ;;  %9865 = vmatprep.mubr.msk.f32.mxu0 %vm15188_vm10, %v11284_v62  ;;  %vm15194_vm4 = vmmov %vm15192_vm1 }
 0x9f3   :  { %9827 = vmatprep.mubr.msk.f32.mxu1 %vm15189_vm11, %v12302_v29  ;;  %vm15195_vm12 = vmmov %vm15192_vm1 }
 0x9f4   :  { %vm15196_vm10 = vmmov %vm15192_vm1 }
 0x9f5   :  { %vm15197_vm11 = vmmov %vm15192_vm1 }
 0x9f6   :  { %9828 = vmatmul.mubr.msk.f32.gmra.mrb[62].mxu1 %vm15190_vm14, %v12316_v7  ;;  %vm15198_vm14 = vmmov %vm15192_vm1 }
 0xaad   :  { %v9808_v36 = vpop.f32.mrb[48].mxu1 }
 0xaae   :  { %v2410_v41 = vmax.f32 %v9808_v36, 0.0  ;;  %v2330_v47 = vpop.f32.mrb[49].mxu1 }
 0xaaf   :  { %v2409_v49 = vmax.f32 %v2330_v47, 0.0 }
 0xab0   :  { %v12737_v3 = vmax.f32 %v12603_v54, %v2410_v41 }
 0xab1   :  { %v12740_v35 = vmax.f32 %v12608_v55, %v2409_v49  ;;  %v9811_v5 = vpop.f32.mrb[50].mxu1 }
 0xab2   :  { %v2412_v27 = vmax.f32 %v9811_v5, 0.0  ;;  %v2340_v9 = vpop.f32.mrb[51].mxu1 }
 0xab3   :  { %v2411_v28 = vmax.f32 %v2340_v9, 0.0 }
 0xab4   :  { %v12743_v39 = vmax.f32 %v12621_v34, %v2412_v27 }
 0xab5   :  { %v12746_v14 = vmax.f32 %v12626_v45, %v2411_v28  ;;  %v9814_v23 = vpop.f32.mrb[52].mxu1 }
 0xab6   :  { %v2414_v51 = vmax.f32 %v9814_v23, 0.0  ;;  %v2350_v10 = vpop.f32.mrb[53].mxu1 }
 0xab7   :  { %v2413_v1 = vmax.f32 %v2350_v10, 0.0 }
 0xab8   :  { %v12749_v54 = vmax.f32 %v12639_v50, %v2414_v51 }
 0xab9   :  { %v12752_v55 = vmax.f32 %v12644_v42, %v2413_v1  ;;  %v9817_v32 = vpop.f32.mrb[54].mxu1 }
 0xaba   :  { %v2416_v61 = vmax.f32 %v9817_v32, 0.0  ;;  %v2360_v40 = vpop.f32.mrb[55].mxu1 }
 0xabb   :  { %v2415_v4 = vmax.f32 %v2360_v40, 0.0 }
 0xabc   :  { %v12755_v34 = vmax.f32 %v12657_v57, %v2416_v61 }
 0xabd   :  { %v12758_v45 = vmax.f32 %v12662_v59, %v2415_v4  ;;  %v9820_v0 = vpop.f32.mrb[56].mxu1 }
 0xabe   :  { %v2418_v2 = vmax.f32 %v9820_v0, 0.0  ;;  %v2370_v46 = vpop.f32.mrb[57].mxu1 }
 0xabf   :  { %v2417_v62 = vmax.f32 %v2370_v46, 0.0 }
 0xac0   :  { %v12761_v50 = vmax.f32 %v12665_v20, %v2418_v2  ;;  %v9853_v36 = vpop.f32.mrb[48].mxu0 }
 0xac1   :  { %v12764_v42 = vmax.f32 %v12668_v19, %v2417_v62  ;;  %v2737_v41 = vmax.f32 %v9853_v36, 0.0  ;;  %v9823_v47 = vpop.f32.mrb[58].mxu1  ;;  %v2717_v49 = vpop.f32.mrb[49].mxu0 }
 0xac2   :  { %v2420_v5 = vmax.f32 %v9823_v47, 0.0  ;;  %v2736_v57 = vmax.f32 %v2717_v49, 0.0  ;;  %v2380_v27 = vpop.f32.mrb[59].mxu1 }
 0xac3   :  { %v12767_v59 = vmax.f32 %v12410_v13, %v2737_v41  ;;  %v2419_v9 = vmax.f32 %v2380_v27, 0.0 }
 0xac4   :  { %v12770_v28 = vmax.f32 %v12673_v63, %v2420_v5  ;;  %v10571_v23 = vpack.c.bf16 %v2737_v41, %v2736_v57  ;;  %v12773_v20 = vmax.f32 %v12412_v33, %v2736_v57  ;;  %v9856_v51 = vpop.f32.mrb[50].mxu0 }
 0xac5   :  { %v12776_v19 = vmax.f32 %v12678_v18, %v2419_v9  ;;  %v2739_v10 = vmax.f32 %v9856_v51, 0.0  ;;  %v9826_v1 = vpop.f32.mrb[60].mxu1  ;;  %v2727_v32 = vpop.f32.mrb[51].mxu0 }
 0xac6   :  { %v10605_v61 = vpack.c.bf16 %v12767_v59, %v12773_v20  ;;  %v2422_v13 = vmax.f32 %v9826_v1, 0.0  ;;  %v2738_v40 = vmax.f32 %v2727_v32, 0.0  ;;  %v2390_v4 = vpop.f32.mrb[61].mxu1  ;;  %10572 = vmatprep.subr.bf16.mxu0 %v10571_v23 }
 0xac7   :  { %v12781_v63 = vmax.f32 %v12420_v31, %v2739_v10  ;;  %v2421_v0 = vmax.f32 %v2390_v4, 0.0  ;;  %10574 = vmatpush3.bf16.msra.mxu0 %v10571_v23 }
 0xac8   :  { %v12784_v33 = vmax.f32 %v12683_v17, %v2422_v13  ;;  %v10575_v18 = vpack.c.bf16 %v2739_v10, %v2738_v40  ;;  %v12787_v2 = vmax.f32 %v12424_v60, %v2738_v40  ;;  %v11285_v60 = vld [vmem:[%s15040_s26 + $0x8] sm:$0xff] }
 0xac9   :  { %v12790_v46 = vmax.f32 %v12688_v21, %v2421_v0  ;;  %v9829_v62 = vpop.f32.mrb[62].mxu1  ;;  %v11286_v21 = vld [vmem:[%s15040_s26 + $0x10] sm:$0xff] }
 0xaca   :  { %v10609_v36 = vpack.c.bf16 %v12781_v63, %v12787_v2  ;;  %v2424_v41 = vmax.f32 %v9829_v62, 0.0  ;;  %v2400_v47 = vpop.f32.mrb[63].mxu1  ;;  %10576 = vmatprep.subr.bf16.mxu0 %v10575_v18  ;;  %v11289_v62 = vld [vmem:[%s14898_s3 + $0x8] sm:$0xff] }
 0xacb   :  { %v2423_v31 = vmax.f32 %v2400_v47, 0.0  ;;  %10578 = vmatpush3.bf16.msra.mxu0 %v10575_v18  ;;  %v11293_v47 = vld [vmem:[%s14898_s3 + $0x28] sm:$0xff] }
 0xacc   :  { %v12795_v49 = vmax.f32 %v12692_v22, %v2424_v41  ;;  %v11287_v22 = vld [vmem:[%s15040_s26 + $0x18] sm:$0xff]  ;;  %v11292_v41 = vld [vmem:[%s14898_s3 + $0x20] sm:$0xff] }
 0xacd   :  { %v12798_v17 = vmax.f32 %v12696_v43, %v2423_v31  ;;  %v11288_v43 = vld [vmem:[%s14898_s3] sm:$0xff]  ;;  %v11294_v31 = vld [vmem:[%s14898_s3 + $0x30] sm:$0xff] }
 0xace   :  { %9866 = vmatmul.mubr.msk.f32.vlgmr.msra.gmra.mrb[52].mxu0 %vm15191_vm15, %v11285_v60  ;;  %vm15199_vm15 = vmmov %vm15192_vm1  ;;  %v11295_v60 = vld [vmem:[%s14898_s3 + $0x38] sm:$0xff] }
 0xacf   :  { %9868 = vmatprep.mubr.msk.f32.mxu0 %vm15192_vm1, %v11286_v21  ;;  %v11296_v21 = vld [vmem:[%s14899_s4] sm:$0xff] }
 0xad2   :  { %9869 = vmatmul.mubr.msk.f32.gmra.mrb[54].mxu0 %vm15193_vm13, %v11287_v22  ;;  %vm15200_vm13 = vmmov %vm15192_vm1 }
 0xad3   :  { %9879 = vmatprep.mubr.msk.f32.mxu0 %vm15194_vm4, %v11288_v43  ;;  %vm15201_vm4 = vcmask 523264  }
 0xba1   :  { %v9867_v5 = vpop.f32.mrb[52].mxu0 }
 0xba2   :  { %v2826_v57 = vmax.f32 %v9867_v5, 0.0  ;;  %v2806_v27 = vpop.f32.mrb[53].mxu0 }
 0xba3   :  { %v2825_v9 = vmax.f32 %v2806_v27, 0.0 }
 0xba4   :  { %v12817_v23 = vmax.f32 %v12478_v44, %v2826_v57 }
 0xba5   :  { %v10579_v51 = vpack.c.bf16 %v2826_v57, %v2825_v9  ;;  %v12820_v10 = vmax.f32 %v12484_v56, %v2825_v9  ;;  %v9870_v1 = vpop.f32.mrb[54].mxu0 }
 0xba6   :  { %v2828_v32 = vmax.f32 %v9870_v1, 0.0  ;;  %v2816_v13 = vpop.f32.mrb[55].mxu0 }
 0xba7   :  { %v10613_v40 = vpack.c.bf16 %v12817_v23, %v12820_v10  ;;  %v2827_v4 = vmax.f32 %v2816_v13, 0.0  ;;  %10580 = vmatprep.subr.bf16.mxu0 %v10579_v51 }
 0xba8   :  { %v12825_v0 = vmax.f32 %v12500_v6, %v2828_v32  ;;  %10582 = vmatpush3.bf16.msra.mxu0 %v10579_v51  ;;  %v11290_v6 = vld [vmem:[%s14898_s3 + $0x10] sm:$0xff] }
 0xba9   :  { %v10583_v18 = vpack.c.bf16 %v2828_v32, %v2827_v4  ;;  %v12828_v44 = vmax.f32 %v12506_v53, %v2827_v4  ;;  %v11291_v53 = vld [vmem:[%s14898_s3 + $0x18] sm:$0xff] }
 0xbab   :  { %v10617_v56 = vpack.c.bf16 %v12825_v0, %v12828_v44  ;;  %10584 = vmatprep.subr.bf16.mxu0 %v10583_v18 }
 0xbac   :  { %10586 = vmatpush3.bf16.msra.mxu0 %v10583_v18 }
 0xbaf   :  { %9880 = vmatmul.mubr.msk.f32.vlgmr.msra.gmra.mrb[56].mxu0 %vm15195_vm12, %v11289_v62  ;;  %vm15202_vm12 = vmmov %vm15201_vm4 }
 0xbb0   :  { %9882 = vmatprep.mubr.msk.f32.mxu0 %vm15196_vm10, %v11290_v6  ;;  %vm15203_vm10 = vmmov %vm15201_vm4 }
 0xbb3   :  { %9883 = vmatmul.mubr.msk.f32.gmra.mrb[58].mxu0 %vm15197_vm11, %v11291_v53  ;;  %vm15204_vm11 = vmmov %vm15201_vm4 }
 0xbb4   :  { %9885 = vmatprep.mubr.msk.f32.mxu0 %vm15198_vm14, %v11292_v41  ;;  %vm15205_vm14 = vmmov %vm15201_vm4 }
 0xbb7   :  { %9886 = vmatmul.mubr.msk.f32.gmra.mrb[60].mxu0 %vm15199_vm15, %v11293_v47  ;;  %vm15206_vm15 = vmmov %vm15201_vm4 }
 0xbb8   :  { %9888 = vmatprep.mubr.msk.f32.mxu0 %vm15192_vm1, %v11294_v31  ;;  %vm15207_vm1 = vmmov %vm15201_vm4 }
 0xbbb   :  { %9889 = vmatmul.mubr.msk.f32.gmra.mrb[62].mxu0 %vm15200_vm13, %v11295_v60  ;;  %vm15208_vm13 = vmmov %vm15207_vm1 }
 0xbbc   :  { %9907 = vmatprep.mubr.msk.f32.mxu0 %vm15201_vm4, %v11296_v21  ;;  %vm15209_vm4 = vmmov %vm15207_vm1 }
 0xc82   :  { %v9881_v22 = vpop.f32.mrb[56].mxu0 }
 0xc83   :  { %v2935_v43 = vmax.f32 %v9881_v22, 0.0  ;;  %v2895_v5 = vpop.f32.mrb[57].mxu0 }
 0xc84   :  { %v2934_v57 = vmax.f32 %v2895_v5, 0.0 }
 0xc85   :  { %v12865_v27 = vmax.f32 %v12601_v30, %v2935_v43 }
 0xc86   :  { %v10587_v9 = vpack.c.bf16 %v2935_v43, %v2934_v57  ;;  %v12868_v51 = vmax.f32 %v12606_v25, %v2934_v57  ;;  %v9884_v1 = vpop.f32.mrb[58].mxu0 }
 0xc87   :  { %v2937_v32 = vmax.f32 %v9884_v1, 0.0  ;;  %v2905_v13 = vpop.f32.mrb[59].mxu0 }
 0xc88   :  { %v10621_v4 = vpack.c.bf16 %v12865_v27, %v12868_v51  ;;  %v2936_v18 = vmax.f32 %v2905_v13, 0.0  ;;  %10588 = vmatprep.subr.bf16.mxu0 %v10587_v9  ;;  %v11300_v13 = vld [vmem:[%s14899_s4 + $0x20] sm:$0xff]  ;;  %v3140_v51 = vld [vmem:[%s14900_s5 + $0x28] sm:$0xff] }
 0xc89   :  { %v12873_v62 = vmax.f32 %v12619_v38, %v2937_v32  ;;  %10590 = vmatpush3.bf16.msra.mxu0 %v10587_v9 }
 0xc8a   :  { %v10591_v6 = vpack.c.bf16 %v2937_v32, %v2936_v18  ;;  %v12876_v30 = vmax.f32 %v12624_v48, %v2936_v18  ;;  %v9887_v53 = vpop.f32.mrb[60].mxu0  ;;  %v11297_v32 = vld [vmem:[%s14899_s4 + $0x8] sm:$0xff] }
 0xc8b   :  { %v2939_v41 = vmax.f32 %v9887_v53, 0.0  ;;  %v2915_v25 = vpop.f32.mrb[61].mxu0  ;;  %v11301_v18 = vld [vmem:[%s14899_s4 + $0x28] sm:$0xff]  ;;  %v11303_v53 = vld [vmem:[%s14899_s4 + $0x38] sm:$0xff] }
 0xc8c   :  { %v10625_v47 = vpack.c.bf16 %v12873_v62, %v12876_v30  ;;  %v2938_v31 = vmax.f32 %v2915_v25, 0.0  ;;  %10592 = vmatprep.subr.bf16.mxu0 %v10591_v6  ;;  %v11305_v25 = vld [vmem:[%s14899_s4 + $0x48] sm:$0xff]  ;;  %v3142_v62 = vld [vmem:[%s14900_s5 + $0x38] sm:$0xff]  ;;  %v3141_v30 = vld [vmem:[%s14900_s5 + $0x30] sm:$0xff] }
 0xc8d   :  { %v12881_v60 = vmax.f32 %v12637_v52, %v2939_v41  ;;  %10594 = vmatpush3.bf16.msra.mxu0 %v10591_v6  ;;  %v11302_v6 = vld [vmem:[%s14899_s4 + $0x30] sm:$0xff] }
 0xc8e   :  { %v10595_v21 = vpack.c.bf16 %v2939_v41, %v2938_v31  ;;  %v12884_v38 = vmax.f32 %v12642_v26, %v2938_v31  ;;  %v9890_v22 = vpop.f32.mrb[62].mxu0  ;;  %v11304_v41 = vld [vmem:[%s14899_s4 + $0x40] sm:$0xff]  ;;  %v11306_v31 = vld [vmem:[%s14899_s4 + $0x50] sm:$0xff] }
 0xc8f   :  { %v2941_v43 = vmax.f32 %v9890_v22, 0.0  ;;  %v2925_v48 = vpop.f32.mrb[63].mxu0 }
 0xc90   :  { %v10629_v5 = vpack.c.bf16 %v12881_v60, %v12884_v38  ;;  %v2940_v57 = vmax.f32 %v2925_v48, 0.0  ;;  %10596 = vmatprep.subr.bf16.mxu0 %v10595_v21  ;;  %v3244_v60 = vld [vmem:[%s14902_s7] sm:$0xff]  ;;  %v3245_v38 = vld [vmem:[%s14902_s7 + $0x8] sm:$0xff] }
 0xc91   :  { %v12889_v9 = vmax.f32 %v12655_v12, %v2941_v43  ;;  %10598 = vmatpush3.bf16.msra.mxu0 %v10595_v21  ;;  %v11298_v12 = vld [vmem:[%s14899_s4 + $0x10] sm:$0xff]  ;;  %v3136_v21 = vld [vmem:[%s14900_s5 + $0x8] sm:$0xff] }
 0xc92   :  { %v10599_v1 = vpack.c.bf16 %v2941_v43, %v2940_v57  ;;  %v12892_v52 = vmax.f32 %v12660_v58, %v2940_v57  ;;  %v11299_v58 = vld [vmem:[%s14899_s4 + $0x18] sm:$0xff]  ;;  %3207 = vmatprep.mubr.f32.mxu1 %v3136_v21 }
 0xc94   :  { %v10633_v26 = vpack.c.bf16 %v12889_v9, %v12892_v52  ;;  %10600 = vmatprep.subr.bf16.mxu0 %v10599_v1  ;;  %v3248_v9 = vld [vmem:[%s14902_s7 + $0x20] sm:$0xff]  ;;  %v3249_v52 = vld [vmem:[%s14902_s7 + $0x28] sm:$0xff] }
 0xc95   :  { %10602 = vmatpush3.bf16.msra.mxu0 %v10599_v1 }
 0xc98   :  { %9908 = vmatmul.mubr.msk.f32.vlgmr.msra.gmra.mrb[64].mxu0 %vm15202_vm12, %v11297_v32  ;;  %vm15210_vm12 = vmmov %vm15207_vm1 }
 0xc99   :  { %9910 = vmatprep.mubr.msk.f32.mxu0 %vm15203_vm10, %v11298_v12  ;;  %vm15211_vm10 = vmmov %vm15207_vm1 }
 0xc9c   :  { %9911 = vmatmul.mubr.msk.f32.gmra.mrb[66].mxu0 %vm15204_vm11, %v11299_v58  ;;  %vm15212_vm11 = vmmov %vm15207_vm1 }
 0xc9d   :  { %9913 = vmatprep.mubr.msk.f32.mxu0 %vm15205_vm14, %v11300_v13  ;;  %vm15213_vm14 = vmmov %vm15207_vm1 }
 0xca0   :  { %9914 = vmatmul.mubr.msk.f32.gmra.mrb[68].mxu0 %vm15206_vm15, %v11301_v18  ;;  %vm15214_vm15 = vmmov %vm15207_vm1 }
 0xca1   :  { %9916 = vmatprep.mubr.msk.f32.mxu0 %vm15207_vm1, %v11302_v6 }
 0xca4   :  { %9917 = vmatmul.mubr.msk.f32.gmra.mrb[70].mxu0 %vm15208_vm13, %v11303_v53  ;;  %vm15215_vm13 = vmmov %vm15207_vm1 }
 0xca5   :  { %9919 = vmatprep.mubr.msk.f32.mxu0 %vm15209_vm4, %v11304_v41  ;;  %vm15216_vm4 = vcmask 261120  }
 0xca8   :  { %9920 = vmatmul.mubr.msk.f32.gmra.mrb[72].mxu0 %vm15210_vm12, %v11305_v25  ;;  %vm15217_vm12 = vmmov %vm15216_vm4 }
 0xca9   :  { %9922 = vmatprep.mubr.msk.f32.mxu0 %vm15211_vm10, %v11306_v31  ;;  %vm15218_vm10 = vmmov %vm15216_vm4 }
 0xcac   :  { %9923 = vmatmul.mubr.msk.f32.gmra.mrb[74].mxu0 %vm15212_vm11, %v12273_v24  ;;  %vm15219_vm11 = vmmov %vm15216_vm4 }
 0xcad   :  { %9925 = vmatprep.mubr.msk.f32.mxu0 %vm15213_vm14, %v12279_v8  ;;  %vm15220_vm14 = vmmov %vm15216_vm4 }
 0xcb0   :  { %9926 = vmatmul.mubr.msk.f32.gmra.mrb[76].mxu0 %vm15214_vm15, %v12292_v16  ;;  %vm15221_vm15 = vmmov %vm15216_vm4 }
 0xcb1   :  { %9928 = vmatprep.mubr.msk.f32.mxu0 %vm15207_vm1, %v12302_v29  ;;  %vm3509_vm1 = vcmask 64512  }
 0xcb4   :  { %9929 = vmatmul.mubr.msk.f32.gmra.mrb[78].mxu0 %vm15215_vm13, %v12316_v7  ;;  %vm15222_vm13 = vmmov %vm15216_vm4 }
 0xd6b   :  { %v9909_v22 = vpop.f32.mrb[64].mxu0 }
 0xd6c   :  { %v3088_v43 = vmax.f32 %v9909_v22, 0.0  ;;  %v3008_v24 = vpop.f32.mrb[65].mxu0 }
 0xd6d   :  { %v3087_v48 = vmax.f32 %v3008_v24, 0.0 }
 0xd6e   :  { %v3120_v8 = vmax.f32 %v12737_v3, %v3088_v43 }
 0xd6f   :  { %v3119_v57 = vmax.f32 %v12740_v35, %v3087_v48  ;;  %v9912_v16 = vpop.f32.mrb[66].mxu0 }
 0xd70   :  { %v3090_v1 = vmax.f32 %v9912_v16, 0.0  ;;  %v3018_v32 = vpop.f32.mrb[67].mxu0 }
 0xd71   :  { %v3089_v29 = vmax.f32 %v3018_v32, 0.0  ;;  %v10603_v12 = vpack.c.bf16 %v3120_v8, %v3119_v57 }
 0xd72   :  { %v3122_v7 = vmax.f32 %v12743_v39, %v3090_v1 }
 0xd73   :  { %v3121_v58 = vmax.f32 %v12746_v14, %v3089_v29  ;;  %v9915_v13 = vpop.f32.mrb[68].mxu0  ;;  %10604 = vmatprep.subr.bf16.mxu1 %v10603_v12 }
 0xd74   :  { %v3092_v18 = vmax.f32 %v9915_v13, 0.0  ;;  %v3028_v6 = vpop.f32.mrb[69].mxu0  ;;  %10606 = vmatpush3.bf16.msra.mxu1 %v10605_v61 }
 0xd75   :  { %v3091_v3 = vmax.f32 %v3028_v6, 0.0  ;;  %v10607_v53 = vpack.c.bf16 %v3122_v7, %v3121_v58 }
 0xd76   :  { %v3124_v35 = vmax.f32 %v12749_v54, %v3092_v18 }
 0xd77   :  { %v3123_v41 = vmax.f32 %v12752_v55, %v3091_v3  ;;  %v9918_v25 = vpop.f32.mrb[70].mxu0  ;;  %10608 = vmatprep.subr.bf16.mxu1 %v10607_v53 }
 0xd78   :  { %v3094_v31 = vmax.f32 %v9918_v25, 0.0  ;;  %v3038_v39 = vpop.f32.mrb[71].mxu0  ;;  %10610 = vmatpush3.bf16.msra.mxu1 %v10609_v36 }
 0xd79   :  { %v3093_v14 = vmax.f32 %v3038_v39, 0.0  ;;  %v10611_v21 = vpack.c.bf16 %v3124_v35, %v3123_v41 }
 0xd7a   :  { %v3126_v22 = vmax.f32 %v12755_v34, %v3094_v31 }
 0xd7b   :  { %v3125_v59 = vmax.f32 %v12758_v45, %v3093_v14  ;;  %v9921_v20 = vpop.f32.mrb[72].mxu0  ;;  %10612 = vmatprep.subr.bf16.mxu1 %v10611_v21 }
 0xd7c   :  { %v3096_v61 = vmax.f32 %v9921_v20, 0.0  ;;  %v3048_v54 = vpop.f32.mrb[73].mxu0  ;;  %10614 = vmatpush3.bf16.msra.mxu1 %v10613_v40  ;;  %v3234_v20 = vld [vmem:[%s14901_s6 + $0x10] sm:$0xff] }
 0xd7d   :  { %v3095_v55 = vmax.f32 %v3048_v54, 0.0  ;;  %v10615_v43 = vpack.c.bf16 %v3126_v22, %v3125_v59  ;;  %v3233_v59 = vld [vmem:[%s14901_s6 + $0x8] sm:$0xff]  ;;  %v3236_v54 = vld [vmem:[%s14901_s6 + $0x20] sm:$0xff] }
 0xd7e   :  { %v3128_v24 = vmax.f32 %v12761_v50, %v3096_v61  ;;  %v3235_v61 = vld [vmem:[%s14901_s6 + $0x18] sm:$0xff] }
 0xd7f   :  { %v3127_v63 = vmax.f32 %v12764_v42, %v3095_v55  ;;  %v9924_v2 = vpop.f32.mrb[74].mxu0  ;;  %10616 = vmatprep.subr.bf16.mxu1 %v10615_v43  ;;  %v3237_v55 = vld [vmem:[%s14901_s6 + $0x28] sm:$0xff] }
 0xd80   :  { %v3098_v36 = vmax.f32 %v9924_v2, 0.0  ;;  %v3058_v34 = vpop.f32.mrb[75].mxu0  ;;  %10618 = vmatpush3.bf16.msra.mxu1 %v10617_v56 }
 0xd81   :  { %v3097_v45 = vmax.f32 %v3058_v34, 0.0  ;;  %v10619_v48 = vpack.c.bf16 %v3128_v24, %v3127_v63 }
 0xd82   :  { %v3130_v8 = vmax.f32 %v12770_v28, %v3098_v36 }
 0xd83   :  { %v3129_v23 = vmax.f32 %v12776_v19, %v3097_v45  ;;  %v9927_v10 = vpop.f32.mrb[76].mxu0  ;;  %10620 = vmatprep.subr.bf16.mxu1 %v10619_v48 }
 0xd84   :  { %v3100_v40 = vmax.f32 %v9927_v10, 0.0  ;;  %v3068_v50 = vpop.f32.mrb[77].mxu0  ;;  %10622 = vmatpush3.bf16.msra.mxu1 %v10621_v4  ;;  %v3139_v4 = vld [vmem:[%s14900_s5 + $0x20] sm:$0xff] }
 0xd85   :  { %v3099_v42 = vmax.f32 %v3068_v50, 0.0  ;;  %v10623_v57 = vpack.c.bf16 %v3130_v8, %v3129_v23 }
 0xd86   :  { %v3132_v16 = vmax.f32 %v12784_v33, %v3100_v40 }
 0xd87   :  { %v3131_v0 = vmax.f32 %v12790_v46, %v3099_v42  ;;  %v9930_v44 = vpop.f32.mrb[78].mxu0  ;;  %10624 = vmatprep.subr.bf16.mxu1 %v10623_v57  ;;  %v3135_v46 = vld [vmem:[%s14900_s5] sm:$0xff] }
 0xd88   :  { %v3102_v56 = vmax.f32 %v9930_v44, 0.0  ;;  %v3078_v28 = vpop.f32.mrb[79].mxu0  ;;  %10626 = vmatpush3.bf16.msra.mxu1 %v10625_v47  ;;  %v3232_v47 = vld [vmem:[%s14901_s6] sm:$0xff] }
 0xd89   :  { %v3101_v19 = vmax.f32 %v3078_v28, 0.0  ;;  %v10627_v1 = vpack.c.bf16 %v3132_v16, %v3131_v0  ;;  %9939 = vmatprep.mubr.msk.f32.mxu0 %vm15216_vm4, %v3232_v47  ;;  %v3240_v47 = vld [vmem:[%s14901_s6 + $0x40] sm:$0xff] }
 0xd8a   :  { %v3134_v32 = vmax.f32 %v12795_v49, %v3102_v56  ;;  %v3138_v49 = vld [vmem:[%s14900_s5 + $0x18] sm:$0xff] }
 0xd8b   :  { %v3133_v27 = vmax.f32 %v12798_v17, %v3101_v19  ;;  %10628 = vmatprep.subr.bf16.mxu1 %v10627_v1  ;;  %v3137_v17 = vld [vmem:[%s14900_s5 + $0x10] sm:$0xff]  ;;  %s11363_s5 = smov [#allocation2]  }
 0xd8c   :  { %10630 = vmatpush3.bf16.msra.mxu1 %v10629_v5  ;;  %v11358_v5 = vmov 0  }
 0xd8d   :  { %v10631_v33 = vpack.c.bf16 %v3134_v32, %v3133_v27  ;;  %10897 = vset.pattern.permute.xlu1 %v11358_v5  ;;  %10898 = vset.pattern.permute.xlu0 %v11358_v5 }
 0xd8e   :  { %3258 = vperm.xlu1 %10897, %v3244_v60   ;;  %3263 = vperm.xlu0 %10898, %v3245_v38   ;;  %v3241_v60 = vld [vmem:[%s14901_s6 + $0x48] sm:$0xff] }
 0xd8f   :  { %10632 = vmatprep.subr.bf16.mxu1 %v10631_v33 }
 0xd90   :  { %10634 = vmatpush3.bf16.msra.mxu1 %v10633_v26 }
 0xd92   :  { %3278 = vperm.xlu1 %10897, %v3248_v9  }
 0xd93   :  { %3208 = vmatmul.mubr.f32.vlgmr.msra.gmra.mrb[64].mxu1 %v3135_v46 }
 0xd94   :  { %3212 = vmatprep.mubr.f32.mxu1 %v3138_v49 }
 0xd96   :  { %3283 = vperm.xlu1 %10897, %v3249_v52  }
 0xd97   :  { %3213 = vmatmul.mubr.f32.gmra.mrb[66].mxu1 %v3137_v17 }
 0xd98   :  { %3217 = vmatprep.mubr.f32.mxu1 %v3140_v51 }
 0xd9b   :  { %3218 = vmatmul.mubr.f32.gmra.mrb[68].mxu1 %v3139_v4 }
 0xd9c   :  { %3222 = vmatprep.mubr.f32.mxu1 %v3142_v62  ;;  %v3238_v62 = vld [vmem:[%s14901_s6 + $0x30] sm:$0xff] }
 0xd9f   :  { %3223 = vmatmul.mubr.f32.gmra.mrb[70].mxu1 %v3141_v30  ;;  %v3239_v30 = vld [vmem:[%s14901_s6 + $0x38] sm:$0xff] }
 0xe0d   :  { %v3264_v43 = vpop.permute.xlu0 %3263  ;;  %v3259_v24 = vpop.permute.xlu1 %3258 }
 0xe11   :  { %v3279_v8 = vpop.permute.xlu1 %3278 }
 0xe15   :  { %v3284_v50 = vpop.permute.xlu1 %3283 }
 0xe66   :  { %v9233_v26 = vpop.f32.mrb[64].mxu1 }
 0xe67   :  { %v9234_v29 = vpop.f32.mrb[65].mxu1 }
 0xe68   :  { %v13026_v12 = vadd.f32 %v9234_v29, %v9233_v26 }
 0xe6a   :  { %v9236_v7 = vpop.f32.mrb[66].mxu1  ;;  %v3228_v18 = vmax.f32 %v13026_v12, 0.0 }
 0xe6b   :  { %v9237_v58 = vpop.f32.mrb[67].mxu1 }
 0xe6c   :  { %v13028_v13 = vadd.f32 %v9237_v58, %v9236_v7 }
 0xe6e   :  { %v3229_v6 = vmax.f32 %v13028_v13, 0.0  ;;  %v9239_v3 = vpop.f32.mrb[68].mxu1 }
 0xe6f   :  { %v9240_v53 = vpop.f32.mrb[69].mxu1 }
 0xe70   :  { %v13036_v35 = vpack.c.bf16 %v3229_v6, %v3228_v18  ;;  %v13038_v41 = vadd.f32 %v9240_v53, %v9239_v3 }
 0xe72   :  { %v9242_v25 = vpop.f32.mrb[70].mxu1  ;;  %10636 = vmatprep.subr.bf16.mxu0 %v13036_v35  ;;  %v3230_v14 = vmax.f32 %v13038_v41, 0.0  ;;  %v8801_v41 = vld [vmem:[%s14901_s6 + $0x78] sm:$0xff] }
 0xe73   :  { %v9243_v31 = vpop.f32.mrb[71].mxu1  ;;  %10638 = vmatpush3.bf16.msra.mxu0 %v13036_v35 }
 0xe74   :  { %v13042_v39 = vadd.f32 %v9243_v31, %v9242_v25 }
 0xe76   :  { %v3231_v21 = vmax.f32 %v13042_v39, 0.0  ;;  %v8802_v39 = vld [vmem:[%s14901_s6 + $0x80] sm:$0xff] }
 0xe78   :  { %v13050_v22 = vpack.c.bf16 %v3231_v21, %v3230_v14 }
 0xe7a   :  { %10640 = vmatprep.subr.bf16.mxu0 %v13050_v22 }
 0xe7b   :  { %10642 = vmatpush3.bf16.msra.mxu0 %v13050_v22 }
 0xe7c   :  { %10643 = vmatprep.subr.bf16.mxu0 %v15042_v37 }
 0xe7e   :  { %9940 = vmatmul.mubr.msk.f32.vlgmr.msra.gmra.mrb[80].mxu0 %vm15217_vm12, %v3233_v59  ;;  %vm15223_vm12 = vmmov %vm15216_vm4 }
 0xe7f   :  { %9942 = vmatprep.mubr.msk.f32.mxu0 %vm15218_vm10, %v3234_v20  ;;  %vm15224_vm10 = vmmov %vm15216_vm4 }
 0xe82   :  { %9943 = vmatmul.mubr.msk.f32.gmra.mrb[82].mxu0 %vm15219_vm11, %v3235_v61  ;;  %vm15227_vm11 = vcmask 523264  }
 0xe83   :  { %9945 = vmatprep.mubr.msk.f32.mxu0 %vm15220_vm14, %v3236_v54  ;;  %vm15228_vm14 = vmmov %vm15227_vm11 }
 0xe86   :  { %9946 = vmatmul.mubr.msk.f32.gmra.mrb[84].mxu0 %vm15221_vm15, %v3237_v55  ;;  %vm15230_vm15 = vmmov %vm15227_vm11 }
 0xe87   :  { %9948 = vmatprep.mubr.msk.f32.mxu0 %vm15222_vm13, %v3238_v62  ;;  %vm15232_vm13 = vmmov %vm15227_vm11 }
 0xe8a   :  { %9949 = vmatmul.mubr.msk.f32.gmra.mrb[86].mxu0 %vm15216_vm4, %v3239_v30  ;;  %vm15234_vm4 = vmmov %vm15227_vm11 }
 0xe8b   :  { %9951 = vmatprep.mubr.msk.f32.mxu0 %vm15223_vm12, %v3240_v47  ;;  %vm15236_vm12 = vmmov %vm15234_vm4 }
 0xe8e   :  { %9952 = vmatmul.mubr.msk.f32.gmra.mrb[88].mxu0 %vm15224_vm10, %v3241_v60 }
 0xf51   :  { %v9941_v63 = vpop.f32.mrb[80].mxu0 }
 0xf52   :  { %v3418_v2 = vpop.f32.mrb[81].mxu0  ;;  %v3424_v36 = vadd.f32 %v9941_v63, %v3264_v43 }
 0xf53   :  { %v3419_v34 = vadd.f32 %v3418_v2, %v3259_v24 }
 0xf54   :  { %3840 = vxpose.xlu0.b32.start.end [1/1] (short) (narrow) %v3424_v36, 64 }
 0xf55   :  { %3477 = vxpose.xlu1.b32.start.end [1/1] (short) (narrow) %v3419_v34, 64  ;;  %v13075_v45 = vpop.f32.mrb[82].mxu0 }
 0xf56   :  { %v13077_v48 = vpop.f32.mrb[83].mxu0 }
 0xf59   :  { %v9947_v23 = vpop.f32.mrb[84].mxu0 }
 0xf5a   :  { %v3438_v10 = vpop.f32.mrb[85].mxu0  ;;  %v3444_v42 = vadd.f32 %v9947_v23, %v3284_v50 }
 0xf5b   :  { %v3439_v40 = vadd.f32 %v3438_v10, %v3279_v8 }
 0xf5d   :  { %9957 = vmatprep.subr.mxu1 %v3439_v40 }
 0xf5e   :  { %9958 = vmatpush3.msra.mxu1 %v3439_v40 }
 0xf5f   :  { %9990 = vmatprep.subr.mxu1 %v3444_v42 }
 0xfd4   :  { %v3856_v16 = vpop.trf.xlu0 }
 0xfd5   :  { %v3493_v57 = vpop.trf.xlu1 }
 0xfd6   :  { %9959 = vmatprep.mubr.msk.f32.mxu1 %vm3509_vm1, %v3493_v57 }
 0xfd8   :  { %v3857_v44 = vpop.trf.xlu0 }
 0xfd9   :  { %v3494_v0 = vpop.trf.xlu1 }
 0xfda   :  { %9960 = vmatmul.mubr.msk.f32.vlgmr.msra.gmra.mrb[72].mxu1 %vm3509_vm1, %v3494_v0 }
 0xfdb   :  { %9991 = vmatpush3.msra.mxu1 %v3444_v42 }
 0xfdc   :  { %10659 = vmatprep.subr.bf16.mxu1 %v15042_v37  ;;  %v3858_v19 = vpop.trf.xlu0 }
 0xfdd   :  { %v3495_v56 = vpop.trf.xlu1 }
 0xfde   :  { %9962 = vmatprep.mubr.msk.f32.mxu1 %vm3509_vm1, %v3495_v56 }
 0xfe0   :  { %v3859_v32 = vpop.trf.xlu0 }
 0xfe1   :  { %v3496_v28 = vpop.trf.xlu1 }
 0xfe2   :  { %9963 = vmatmul.mubr.msk.f32.gmra.mrb[74].mxu1 %vm3509_vm1, %v3496_v28  ;;  %v15237_v28 = vld [vmem:[#allocation25_spill] sm:$0xff] }
 0xfe3   :  { %vm15238_vm10 = vnez %v15237_v28 }
 0xfe4   :  { %v3860_v46 = vpop.trf.xlu0 }
 0xfe5   :  { %v3497_v1 = vpop.trf.xlu1 }
 0xfe6   :  { %9965 = vmatprep.mubr.msk.f32.mxu1 %vm3509_vm1, %v3497_v1 }
 0xfe8   :  { %v3861_v17 = vpop.trf.xlu0 }
 0xfe9   :  { %v3498_v27 = vpop.trf.xlu1 }
 0xfea   :  { %9966 = vmatmul.mubr.msk.f32.gmra.mrb[76].mxu1 %vm3509_vm1, %v3498_v27  ;;  %v15240_v27 = vld [vmem:[#allocation24_spill] sm:$0xff] }
 0xfec   :  { %v3862_v51 = vpop.trf.xlu0 }
 0xfed   :  { %v3499_v33 = vpop.trf.xlu1 }
 0xfee   :  { %9968 = vmatprep.mubr.msk.f32.mxu1 %vm3509_vm1, %v3499_v33 }
 0xff0   :  { %v3863_v4 = vpop.trf.xlu0 }
 0xff1   :  { %v3500_v49 = vpop.trf.xlu1 }
 0xff2   :  { %9969 = vmatmul.mubr.msk.f32.gmra.mrb[78].mxu1 %vm3509_vm1, %v3500_v49 }
 0xff3   :  { %9992 = vmatprep.mubr.msk.f32.mxu1 %vm3509_vm1, %v3856_v16 }
 0xff6   :  { %9993 = vmatmul.mubr.msk.f32.vlgmr.msra.gmra.mrb[80].mxu1 %vm3509_vm1, %v3857_v44 }
 0xff7   :  { %9995 = vmatprep.mubr.msk.f32.mxu1 %vm3509_vm1, %v3858_v19 }
 0xffa   :  { %9996 = vmatmul.mubr.msk.f32.gmra.mrb[82].mxu1 %vm3509_vm1, %v3859_v32 }
 0xffb   :  { %9998 = vmatprep.mubr.msk.f32.mxu1 %vm3509_vm1, %v3860_v46 }
 0xffe   :  { %9999 = vmatmul.mubr.msk.f32.gmra.mrb[84].mxu1 %vm3509_vm1, %v3861_v17 }
 0xfff   :  { %10001 = vmatprep.mubr.msk.f32.mxu1 %vm3509_vm1, %v3862_v51 }
0x1002   :  { %10002 = vmatmul.mubr.msk.f32.gmra.mrb[86].mxu1 %vm3509_vm1, %v3863_v4 }
0x1003   :  { %10020 = vmatprep.mubr.msk.f32.mxu1 %vm15044_vm0, %v15041_v11 }
0x10ad   :  { %v9961_v38 = vpop.f32.mrb[72].mxu1 }
0x10ae   :  { %v3640_v5 = vmul.f32 0.35355338, %v9961_v38  ;;  %v3600_v9 = vpop.f32.mrb[73].mxu1 }
0x10af   :  { %v3639_v52 = vmul.f32 0.35355338, %v3600_v9 }
0x10b0   :  { %v13116_v29 = vsel %vm11497_vm3, %v3640_v5, -1e+30 }
0x10b1   :  { %v13120_v58 = vsel %vm11504_vm5, %v3639_v52, -1e+30  ;;  %v3658_v3 = vsel %vm15227_vm11, %v13116_v29, -inf  ;;  %vm15239_vm11 = vmmov %vm15234_vm4 }
0x10b2   :  { %3659 = vmax.xlane.f32.xlu0 %v3658_v3  ;;  %v3655_v53 = vsel %vm15228_vm14, %v13120_v58, -inf  ;;  %vm15241_vm14 = vnez %v15240_v27 }
0x10b3   :  { %3656 = vmax.xlane.f32.xlu1 %v3655_v53 }
0x10b5   :  { %v9964_v25 = vpop.f32.mrb[74].mxu1 }
0x10b6   :  { %v3642_v31 = vmul.f32 0.35355338, %v9964_v25  ;;  %v3610_v59 = vpop.f32.mrb[75].mxu1 }
0x10b7   :  { %v3641_v20 = vmul.f32 0.35355338, %v3610_v59 }
0x10b8   :  { %v13128_v54 = vsel %vm11527_vm6, %v3642_v31, -1e+30 }
0x10b9   :  { %v3664_v55 = vsel %vm15230_vm15, %v13128_v54, -inf  ;;  %v13134_v24 = vsel %vm11535_vm7, %v3641_v20, -1e+30  ;;  %vm15242_vm15 = vmmov %vm15234_vm4 }
0x10ba   :  { %3665 = vmax.xlane.f32.xlu1 %v3664_v55  ;;  %v3661_v2 = vsel %vm15232_vm13, %v13134_v24, -inf  ;;  %vm15243_vm13 = vmmov %vm15234_vm4 }
0x10bd   :  { %v9967_v63 = vpop.f32.mrb[76].mxu1 }
0x10be   :  { %v3644_v36 = vmul.f32 0.35355338, %v9967_v63  ;;  %3662 = vmax.xlane.f32.xlu1 %v3661_v2  ;;  %v3620_v34 = vpop.f32.mrb[77].mxu1 }
0x10bf   :  { %v3643_v8 = vmul.f32 0.35355338, %v3620_v34 }
0x10c0   :  { %v13140_v10 = vsel %vm11557_vm8, %v3644_v36, -1e+30 }
0x10c1   :  { %v3670_v40 = vsel %vm15234_vm4, %v13140_v10, -inf  ;;  %v13146_v42 = vsel %vm11565_vm9, %v3643_v8, -1e+30 }
0x10c2   :  { %3671 = vmax.xlane.f32.xlu1 %v3670_v40  ;;  %v3667_v57 = vsel %vm15236_vm12, %v13146_v42, -inf  ;;  %vm15244_vm12 = vmmov %vm15234_vm4 }
0x10c3   :  { %3668 = vmax.xlane.f32.xlu0 %v3667_v57 }
0x10c5   :  { %v9970_v16 = vpop.f32.mrb[78].mxu1 }
0x10c6   :  { %v3646_v0 = vmul.f32 0.35355338, %v9970_v16  ;;  %v3630_v44 = vpop.f32.mrb[79].mxu1 }
0x10c7   :  { %v3645_v56 = vmul.f32 0.35355338, %v3630_v44 }
0x10c8   :  { %v13152_v19 = vsel %vm15238_vm10, %v3646_v0, -1e+30 }
0x10c9   :  { %v9994_v1 = vpop.f32.mrb[80].mxu1  ;;  %v3676_v32 = vsel %vm15239_vm11, %v13152_v19, -inf  ;;  %v13158_v33 = vsel %vm15241_vm14, %v3645_v56, -1e+30  ;;  %vm15245_vm11 = vmmov %vm15234_vm4 }
0x10ca   :  { %v4002_v46 = vmul.f32 0.35355338, %v9994_v1  ;;  %3677 = vmax.xlane.f32.xlu1 %v3676_v32  ;;  %v3673_v49 = vsel %vm15242_vm15, %v13158_v33, -inf  ;;  %v3962_v17 = vpop.f32.mrb[81].mxu1  ;;  %vm15246_vm15 = vmmov %vm15234_vm4  ;;  %v3247_v32 = vld [vmem:[%s14902_s7 + $0x18] sm:$0xff] }
0x10cb   :  { %3674 = vmax.xlane.f32.xlu0 %v3673_v49  ;;  %v4001_v51 = vmul.f32 0.35355338, %v3962_v17 }
0x10cc   :  { %v13164_v4 = vsel %vm11497_vm3, %v4002_v46, -1e+30  ;;  %v3246_v46 = vld [vmem:[%s14902_s7 + $0x10] sm:$0xff] }
0x10cd   :  { %v9997_v62 = vpop.f32.mrb[82].mxu1  ;;  %v4020_v30 = vsel %vm15243_vm13, %v13164_v4, -inf  ;;  %v13170_v47 = vsel %vm11504_vm5, %v4001_v51, -1e+30  ;;  %vm15247_vm13 = vmmov %vm15234_vm4 }
0x10ce   :  { %v4004_v60 = vmul.f32 0.35355338, %v9997_v62  ;;  %4021 = vmax.xlane.f32.xlu1 %v4020_v30  ;;  %v3972_v38 = vpop.f32.mrb[83].mxu1  ;;  %v4017_v52 = vsel %vm15234_vm4, %v13170_v47, -inf }
0x10cf   :  { %v4003_v5 = vmul.f32 0.35355338, %v3972_v38 }
0x10d0   :  { %v13180_v53 = vsel %vm11527_vm6, %v4004_v60, -1e+30 }
0x10d1   :  { %v10000_v9 = vpop.f32.mrb[84].mxu1  ;;  %v13176_v3 = vsel %vm11535_vm7, %v4003_v5, -1e+30  ;;  %v4026_v2 = vsel %vm15245_vm11, %v13180_v53, -inf  ;;  %vm15249_vm11 = vmmov %vm15234_vm4 }
0x10d2   :  { %v4006_v25 = vmul.f32 0.35355338, %v10000_v9  ;;  %4018 = vmax.xlane.f32.xlu1 %v4017_v52  ;;  %v3982_v31 = vpop.f32.mrb[85].mxu1  ;;  %v4023_v59 = vsel %vm15244_vm12, %v13176_v3, -inf  ;;  %vm15248_vm12 = vmmov %vm15234_vm4 }
0x10d3   :  { %v4005_v20 = vmul.f32 0.35355338, %v3982_v31  ;;  %4024 = vmax.xlane.f32.xlu0 %v4023_v59 }
0x10d4   :  { %v13186_v55 = vsel %vm11557_vm8, %v4006_v25, -1e+30 }
0x10d5   :  { %v10003_v63 = vpop.f32.mrb[86].mxu1  ;;  %v13192_v36 = vsel %vm11565_vm9, %v4005_v20, -1e+30  ;;  %v4032_v16 = vsel %vm15247_vm13, %v13186_v55, -inf  ;;  %vm15251_vm13 = vmmov %vm15234_vm4 }
0x10d6   :  { %v4008_v34 = vmul.f32 0.35355338, %v10003_v63  ;;  %4027 = vmax.xlane.f32.xlu1 %v4026_v2  ;;  %v3992_v8 = vpop.f32.mrb[87].mxu1  ;;  %v4029_v40 = vsel %vm15246_vm15, %v13192_v36, -inf  ;;  %vm15250_vm15 = vmmov %vm15234_vm4 }
0x10d7   :  { %v4007_v57 = vmul.f32 0.35355338, %v3992_v8  ;;  %4030 = vmax.xlane.f32.xlu0 %v4029_v40 }
0x10d8   :  { %v13200_v0 = vsel %vm15238_vm10, %v4008_v34, -1e+30 }
0x10d9   :  { %v13204_v44 = vsel %vm15241_vm14, %v4007_v57, -1e+30  ;;  %v4038_v1 = vsel %vm15248_vm12, %v13200_v0, -inf  ;;  %vm15252_vm12 = vmmov %vm15234_vm4 }
0x10da   :  { %4033 = vmax.xlane.f32.xlu1 %v4032_v16  ;;  %v4035_v56 = vsel %vm15234_vm4, %v13204_v44, -inf }
0x10db   :  { %4036 = vmax.xlane.f32.xlu0 %v4035_v56 }
0x10de   :  { %4039 = vmax.xlane.f32.xlu1 %v4038_v1 }
0x10ef   :  { %3273 = vperm.xlu1 %10897, %v3247_v32  }
0x10f1   :  { %3268 = vperm.xlu0 %10898, %v3246_v46  }
0x113f   :  { %v3660_v49 = vpop.xlane.xlu0 %3659 }
0x1140   :  { %v3680_v17 = vsub.f32 %v13116_v29, %v3660_v49  ;;  %v3657_v51 = vpop.xlane.xlu1 %3656 }
0x1141   :  { %v3679_v62 = vsub.f32 %v13120_v58, %v3657_v51 }
0x1142   :  { %v3689_v30 = vmul.f32 1.442695, %v3680_v17 }
0x1143   :  { %v3687_v60 = vmul.f32 1.442695, %v3679_v62 }
0x1144   :  { %10919 = vpow2.f32 %v3689_v30 }
0x1145   :  { %10921 = vpow2.f32 %v3687_v60 }
0x1147   :  { %v3666_v38 = vpop.xlane.xlu1 %3665 }
0x1148   :  { %v3682_v5 = vsub.f32 %v13128_v54, %v3666_v38 }
0x114a   :  { %v3693_v9 = vmul.f32 1.442695, %v3682_v5 }
0x114b   :  { %v3663_v52 = vpop.xlane.xlu1 %3662 }
0x114c   :  { %10923 = vpow2.f32 %v3693_v9  ;;  %v3681_v25 = vsub.f32 %v13134_v24, %v3663_v52 }
0x114e   :  { %v13220_v31 = vpop.eup %10919  ;;  %v3691_v59 = vmul.f32 1.442695, %v3681_v25 }
0x114f   :  { %v13222_v20 = vpop.eup %10921  ;;  %v3672_v29 = vpop.xlane.xlu1 %3671  ;;  %v3706_v58 = vsel %vm15249_vm11, %v13220_v31, 0.0  ;;  %vm15253_vm11 = vmmov %vm15234_vm4 }
0x1150   :  { %10925 = vpow2.f32 %v3691_v59  ;;  %v3684_v63 = vsub.f32 %v13140_v10, %v3672_v29  ;;  %v3669_v2 = vpop.xlane.xlu0 %3668  ;;  %3707 = vadd.xlane.f32.xlu1 %v3706_v58  ;;  %v3703_v54 = vsel %vm15250_vm15, %v13222_v20, 0.0  ;;  %vm15254_vm15 = vmmov %vm15234_vm4 }
0x1151   :  { %v3683_v34 = vsub.f32 %v13146_v42, %v3669_v2  ;;  %3704 = vadd.xlane.f32.xlu0 %v3703_v54 }
0x1152   :  { %v3697_v24 = vmul.f32 1.442695, %v3684_v63 }
0x1153   :  { %v3695_v8 = vmul.f32 1.442695, %v3683_v34 }
0x1154   :  { %10927 = vpow2.f32 %v3697_v24 }
0x1155   :  { %10929 = vpow2.f32 %v3695_v8 }
0x1156   :  { %v13230_v40 = vpop.eup %10923 }
0x1157   :  { %v3678_v57 = vpop.xlane.xlu1 %3677  ;;  %v3712_v16 = vsel %vm15251_vm13, %v13230_v40, 0.0  ;;  %vm15255_vm13 = vmmov %vm15234_vm4 }
0x1158   :  { %v3686_v10 = vsub.f32 %v13152_v19, %v3678_v57  ;;  %v3675_v56 = vpop.xlane.xlu0 %3674  ;;  %3713 = vadd.xlane.f32.xlu1 %v3712_v16 }
0x1159   :  { %v3685_v1 = vsub.f32 %v13158_v33, %v3675_v56 }
0x115a   :  { %v13236_v32 = vpop.eup %10925  ;;  %v3701_v42 = vmul.f32 1.442695, %v3686_v10 }
0x115b   :  { %v3699_v46 = vmul.f32 1.442695, %v3685_v1  ;;  %v4022_v49 = vpop.xlane.xlu1 %4021  ;;  %v3709_v17 = vsel %vm15234_vm4, %v13236_v32, 0.0 }
0x115c   :  { %10931 = vpow2.f32 %v3701_v42  ;;  %v4042_v51 = vsub.f32 %v13164_v4, %v4022_v49  ;;  %3710 = vadd.xlane.f32.xlu0 %v3709_v17 }
0x115d   :  { %10933 = vpow2.f32 %v3699_v46 }
0x115e   :  { %v13241_v62 = vpop.eup %10927  ;;  %v4051_v19 = vmul.f32 1.442695, %v4042_v51 }
0x115f   :  { %v13243_v30 = vpop.eup %10929  ;;  %v4019_v60 = vpop.xlane.xlu1 %4018  ;;  %v3718_v33 = vsel %vm15252_vm12, %v13241_v62, 0.0  ;;  %vm15256_vm12 = vmmov %vm15234_vm4 }
0x1160   :  { %10935 = vpow2.f32 %v4051_v19  ;;  %v4041_v38 = vsub.f32 %v13170_v47, %v4019_v60  ;;  %v4025_v5 = vpop.xlane.xlu0 %4024  ;;  %3719 = vadd.xlane.f32.xlu1 %v3718_v33  ;;  %v3715_v9 = vsel %vm15253_vm11, %v13243_v30, 0.0  ;;  %vm15257_vm11 = vmmov %vm15234_vm4  ;;  %v3253_v60 = vld [vmem:[%s14902_s7 + $0x48] sm:$0xff]  ;;  %v13289_v33 = vpop.f32.mrb[86].mxu0 }
0x1161   :  { %v4043_v4 = vsub.f32 %v13176_v3, %v4025_v5  ;;  %3716 = vadd.xlane.f32.xlu0 %v3715_v9  ;;  %v3252_v9 = vld [vmem:[%s14902_s7 + $0x40] sm:$0xff] }
0x1162   :  { %v4049_v52 = vmul.f32 1.442695, %v4041_v38  ;;  %v13291_v38 = vpop.f32.mrb[87].mxu0 }
0x1163   :  { %v4053_v25 = vmul.f32 1.442695, %v4043_v4  ;;  %v4028_v59 = vpop.xlane.xlu1 %4027  ;;  %v13293_v5 = vpop.f32.mrb[88].mxu0  ;;  %v3242_v4 = vld [vmem:[%s14901_s6 + $0x50] sm:$0xff] }
0x1164   :  { %10937 = vpow2.f32 %v4049_v52  ;;  %v4044_v29 = vsub.f32 %v13180_v53, %v4028_v59  ;;  %v4031_v58 = vpop.xlane.xlu0 %4030  ;;  %v3243_v52 = vld [vmem:[%s14901_s6 + $0x58] sm:$0xff] }
0x1165   :  { %v4045_v63 = vsub.f32 %v13192_v36, %v4031_v58  ;;  %10939 = vpow2.f32 %v4053_v25  ;;  %v13306_v25 = vpop.f32.mrb[89].mxu0 }
0x1166   :  { %v13253_v2 = vpop.eup %10931  ;;  %v4055_v47 = vmul.f32 1.442695, %v4044_v29 }
0x1167   :  { %v13255_v54 = vpop.eup %10933  ;;  %v4057_v34 = vmul.f32 1.442695, %v4045_v63  ;;  %v4034_v24 = vpop.xlane.xlu1 %4033  ;;  %v3724_v3 = vsel %vm15254_vm15, %v13253_v2, 0.0  ;;  %vm15258_vm15 = vmmov %vm15234_vm4 }
0x1168   :  { %10941 = vpow2.f32 %v4055_v47  ;;  %v4046_v8 = vsub.f32 %v13186_v55, %v4034_v24  ;;  %3725 = vadd.xlane.f32.xlu0 %v3724_v3  ;;  %v3721_v53 = vsel %vm15255_vm13, %v13255_v54, 0.0  ;;  %vm15259_vm13 = vmmov %vm15234_vm4  ;;  %v4037_v59 = vpop.xlane.xlu0 %4036 }
0x1169   :  { %3722 = vadd.xlane.f32.xlu1 %v3721_v53  ;;  %10943 = vpow2.f32 %v4057_v34  ;;  %v4047_v58 = vsub.f32 %v13204_v44, %v4037_v59  ;;  %v3251_v44 = vld [vmem:[%s14902_s7 + $0x38] sm:$0xff] }
0x116a   :  { %v13262_v36 = vpop.eup %10935  ;;  %v4059_v57 = vmul.f32 1.442695, %v4046_v8 }
0x116b   :  { %v4068_v16 = vsel %vm15234_vm4, %v13262_v36, 0.0  ;;  %v4040_v29 = vpop.xlane.xlu1 %4039  ;;  %v4061_v47 = vmul.f32 1.442695, %v4047_v58 }
0x116c   :  { %10945 = vpow2.f32 %v4059_v57  ;;  %v4048_v63 = vsub.f32 %v13200_v0, %v4040_v29  ;;  %v3250_v0 = vld [vmem:[%s14902_s7 + $0x30] sm:$0xff] }
0x116d   :  { %4069 = vadd.xlane.f32.xlu1 %v4068_v16  ;;  %10947 = vpow2.f32 %v4061_v47 }
0x116e   :  { %v13266_v10 = vpop.eup %10937  ;;  %v4063_v34 = vmul.f32 1.442695, %v4048_v63 }
0x116f   :  { %v4065_v56 = vsel %vm15256_vm12, %v13266_v10, 0.0  ;;  %v13270_v55 = vpop.eup %10939  ;;  %vm15260_vm12 = vcmask 261120   ;;  %v3274_v57 = vpop.permute.xlu1 %3273 }
0x1170   :  { %4066 = vadd.xlane.f32.xlu0 %v4065_v56  ;;  %v4071_v42 = vsel %vm15257_vm11, %v13270_v55, 0.0  ;;  %9954 = vmatprep.mubr.msk.f32.mxu0 %vm15260_vm12, %v3242_v4  ;;  %vm15261_vm11 = vmmov %vm15260_vm12  ;;  %10949 = vpow2.f32 %v4063_v34  ;;  %v3269_v16 = vpop.permute.xlu0 %3268 }
0x1171   :  { %9955 = vmatmul.mubr.msk.f32.gmra.mrb[90].mxu0 %vm15261_vm11, %v3243_v52  ;;  %vm15264_vm12 = vmmov %vm15234_vm4 }
0x1172   :  { %v13272_v1 = vpop.eup %10941  ;;  %9987 = vmatprep.mubr.msk.f32.mxu0 %vm15044_vm0, %v15041_v11  ;;  %vm15265_vm11 = vmmov %vm15234_vm4 }
0x1173   :  { %v4074_v46 = vsel %vm15258_vm15, %v13272_v1, 0.0  ;;  %v13278_v49 = vpop.eup %10943  ;;  %vm15262_vm15 = vmmov %vm15234_vm4 }
0x1174   :  { %4072 = vadd.xlane.f32.xlu0 %v4071_v42  ;;  %4075 = vadd.xlane.f32.xlu1 %v4074_v46  ;;  %v4077_v51 = vsel %vm15259_vm13, %v13278_v49, 0.0  ;;  %vm15263_vm13 = vmmov %vm15234_vm4  ;;  %v3434_v46 = vadd.f32 %v13075_v45, %v3274_v57 }
0x1176   :  { %v13280_v17 = vpop.eup %10945 }
0x1177   :  { %v4080_v19 = vsel %vm15234_vm4, %v13280_v17, 0.0  ;;  %v13312_v24 = vpop.eup %10947 }
0x1178   :  { %4078 = vadd.xlane.f32.xlu0 %v4077_v51  ;;  %4081 = vadd.xlane.f32.xlu1 %v4080_v19  ;;  %v4083_v8 = vsel %vm15262_vm15, %v13312_v24, 0.0  ;;  %v3429_v51 = vadd.f32 %v13077_v48, %v3269_v16  ;;  %vm15266_vm15 = vmmov %vm15234_vm4 }
0x117a   :  { %v13314_v3 = vpop.eup %10949 }
0x117b   :  { %v4086_v53 = vsel %vm15263_vm13, %v13314_v3, 0.0 }
0x1189   :  { %3303 = vperm.xlu1 %10897, %v3253_v60  }
0x118e   :  { %3298 = vperm.xlu0 %10898, %v3252_v9  }
0x11ad   :  { %4084 = vadd.xlane.f32.xlu0 %v4083_v8  ;;  %4087 = vadd.xlane.f32.xlu1 %v4086_v53 }
0x11be   :  { %3288 = vperm.xlu1 %10897, %v3250_v0  }
0x11c3   :  { %3293 = vperm.xlu0 %10898, %v3251_v44  }
0x11dd   :  { %v3708_v56 = vpop.xlane.xlu1 %3707 }
0x11de   :  { %10951 = vrcp.f32 %v3708_v56  ;;  %v3705_v42 = vpop.xlane.xlu0 %3704 }
0x11df   :  { %10953 = vrcp.f32 %v3705_v42 }
0x11e1   :  { %4564 = vxpose.xlu0.b32.start.end [1/1] (short) (narrow) %v3434_v46, 64 }
0x11e5   :  { %v3714_v19 = vpop.xlane.xlu1 %3713 }
0x11e6   :  { %10955 = vrcp.f32 %v3714_v19 }
0x11e7   :  { %4202 = vxpose.xlu1.b32.start.end [1/1] (short) (narrow) %v3429_v51, 64 }
0x11e8   :  { %v10952_v60 = vpop.eup %10951 }
0x11e9   :  { %v10954_v9 = vpop.eup %10953  ;;  %v3730_v4 = vmul.f32 %v10952_v60, %v13220_v31  ;;  %v3711_v52 = vpop.xlane.xlu0 %3710 }
0x11ea   :  { %v3728_v59 = vmul.f32 %v10954_v9, %v13222_v20  ;;  %10957 = vrcp.f32 %v3711_v52 }
0x11ec   :  { %v10644_v29 = vpack.c.bf16 %v3730_v4, %v3728_v59 }
0x11ed   :  { %v3720_v58 = vpop.xlane.xlu1 %3719 }
0x11ee   :  { %10959 = vrcp.f32 %v3720_v58  ;;  %v3717_v63 = vpop.xlane.xlu0 %3716  ;;  %10646 = vmatpush3.bf16.xpose.msk.msra.mxu0 %vm11655_vm2, %v10644_v29 }
0x11ef   :  { %10961 = vrcp.f32 %v3717_v63  ;;  %10647 = vmatprep.subr.bf16.mxu0 %v15042_v37 }
0x11f0   :  { %v10956_v45 = vpop.eup %10955 }
0x11f1   :  { %v3734_v47 = vmul.f32 %v10956_v45, %v13230_v40 }
0x11f4   :  { %v10958_v48 = vpop.eup %10957 }
0x11f5   :  { %v3732_v31 = vmul.f32 %v10958_v48, %v13236_v32  ;;  %v3726_v34 = vpop.xlane.xlu0 %3725 }
0x11f6   :  { %10963 = vrcp.f32 %v3726_v34  ;;  %v3723_v20 = vpop.xlane.xlu1 %3722 }
0x11f7   :  { %10965 = vrcp.f32 %v3723_v20  ;;  %v10648_v8 = vpack.c.bf16 %v3734_v47, %v3732_v31 }
0x11f8   :  { %v10960_v53 = vpop.eup %10959 }
0x11f9   :  { %v10962_v0 = vpop.eup %10961  ;;  %10650 = vmatpush3.bf16.xpose.msk.msra.mxu0 %vm11655_vm2, %v10648_v8  ;;  %v3738_v57 = vmul.f32 %v10960_v53, %v13241_v62 }
0x11fa   :  { %v4070_v44 = vpop.xlane.xlu1 %4069  ;;  %10651 = vmatprep.subr.bf16.mxu0 %v15042_v37  ;;  %v3736_v16 = vmul.f32 %v10962_v0, %v13243_v30 }
0x11fb   :  { %10967 = vrcp.f32 %v4070_v44 }
0x11fc   :  { %v10652_v32 = vpack.c.bf16 %v3738_v57, %v3736_v16 }
0x11fd   :  { %v4067_v40 = vpop.xlane.xlu0 %4066 }
0x11fe   :  { %10969 = vrcp.f32 %v4067_v40 }
0x1200   :  { %v10964_v56 = vpop.eup %10963 }
0x1201   :  { %v10966_v42 = vpop.eup %10965  ;;  %v4073_v46 = vpop.xlane.xlu0 %4072  ;;  %10654 = vmatpush3.bf16.xpose.msk.msra.mxu0 %vm11655_vm2, %v10652_v32  ;;  %v3742_v19 = vmul.f32 %v10964_v56, %v13253_v2 }
0x1202   :  { %v4076_v51 = vpop.xlane.xlu1 %4075  ;;  %10971 = vrcp.f32 %v4073_v46  ;;  %10655 = vmatprep.subr.bf16.mxu0 %v15042_v37  ;;  %v3740_v62 = vmul.f32 %v10966_v42, %v13255_v54 }
0x1203   :  { %10973 = vrcp.f32 %v4076_v51 }
0x1204   :  { %v10656_v4 = vpack.c.bf16 %v3742_v19, %v3740_v62 }
0x1205   :  { %v10968_v30 = vpop.eup %10967  ;;  %v4079_v60 = vpop.xlane.xlu0 %4078 }
0x1206   :  { %v4082_v9 = vpop.xlane.xlu1 %4081  ;;  %v4092_v59 = vmul.f32 %v10968_v30, %v13262_v36  ;;  %10975 = vrcp.f32 %v4079_v60 }
0x1207   :  { %10977 = vrcp.f32 %v4082_v9 }
0x1208   :  { %v10970_v52 = vpop.eup %10969 }
0x1209   :  { %v4090_v29 = vmul.f32 %v10970_v52, %v13266_v10  ;;  %10658 = vmatpush3.bf16.xpose.msk.msra.mxu0 %vm11655_vm2, %v10656_v4 }
0x120b   :  { %v10660_v58 = vpack.c.bf16 %v4092_v59, %v4090_v29 }
0x120c   :  { %v10972_v63 = vpop.eup %10971 }
0x120d   :  { %v10974_v2 = vpop.eup %10973  ;;  %v3299_v45 = vpop.permute.xlu0 %3298  ;;  %10662 = vmatpush3.bf16.xpose.msk.msra.mxu1 %vm11655_vm2, %v10660_v58  ;;  %v4094_v36 = vmul.f32 %v10972_v63, %v13270_v55 }
0x120e   :  { %v3459_v54 = vadd.f32 %v13306_v25, %v3299_v45  ;;  %10663 = vmatprep.subr.bf16.mxu1 %v15042_v37  ;;  %v4096_v10 = vmul.f32 %v10974_v2, %v13272_v1  ;;  %v3304_v55 = vpop.permute.xlu1 %3303 }
0x1210   :  { %9988 = vmatmul.mubr.msk.f32.vlgmr.msra.gmra.mrb[92].mxu0 %vm15234_vm4, %v3459_v54  ;;  %v10976_v48 = vpop.eup %10975  ;;  %v10664_v47 = vpack.c.bf16 %v4096_v10, %v4094_v36 }
0x1211   :  { %v10978_v31 = vpop.eup %10977  ;;  %v4098_v34 = vmul.f32 %v10976_v48, %v13278_v49 }
0x1212   :  { %v4100_v25 = vmul.f32 %v10978_v31, %v13280_v17 }
0x1214   :  { %v10668_v20 = vpack.c.bf16 %v4100_v25, %v4098_v34 }
0x1215   :  { %10666 = vmatpush3.bf16.xpose.msk.msra.mxu1 %vm11655_vm2, %v10664_v47 }
0x1216   :  { %10667 = vmatprep.subr.bf16.mxu1 %v15042_v37 }
0x121d   :  { %10670 = vmatpush3.bf16.xpose.msk.msra.mxu1 %vm11655_vm2, %v10668_v20 }
0x121e   :  { %10671 = vmatprep.subr.bf16.mxu1 %v15042_v37 }
0x123a   :  { %v4085_v1 = vpop.xlane.xlu0 %4084  ;;  %v4088_v8 = vpop.xlane.xlu1 %4087 }
0x123b   :  { %10979 = vrcp.f32 %v4085_v1 }
0x123c   :  { %10981 = vrcp.f32 %v4088_v8 }
0x123e   :  { %v3289_v53 = vpop.permute.xlu1 %3288 }
0x123f   :  { %v3449_v0 = vadd.f32 %v13291_v38, %v3289_v53  ;;  %v3464_v38 = vadd.f32 %v13293_v5, %v3304_v55 }
0x1241   :  { %10023 = vmatprep.subr.mxu0 %v3449_v0 }
0x1242   :  { %10024 = vmatpush3.msra.mxu0 %v3449_v0  ;;  %v3294_v16 = vpop.permute.xlu0 %3293 }
0x1243   :  { %10675 = vmatprep.subr.bf16.mxu0 %v15042_v37  ;;  %v3454_v32 = vadd.f32 %v13289_v33, %v3294_v16 }
0x1244   :  { %v13374_v56 = vpop.f32.mrb[90].mxu0 }
0x1245   :  { %v10980_v49 = vpop.eup %10979  ;;  %v13376_v42 = vpop.f32.mrb[91].mxu0 }
0x1246   :  { %v10982_v17 = vpop.eup %10981  ;;  %v4102_v44 = vmul.f32 %v10980_v49, %v13312_v24 }
0x1247   :  { %v4104_v57 = vmul.f32 %v10982_v17, %v13314_v3 }
0x1249   :  { %v10672_v40 = vpack.c.bf16 %v4104_v57, %v4102_v44 }
0x124b   :  { %10674 = vmatpush3.bf16.xpose.msk.msra.mxu1 %vm11655_vm2, %v10672_v40 }
0x124c   :  { %10056 = vmatprep.subr.mxu1 %v3454_v32 }
0x1252   :  { %10021 = vmatmul.mubr.msk.f32.vlgmr.msra.gmra.mrb[88].mxu1 %vm15264_vm12, %v3464_v38 }
0x1253   :  { %10057 = vmatpush3.msra.mxu1 %v3454_v32 }
0x1254   :  { %10691 = vmatprep.subr.bf16.mxu1 %v15042_v37 }
0x1261   :  { %v4580_v24 = vpop.trf.xlu0 }
0x1262   :  { %10058 = vmatprep.mubr.msk.f32.mxu1 %vm3509_vm1, %v4580_v24 }
0x1265   :  { %v4581_v3 = vpop.trf.xlu0 }
0x1266   :  { %10059 = vmatmul.mubr.msk.f32.vlgmr.msra.gmra.mrb[90].mxu1 %vm3509_vm1, %v4581_v3 }
0x1267   :  { %v4218_v33 = vpop.trf.xlu1 }
0x1268   :  { %10025 = vmatprep.mubr.msk.f32.mxu0 %vm3509_vm1, %v4218_v33 }
0x1269   :  { %v4582_v46 = vpop.trf.xlu0 }
0x126a   :  { %10061 = vmatprep.mubr.msk.f32.mxu1 %vm3509_vm1, %v4582_v46 }
0x126b   :  { %v4219_v5 = vpop.trf.xlu1 }
0x126c   :  { %10026 = vmatmul.mubr.msk.f32.vlgmr.msra.gmra.mrb[94].mxu0 %vm3509_vm1, %v4219_v5 }
0x126d   :  { %v4583_v51 = vpop.trf.xlu0 }
0x126e   :  { %10062 = vmatmul.mubr.msk.f32.gmra.mrb[92].mxu1 %vm3509_vm1, %v4583_v51 }
0x126f   :  { %v4220_v19 = vpop.trf.xlu1 }
0x1270   :  { %10028 = vmatprep.mubr.msk.f32.mxu0 %vm3509_vm1, %v4220_v19 }
0x1271   :  { %v4584_v62 = vpop.trf.xlu0 }
0x1272   :  { %10064 = vmatprep.mubr.msk.f32.mxu1 %vm3509_vm1, %v4584_v62 }
0x1273   :  { %v4221_v30 = vpop.trf.xlu1 }
0x1274   :  { %10029 = vmatmul.mubr.msk.f32.gmra.mrb[96].mxu0 %vm3509_vm1, %v4221_v30 }
0x1275   :  { %v4585_v60 = vpop.trf.xlu0 }
0x1276   :  { %10065 = vmatmul.mubr.msk.f32.gmra.mrb[94].mxu1 %vm3509_vm1, %v4585_v60 }
0x1277   :  { %v4222_v9 = vpop.trf.xlu1 }
0x1278   :  { %10031 = vmatprep.mubr.msk.f32.mxu0 %vm3509_vm1, %v4222_v9 }
0x1279   :  { %v4586_v4 = vpop.trf.xlu0 }
0x127a   :  { %10067 = vmatprep.mubr.msk.f32.mxu1 %vm3509_vm1, %v4586_v4 }
0x127b   :  { %v4223_v52 = vpop.trf.xlu1 }
0x127c   :  { %10032 = vmatmul.mubr.msk.f32.gmra.mrb[98].mxu0 %vm3509_vm1, %v4223_v52 }
0x127d   :  { %v4587_v59 = vpop.trf.xlu0 }
0x127e   :  { %10068 = vmatmul.mubr.msk.f32.gmra.mrb[96].mxu1 %vm3509_vm1, %v4587_v59 }
0x127f   :  { %v4224_v29 = vpop.trf.xlu1  ;;  %10086 = vmatprep.mubr.msk.f32.mxu1 %vm15044_vm0, %v15041_v11 }
0x1280   :  { %10034 = vmatprep.mubr.msk.f32.mxu0 %vm3509_vm1, %v4224_v29 }
0x1283   :  { %v4225_v58 = vpop.trf.xlu1 }
0x1284   :  { %10035 = vmatmul.mubr.msk.f32.gmra.mrb[100].mxu0 %vm3509_vm1, %v4225_v58 }
0x1285   :  { %10053 = vmatprep.mubr.msk.f32.mxu0 %vm15044_vm0, %v15041_v11 }
0x12e3   :  { %v3836_v63 = vpop.f32.mrb[92].mxu0 }
0x12e4   :  { %v9989_v2 = vpop.f32.mrb[93].mxu0 }
0x1325   :  { %v4198_v45 = vpop.f32.mrb[88].mxu1 }
0x1326   :  { %v13398_v54 = vpack.c.bf16 %v4198_v45, %v3836_v63  ;;  %v10022_v36 = vpop.f32.mrb[89].mxu1 }
0x1339   :  { %v10060_v10 = vpop.f32.mrb[90].mxu1 }
0x133a   :  { %v4686_v48 = vpop.f32.mrb[91].mxu1  ;;  %v4726_v47 = vmul.f32 0.35355338, %v10060_v10 }
0x133b   :  { %v4725_v34 = vmul.f32 0.35355338, %v4686_v48 }
0x133c   :  { %v13406_v53 = vsel %vm11497_vm3, %v4726_v47, -1e+30 }
0x133d   :  { %v13414_v17 = vsel %vm11504_vm5, %v4725_v34, -1e+30 }
0x133f   :  { %v10027_v31 = vpop.f32.mrb[94].mxu0 }
0x1340   :  { %v4364_v25 = vmul.f32 0.35355338, %v10027_v31  ;;  %v4324_v20 = vpop.f32.mrb[95].mxu0 }
0x1341   :  { %v4363_v55 = vmul.f32 0.35355338, %v4324_v20  ;;  %v10063_v1 = vpop.f32.mrb[92].mxu1 }
0x1342   :  { %v13402_v8 = vsel %vm11497_vm3, %v4364_v25, -1e+30  ;;  %v4696_v0 = vpop.f32.mrb[93].mxu1  ;;  %vm15267_vm3 = vmmov %vm15234_vm4  ;;  %v4728_v40 = vmul.f32 0.35355338, %v10063_v1 }
0x1343   :  { %v13410_v49 = vsel %vm11504_vm5, %v4363_v55, -1e+30  ;;  %v4382_v44 = vsel %vm15265_vm11, %v13402_v8, -inf  ;;  %v4744_v26 = vsel %vm15267_vm3, %v13406_v53, -inf  ;;  %vm15268_vm13 = vmmov %vm15267_vm3  ;;  %v4727_v38 = vmul.f32 0.35355338, %v4696_v0 }
0x1344   :  { %4383 = vmax.xlane.f32.xlu1 %v4382_v44  ;;  %v4379_v57 = vsel %vm15266_vm15, %v13410_v49, -inf  ;;  %v4741_v16 = vsel %vm15268_vm13, %v13414_v17, -inf  ;;  %v13430_v5 = vsel %vm11527_vm6, %v4728_v40, -1e+30  ;;  %vm15269_vm5 = vmmov %vm15267_vm3 }
0x1345   :  { %4380 = vmax.xlane.f32.xlu0 %v4379_v57  ;;  %v13438_v62 = vsel %vm11535_vm7, %v4727_v38, -1e+30  ;;  %vm15270_vm4 = vmmov %vm15267_vm3 }
0x1346   :  { %vm15272_vm12 = vmmov %vm15267_vm3 }
0x1347   :  { %v10030_v32 = vpop.f32.mrb[96].mxu0  ;;  %v4747_v9 = vsel %vm15272_vm12, %v13438_v62, -inf  ;;  %vm15274_vm11 = vmmov %vm15267_vm3 }
0x1348   :  { %v4366_v7 = vmul.f32 0.35355338, %v10030_v32  ;;  %4745 = vmax.xlane.f32.xlu1 %v4744_v26  ;;  %v4334_v24 = vpop.f32.mrb[97].mxu0  ;;  %vm15276_vm15 = vmmov %vm15267_vm3 }
0x1349   :  { %v4365_v3 = vmul.f32 0.35355338, %v4334_v24  ;;  %4742 = vmax.xlane.f32.xlu0 %v4741_v16  ;;  %v10066_v33 = vpop.f32.mrb[94].mxu1  ;;  %vm15278_vm13 = vmmov %vm15267_vm3 }
0x134a   :  { %v13426_v46 = vsel %vm11527_vm6, %v4366_v7, -1e+30  ;;  %v4706_v51 = vpop.f32.mrb[95].mxu1  ;;  %vm15271_vm6 = vmmov %vm15267_vm3  ;;  %v4730_v4 = vmul.f32 0.35355338, %v10066_v33 }
0x134b   :  { %v13434_v19 = vsel %vm11535_vm7, %v4365_v3, -1e+30  ;;  %v4388_v30 = vsel %vm15269_vm5, %v13426_v46, -inf  ;;  %v4750_v61 = vsel %vm15271_vm6, %v13430_v5, -inf  ;;  %v4729_v59 = vmul.f32 0.35355338, %v4706_v51  ;;  %vm15273_vm7 = vmmov %vm15267_vm3 }
0x134c   :  { %4389 = vmax.xlane.f32.xlu1 %v4388_v30  ;;  %v4385_v60 = vsel %vm15270_vm4, %v13434_v19, -inf  ;;  %v13454_v45 = vsel %vm11557_vm8, %v4730_v4, -1e+30  ;;  %vm15281_vm5 = vmmov %vm15267_vm3 }
0x134d   :  { %4386 = vmax.xlane.f32.xlu0 %v4385_v60  ;;  %v13462_v48 = vsel %vm11565_vm9, %v4729_v59, -1e+30  ;;  %vm15282_vm4 = vmmov %vm15267_vm3 }
0x134e   :  { %v4753_v34 = vsel %vm15276_vm15, %v13462_v48, -inf  ;;  %vm15283_vm6 = vmmov %vm15267_vm3 }
0x134f   :  { %v10033_v52 = vpop.f32.mrb[98].mxu0  ;;  %vm15284_vm12 = vmmov %vm15267_vm3 }
0x1350   :  { %v4368_v43 = vmul.f32 0.35355338, %v10033_v52  ;;  %4751 = vmax.xlane.f32.xlu1 %v4750_v61  ;;  %v4344_v29 = vpop.f32.mrb[99].mxu0  ;;  %vm15288_vm15 = vmmov %vm15267_vm3 }
0x1351   :  { %v4367_v58 = vmul.f32 0.35355338, %v4344_v29  ;;  %4748 = vmax.xlane.f32.xlu0 %v4747_v9  ;;  %v10069_v63 = vpop.f32.mrb[96].mxu1 }
0x1352   :  { %v13450_v2 = vsel %vm11557_vm8, %v4368_v43, -1e+30  ;;  %v4716_v36 = vpop.f32.mrb[97].mxu1  ;;  %vm15275_vm8 = vmmov %vm15267_vm3  ;;  %v4732_v25 = vmul.f32 0.35355338, %v10069_v63 }
0x1353   :  { %v13458_v10 = vsel %vm11565_vm9, %v4367_v58, -1e+30  ;;  %v4394_v47 = vsel %vm15273_vm7, %v13450_v2, -inf  ;;  %v4756_v23 = vsel %vm15275_vm8, %v13454_v45, -inf  ;;  %v4731_v55 = vmul.f32 0.35355338, %v4716_v36  ;;  %vm15277_vm9 = vmmov %vm15267_vm3 }
0x1354   :  { %4395 = vmax.xlane.f32.xlu1 %v4394_v47  ;;  %v4391_v31 = vsel %vm15274_vm11, %v13458_v10, -inf  ;;  %v13478_v57 = vsel %vm15238_vm10, %v4732_v25, -1e+30  ;;  %vm15285_vm7 = vmmov %vm15267_vm3 }
0x1355   :  { %4392 = vmax.xlane.f32.xlu0 %v4391_v31  ;;  %v13486_v16 = vsel %vm15241_vm14, %v4731_v55, -1e+30  ;;  %v4762_v28 = vsel %vm15278_vm13, %v13478_v57, -inf  ;;  %vm15286_vm11 = vmmov %vm15267_vm3 }
0x1356   :  { %vm15287_vm8 = vmmov %vm15267_vm3 }
0x1357   :  { %v10036_v20 = vpop.f32.mrb[100].mxu0  ;;  %vm15290_vm13 = vmmov %vm15267_vm3 }
0x1358   :  { %v4370_v50 = vmul.f32 0.35355338, %v10036_v20  ;;  %4757 = vmax.xlane.f32.xlu1 %v4756_v23  ;;  %v4354_v1 = vpop.f32.mrb[101].mxu0 }
0x1359   :  { %v4369_v0 = vmul.f32 0.35355338, %v4354_v1  ;;  %4754 = vmax.xlane.f32.xlu0 %v4753_v34 }
0x135a   :  { %v13474_v44 = vsel %vm15238_vm10, %v4370_v50, -1e+30  ;;  %vm15279_vm10 = vmmov %vm15267_vm3 }
0x135b   :  { %v13482_v26 = vsel %vm15241_vm14, %v4369_v0, -1e+30  ;;  %v4400_v40 = vsel %vm15277_vm9, %v13474_v44, -inf  ;;  %v4759_v38 = vsel %vm15279_vm10, %v13486_v16, -inf  ;;  %vm15280_vm14 = vmmov %vm15267_vm3 }
0x135c   :  { %4401 = vmax.xlane.f32.xlu1 %v4400_v40  ;;  %v4397_v32 = vsel %vm15267_vm3, %v13482_v26, -inf  ;;  %vm15289_vm9 = vmmov %vm15267_vm3 }
0x135d   :  { %4398 = vmax.xlane.f32.xlu0 %v4397_v32  ;;  %vm15291_vm10 = vmmov %vm15267_vm3 }
0x1360   :  { %4763 = vmax.xlane.f32.xlu1 %v4762_v28 }
0x1361   :  { %4760 = vmax.xlane.f32.xlu0 %v4759_v38 }
0x13d1   :  { %v4384_v7 = vpop.xlane.xlu1 %4383 }
0x13d2   :  { %v4404_v27 = vsub.f32 %v13402_v8, %v4384_v7  ;;  %v4381_v24 = vpop.xlane.xlu0 %4380 }
0x13d3   :  { %v4403_v3 = vsub.f32 %v13410_v49, %v4381_v24 }
0x13d4   :  { %v4413_v33 = vmul.f32 1.442695, %v4404_v27 }
0x13d5   :  { %v4411_v51 = vmul.f32 1.442695, %v4403_v3  ;;  %v4746_v30 = vpop.xlane.xlu1 %4745 }
0x13d6   :  { %10983 = vpow2.f32 %v4413_v33  ;;  %v4743_v60 = vpop.xlane.xlu0 %4742  ;;  %v4766_v61 = vsub.f32 %v13406_v53, %v4746_v30 }
0x13d7   :  { %10985 = vpow2.f32 %v4411_v51  ;;  %v4765_v9 = vsub.f32 %v13414_v17, %v4743_v60 }
0x13d8   :  { %v4775_v8 = vmul.f32 1.442695, %v4766_v61 }
0x13d9   :  { %v4390_v4 = vpop.xlane.xlu1 %4389  ;;  %v4773_v58 = vmul.f32 1.442695, %v4765_v9 }
0x13da   :  { %v4406_v52 = vsub.f32 %v13426_v46, %v4390_v4  ;;  %v4387_v59 = vpop.xlane.xlu0 %4386 }
0x13db   :  { %v4405_v43 = vsub.f32 %v13434_v19, %v4387_v59 }
0x13dc   :  { %v4417_v29 = vmul.f32 1.442695, %v4406_v52 }
0x13dd   :  { %v4415_v49 = vmul.f32 1.442695, %v4405_v43  ;;  %v4752_v63 = vpop.xlane.xlu1 %4751 }
0x13de   :  { %10987 = vpow2.f32 %v4417_v29  ;;  %v4749_v36 = vpop.xlane.xlu0 %4748  ;;  %v4768_v53 = vsub.f32 %v13430_v5, %v4752_v63 }
0x13df   :  { %10989 = vpow2.f32 %v4415_v49  ;;  %v4767_v46 = vsub.f32 %v13438_v62, %v4749_v36 }
0x13e0   :  { %v13502_v47 = vpop.eup %10983  ;;  %10991 = vpow2.f32 %v4775_v8  ;;  %v4779_v5 = vmul.f32 1.442695, %v4768_v53 }
0x13e1   :  { %v13505_v17 = vpop.eup %10985  ;;  %10993 = vpow2.f32 %v4773_v58  ;;  %v4396_v31 = vpop.xlane.xlu1 %4395  ;;  %v4430_v19 = vsel %vm15280_vm14, %v13502_v47, 0.0  ;;  %v4777_v50 = vmul.f32 1.442695, %v4767_v46  ;;  %vm15292_vm14 = vmmov %vm15267_vm3 }
0x13e2   :  { %v4408_v23 = vsub.f32 %v13450_v2, %v4396_v31  ;;  %v4393_v34 = vpop.xlane.xlu0 %4392  ;;  %4431 = vadd.xlane.f32.xlu1 %v4430_v19  ;;  %v4427_v25 = vsel %vm15281_vm5, %v13505_v17, 0.0  ;;  %vm15293_vm5 = vmmov %vm15267_vm3 }
0x13e3   :  { %v4407_v20 = vsub.f32 %v13458_v10, %v4393_v34  ;;  %4428 = vadd.xlane.f32.xlu0 %v4427_v25 }
0x13e4   :  { %v4421_v55 = vmul.f32 1.442695, %v4408_v23 }
0x13e5   :  { %v4419_v1 = vmul.f32 1.442695, %v4407_v20  ;;  %v4758_v0 = vpop.xlane.xlu1 %4757 }
0x13e6   :  { %10995 = vpow2.f32 %v4421_v55  ;;  %v4755_v62 = vpop.xlane.xlu0 %4754  ;;  %v4770_v2 = vsub.f32 %v13454_v45, %v4758_v0  ;;  %v3255_v0 = vld [vmem:[%s14902_s7 + $0x58] sm:$0xff] }
0x13e7   :  { %10997 = vpow2.f32 %v4419_v1  ;;  %v4769_v28 = vsub.f32 %v13462_v48, %v4755_v62  ;;  %v4930_v62 = vld [vmem:[%s14904_s9] sm:$0xff] }
0x13e8   :  { %v13514_v40 = vpop.eup %10987  ;;  %10999 = vpow2.f32 %v4779_v5  ;;  %v4783_v51 = vmul.f32 1.442695, %v4770_v2  ;;  %v3254_v2 = vld [vmem:[%s14902_s7 + $0x50] sm:$0xff] }
0x13e9   :  { %v13517_v32 = vpop.eup %10989  ;;  %11001 = vpow2.f32 %v4777_v50  ;;  %v4402_v10 = vpop.xlane.xlu1 %4401  ;;  %v4436_v38 = vsel %vm15282_vm4, %v13514_v40, 0.0  ;;  %v4781_v30 = vmul.f32 1.442695, %v4769_v28  ;;  %vm15294_vm4 = vmmov %vm15267_vm3  ;;  %v4932_v28 = vld [vmem:[%s14904_s9 + $0x10] sm:$0xff] }
0x13ea   :  { %v13522_v7 = vpop.eup %10991  ;;  %v4410_v27 = vsub.f32 %v13474_v44, %v4402_v10  ;;  %v4399_v24 = vpop.xlane.xlu0 %4398  ;;  %4437 = vadd.xlane.f32.xlu1 %v4436_v38  ;;  %v4433_v3 = vsel %vm15283_vm6, %v13517_v32, 0.0  ;;  %v4931_v10 = vld [vmem:[%s14904_s9 + $0x8] sm:$0xff]  ;;  %v5059_v38 = vld [vmem:[%s14906_s11] sm:$0xff]  ;;  %vm15295_vm6 = vmmov %vm15267_vm3 }
0x13eb   :  { %v13527_v33 = vpop.eup %10993  ;;  %v4409_v45 = vsub.f32 %v13482_v26, %v4399_v24  ;;  %4434 = vadd.xlane.f32.xlu0 %v4433_v3  ;;  %v4792_v9 = vsel %vm15284_vm12, %v13522_v7, 0.0  ;;  %v5061_v24 = vld [vmem:[%s14906_s11 + $0x10] sm:$0xff]  ;;  %v5060_v3 = vld [vmem:[%s14906_s11 + $0x8] sm:$0xff]  ;;  %vm15296_vm12 = vmmov %vm15267_vm3 }
0x13ec   :  { %v4425_v48 = vmul.f32 1.442695, %v4410_v27  ;;  %v4789_v52 = vsel %vm15285_vm7, %v13527_v33, 0.0  ;;  %v4933_v27 = vld [vmem:[%s14904_s9 + $0x18] sm:$0xff]  ;;  %vm15297_vm7 = vcmask 261120  }
0x13ed   :  { %v4423_v60 = vmul.f32 1.442695, %v4409_v45  ;;  %v4764_v61 = vpop.xlane.xlu1 %4763  ;;  %v5063_v45 = vld [vmem:[%s14906_s11 + $0x20] sm:$0xff] }
0x13ee   :  { %11003 = vpow2.f32 %v4425_v48  ;;  %v4772_v44 = vsub.f32 %v13478_v57, %v4764_v61  ;;  %v4761_v4 = vpop.xlane.xlu0 %4760  ;;  %4793 = vadd.xlane.f32.xlu1 %v4792_v9  ;;  %v5065_v48 = vld [vmem:[%s14906_s11 + $0x30] sm:$0xff]  ;;  %v5066_v61 = vld [vmem:[%s14906_s11 + $0x38] sm:$0xff] }
0x13ef   :  { %11005 = vpow2.f32 %v4423_v60  ;;  %v4771_v26 = vsub.f32 %v13486_v16, %v4761_v4  ;;  %4790 = vadd.xlane.f32.xlu0 %v4789_v52  ;;  %v5248_v60 = vld [vmem:[%s14908_s13] sm:$0xff]  ;;  %v5250_v9 = vld [vmem:[%s14908_s13 + $0x10] sm:$0xff]  ;;  %v5251_v52 = vld [vmem:[%s14908_s13 + $0x18] sm:$0xff] }
0x13f0   :  { %v13536_v59 = vpop.eup %10995  ;;  %11007 = vpow2.f32 %v4783_v51  ;;  %v4787_v43 = vmul.f32 1.442695, %v4772_v44  ;;  %v5062_v51 = vld [vmem:[%s14906_s11 + $0x18] sm:$0xff]  ;;  %v5249_v44 = vld [vmem:[%s14908_s13 + $0x8] sm:$0xff]  ;;  %v8810_v4 = vld [vmem:[%s14902_s7 + $0x60] sm:$0xff] }
0x13f1   :  { %v13538_v8 = vpop.eup %10997  ;;  %11009 = vpow2.f32 %v4781_v30  ;;  %v4785_v29 = vmul.f32 1.442695, %v4771_v26  ;;  %v4442_v57 = vsel %vm15286_vm11, %v13536_v59, 0.0  ;;  %v5064_v30 = vld [vmem:[%s14906_s11 + $0x28] sm:$0xff]  ;;  %v8814_v26 = vld [vmem:[%s14902_s7 + $0x80] sm:$0xff]  ;;  %vm15298_vm11 = vmmov %vm15297_vm7 }
0x13f2   :  { %v13542_v58 = vpop.eup %10999  ;;  %4443 = vadd.xlane.f32.xlu1 %v4442_v57  ;;  %v4439_v49 = vsel %vm15287_vm8, %v13538_v8, 0.0  ;;  %11011 = vpow2.f32 %v4787_v43  ;;  %v8811_v43 = vld [vmem:[%s14902_s7 + $0x68] sm:$0xff]  ;;  %vm15299_vm8 = vmmov %vm15297_vm7 }
0x13f3   :  { %v13546_v63 = vpop.eup %11001  ;;  %4440 = vadd.xlane.f32.xlu0 %v4439_v49  ;;  %11013 = vpow2.f32 %v4785_v29  ;;  %v4798_v16 = vsel %vm15288_vm15, %v13542_v58, 0.0  ;;  %v8815_v29 = vld [vmem:[%s14902_s7 + $0x88] sm:$0xff]  ;;  %vm15300_vm15 = vmmov %vm15297_vm7 }
0x13f4   :  { %v4795_v36 = vsel %vm15289_vm9, %v13546_v63, 0.0  ;;  %vm15301_vm9 = vmmov %vm15267_vm3 }
0x13f6   :  { %4799 = vadd.xlane.f32.xlu1 %v4798_v16 }
0x13f7   :  { %4796 = vadd.xlane.f32.xlu0 %v4795_v36 }
0x13f8   :  { %v13552_v53 = vpop.eup %11003 }
0x13f9   :  { %v13554_v46 = vpop.eup %11005  ;;  %v4448_v31 = vsel %vm15267_vm3, %v13552_v53, 0.0 }
0x13fa   :  { %v13558_v19 = vpop.eup %11007  ;;  %4449 = vadd.xlane.f32.xlu1 %v4448_v31  ;;  %v4445_v23 = vsel %vm15290_vm13, %v13554_v46, 0.0  ;;  %vm15302_vm13 = vmmov %vm15267_vm3 }
0x13fb   :  { %v13562_v34 = vpop.eup %11009  ;;  %4446 = vadd.xlane.f32.xlu0 %v4445_v23  ;;  %v4804_v25 = vsel %vm15291_vm10, %v13558_v19, 0.0  ;;  %vm15303_vm10 = vmmov %vm15267_vm3 }
0x13fc   :  { %v13566_v20 = vpop.eup %11011  ;;  %v4801_v5 = vsel %vm15292_vm14, %v13562_v34, 0.0  ;;  %vm15304_vm14 = vmmov %vm15267_vm3 }
0x13fd   :  { %v13570_v55 = vpop.eup %11013  ;;  %v4810_v50 = vsel %vm15293_vm5, %v13566_v20, 0.0  ;;  %vm15305_vm5 = vmmov %vm15267_vm3 }
0x13fe   :  { %4805 = vadd.xlane.f32.xlu1 %v4804_v25  ;;  %v4807_v1 = vsel %vm15294_vm4, %v13570_v55, 0.0  ;;  %vm15306_vm4 = vmmov %vm15267_vm3 }
0x13ff   :  { %4802 = vadd.xlane.f32.xlu0 %v4801_v5 }
0x1402   :  { %4811 = vadd.xlane.f32.xlu1 %v4810_v50 }
0x1403   :  { %4808 = vadd.xlane.f32.xlu0 %v4807_v1 }
0x1413   :  { %3313 = vperm.xlu1 %10897, %v3255_v0  }
0x1417   :  { %4936 = vperm.xlu1 %10897, %v4930_v62  }
0x1419   :  { %3308 = vperm.xlu0 %10898, %v3254_v2  }
0x141b   :  { %4946 = vperm.xlu1 %10897, %v4932_v28  }
0x141d   :  { %4941 = vperm.xlu0 %10898, %v4931_v10  }
0x141f   :  { %5069 = vperm.xlu1 %10897, %v5059_v38  }
0x1421   :  { %4951 = vperm.xlu0 %10898, %v4933_v27  }
0x1423   :  { %5079 = vperm.xlu1 %10897, %v5061_v24  }
0x1425   :  { %5074 = vperm.xlu0 %10898, %v5060_v3  }
0x1427   :  { %5089 = vperm.xlu1 %10897, %v5063_v45  }
0x1429   :  { %5084 = vperm.xlu0 %10898, %v5062_v51  }
0x142b   :  { %5099 = vperm.xlu1 %10897, %v5065_v48  }
0x142d   :  { %5094 = vperm.xlu0 %10898, %v5064_v30  }
0x142f   :  { %5254 = vperm.xlu1 %10897, %v5248_v60  }
0x1431   :  { %5104 = vperm.xlu0 %10898, %v5066_v61  }
0x1433   :  { %5264 = vperm.xlu1 %10897, %v5250_v9  }
0x1435   :  { %5259 = vperm.xlu0 %10898, %v5249_v44  }
0x1437   :  { %5401 = vperm.xlu1 %10897, %v8810_v4  }
0x1439   :  { %5269 = vperm.xlu0 %10898, %v5251_v52  }
0x143b   :  { %5421 = vperm.xlu1 %10897, %v8814_v26  }
0x143d   :  { %5406 = vperm.xlu0 %10898, %v8811_v43  }
0x1441   :  { %5426 = vperm.xlu0 %10898, %v8815_v29  }
0x146f   :  { %v4432_v57 = vpop.xlane.xlu1 %4431 }
0x1470   :  { %11015 = vrcp.f32 %v4432_v57  ;;  %v4429_v49 = vpop.xlane.xlu0 %4428 }
0x1471   :  { %11017 = vrcp.f32 %v4429_v49 }
0x1477   :  { %v4438_v16 = vpop.xlane.xlu1 %4437 }
0x1478   :  { %11019 = vrcp.f32 %v4438_v16  ;;  %v4435_v36 = vpop.xlane.xlu0 %4434 }
0x1479   :  { %11021 = vrcp.f32 %v4435_v36 }
0x147a   :  { %v11016_v31 = vpop.eup %11015 }
0x147b   :  { %v11018_v23 = vpop.eup %11017  ;;  %v4454_v25 = vmul.f32 %v11016_v31, %v13502_v47  ;;  %v4794_v5 = vpop.xlane.xlu1 %4793 }
0x147c   :  { %v4452_v50 = vmul.f32 %v11018_v23, %v13505_v17  ;;  %11023 = vrcp.f32 %v4794_v5  ;;  %v4791_v1 = vpop.xlane.xlu0 %4790 }
0x147d   :  { %11025 = vrcp.f32 %v4791_v1 }
0x147e   :  { %v10676_v0 = vpack.c.bf16 %v4454_v25, %v4452_v50 }
0x147f   :  { %v4444_v62 = vpop.xlane.xlu1 %4443 }
0x1480   :  { %11027 = vrcp.f32 %v4444_v62  ;;  %v4441_v2 = vpop.xlane.xlu0 %4440  ;;  %10678 = vmatpush3.bf16.xpose.msk.msra.mxu0 %vm11655_vm2, %v10676_v0 }
0x1481   :  { %11029 = vrcp.f32 %v4441_v2  ;;  %10679 = vmatprep.subr.bf16.mxu0 %v15042_v37 }
0x1482   :  { %v11020_v28 = vpop.eup %11019 }
0x1483   :  { %v11022_v10 = vpop.eup %11021  ;;  %v4458_v47 = vmul.f32 %v11020_v28, %v13514_v40  ;;  %v4800_v38 = vpop.xlane.xlu1 %4799 }
0x1484   :  { %v4456_v17 = vmul.f32 %v11022_v10, %v13517_v32  ;;  %11031 = vrcp.f32 %v4800_v38  ;;  %v4797_v27 = vpop.xlane.xlu0 %4796  ;;  %v5051_v38 = vld [vmem:[%s14905_s10] sm:$0xff] }
0x1485   :  { %11033 = vrcp.f32 %v4797_v27 }
0x1486   :  { %v11024_v24 = vpop.eup %11023  ;;  %v10680_v3 = vpack.c.bf16 %v4458_v47, %v4456_v17 }
0x1487   :  { %v11026_v45 = vpop.eup %11025  ;;  %v4816_v51 = vmul.f32 %v11024_v24, %v13522_v7  ;;  %v4450_v48 = vpop.xlane.xlu1 %4449 }
0x1488   :  { %v4814_v30 = vmul.f32 %v11026_v45, %v13527_v33  ;;  %11035 = vrcp.f32 %v4450_v48  ;;  %v4447_v60 = vpop.xlane.xlu0 %4446  ;;  %10682 = vmatpush3.bf16.xpose.msk.msra.mxu0 %vm11655_vm2, %v10680_v3 }
0x1489   :  { %11037 = vrcp.f32 %v4447_v60  ;;  %10683 = vmatprep.subr.bf16.mxu0 %v15042_v37 }
0x148a   :  { %v11028_v40 = vpop.eup %11027  ;;  %v10692_v32 = vpack.c.bf16 %v4816_v51, %v4814_v30 }
0x148b   :  { %v11030_v61 = vpop.eup %11029  ;;  %v4462_v9 = vmul.f32 %v11028_v40, %v13536_v59  ;;  %v4806_v44 = vpop.xlane.xlu1 %4805 }
0x148c   :  { %v4460_v4 = vmul.f32 %v11030_v61, %v13538_v8  ;;  %11039 = vrcp.f32 %v4806_v44  ;;  %v4803_v7 = vpop.xlane.xlu0 %4802  ;;  %10694 = vmatpush3.bf16.xpose.msk.msra.mxu1 %vm11655_vm2, %v10692_v32 }
0x148d   :  { %11041 = vrcp.f32 %v4803_v7  ;;  %10695 = vmatprep.subr.bf16.mxu1 %v15042_v37  ;;  %v5053_v7 = vld [vmem:[%s14905_s10 + $0x10] sm:$0xff] }
0x148e   :  { %v11032_v33 = vpop.eup %11031  ;;  %v10684_v52 = vpack.c.bf16 %v4462_v9, %v4460_v4  ;;  %v5052_v4 = vld [vmem:[%s14905_s10 + $0x8] sm:$0xff] }
0x148f   :  { %v11034_v26 = vpop.eup %11033  ;;  %v4820_v43 = vmul.f32 %v11032_v33, %v13542_v58  ;;  %v4812_v29 = vpop.xlane.xlu1 %4811  ;;  %v5054_v33 = vld [vmem:[%s14905_s10 + $0x18] sm:$0xff] }
0x1490   :  { %v4818_v57 = vmul.f32 %v11034_v26, %v13546_v63  ;;  %11043 = vrcp.f32 %v4812_v29  ;;  %v4809_v59 = vpop.xlane.xlu0 %4808  ;;  %10686 = vmatpush3.bf16.xpose.msk.msra.mxu0 %vm11655_vm2, %v10684_v52  ;;  %v5055_v52 = vld [vmem:[%s14905_s10 + $0x20] sm:$0xff]  ;;  %v5056_v26 = vld [vmem:[%s14905_s10 + $0x28] sm:$0xff]  ;;  %v5058_v29 = vld [vmem:[%s14905_s10 + $0x38] sm:$0xff] }
0x1491   :  { %11045 = vrcp.f32 %v4809_v59  ;;  %10687 = vmatprep.subr.bf16.mxu0 %v15042_v37 }
0x1492   :  { %v11036_v8 = vpop.eup %11035  ;;  %v10696_v49 = vpack.c.bf16 %v4820_v43, %v4818_v57  ;;  %v5057_v43 = vld [vmem:[%s14905_s10 + $0x30] sm:$0xff]  ;;  %v5244_v57 = vld [vmem:[%s14907_s12] sm:$0xff] }
0x1493   :  { %v11038_v16 = vpop.eup %11037  ;;  %v4466_v36 = vmul.f32 %v11036_v8, %v13552_v53  ;;  %v3314_v2 = vpop.permute.xlu1 %3313 }
0x1494   :  { %v4464_v31 = vmul.f32 %v11038_v16, %v13554_v46  ;;  %10698 = vmatpush3.bf16.xpose.msk.msra.mxu1 %vm11655_vm2, %v10696_v49  ;;  %v3474_v28 = vadd.f32 %v13374_v56, %v3314_v2  ;;  %v4929_v56 = vld [vmem:[%s14903_s8 + $0x18] sm:$0xff] }
0x1495   :  { %10699 = vmatprep.subr.bf16.mxu1 %v15042_v37 }
0x1496   :  { %v11040_v58 = vpop.eup %11039  ;;  %v10688_v63 = vpack.c.bf16 %v4466_v36, %v4464_v31 }
0x1497   :  { %v11042_v23 = vpop.eup %11041  ;;  %v4824_v25 = vmul.f32 %v11040_v58, %v13558_v19  ;;  %v4937_v27 = vpop.permute.xlu1 %4936 }
0x1498   :  { %v4822_v5 = vmul.f32 %v11042_v23, %v13562_v34  ;;  %10690 = vmatpush3.bf16.xpose.msk.msra.mxu0 %vm11655_vm2, %v10688_v63  ;;  %v3309_v50 = vpop.permute.xlu0 %3308 }
0x1499   :  { %10708 = vmatprep.subr.bf16.mxu0 %v13398_v54  ;;  %v3469_v0 = vadd.f32 %v13376_v42, %v3309_v50  ;;  %v4926_v42 = vld [vmem:[%s14903_s8] sm:$0xff] }
0x149a   :  { %v11044_v53 = vpop.eup %11043  ;;  %v10700_v46 = vpack.c.bf16 %v4824_v25, %v4822_v5 }
0x149b   :  { %v11046_v1 = vpop.eup %11045  ;;  %v4828_v19 = vmul.f32 %v11044_v53, %v13566_v20  ;;  %v4947_v40 = vpop.permute.xlu1 %4946 }
0x149c   :  { %10702 = vmatpush3.bf16.xpose.msk.msra.mxu1 %vm11655_vm2, %v10700_v46  ;;  %v4826_v34 = vmul.f32 %v11046_v1, %v13570_v55  ;;  %v4942_v17 = vpop.permute.xlu0 %4941 }
0x149d   :  { %10703 = vmatprep.subr.bf16.mxu1 %v15042_v37 }
0x149e   :  { %v10704_v62 = vpack.c.bf16 %v4828_v19, %v4826_v34 }
0x149f   :  { %10054 = vmatmul.mubr.msk.f32.vlgmr.msra.gmra.mrb[102].mxu0 %vm15295_vm6, %v3469_v0  ;;  %vm15307_vm6 = vmmov %vm15267_vm3  ;;  %v5070_v8 = vpop.permute.xlu1 %5069 }
0x14a0   :  { %10710 = vmatpush3.bf16.msra.mxu0 %v13398_v54  ;;  %10097 = vmatprep.mubr.msk.f32.mxu0 %vm15297_vm7, %v4926_v42  ;;  %v4952_v48 = vpop.permute.xlu0 %4951  ;;  %vm15309_vm7 = vmmov %vm15267_vm3 }
0x14a3   :  { %v5080_v36 = vpop.permute.xlu1 %5079 }
0x14a4   :  { %10706 = vmatpush3.bf16.xpose.msk.msra.mxu1 %vm11655_vm2, %v10704_v62  ;;  %v5075_v59 = vpop.permute.xlu0 %5074 }
0x14a5   :  { %10716 = vmatprep.subr.bf16.mxu1 %v13036_v35 }
0x14a7   :  { %v5090_v19 = vpop.permute.xlu1 %5089 }
0x14a8   :  { %v5085_v49 = vpop.permute.xlu0 %5084 }
0x14ab   :  { %10087 = vmatmul.mubr.msk.f32.vlgmr.msra.gmra.mrb[98].mxu1 %vm15296_vm12, %v3474_v28  ;;  %vm15308_vm12 = vmmov %vm15267_vm3 }
0x14ac   :  { %10718 = vmatpush3.bf16.msra.mxu1 %v13036_v35  ;;  %v4927_v35 = vld [vmem:[%s14903_s8 + $0x8] sm:$0xff]  ;;  %10119 = vmatprep.mubr.msk.f32.mxu1 %vm15301_vm9, %v5051_v38  ;;  %v5095_v46 = vpop.permute.xlu0 %5094  ;;  %vm15312_vm9 = vmmov %vm15300_vm15 }
0x14ad   :  { %10720 = vmatprep.subr.bf16.mxu1 %v13050_v22 }
0x14b0   :  { %10722 = vmatpush3.bf16.msra.mxu1 %v13050_v22  ;;  %v4928_v22 = vld [vmem:[%s14903_s8 + $0x10] sm:$0xff] }
0x1572   :  { %v4560_v54 = vpop.f32.mrb[102].mxu0 }
0x1573   :  { %v10055_v20 = vpop.f32.mrb[103].mxu0 }
0x157e   :  { %v4922_v55 = vpop.f32.mrb[98].mxu1 }
0x157f   :  { %v10711_v10 = vpack.c.bf16 %v4922_v55, %v4560_v54  ;;  %v10088_v47 = vpop.f32.mrb[99].mxu1 }
0x1581   :  { %10712 = vmatprep.subr.bf16.mxu0 %v10711_v10 }
0x1582   :  { %10714 = vmatpush3.bf16.msra.mxu0 %v10711_v10  ;;  %v5105_v10 = vpop.permute.xlu0 %5104 }
0x1585   :  { %10098 = vmatmul.mubr.msk.f32.vlgmr.msra.gmra.mrb[104].mxu0 %vm15298_vm11, %v4927_v35  ;;  %vm15310_vm11 = vmmov %vm15267_vm3 }
0x1586   :  { %10100 = vmatprep.mubr.msk.f32.mxu0 %vm15299_vm8, %v4928_v22  ;;  %v5100_v22 = vpop.permute.xlu1 %5099  ;;  %vm15311_vm8 = vmmov %vm15267_vm3 }
0x1589   :  { %10101 = vmatmul.mubr.msk.f32.gmra.mrb[106].mxu0 %vm15300_vm15, %v4929_v56 }
0x1658   :  { %v10099_v24 = vpop.f32.mrb[104].mxu0 }
0x1659   :  { %v5038_v3 = vadd.f32 %v10099_v24, %v4942_v17  ;;  %v5032_v45 = vpop.f32.mrb[105].mxu0 }
0x165a   :  { %v5033_v51 = vadd.f32 %v5032_v45, %v4937_v27 }
0x165c   :  { %v10723_v30 = vpack.c.bf16 %v5038_v3, %v5033_v51  ;;  %v10102_v60 = vpop.f32.mrb[106].mxu0  ;;  %v5245_v51 = vld [vmem:[%s14907_s12 + $0x8] sm:$0xff] }
0x165d   :  { %v5048_v32 = vadd.f32 %v10102_v60, %v4952_v48  ;;  %v5042_v61 = vpop.f32.mrb[107].mxu0  ;;  %v5246_v48 = vld [vmem:[%s14907_s12 + $0x10] sm:$0xff]  ;;  %v8798_v60 = vld [vmem:[%s14901_s6 + $0x60] sm:$0xff] }
0x165e   :  { %v5043_v9 = vadd.f32 %v5042_v61, %v4947_v40  ;;  %10724 = vmatprep.subr.bf16.mxu1 %v10723_v30  ;;  %10161 = vmatprep.mubr.msk.f32.mxu0 %vm15300_vm15, %v8798_v60  ;;  %v5260_v40 = vpop.permute.xlu0 %5259  ;;  %v15322_v60 = vld [vmem:[#allocation11_spill] sm:$0xff] }
0x165f   :  { %10726 = vmatpush3.bf16.msra.mxu1 %v10723_v30  ;;  %v5247_v30 = vld [vmem:[%s14907_s12 + $0x18] sm:$0xff] }
0x1660   :  { %v10727_v44 = vpack.c.bf16 %v5048_v32, %v5043_v9  ;;  %v5255_v32 = vpop.permute.xlu1 %5254 }
0x1662   :  { %10728 = vmatprep.subr.bf16.mxu1 %v10727_v44 }
0x1663   :  { %10730 = vmatpush3.bf16.msra.mxu1 %v10727_v44 }
0x1666   :  { %10120 = vmatmul.mubr.msk.f32.vlgmr.msra.gmra.mrb[100].mxu1 %vm15267_vm3, %v5052_v4  ;;  %vm15313_vm3 = vmmov %vm15312_vm9 }
0x1667   :  { %10122 = vmatprep.mubr.msk.f32.mxu1 %vm15302_vm13, %v5053_v7  ;;  %vm15314_vm13 = vmmov %vm15313_vm3 }
0x166a   :  { %10123 = vmatmul.mubr.msk.f32.gmra.mrb[102].mxu1 %vm15303_vm10, %v5054_v33  ;;  %v5270_v33 = vpop.permute.xlu0 %5269  ;;  %vm15315_vm10 = vmmov %vm15313_vm3 }
0x166b   :  { %10125 = vmatprep.mubr.msk.f32.mxu1 %vm15304_vm14, %v5055_v52  ;;  %vm15316_vm14 = vmmov %vm15313_vm3 }
0x166e   :  { %10126 = vmatmul.mubr.msk.f32.gmra.mrb[104].mxu1 %vm15305_vm5, %v5056_v26  ;;  %vm15317_vm5 = vmmov %vm15313_vm3 }
0x166f   :  { %10128 = vmatprep.mubr.msk.f32.mxu1 %vm15306_vm4, %v5057_v43  ;;  %v5265_v43 = vpop.permute.xlu1 %5264  ;;  %vm15318_vm4 = vmmov %vm15313_vm3 }
0x1672   :  { %10129 = vmatmul.mubr.msk.f32.gmra.mrb[106].mxu1 %vm15307_vm6, %v5058_v29  ;;  %vm15319_vm6 = vmmov %vm15313_vm3 }
0x1673   :  { %10147 = vmatprep.mubr.msk.f32.mxu1 %vm15308_vm12, %v5244_v57  ;;  %vm15320_vm12 = vmmov %vm15313_vm3 }
0x1739   :  { %v10121_v16 = vpop.f32.mrb[100].mxu1 }
0x173a   :  { %v5203_v31 = vadd.f32 %v10121_v16, %v5075_v59  ;;  %v5197_v58 = vpop.f32.mrb[101].mxu1 }
0x173b   :  { %v5198_v63 = vadd.f32 %v5197_v58, %v5070_v8 }
0x173c   :  { %v5237_v23 = vmax.f32 %v5203_v31, 0.0 }
0x173d   :  { %v5236_v25 = vmax.f32 %v5198_v63, 0.0  ;;  %v10124_v5 = vpop.f32.mrb[102].mxu1 }
0x173e   :  { %v5213_v53 = vadd.f32 %v10124_v5, %v5085_v49  ;;  %v5207_v50 = vpop.f32.mrb[103].mxu1 }
0x173f   :  { %v10731_v1 = vpack.c.bf16 %v5237_v23, %v5236_v25  ;;  %v5208_v0 = vadd.f32 %v5207_v50, %v5080_v36  ;;  %v5402_v36 = vpop.permute.xlu1 %5401 }
0x1740   :  { %v5239_v34 = vmax.f32 %v5213_v53, 0.0 }
0x1741   :  { %v5238_v62 = vmax.f32 %v5208_v0, 0.0  ;;  %v10127_v2 = vpop.f32.mrb[104].mxu1  ;;  %10732 = vmatprep.subr.bf16.mxu1 %v10731_v1 }
0x1742   :  { %v5223_v28 = vadd.f32 %v10127_v2, %v5095_v46  ;;  %v5217_v42 = vpop.f32.mrb[105].mxu1  ;;  %10734 = vmatpush3.bf16.msra.mxu1 %v10731_v1 }
0x1743   :  { %v10735_v54 = vpack.c.bf16 %v5239_v34, %v5238_v62  ;;  %v5218_v20 = vadd.f32 %v5217_v42, %v5090_v19  ;;  %v5422_v53 = vpop.permute.xlu1 %5421 }
0x1744   :  { %v5241_v55 = vmax.f32 %v5223_v28, 0.0 }
0x1745   :  { %v5240_v47 = vmax.f32 %v5218_v20, 0.0  ;;  %v10130_v35 = vpop.f32.mrb[106].mxu1  ;;  %10736 = vmatprep.subr.bf16.mxu1 %v10735_v54 }
0x1746   :  { %v5233_v56 = vadd.f32 %v10130_v35, %v5105_v10  ;;  %v5227_v38 = vpop.f32.mrb[107].mxu1  ;;  %10738 = vmatpush3.bf16.msra.mxu1 %v10735_v54 }
0x1747   :  { %v10739_v17 = vpack.c.bf16 %v5241_v55, %v5240_v47  ;;  %v5228_v27 = vadd.f32 %v5227_v38, %v5100_v22 }
0x1748   :  { %v5243_v24 = vmax.f32 %v5233_v56, 0.0 }
0x1749   :  { %v5242_v3 = vmax.f32 %v5228_v27, 0.0  ;;  %10740 = vmatprep.subr.bf16.mxu1 %v10739_v17  ;;  %v8804_v27 = vld [vmem:[%s14901_s6 + $0x90] sm:$0xff] }
0x174a   :  { %10742 = vmatpush3.bf16.msra.mxu1 %v10739_v17 }
0x174b   :  { %v10743_v45 = vpack.c.bf16 %v5243_v24, %v5242_v3  ;;  %v8805_v24 = vld [vmem:[%s14901_s6 + $0x98] sm:$0xff]  ;;  %v8806_v3 = vld [vmem:[%s14901_s6 + $0xa0] sm:$0xff] }
0x174d   :  { %10744 = vmatprep.subr.bf16.mxu1 %v10743_v45 }
0x174e   :  { %10746 = vmatpush3.bf16.msra.mxu1 %v10743_v45  ;;  %v8807_v45 = vld [vmem:[%s14901_s6 + $0xa8] sm:$0xff] }
0x1751   :  { %10148 = vmatmul.mubr.msk.f32.vlgmr.msra.gmra.mrb[108].mxu1 %vm15309_vm7, %v5245_v51  ;;  %v15321_v51 = vld [vmem:[#allocation9_spill] sm:$0xff] }
0x1752   :  { %10150 = vmatprep.mubr.msk.f32.mxu1 %vm15310_vm11, %v5246_v48  ;;  %v95_v48 = vadd.s32 2, %v15321_v51  ;;  %vm87_vm7 = vcmp.lt.s32.totalorder %v15321_v51, 2  ;;  %vm86_vm11 = vcmp.lt.s32.totalorder %v15322_v60, 2 }
0x1755   :  { %10151 = vmatmul.mubr.msk.f32.gmra.mrb[110].mxu1 %vm15311_vm8, %v5247_v30  ;;  %v8486_v30 = vadd.s32 4294967294, %v15321_v51 }
0x1824   :  { %v10149_v61 = vpop.f32.mrb[108].mxu1 }
0x1825   :  { %v5356_v9 = vadd.f32 %v10149_v61, %v5260_v40  ;;  %v5350_v44 = vpop.f32.mrb[109].mxu1  ;;  %v94_v40 = vadd.s32 2, %v15322_v60  ;;  %v13852_v61 = vsel %vm87_vm7, %v95_v48, %v8486_v30 }
0x1826   :  { %v5351_v4 = vadd.f32 %v5350_v44, %v5255_v32  ;;  %v8485_v32 = vadd.s32 4294967294, %v15322_v60  ;;  %v15323_v44 = vld [vmem:[#allocation10_spill] sm:$0xff] }
0x1827   :  { %v13760_v7 = vadd.f32 %v5356_v9, %v3229_v6  ;;  %v8800_v6 = vld [vmem:[%s14901_s6 + $0x70] sm:$0xff]  ;;  %vm119_vm8 = vcmp.eq.s32.totalorder %v13852_v61, %v15323_v44 }
0x1828   :  { %v13764_v52 = vadd.f32 %v5351_v4, %v3228_v18  ;;  %v10152_v26 = vpop.f32.mrb[110].mxu1  ;;  %v8799_v18 = vld [vmem:[%s14901_s6 + $0x68] sm:$0xff]  ;;  %v13854_v9 = vsel %vm86_vm11, %v94_v40, %v8485_v32 }
0x1829   :  { %v5366_v29 = vadd.f32 %v10152_v26, %v5270_v33  ;;  %v5360_v57 = vpop.f32.mrb[111].mxu1  ;;  %vm118_vm15 = vcmp.eq.s32.totalorder %v13854_v9, %v15323_v44 }
0x182a   :  { %v13768_v59 = vpack.c.bf16 %v13760_v7, %v13764_v52  ;;  %v5361_v8 = vadd.f32 %v5360_v57, %v5265_v43  ;;  %v15324_v43 = vld [vmem:[#allocation14_spill] sm:$0xff] }
0x182b   :  { %v13772_v49 = vadd.f32 %v5366_v29, %v3231_v21  ;;  %v5407_v21 = vpop.permute.xlu0 %5406  ;;  %v97_v29 = vadd.s32 2, %v15324_v43  ;;  %v8488_v57 = vadd.s32 4294967294, %v15324_v43 }
0x182c   :  { %v13776_v13 = vadd.f32 %v5361_v8, %v3230_v14  ;;  %10748 = vmatprep.subr.bf16.mxu0 %v13768_v59  ;;  %v8803_v14 = vld [vmem:[%s14901_s6 + $0x88] sm:$0xff] }
0x182d   :  { %10750 = vmatpush3.bf16.msra.mxu0 %v13768_v59 }
0x182e   :  { %v13782_v12 = vpack.c.bf16 %v13772_v49, %v13776_v13 }
0x182f   :  { %v5427_v1 = vpop.permute.xlu0 %5426 }
0x1830   :  { %10752 = vmatprep.subr.bf16.mxu0 %v13782_v12 }
0x1831   :  { %10754 = vmatpush3.bf16.msra.mxu0 %v13782_v12 }
0x1832   :  { %10755 = vmatprep.subr.bf16.mxu0 %v15042_v37 }
0x1834   :  { %10162 = vmatmul.mubr.msk.f32.vlgmr.msra.gmra.mrb[108].mxu0 %vm15312_vm9, %v8799_v18  ;;  %vm89_vm9 = vcmp.lt.s32.totalorder %v15324_v43, 2  ;;  %v15325_v18 = vld [vmem:[#allocation15_spill] sm:$0xff] }
0x1835   :  { %10164 = vmatprep.mubr.msk.f32.mxu0 %vm15313_vm3, %v8800_v6  ;;  %v96_v6 = vadd.s32 2, %v15325_v18  ;;  %vm88_vm3 = vcmp.lt.s32.totalorder %v15325_v18, 2 }
0x1838   :  { %10165 = vmatmul.mubr.msk.f32.gmra.mrb[110].mxu0 %vm15314_vm13, %v8801_v41  ;;  %v8487_v41 = vadd.s32 4294967294, %v15325_v18  ;;  %vm15326_vm13 = vcmask 523264  }
0x1839   :  { %10167 = vmatprep.mubr.msk.f32.mxu0 %vm15315_vm10, %v8802_v39  ;;  %vm15327_vm10 = vmmov %vm15326_vm13 }
0x183a   :  { %vm15331_vm7 = vmmov %vm15327_vm10 }
0x183c   :  { %10168 = vmatmul.mubr.msk.f32.gmra.mrb[112].mxu0 %vm15316_vm14, %v8803_v14 }
0x183d   :  { %10170 = vmatprep.mubr.msk.f32.mxu0 %vm15317_vm5, %v8804_v27 }
0x1840   :  { %10171 = vmatmul.mubr.msk.f32.gmra.mrb[114].mxu0 %vm15318_vm4, %v8805_v24 }
0x1841   :  { %10173 = vmatprep.mubr.msk.f32.mxu0 %vm15319_vm6, %v8806_v3 }
0x1844   :  { %10174 = vmatmul.mubr.msk.f32.gmra.mrb[116].mxu0 %vm15320_vm12, %v8807_v45  ;;  %vm15330_vm12 = vmmov %vm15327_vm10 }
0x1907   :  { %v10163_v16 = vpop.f32.mrb[108].mxu0 }
0x1908   :  { %v5567_v31 = vadd.f32 %v10163_v16, %v5407_v21  ;;  %v5561_v58 = vpop.f32.mrb[109].mxu0 }
0x1909   :  { %v5562_v63 = vadd.f32 %v5561_v58, %v5402_v36  ;;  %v13880_v36 = vsel %vm89_vm9, %v97_v29, %v8488_v57 }
0x190a   :  { %5982 = vxpose.xlu0.b32.start.end [1/1] (short) (narrow) %v5567_v31, 64  ;;  %v13882_v31 = vsel %vm88_vm3, %v96_v6, %v8487_v41  ;;  %vm121_vm14 = vcmp.eq.s32.totalorder %v13880_v36, %v15323_v44 }
0x190b   :  { %5620 = vxpose.xlu1.b32.start.end [1/1] (short) (narrow) %v5562_v63, 64  ;;  %v13807_v23 = vpop.f32.mrb[110].mxu0  ;;  %vm120_vm5 = vcmp.eq.s32.totalorder %v13882_v31, %v15323_v44 }
0x190c   :  { %v13809_v25 = vpop.f32.mrb[111].mxu0 }
0x190f   :  { %v10169_v5 = vpop.f32.mrb[112].mxu0 }
0x1910   :  { %v5581_v50 = vpop.f32.mrb[113].mxu0  ;;  %v5587_v0 = vadd.f32 %v10169_v5, %v5427_v1 }
0x1911   :  { %v5582_v46 = vadd.f32 %v5581_v50, %v5422_v53  ;;  %v15328_v53 = vld [vmem:[#allocation18_spill] sm:$0xff] }
0x1912   :  { %v99_v50 = vadd.s32 2, %v15328_v53  ;;  %vm91_vm4 = vcmp.lt.s32.totalorder %v15328_v53, 2 }
0x1913   :  { %10179 = vmatprep.subr.mxu1 %v5582_v46 }
0x1914   :  { %10180 = vmatpush3.msra.mxu1 %v5582_v46  ;;  %v8490_v46 = vadd.s32 4294967294, %v15328_v53 }
0x1915   :  { %10212 = vmatprep.subr.mxu1 %v5587_v0 }
0x198a   :  { %v5998_v34 = vpop.trf.xlu0 }
0x198b   :  { %v5636_v19 = vpop.trf.xlu1 }
0x198c   :  { %10181 = vmatprep.mubr.msk.f32.mxu1 %vm3509_vm1, %v5636_v19 }
0x198e   :  { %v5999_v2 = vpop.trf.xlu0 }
0x198f   :  { %v5637_v62 = vpop.trf.xlu1 }
0x1990   :  { %10182 = vmatmul.mubr.msk.f32.vlgmr.msra.gmra.mrb[112].mxu1 %vm3509_vm1, %v5637_v62 }
0x1991   :  { %10213 = vmatpush3.msra.mxu1 %v5587_v0  ;;  %v15329_v0 = vld [vmem:[#allocation19_spill] sm:$0xff] }
0x1992   :  { %10771 = vmatprep.subr.bf16.mxu1 %v15042_v37  ;;  %v6000_v54 = vpop.trf.xlu0  ;;  %v98_v19 = vadd.s32 2, %v15329_v0  ;;  %vm90_vm6 = vcmp.lt.s32.totalorder %v15329_v0, 2 }
0x1993   :  { %v5638_v28 = vpop.trf.xlu1 }
0x1994   :  { %10184 = vmatprep.mubr.msk.f32.mxu1 %vm3509_vm1, %v5638_v28 }
0x1996   :  { %v6001_v55 = vpop.trf.xlu0 }
0x1997   :  { %v5639_v42 = vpop.trf.xlu1 }
0x1998   :  { %10185 = vmatmul.mubr.msk.f32.gmra.mrb[114].mxu1 %vm3509_vm1, %v5639_v42 }
0x199a   :  { %v6002_v35 = vpop.trf.xlu0 }
0x199b   :  { %v5640_v20 = vpop.trf.xlu1 }
0x199c   :  { %10187 = vmatprep.mubr.msk.f32.mxu1 %vm3509_vm1, %v5640_v20 }
0x199e   :  { %v6003_v56 = vpop.trf.xlu0 }
0x199f   :  { %v5641_v10 = vpop.trf.xlu1 }
0x19a0   :  { %10188 = vmatmul.mubr.msk.f32.gmra.mrb[116].mxu1 %vm3509_vm1, %v5641_v10 }
0x19a2   :  { %v6004_v38 = vpop.trf.xlu0 }
0x19a3   :  { %v5642_v47 = vpop.trf.xlu1 }
0x19a4   :  { %10190 = vmatprep.mubr.msk.f32.mxu1 %vm3509_vm1, %v5642_v47 }
0x19a6   :  { %v6005_v17 = vpop.trf.xlu0 }
0x19a7   :  { %v5643_v22 = vpop.trf.xlu1 }
0x19a8   :  { %10191 = vmatmul.mubr.msk.f32.gmra.mrb[118].mxu1 %vm3509_vm1, %v5643_v22 }
0x19a9   :  { %10214 = vmatprep.mubr.msk.f32.mxu1 %vm3509_vm1, %v5998_v34  ;;  %v8489_v34 = vadd.s32 4294967294, %v15329_v0 }
0x19ab   :  { %v13910_v20 = vsel %vm90_vm6, %v98_v19, %v8489_v34 }
0x19ac   :  { %10215 = vmatmul.mubr.msk.f32.vlgmr.msra.gmra.mrb[120].mxu1 %vm3509_vm1, %v5999_v2  ;;  %vm122_vm9 = vcmp.eq.s32.totalorder %v13910_v20, %v15323_v44 }
0x19ad   :  { %10217 = vmatprep.mubr.msk.f32.mxu1 %vm3509_vm1, %v6000_v54  ;;  %v13908_v54 = vsel %vm91_vm4, %v99_v50, %v8490_v46  ;;  %vm15335_vm4 = vmmov %vm15331_vm7 }
0x19ae   :  { %vm123_vm11 = vcmp.eq.s32.totalorder %v13908_v54, %v15323_v44 }
0x19b0   :  { %10218 = vmatmul.mubr.msk.f32.gmra.mrb[122].mxu1 %vm3509_vm1, %v6001_v55 }
0x19b1   :  { %10220 = vmatprep.mubr.msk.f32.mxu1 %vm3509_vm1, %v6002_v35  ;;  %v15332_v35 = vld [vmem:[#allocation23_spill] sm:$0xff] }
0x19b2   :  { %v101_v22 = vadd.s32 2, %v15332_v35  ;;  %vm93_vm3 = vcmp.lt.s32.totalorder %v15332_v35, 2 }
0x19b4   :  { %10221 = vmatmul.mubr.msk.f32.gmra.mrb[124].mxu1 %vm3509_vm1, %v6003_v56  ;;  %v8492_v56 = vadd.s32 4294967294, %v15332_v35 }
0x19b5   :  { %10223 = vmatprep.mubr.msk.f32.mxu1 %vm3509_vm1, %v6004_v38 }
0x19b6   :  { %v13936_v30 = vsel %vm93_vm3, %v101_v22, %v8492_v56  ;;  %vm15337_vm3 = vmmov %vm15335_vm4 }
0x19b7   :  { %vm125_vm6 = vcmp.eq.s32.totalorder %v13936_v30, %v15323_v44 }
0x19b8   :  { %10224 = vmatmul.mubr.msk.f32.gmra.mrb[126].mxu1 %vm3509_vm1, %v6005_v17  ;;  %v15333_v17 = vld [vmem:[#allocation22_spill] sm:$0xff] }
0x19b9   :  { %10242 = vmatprep.mubr.msk.f32.mxu1 %vm15044_vm0, %v15041_v11  ;;  %v100_v27 = vadd.s32 2, %v15333_v17  ;;  %v8491_v24 = vadd.s32 4294967294, %v15333_v17 }
0x1a63   :  { %v10183_v4 = vpop.f32.mrb[112].mxu1 }
0x1a64   :  { %v5782_v33 = vmul.f32 0.35355338, %v10183_v4  ;;  %v5742_v26 = vpop.f32.mrb[113].mxu1 }
0x1a65   :  { %v5781_v8 = vmul.f32 0.35355338, %v5742_v26 }
0x1a66   :  { %v13868_v39 = vsel %vm119_vm8, %v5782_v33, -1e+30 }
0x1a67   :  { %v13874_v14 = vsel %vm118_vm15, %v5781_v8, -1e+30  ;;  %v5800_v21 = vsel %vm15326_vm13, %v13868_v39, -inf  ;;  %vm92_vm13 = vcmp.lt.s32.totalorder %v15333_v17, 2 }
0x1a68   :  { %5801 = vmax.xlane.f32.xlu1 %v5800_v21  ;;  %v5797_v16 = vsel %vm15327_vm10, %v13874_v14, -inf  ;;  %vm15334_vm10 = vmmov %vm15331_vm7  ;;  %v13938_v60 = vsel %vm92_vm13, %v100_v27, %v8491_v24 }
0x1a69   :  { %5798 = vmax.xlane.f32.xlu0 %v5797_v16  ;;  %vm15338_vm13 = vmmov %vm15337_vm3 }
0x1a6b   :  { %v10186_v58 = vpop.f32.mrb[114].mxu1 }
0x1a6c   :  { %v5784_v63 = vmul.f32 0.35355338, %v10186_v58  ;;  %v5752_v5 = vpop.f32.mrb[115].mxu1 }
0x1a6d   :  { %v5783_v1 = vmul.f32 0.35355338, %v5752_v5 }
0x1a6e   :  { %v13896_v62 = vsel %vm121_vm14, %v5784_v63, -1e+30 }
0x1a6f   :  { %v13902_v2 = vsel %vm120_vm5, %v5783_v1, -1e+30  ;;  %v5806_v28 = vsel %vm15330_vm12, %v13896_v62, -inf  ;;  %vm124_vm12 = vcmp.eq.s32.totalorder %v13938_v60, %v15323_v44 }
0x1a70   :  { %5807 = vmax.xlane.f32.xlu1 %v5806_v28  ;;  %v5803_v42 = vsel %vm15331_vm7, %v13902_v2, -inf  ;;  %vm15336_vm7 = vmmov %vm15335_vm4 }
0x1a71   :  { %5804 = vmax.xlane.f32.xlu0 %v5803_v42 }
0x1a73   :  { %v10189_v55 = vpop.f32.mrb[116].mxu1 }
0x1a74   :  { %v5786_v10 = vmul.f32 0.35355338, %v10189_v55  ;;  %v5762_v47 = vpop.f32.mrb[117].mxu1 }
0x1a75   :  { %v5785_v38 = vmul.f32 0.35355338, %v5762_v47 }
0x1a76   :  { %v13924_v3 = vsel %vm123_vm11, %v5786_v10, -1e+30 }
0x1a77   :  { %v13930_v45 = vsel %vm122_vm9, %v5785_v38, -1e+30  ;;  %v5812_v51 = vsel %vm15334_vm10, %v13924_v3, -inf  ;;  %vm15339_vm10 = vmmov %vm15337_vm3 }
0x1a78   :  { %5813 = vmax.xlane.f32.xlu1 %v5812_v51  ;;  %v5809_v48 = vsel %vm15335_vm4, %v13930_v45, -inf  ;;  %vm15340_vm4 = vmmov %vm15337_vm3 }
0x1a79   :  { %5810 = vmax.xlane.f32.xlu0 %v5809_v48 }
0x1a7b   :  { %v10192_v40 = vpop.f32.mrb[118].mxu1 }
0x1a7c   :  { %v5788_v32 = vmul.f32 0.35355338, %v10192_v40  ;;  %v5772_v4 = vpop.f32.mrb[119].mxu1 }
0x1a7d   :  { %v5787_v33 = vmul.f32 0.35355338, %v5772_v4  ;;  %v8813_v4 = vld [vmem:[%s14902_s7 + $0x78] sm:$0xff] }
0x1a7e   :  { %v13947_v26 = vsel %vm125_vm6, %v5788_v32, -1e+30 }
0x1a7f   :  { %v13952_v43 = vsel %vm124_vm12, %v5787_v33, -1e+30  ;;  %v10216_v29 = vpop.f32.mrb[120].mxu1  ;;  %v5818_v57 = vsel %vm15336_vm7, %v13947_v26, -inf  ;;  %vm15341_vm7 = vmmov %vm15337_vm3  ;;  %v8812_v33 = vld [vmem:[%s14902_s7 + $0x70] sm:$0xff] }
0x1a80   :  { %v6144_v8 = vmul.f32 0.35355338, %v10216_v29  ;;  %5819 = vmax.xlane.f32.xlu1 %v5818_v57  ;;  %v6104_v18 = vpop.f32.mrb[121].mxu1  ;;  %v5815_v6 = vsel %vm15337_vm3, %v13952_v43, -inf }
0x1a81   :  { %v6143_v41 = vmul.f32 0.35355338, %v6104_v18  ;;  %5816 = vmax.xlane.f32.xlu0 %v5815_v6 }
0x1a82   :  { %v13961_v21 = vsel %vm119_vm8, %v6144_v8, -1e+30 }
0x1a83   :  { %v13966_v16 = vsel %vm118_vm15, %v6143_v41, -1e+30  ;;  %v10219_v58 = vpop.f32.mrb[122].mxu1  ;;  %v6162_v63 = vsel %vm15338_vm13, %v13961_v21, -inf  ;;  %vm15342_vm13 = vmmov %vm15337_vm3 }
0x1a84   :  { %v6146_v5 = vmul.f32 0.35355338, %v10219_v58  ;;  %6163 = vmax.xlane.f32.xlu1 %v6162_v63  ;;  %v6114_v53 = vpop.f32.mrb[123].mxu1  ;;  %v6159_v50 = vsel %vm15339_vm10, %v13966_v16, -inf  ;;  %vm15343_vm10 = vmmov %vm15337_vm3 }
0x1a85   :  { %v6145_v46 = vmul.f32 0.35355338, %v6114_v53  ;;  %6160 = vmax.xlane.f32.xlu0 %v6159_v50 }
0x1a86   :  { %v13975_v1 = vsel %vm121_vm14, %v6146_v5, -1e+30 }
0x1a87   :  { %v13980_v0 = vsel %vm120_vm5, %v6145_v46, -1e+30  ;;  %v10222_v19 = vpop.f32.mrb[124].mxu1  ;;  %v6168_v34 = vsel %vm15340_vm4, %v13975_v1, -inf  ;;  %vm15344_vm4 = vmmov %vm15337_vm3 }
0x1a88   :  { %v6148_v28 = vmul.f32 0.35355338, %v10222_v19  ;;  %6169 = vmax.xlane.f32.xlu1 %v6168_v34  ;;  %v6124_v42 = vpop.f32.mrb[125].mxu1  ;;  %v6165_v55 = vsel %vm15341_vm7, %v13980_v0, -inf  ;;  %vm15345_vm7 = vmmov %vm15337_vm3 }
0x1a89   :  { %v6147_v10 = vmul.f32 0.35355338, %v6124_v42  ;;  %6166 = vmax.xlane.f32.xlu0 %v6165_v55 }
0x1a8a   :  { %v13989_v47 = vsel %vm123_vm11, %v6148_v28, -1e+30 }
0x1a8b   :  { %v13994_v35 = vsel %vm122_vm9, %v6147_v10, -1e+30  ;;  %v10225_v22 = vpop.f32.mrb[126].mxu1  ;;  %v6174_v56 = vsel %vm15337_vm3, %v13989_v47, -inf }
0x1a8c   :  { %v6150_v38 = vmul.f32 0.35355338, %v10225_v22  ;;  %6175 = vmax.xlane.f32.xlu1 %v6174_v56  ;;  %v6134_v17 = vpop.f32.mrb[127].mxu1  ;;  %v6171_v27 = vsel %vm15342_vm13, %v13994_v35, -inf  ;;  %vm15346_vm13 = vmmov %vm15337_vm3 }
0x1a8d   :  { %v6149_v24 = vmul.f32 0.35355338, %v6134_v17  ;;  %6172 = vmax.xlane.f32.xlu0 %v6171_v27 }
0x1a8e   :  { %v14003_v51 = vsel %vm125_vm6, %v6150_v38, -1e+30 }
0x1a8f   :  { %v14008_v48 = vsel %vm124_vm12, %v6149_v24, -1e+30  ;;  %v6180_v40 = vsel %vm15343_vm10, %v14003_v51, -inf  ;;  %vm15347_vm10 = vmmov %vm15337_vm3 }
0x1a90   :  { %6181 = vmax.xlane.f32.xlu1 %v6180_v40  ;;  %v6177_v32 = vsel %vm15344_vm4, %v14008_v48, -inf  ;;  %vm15348_vm4 = vmmov %vm15337_vm3 }
0x1a91   :  { %6178 = vmax.xlane.f32.xlu0 %v6177_v32 }
0x1aa1   :  { %5416 = vperm.xlu1 %10897, %v8813_v4  }
0x1aa7   :  { %5411 = vperm.xlu0 %10898, %v8812_v33  }
0x1af5   :  { %v5802_v29 = vpop.xlane.xlu1 %5801 }
0x1af6   :  { %v5822_v57 = vsub.f32 %v13868_v39, %v5802_v29  ;;  %v5799_v8 = vpop.xlane.xlu0 %5798 }
0x1af7   :  { %v5821_v18 = vsub.f32 %v13874_v14, %v5799_v8 }
0x1af8   :  { %v5831_v6 = vmul.f32 1.442695, %v5822_v57 }
0x1af9   :  { %v5829_v41 = vmul.f32 1.442695, %v5821_v18 }
0x1afa   :  { %11047 = vpow2.f32 %v5831_v6 }
0x1afb   :  { %11049 = vpow2.f32 %v5829_v41 }
0x1afd   :  { %v5808_v58 = vpop.xlane.xlu1 %5807 }
0x1afe   :  { %v5824_v63 = vsub.f32 %v13896_v62, %v5808_v58  ;;  %v5805_v5 = vpop.xlane.xlu0 %5804 }
0x1aff   :  { %v5823_v53 = vsub.f32 %v13902_v2, %v5805_v5 }
0x1b00   :  { %v5835_v50 = vmul.f32 1.442695, %v5824_v63 }
0x1b01   :  { %v5833_v46 = vmul.f32 1.442695, %v5823_v53 }
0x1b02   :  { %11051 = vpow2.f32 %v5835_v50 }
0x1b03   :  { %11053 = vpow2.f32 %v5833_v46 }
0x1b04   :  { %v14024_v19 = vpop.eup %11047 }
0x1b05   :  { %v14026_v39 = vpop.eup %11049  ;;  %v5814_v34 = vpop.xlane.xlu1 %5813  ;;  %v5848_v14 = vsel %vm15345_vm7, %v14024_v19, 0.0  ;;  %vm15349_vm7 = vmmov %vm15337_vm3 }
0x1b06   :  { %v5826_v28 = vsub.f32 %v13924_v3, %v5814_v34  ;;  %v5811_v42 = vpop.xlane.xlu0 %5810  ;;  %5849 = vadd.xlane.f32.xlu1 %v5848_v14  ;;  %v5845_v62 = vsel %vm15337_vm3, %v14026_v39, 0.0 }
0x1b07   :  { %v5825_v2 = vsub.f32 %v13930_v45, %v5811_v42  ;;  %5846 = vadd.xlane.f32.xlu0 %v5845_v62 }
0x1b08   :  { %v5839_v55 = vmul.f32 1.442695, %v5826_v28 }
0x1b09   :  { %v5837_v10 = vmul.f32 1.442695, %v5825_v2 }
0x1b0a   :  { %11055 = vpow2.f32 %v5839_v55 }
0x1b0b   :  { %11057 = vpow2.f32 %v5837_v10 }
0x1b0c   :  { %v14034_v22 = vpop.eup %11051 }
0x1b0d   :  { %v14036_v56 = vpop.eup %11053  ;;  %v5820_v38 = vpop.xlane.xlu1 %5819  ;;  %v5854_v3 = vsel %vm15346_vm13, %v14034_v22, 0.0  ;;  %vm15350_vm13 = vmmov %vm15337_vm3 }
0x1b0e   :  { %v5828_v17 = vsub.f32 %v13947_v26, %v5820_v38  ;;  %v5817_v27 = vpop.xlane.xlu0 %5816  ;;  %5855 = vadd.xlane.f32.xlu1 %v5854_v3  ;;  %v5851_v45 = vsel %vm15347_vm10, %v14036_v56, 0.0  ;;  %vm15351_vm10 = vmmov %vm15337_vm3 }
0x1b0f   :  { %v5827_v24 = vsub.f32 %v13952_v43, %v5817_v27  ;;  %5852 = vadd.xlane.f32.xlu0 %v5851_v45 }
0x1b10   :  { %v5843_v40 = vmul.f32 1.442695, %v5828_v17 }
0x1b11   :  { %v5841_v32 = vmul.f32 1.442695, %v5827_v24  ;;  %v6164_v4 = vpop.xlane.xlu1 %6163 }
0x1b12   :  { %11059 = vpow2.f32 %v5843_v40  ;;  %v6184_v33 = vsub.f32 %v13961_v21, %v6164_v4  ;;  %v6161_v29 = vpop.xlane.xlu0 %6160  ;;  %v8819_v4 = vld [vmem:[%s14902_s7 + $0xa8] sm:$0xff] }
0x1b13   :  { %11061 = vpow2.f32 %v5841_v32  ;;  %v6183_v57 = vsub.f32 %v13966_v16, %v6161_v29 }
0x1b14   :  { %v14046_v8 = vpop.eup %11055  ;;  %v6193_v26 = vmul.f32 1.442695, %v6184_v33  ;;  %v14093_v33 = vpop.f32.mrb[114].mxu0 }
0x1b15   :  { %v14048_v18 = vpop.eup %11057  ;;  %v6191_v6 = vmul.f32 1.442695, %v6183_v57  ;;  %v6170_v41 = vpop.xlane.xlu1 %6169  ;;  %v5860_v43 = vsel %vm15348_vm4, %v14046_v8, 0.0  ;;  %vm15352_vm4 = vmmov %vm15337_vm3 }
0x1b16   :  { %11063 = vpow2.f32 %v6193_v26  ;;  %v6186_v58 = vsub.f32 %v13975_v1, %v6170_v41  ;;  %v6167_v63 = vpop.xlane.xlu0 %6166  ;;  %5861 = vadd.xlane.f32.xlu1 %v5860_v43  ;;  %v5857_v21 = vsel %vm15349_vm7, %v14048_v18, 0.0  ;;  %vm15353_vm7 = vmmov %vm15337_vm3  ;;  %v14095_v29 = vpop.f32.mrb[115].mxu0  ;;  %v8818_v26 = vld [vmem:[%s14902_s7 + $0xa0] sm:$0xff]  ;;  %v8809_v41 = vld [vmem:[%s14901_s6 + $0xb8] sm:$0xff] }
0x1b17   :  { %11065 = vpow2.f32 %v6191_v6  ;;  %v6185_v16 = vsub.f32 %v13980_v0, %v6167_v63  ;;  %5858 = vadd.xlane.f32.xlu0 %v5857_v21  ;;  %v14097_v57 = vpop.f32.mrb[116].mxu0  ;;  %v8808_v6 = vld [vmem:[%s14901_s6 + $0xb0] sm:$0xff]  ;;  %s8468_s6 = sshll.u32 %s11364_s20, 4  ;;  %s14852_s6 = int_to_ptr.vmem [resolvable:$true] %s8468_s6 }
0x1b18   :  { %v6197_v5 = vmul.f32 1.442695, %v6186_v58  ;;  %v14110_v43 = vpop.f32.mrb[117].mxu0 }
0x1b19   :  { %v6195_v53 = vmul.f32 1.442695, %v6185_v16  ;;  %v6176_v50 = vpop.xlane.xlu1 %6175 }
0x1b1a   :  { %11067 = vpow2.f32 %v6197_v5  ;;  %v6188_v46 = vsub.f32 %v13989_v47, %v6176_v50  ;;  %v6173_v34 = vpop.xlane.xlu0 %6172 }
0x1b1b   :  { %11069 = vpow2.f32 %v6195_v53  ;;  %v6187_v14 = vsub.f32 %v13994_v35, %v6173_v34 }
0x1b1c   :  { %v14058_v1 = vpop.eup %11059  ;;  %v6201_v28 = vmul.f32 1.442695, %v6188_v46 }
0x1b1d   :  { %v14060_v42 = vpop.eup %11061  ;;  %v6199_v62 = vmul.f32 1.442695, %v6187_v14  ;;  %v5866_v0 = vsel %vm15337_vm3, %v14058_v1, 0.0  ;;  %v6182_v58 = vpop.xlane.xlu1 %6181 }
0x1b1e   :  { %11071 = vpow2.f32 %v6201_v28  ;;  %5867 = vadd.xlane.f32.xlu0 %v5866_v0  ;;  %v5863_v2 = vsel %vm15350_vm13, %v14060_v42, 0.0  ;;  %vm15354_vm13 = vmmov %vm15337_vm3  ;;  %v6179_v63 = vpop.xlane.xlu0 %6178  ;;  %v6190_v21 = vsub.f32 %v14003_v51, %v6182_v58  ;;  %v8816_v51 = vld [vmem:[%s14902_s7 + $0x90] sm:$0xff] }
0x1b1f   :  { %11073 = vpow2.f32 %v6199_v62  ;;  %5864 = vadd.xlane.f32.xlu1 %v5863_v2  ;;  %v6189_v16 = vsub.f32 %v14008_v48, %v6179_v63  ;;  %v8817_v48 = vld [vmem:[%s14902_s7 + $0x98] sm:$0xff] }
0x1b20   :  { %v14066_v47 = vpop.eup %11063  ;;  %v6205_v5 = vmul.f32 1.442695, %v6190_v21 }
0x1b21   :  { %v14068_v55 = vpop.eup %11065  ;;  %v6210_v35 = vsel %vm15351_vm10, %v14066_v47, 0.0  ;;  %vm15355_vm10 = vmmov %vm15337_vm3  ;;  %v6203_v53 = vmul.f32 1.442695, %v6189_v16  ;;  %v5417_v28 = vpop.permute.xlu1 %5416 }
0x1b22   :  { %v6207_v10 = vsel %vm15352_vm4, %v14068_v55, 0.0  ;;  %vm15356_vm4 = vcmask 261120   ;;  %11075 = vpow2.f32 %v6205_v5  ;;  %v5577_v0 = vadd.f32 %v13807_v23, %v5417_v28 }
0x1b23   :  { %6208 = vadd.xlane.f32.xlu0 %v6207_v10  ;;  %6211 = vadd.xlane.f32.xlu1 %v6210_v35  ;;  %11077 = vpow2.f32 %v6203_v53 }
0x1b24   :  { %v14074_v38 = vpop.eup %11067  ;;  %10176 = vmatprep.mubr.msk.f32.mxu0 %vm15356_vm4, %v8808_v6 }
0x1b25   :  { %v14076_v3 = vpop.eup %11069  ;;  %v6216_v17 = vsel %vm15353_vm7, %v14074_v38, 0.0  ;;  %vm15357_vm7 = vmmov %vm15356_vm4 }
0x1b26   :  { %v6213_v27 = vsel %vm15337_vm3, %v14076_v3, 0.0  ;;  %10177 = vmatmul.mubr.msk.f32.gmra.mrb[118].mxu0 %vm15357_vm7, %v8809_v41  ;;  %v5412_v62 = vpop.permute.xlu0 %5411  ;;  %vm15360_vm4 = vmmov %vm15337_vm3 }
0x1b27   :  { %6214 = vadd.xlane.f32.xlu0 %v6213_v27  ;;  %6217 = vadd.xlane.f32.xlu1 %v6216_v17  ;;  %v5572_v10 = vadd.f32 %v13809_v25, %v5412_v62 }
0x1b28   :  { %v14082_v45 = vpop.eup %11071  ;;  %10209 = vmatprep.mubr.msk.f32.mxu0 %vm15044_vm0, %v15041_v11 }
0x1b29   :  { %v14084_v24 = vpop.eup %11073  ;;  %v6222_v40 = vsel %vm15354_vm13, %v14082_v45, 0.0  ;;  %vm15358_vm13 = vmmov %vm15337_vm3 }
0x1b2a   :  { %v6219_v32 = vsel %vm15355_vm10, %v14084_v24, 0.0  ;;  %vm15359_vm10 = vmmov %vm15337_vm3 }
0x1b2b   :  { %6220 = vadd.xlane.f32.xlu0 %v6219_v32  ;;  %6223 = vadd.xlane.f32.xlu1 %v6222_v40 }
0x1b2c   :  { %v14116_v50 = vpop.eup %11075 }
0x1b2d   :  { %v14118_v46 = vpop.eup %11077  ;;  %v6228_v14 = vsel %vm15358_vm13, %v14116_v50, 0.0 }
0x1b2e   :  { %v6225_v34 = vsel %vm15337_vm3, %v14118_v46, 0.0 }
0x1b3c   :  { %5446 = vperm.xlu1 %10897, %v8819_v4  }
0x1b41   :  { %5441 = vperm.xlu0 %10898, %v8818_v26  }
0x1b60   :  { %6226 = vadd.xlane.f32.xlu0 %v6225_v34  ;;  %6229 = vadd.xlane.f32.xlu1 %v6228_v14 }
0x1b71   :  { %5431 = vperm.xlu1 %10897, %v8816_v51  }
0x1b76   :  { %5436 = vperm.xlu0 %10898, %v8817_v48  }
0x1b93   :  { %v5850_v2 = vpop.xlane.xlu1 %5849 }
0x1b94   :  { %11079 = vrcp.f32 %v5850_v2  ;;  %v5847_v35 = vpop.xlane.xlu0 %5846  ;;  %6706 = vxpose.xlu0.b32.start.end [1/1] (short) (narrow) %v5577_v0, 64 }
0x1b95   :  { %11081 = vrcp.f32 %v5847_v35 }
0x1b9a   :  { %6344 = vxpose.xlu1.b32.start.end [1/1] (short) (narrow) %v5572_v10, 64 }
0x1b9b   :  { %v5856_v17 = vpop.xlane.xlu1 %5855 }
0x1b9c   :  { %11083 = vrcp.f32 %v5856_v17  ;;  %v5853_v27 = vpop.xlane.xlu0 %5852 }
0x1b9d   :  { %11085 = vrcp.f32 %v5853_v27 }
0x1b9e   :  { %v11080_v40 = vpop.eup %11079 }
0x1b9f   :  { %v11082_v32 = vpop.eup %11081  ;;  %v5872_v4 = vmul.f32 %v11080_v40, %v14024_v19 }
0x1ba0   :  { %v5870_v26 = vmul.f32 %v11082_v32, %v14026_v39 }
0x1ba2   :  { %v10756_v6 = vpack.c.bf16 %v5872_v4, %v5870_v26 }
0x1ba3   :  { %v5862_v23 = vpop.xlane.xlu1 %5861 }
0x1ba4   :  { %11087 = vrcp.f32 %v5862_v23  ;;  %v5859_v41 = vpop.xlane.xlu0 %5858  ;;  %10758 = vmatpush3.bf16.xpose.msk.msra.mxu0 %vm11655_vm2, %v10756_v6 }
0x1ba5   :  { %11089 = vrcp.f32 %v5859_v41  ;;  %10759 = vmatprep.subr.bf16.mxu0 %v15042_v37 }
0x1ba6   :  { %v11084_v25 = vpop.eup %11083 }
0x1ba7   :  { %v11086_v58 = vpop.eup %11085  ;;  %v5876_v63 = vmul.f32 %v11084_v25, %v14034_v22 }
0x1ba8   :  { %v5874_v21 = vmul.f32 %v11086_v58, %v14036_v56 }
0x1baa   :  { %v10760_v16 = vpack.c.bf16 %v5876_v63, %v5874_v21 }
0x1bab   :  { %v5868_v19 = vpop.xlane.xlu0 %5867 }
0x1bac   :  { %11091 = vrcp.f32 %v5868_v19  ;;  %10762 = vmatpush3.bf16.xpose.msk.msra.mxu0 %vm11655_vm2, %v10760_v16  ;;  %v5865_v39 = vpop.xlane.xlu1 %5864 }
0x1bad   :  { %11093 = vrcp.f32 %v5865_v39  ;;  %10763 = vmatprep.subr.bf16.mxu0 %v15042_v37 }
0x1bae   :  { %v11088_v5 = vpop.eup %11087 }
0x1baf   :  { %v11090_v53 = vpop.eup %11089  ;;  %v5880_v34 = vmul.f32 %v11088_v5, %v14046_v8 }
0x1bb0   :  { %v5878_v14 = vmul.f32 %v11090_v53, %v14048_v18  ;;  %v6209_v51 = vpop.xlane.xlu0 %6208  ;;  %v6212_v22 = vpop.xlane.xlu1 %6211 }
0x1bb1   :  { %11095 = vrcp.f32 %v6209_v51 }
0x1bb2   :  { %11097 = vrcp.f32 %v6212_v22  ;;  %v10764_v56 = vpack.c.bf16 %v5880_v34, %v5878_v14 }
0x1bb4   :  { %v6215_v48 = vpop.xlane.xlu0 %6214  ;;  %10766 = vmatpush3.bf16.xpose.msk.msra.mxu0 %vm11655_vm2, %v10764_v56  ;;  %v6218_v28 = vpop.xlane.xlu1 %6217 }
0x1bb5   :  { %11099 = vrcp.f32 %v6215_v48  ;;  %10767 = vmatprep.subr.bf16.mxu0 %v15042_v37 }
0x1bb6   :  { %v11092_v62 = vpop.eup %11091  ;;  %11101 = vrcp.f32 %v6218_v28 }
0x1bb7   :  { %v11094_v0 = vpop.eup %11093  ;;  %v5884_v8 = vmul.f32 %v11092_v62, %v14058_v1 }
0x1bb8   :  { %v5882_v18 = vmul.f32 %v11094_v0, %v14060_v42  ;;  %v6221_v2 = vpop.xlane.xlu0 %6220  ;;  %v6224_v17 = vpop.xlane.xlu1 %6223 }
0x1bb9   :  { %11103 = vrcp.f32 %v6221_v2 }
0x1bba   :  { %v10768_v35 = vpack.c.bf16 %v5884_v8, %v5882_v18  ;;  %11105 = vrcp.f32 %v6224_v17 }
0x1bbb   :  { %v11096_v10 = vpop.eup %11095 }
0x1bbc   :  { %v11098_v27 = vpop.eup %11097  ;;  %v6232_v40 = vmul.f32 %v11096_v10, %v14068_v55  ;;  %10770 = vmatpush3.bf16.xpose.msk.msra.mxu0 %vm11655_vm2, %v10768_v35 }
0x1bbd   :  { %v6234_v32 = vmul.f32 %v11098_v27, %v14066_v47 }
0x1bbf   :  { %v11100_v4 = vpop.eup %11099  ;;  %v10772_v26 = vpack.c.bf16 %v6234_v32, %v6232_v40 }
0x1bc0   :  { %v11102_v6 = vpop.eup %11101  ;;  %v5442_v1 = vpop.permute.xlu0 %5441  ;;  %v6236_v55 = vmul.f32 %v11100_v4, %v14076_v3 }
0x1bc1   :  { %v5602_v42 = vadd.f32 %v14110_v43, %v5442_v1  ;;  %10774 = vmatpush3.bf16.xpose.msk.msra.mxu1 %vm11655_vm2, %v10772_v26  ;;  %v6238_v23 = vmul.f32 %v11102_v6, %v14074_v38  ;;  %v5447_v38 = vpop.permute.xlu1 %5446 }
0x1bc2   :  { %10775 = vmatprep.subr.bf16.mxu1 %v15042_v37 }
0x1bc3   :  { %10210 = vmatmul.mubr.msk.f32.vlgmr.msra.gmra.mrb[120].mxu0 %vm15359_vm10, %v5602_v42  ;;  %v11104_v47 = vpop.eup %11103  ;;  %v10776_v41 = vpack.c.bf16 %v6238_v23, %v6236_v55 }
0x1bc4   :  { %v11106_v25 = vpop.eup %11105  ;;  %v6240_v43 = vmul.f32 %v11104_v47, %v14084_v24 }
0x1bc5   :  { %v6242_v58 = vmul.f32 %v11106_v25, %v14082_v45 }
0x1bc7   :  { %v10780_v63 = vpack.c.bf16 %v6242_v58, %v6240_v43 }
0x1bc9   :  { %10778 = vmatpush3.bf16.xpose.msk.msra.mxu1 %vm11655_vm2, %v10776_v41 }
0x1bca   :  { %10779 = vmatprep.subr.bf16.mxu1 %v15042_v37 }
0x1bd1   :  { %10782 = vmatpush3.bf16.xpose.msk.msra.mxu1 %vm11655_vm2, %v10780_v63 }
0x1bd2   :  { %10783 = vmatprep.subr.bf16.mxu1 %v15042_v37 }
0x1bed   :  { %v6227_v3 = vpop.xlane.xlu0 %6226  ;;  %v6230_v21 = vpop.xlane.xlu1 %6229 }
0x1bee   :  { %11107 = vrcp.f32 %v6227_v3 }
0x1bef   :  { %11109 = vrcp.f32 %v6230_v21 }
0x1bf1   :  { %v5432_v16 = vpop.permute.xlu1 %5431 }
0x1bf2   :  { %v5592_v19 = vadd.f32 %v14095_v29, %v5432_v16  ;;  %v5607_v29 = vadd.f32 %v14097_v57, %v5447_v38 }
0x1bf4   :  { %10245 = vmatprep.subr.mxu0 %v5592_v19 }
0x1bf5   :  { %10246 = vmatpush3.msra.mxu0 %v5592_v19  ;;  %v5437_v53 = vpop.permute.xlu0 %5436 }
0x1bf6   :  { %10787 = vmatprep.subr.bf16.mxu0 %v15042_v37  ;;  %v5597_v14 = vadd.f32 %v14093_v33, %v5437_v53 }
0x1bf8   :  { %v11108_v24 = vpop.eup %11107 }
0x1bf9   :  { %v11110_v45 = vpop.eup %11109  ;;  %v6244_v39 = vmul.f32 %v11108_v24, %v14118_v46  ;;  %v14178_v51 = vpop.f32.mrb[118].mxu0 }
0x1bfa   :  { %v6246_v5 = vmul.f32 %v11110_v45, %v14116_v50  ;;  %v14180_v22 = vpop.f32.mrb[119].mxu0 }
0x1bfc   :  { %v10784_v34 = vpack.c.bf16 %v6246_v5, %v6244_v39 }
0x1bfe   :  { %10786 = vmatpush3.bf16.xpose.msk.msra.mxu1 %vm11655_vm2, %v10784_v34 }
0x1bff   :  { %10278 = vmatprep.subr.mxu1 %v5597_v14 }
0x1c05   :  { %10243 = vmatmul.mubr.msk.f32.vlgmr.msra.gmra.mrb[128].mxu1 %vm15360_vm4, %v5607_v29 }
0x1c06   :  { %10279 = vmatpush3.msra.mxu1 %v5597_v14 }
0x1c07   :  { %10803 = vmatprep.subr.bf16.mxu1 %v15042_v37 }
0x1c14   :  { %v6722_v46 = vpop.trf.xlu0 }
0x1c15   :  { %10280 = vmatprep.mubr.msk.f32.mxu1 %vm3509_vm1, %v6722_v46 }
0x1c18   :  { %v6723_v50 = vpop.trf.xlu0 }
0x1c19   :  { %10281 = vmatmul.mubr.msk.f32.vlgmr.msra.gmra.mrb[130].mxu1 %vm3509_vm1, %v6723_v50 }
0x1c1a   :  { %v6360_v33 = vpop.trf.xlu1 }
0x1c1b   :  { %10247 = vmatprep.mubr.msk.f32.mxu0 %vm3509_vm1, %v6360_v33 }
0x1c1c   :  { %v6724_v56 = vpop.trf.xlu0 }
0x1c1d   :  { %10283 = vmatprep.mubr.msk.f32.mxu1 %vm3509_vm1, %v6724_v56 }
0x1c1e   :  { %v6361_v57 = vpop.trf.xlu1 }
0x1c1f   :  { %10248 = vmatmul.mubr.msk.f32.vlgmr.msra.gmra.mrb[122].mxu0 %vm3509_vm1, %v6361_v57 }
0x1c20   :  { %v6725_v48 = vpop.trf.xlu0 }
0x1c21   :  { %10284 = vmatmul.mubr.msk.f32.gmra.mrb[132].mxu1 %vm3509_vm1, %v6725_v48 }
0x1c22   :  { %v6362_v28 = vpop.trf.xlu1 }
0x1c23   :  { %10250 = vmatprep.mubr.msk.f32.mxu0 %vm3509_vm1, %v6362_v28 }
0x1c24   :  { %v6726_v62 = vpop.trf.xlu0 }
0x1c25   :  { %10286 = vmatprep.mubr.msk.f32.mxu1 %vm3509_vm1, %v6726_v62 }
0x1c26   :  { %v6363_v0 = vpop.trf.xlu1 }
0x1c27   :  { %10251 = vmatmul.mubr.msk.f32.gmra.mrb[124].mxu0 %vm3509_vm1, %v6363_v0 }
0x1c28   :  { %v6727_v8 = vpop.trf.xlu0 }
0x1c29   :  { %10287 = vmatmul.mubr.msk.f32.gmra.mrb[134].mxu1 %vm3509_vm1, %v6727_v8 }
0x1c2a   :  { %v6364_v18 = vpop.trf.xlu1 }
0x1c2b   :  { %10253 = vmatprep.mubr.msk.f32.mxu0 %vm3509_vm1, %v6364_v18 }
0x1c2c   :  { %v6728_v2 = vpop.trf.xlu0 }
0x1c2d   :  { %10289 = vmatprep.mubr.msk.f32.mxu1 %vm3509_vm1, %v6728_v2 }
0x1c2e   :  { %v6365_v35 = vpop.trf.xlu1 }
0x1c2f   :  { %10254 = vmatmul.mubr.msk.f32.gmra.mrb[126].mxu0 %vm3509_vm1, %v6365_v35 }
0x1c30   :  { %v6729_v10 = vpop.trf.xlu0 }
0x1c31   :  { %10290 = vmatmul.mubr.msk.f32.gmra.mrb[136].mxu1 %vm3509_vm1, %v6729_v10 }
0x1c32   :  { %v6366_v17 = vpop.trf.xlu1  ;;  %10308 = vmatprep.mubr.msk.f32.mxu1 %vm15044_vm0, %v15041_v11 }
0x1c33   :  { %10256 = vmatprep.mubr.msk.f32.mxu0 %vm3509_vm1, %v6366_v17 }
0x1c36   :  { %v6367_v27 = vpop.trf.xlu1 }
0x1c37   :  { %10257 = vmatmul.mubr.msk.f32.gmra.mrb[128].mxu0 %vm3509_vm1, %v6367_v27 }
0x1c38   :  { %10275 = vmatprep.mubr.msk.f32.mxu0 %vm15044_vm0, %v15041_v11  ;;  %vm15361_vm0 = vmmov %vm15337_vm3 }
0x1c39   :  { %vm15362_vm1 = vmmov %vm15361_vm0 }
0x1c3a   :  { %vm15364_vm7 = vmmov %vm15361_vm0 }
0x1c3b   :  { %vm15366_vm3 = vmmov %vm15361_vm0 }
0x1c3c   :  { %vm15368_vm13 = vmmov %vm15361_vm0 }
0x1c3d   :  { %vm15370_vm10 = vmmov %vm15361_vm0 }
0x1c3e   :  { %vm15372_vm4 = vmmov %vm15361_vm0 }
0x1c96   :  { %v5978_v40 = vpop.f32.mrb[120].mxu0 }
0x1c97   :  { %v10211_v32 = vpop.f32.mrb[121].mxu0 }
0x1cd8   :  { %v6340_v4 = vpop.f32.mrb[128].mxu1 }
0x1cd9   :  { %v14202_v26 = vpack.c.bf16 %v6340_v4, %v5978_v40  ;;  %v10244_v6 = vpop.f32.mrb[129].mxu1 }
0x1cec   :  { %v10282_v1 = vpop.f32.mrb[130].mxu1 }
0x1ced   :  { %v6828_v42 = vpop.f32.mrb[131].mxu1  ;;  %v6868_v55 = vmul.f32 0.35355338, %v10282_v1 }
0x1cee   :  { %v6867_v47 = vmul.f32 0.35355338, %v6828_v42 }
0x1cef   :  { %v14212_v11 = vsel %vm119_vm8, %v6868_v55, -1e+30 }
0x1cf0   :  { %v14222_v21 = vsel %vm118_vm15, %v6867_v47, -1e+30 }
0x1cf1   :  { %v6883_v24 = vsel %vm15364_vm7, %v14222_v21, -inf  ;;  %vm15378_vm7 = vmmov %vm15361_vm0 }
0x1cf2   :  { %v10249_v23 = vpop.f32.mrb[122].mxu0 }
0x1cf3   :  { %v6506_v41 = vmul.f32 0.35355338, %v10249_v23  ;;  %v6466_v25 = vpop.f32.mrb[123].mxu0 }
0x1cf4   :  { %v6505_v43 = vmul.f32 0.35355338, %v6466_v25  ;;  %v10285_v58 = vpop.f32.mrb[132].mxu1 }
0x1cf5   :  { %v14207_v63 = vsel %vm119_vm8, %v6506_v41, -1e+30  ;;  %v6838_v38 = vpop.f32.mrb[133].mxu1  ;;  %vm15363_vm8 = vmmov %vm15361_vm0  ;;  %v6870_v45 = vmul.f32 0.35355338, %v10285_v58 }
0x1cf6   :  { %v14217_v3 = vsel %vm118_vm15, %v6505_v43, -1e+30  ;;  %v6524_v16 = vsel %vm15361_vm0, %v14207_v63, -inf  ;;  %v6886_v19 = vsel %vm15363_vm8, %v14212_v11, -inf  ;;  %v6869_v5 = vmul.f32 0.35355338, %v6838_v38  ;;  %vm15365_vm15 = vmmov %vm15361_vm0 }
0x1cf7   :  { %6525 = vmax.xlane.f32.xlu1 %v6524_v16  ;;  %v6521_v61 = vsel %vm15362_vm1, %v14217_v3, -inf  ;;  %v14240_v46 = vsel %vm121_vm14, %v6870_v45, -1e+30  ;;  %vm15375_vm1 = vmmov %vm15361_vm0 }
0x1cf8   :  { %6522 = vmax.xlane.f32.xlu0 %v6521_v61  ;;  %v14250_v56 = vsel %vm120_vm5, %v6869_v5, -1e+30  ;;  %vm15377_vm8 = vmmov %vm15361_vm0 }
0x1cf9   :  { %v6889_v28 = vsel %vm15368_vm13, %v14250_v56, -inf  ;;  %vm15382_vm13 = vmmov %vm15361_vm0 }
0x1cfa   :  { %v10252_v39 = vpop.f32.mrb[124].mxu0 }
0x1cfb   :  { %v6508_v9 = vmul.f32 0.35355338, %v10252_v39  ;;  %6887 = vmax.xlane.f32.xlu1 %v6886_v19  ;;  %v6476_v53 = vpop.f32.mrb[125].mxu0 }
0x1cfc   :  { %v6507_v34 = vmul.f32 0.35355338, %v6476_v53  ;;  %6884 = vmax.xlane.f32.xlu0 %v6883_v24  ;;  %v10288_v14 = vpop.f32.mrb[134].mxu1 }
0x1cfd   :  { %v14235_v29 = vsel %vm121_vm14, %v6508_v9, -1e+30  ;;  %v6848_v50 = vpop.f32.mrb[135].mxu1  ;;  %vm15367_vm14 = vmmov %vm15361_vm0  ;;  %v6872_v62 = vmul.f32 0.35355338, %v10288_v14 }
0x1cfe   :  { %v14245_v33 = vsel %vm120_vm5, %v6507_v34, -1e+30  ;;  %v6530_v57 = vsel %vm15365_vm15, %v14235_v29, -inf  ;;  %v6892_v48 = vsel %vm15367_vm14, %v14240_v46, -inf  ;;  %v6871_v8 = vmul.f32 0.35355338, %v6848_v50  ;;  %vm15369_vm5 = vmmov %vm15361_vm0 }
0x1cff   :  { %6531 = vmax.xlane.f32.xlu1 %v6530_v57  ;;  %v6527_v36 = vsel %vm15366_vm3, %v14245_v33, -inf  ;;  %v14268_v17 = vsel %vm123_vm11, %v6872_v62, -1e+30  ;;  %vm15379_vm15 = vmmov %vm15361_vm0 }
0x1d00   :  { %6528 = vmax.xlane.f32.xlu0 %v6527_v36  ;;  %v14278_v32 = vsel %vm122_vm9, %v6871_v8, -1e+30  ;;  %vm15380_vm3 = vmmov %vm15361_vm0 }
0x1d01   :  { %v6895_v1 = vsel %vm15372_vm4, %v14278_v32, -inf  ;;  %vm15381_vm14 = vmmov %vm15361_vm0 }
0x1d02   :  { %v10255_v0 = vpop.f32.mrb[126].mxu0  ;;  %vm15386_vm4 = vmmov %vm15361_vm0 }
0x1d03   :  { %v6510_v31 = vmul.f32 0.35355338, %v10255_v0  ;;  %6893 = vmax.xlane.f32.xlu1 %v6892_v48  ;;  %v6486_v18 = vpop.f32.mrb[127].mxu0 }
0x1d04   :  { %v6509_v2 = vmul.f32 0.35355338, %v6486_v18  ;;  %6890 = vmax.xlane.f32.xlu0 %v6889_v28  ;;  %v10291_v35 = vpop.f32.mrb[136].mxu1 }
0x1d05   :  { %v14263_v10 = vsel %vm123_vm11, %v6510_v31, -1e+30  ;;  %v6858_v27 = vpop.f32.mrb[137].mxu1  ;;  %vm15371_vm11 = vmmov %vm15361_vm0  ;;  %v6874_v42 = vmul.f32 0.35355338, %v10291_v35 }
0x1d06   :  { %v14273_v40 = vsel %vm122_vm9, %v6509_v2, -1e+30  ;;  %v6536_v4 = vsel %vm15369_vm5, %v14263_v10, -inf  ;;  %v6898_v6 = vsel %vm15371_vm11, %v14268_v17, -inf  ;;  %v6873_v23 = vmul.f32 0.35355338, %v6858_v27  ;;  %vm15373_vm9 = vmmov %vm15361_vm0 }
0x1d07   :  { %6537 = vmax.xlane.f32.xlu1 %v6536_v4  ;;  %v6533_v54 = vsel %vm15370_vm10, %v14273_v40, -inf  ;;  %v14296_v43 = vsel %vm125_vm6, %v6874_v42, -1e+30  ;;  %vm15383_vm5 = vmmov %vm15361_vm0 }
0x1d08   :  { %6534 = vmax.xlane.f32.xlu0 %v6533_v54  ;;  %v14306_v38 = vsel %vm124_vm12, %v6873_v23, -1e+30  ;;  %vm15384_vm10 = vmmov %vm15361_vm0 }
0x1d09   :  { %v6901_v19 = vsel %vm15375_vm1, %v14306_v38, -inf  ;;  %vm15385_vm11 = vmmov %vm15361_vm0 }
0x1d0a   :  { %v10258_v55 = vpop.f32.mrb[128].mxu0  ;;  %vm15389_vm1 = vmmov %vm15361_vm0 }
0x1d0b   :  { %v6512_v20 = vmul.f32 0.35355338, %v10258_v55  ;;  %6899 = vmax.xlane.f32.xlu1 %v6898_v6  ;;  %v6496_v47 = vpop.f32.mrb[129].mxu0 }
0x1d0c   :  { %v6511_v41 = vmul.f32 0.35355338, %v6496_v47  ;;  %6896 = vmax.xlane.f32.xlu0 %v6895_v1 }
0x1d0d   :  { %v14291_v25 = vsel %vm125_vm6, %v6512_v20, -1e+30  ;;  %vm15374_vm6 = vmmov %vm15361_vm0 }
0x1d0e   :  { %v14301_v58 = vsel %vm124_vm12, %v6511_v41, -1e+30  ;;  %v6542_v16 = vsel %vm15373_vm9, %v14291_v25, -inf  ;;  %v6904_v30 = vsel %vm15374_vm6, %v14296_v43, -inf  ;;  %vm15376_vm12 = vmmov %vm15361_vm0 }
0x1d0f   :  { %6543 = vmax.xlane.f32.xlu1 %v6542_v16  ;;  %v6539_v61 = vsel %vm15361_vm0, %v14301_v58, -inf  ;;  %vm15387_vm9 = vmmov %vm15361_vm0 }
0x1d10   :  { %6540 = vmax.xlane.f32.xlu0 %v6539_v61  ;;  %vm15388_vm6 = vmmov %vm15361_vm0 }
0x1d13   :  { %6905 = vmax.xlane.f32.xlu1 %v6904_v30 }
0x1d14   :  { %6902 = vmax.xlane.f32.xlu0 %v6901_v19 }
0x1d84   :  { %v6526_v24 = vpop.xlane.xlu1 %6525 }
0x1d85   :  { %v6546_v44 = vsub.f32 %v14207_v63, %v6526_v24  ;;  %v6523_v60 = vpop.xlane.xlu0 %6522 }
0x1d86   :  { %v6545_v45 = vsub.f32 %v14217_v3, %v6523_v60 }
0x1d87   :  { %v6555_v39 = vmul.f32 1.442695, %v6546_v44 }
0x1d88   :  { %v6553_v5 = vmul.f32 1.442695, %v6545_v45  ;;  %v6888_v9 = vpop.xlane.xlu1 %6887 }
0x1d89   :  { %11111 = vpow2.f32 %v6555_v39  ;;  %v6885_v53 = vpop.xlane.xlu0 %6884  ;;  %v6908_v34 = vsub.f32 %v14212_v11, %v6888_v9 }
0x1d8a   :  { %11113 = vpow2.f32 %v6553_v5  ;;  %v6907_v14 = vsub.f32 %v14222_v21, %v6885_v53 }
0x1d8b   :  { %v6917_v63 = vmul.f32 1.442695, %v6908_v34 }
0x1d8c   :  { %v6532_v50 = vpop.xlane.xlu1 %6531  ;;  %v6915_v62 = vmul.f32 1.442695, %v6907_v14 }
0x1d8d   :  { %v6548_v57 = vsub.f32 %v14235_v29, %v6532_v50  ;;  %v6529_v36 = vpop.xlane.xlu0 %6528 }
0x1d8e   :  { %v6547_v48 = vsub.f32 %v14245_v33, %v6529_v36 }
0x1d8f   :  { %v6559_v28 = vmul.f32 1.442695, %v6548_v57 }
0x1d90   :  { %v6557_v3 = vmul.f32 1.442695, %v6547_v48  ;;  %v6894_v0 = vpop.xlane.xlu1 %6893 }
0x1d91   :  { %11115 = vpow2.f32 %v6559_v28  ;;  %v6891_v8 = vpop.xlane.xlu0 %6890  ;;  %v6910_v11 = vsub.f32 %v14240_v46, %v6894_v0 }
0x1d92   :  { %11117 = vpow2.f32 %v6557_v3  ;;  %v6909_v29 = vsub.f32 %v14250_v56, %v6891_v8 }
0x1d93   :  { %v14322_v31 = vpop.eup %11111  ;;  %11119 = vpow2.f32 %v6917_v63  ;;  %v6921_v46 = vmul.f32 1.442695, %v6910_v11 }
0x1d94   :  { %v14325_v21 = vpop.eup %11113  ;;  %11121 = vpow2.f32 %v6915_v62  ;;  %v6538_v18 = vpop.xlane.xlu1 %6537  ;;  %v6572_v33 = vsel %vm15376_vm12, %v14322_v31, 0.0  ;;  %v6919_v6 = vmul.f32 1.442695, %v6909_v29  ;;  %vm15390_vm12 = vmmov %vm15361_vm0 }
0x1d95   :  { %v6550_v2 = vsub.f32 %v14263_v10, %v6538_v18  ;;  %v6535_v35 = vpop.xlane.xlu0 %6534  ;;  %6573 = vadd.xlane.f32.xlu1 %v6572_v33  ;;  %v6569_v27 = vsel %vm15377_vm8, %v14325_v21, 0.0  ;;  %vm15391_vm8 = vmmov %vm15361_vm0 }
0x1d96   :  { %v6549_v4 = vsub.f32 %v14273_v40, %v6535_v35  ;;  %6570 = vadd.xlane.f32.xlu0 %v6569_v27 }
0x1d97   :  { %v6563_v54 = vmul.f32 1.442695, %v6550_v2 }
0x1d98   :  { %v6561_v1 = vmul.f32 1.442695, %v6549_v4  ;;  %v6900_v42 = vpop.xlane.xlu1 %6899  ;;  %v8821_v4 = vld [vmem:[%s14902_s7 + $0xb8] sm:$0xff] }
0x1d99   :  { %11123 = vpow2.f32 %v6563_v54  ;;  %v6897_v56 = vpop.xlane.xlu0 %6896  ;;  %v6912_v10 = vsub.f32 %v14268_v17, %v6900_v42  ;;  %v8820_v54 = vld [vmem:[%s14902_s7 + $0xb0] sm:$0xff]  ;;  %v8922_v42 = vld [vmem:[%s14906_s11 + $0x40] sm:$0xff]  ;;  %s8454_s7 = sshll.u32 %s11363_s5, 4  ;;  %s8455_s7 = int_to_ptr.vmem [resolvable:$true] %s8454_s7 }
0x1d9a   :  { %11125 = vpow2.f32 %v6561_v1  ;;  %v6911_v20 = vsub.f32 %v14278_v32, %v6897_v56  ;;  %v8907_v1 = vld [vmem:[%s14904_s9 + $0x28] sm:$0xff]  ;;  %v8909_v56 = vld [vmem:[%s14904_s9 + $0x38] sm:$0xff]  ;;  %p11312_p1 = scmp.lt.s32.totalorder %s8455_s7, %s8455_s7 }
0x1d9b   :  { %v14334_v55 = vpop.eup %11115  ;;  %11127 = vpow2.f32 %v6921_v46  ;;  %v6925_v24 = vmul.f32 1.442695, %v6912_v10  ;;  %v8906_v46 = vld [vmem:[%s14904_s9 + $0x20] sm:$0xff]  ;;  %v8924_v10 = vld [vmem:[%s14906_s11 + $0x50] sm:$0xff] }
0x1d9c   :  { %v14337_v23 = vpop.eup %11117  ;;  %11129 = vpow2.f32 %v6919_v6  ;;  %v6544_v40 = vpop.xlane.xlu1 %6543  ;;  %v6578_v47 = vsel %vm15378_vm7, %v14334_v55, 0.0  ;;  %v6923_v44 = vmul.f32 1.442695, %v6911_v20  ;;  %v8908_v6 = vld [vmem:[%s14904_s9 + $0x30] sm:$0xff]  ;;  %v8923_v20 = vld [vmem:[%s14906_s11 + $0x48] sm:$0xff]  ;;  %vm15392_vm7 = vmmov %vm15361_vm0 }
0x1d9d   :  { %v14342_v41 = vpop.eup %11119  ;;  %v6552_v16 = vsub.f32 %v14291_v25, %v6544_v40  ;;  %v6541_v61 = vpop.xlane.xlu0 %6540  ;;  %6579 = vadd.xlane.f32.xlu1 %v6578_v47  ;;  %v6575_v30 = vsel %vm15379_vm15, %v14337_v23, 0.0  ;;  %v8926_v40 = vld [vmem:[%s14906_s11 + $0x60] sm:$0xff]  ;;  %v8925_v47 = vld [vmem:[%s14906_s11 + $0x58] sm:$0xff]  ;;  %vm15393_vm15 = vcmask 261120  }
0x1d9e   :  { %v14347_v19 = vpop.eup %11121  ;;  %v6551_v17 = vsub.f32 %v14301_v58, %v6541_v61  ;;  %6576 = vadd.xlane.f32.xlu0 %v6575_v30  ;;  %v6934_v39 = vsel %vm15380_vm3, %v14342_v41, 0.0  ;;  %v8927_v61 = vld [vmem:[%s14906_s11 + $0x68] sm:$0xff]  ;;  %v8942_v30 = vld [vmem:[%s14908_s13 + $0x20] sm:$0xff] }
0x1d9f   :  { %v6567_v32 = vmul.f32 1.442695, %v6552_v16  ;;  %v6931_v9 = vsel %vm15381_vm14, %v14347_v19, 0.0  ;;  %v8928_v16 = vld [vmem:[%s14906_s11 + $0x70] sm:$0xff] }
0x1da0   :  { %v6565_v60 = vmul.f32 1.442695, %v6551_v17  ;;  %v6906_v45 = vpop.xlane.xlu1 %6905  ;;  %v8929_v17 = vld [vmem:[%s14906_s11 + $0x78] sm:$0xff]  ;;  %s11307_s11 = scalar_lea.vmem %s8455_s7, 512 }
0x1da1   :  { %11131 = vpow2.f32 %v6567_v32  ;;  %v6914_v25 = vsub.f32 %v14296_v43, %v6906_v45  ;;  %v6903_v5 = vpop.xlane.xlu0 %6902  ;;  %6935 = vadd.xlane.f32.xlu1 %v6934_v39  ;;  %v8943_v32 = vld [vmem:[%s14908_s13 + $0x28] sm:$0xff]  ;;  %v7527_v45 = vld [vmem:[%s14910_s15 + $0x10] sm:$0xff]  ;;  %p11308_p0 = scmp.ne.s32.totalorder %s8455_s7, %s11307_s11  ;;  %p11313_p2 = scmp.lt.s32.totalorder %s11307_s11, %s11307_s11 }
0x1da2   :  { %11133 = vpow2.f32 %v6565_v60  ;;  %v6913_v58 = vsub.f32 %v14306_v38, %v6903_v5  ;;  %6932 = vadd.xlane.f32.xlu0 %v6931_v9  ;;  %v8945_v60 = vld [vmem:[%s14908_s13 + $0x38] sm:$0xff]  ;;  %v7526_v39 = vld [vmem:[%s14910_s15 + $0x8] sm:$0xff] }
0x1da3   :  { %v14356_v53 = vpop.eup %11123  ;;  %11135 = vpow2.f32 %v6925_v24  ;;  %v6929_v34 = vmul.f32 1.442695, %v6914_v25  ;;  %v8944_v24 = vld [vmem:[%s14908_s13 + $0x30] sm:$0xff]  ;;  %v7528_v25 = vld [vmem:[%s14910_s15 + $0x18] sm:$0xff]  ;;  %p11314_p3 = por %p11313_p2, %p11312_p1 }
0x1da4   :  { %v14358_v14 = vpop.eup %11125  ;;  %11137 = vpow2.f32 %v6923_v44  ;;  %v6927_v50 = vmul.f32 1.442695, %v6913_v58  ;;  %v6584_v43 = vsel %vm15382_vm13, %v14356_v53, 0.0  ;;  %v7525_v44 = vld [vmem:[%s14910_s15] sm:$0xff]  ;;  %vm15397_vm13 = vmmov %vm15361_vm0 }
0x1da5   :  { %v14362_v57 = vpop.eup %11127  ;;  %6585 = vadd.xlane.f32.xlu1 %v6584_v43  ;;  %v6581_v36 = vsel %vm15383_vm5, %v14358_v14, 0.0  ;;  %11139 = vpow2.f32 %v6929_v34  ;;  %vm15398_vm5 = vmmov %vm15361_vm0  ;;  %p11315_p4 = pnand %p11314_p3, %p11308_p0 }
0x1da6   :  { %v14366_v48 = vpop.eup %11129  ;;  %6582 = vadd.xlane.f32.xlu0 %v6581_v36  ;;  %11141 = vpow2.f32 %v6927_v50  ;;  %v6940_v38 = vsel %vm15384_vm10, %v14362_v57, 0.0  ;;  %vm15399_vm10 = vmmov %vm15361_vm0 }
0x1da7   :  { %v6937_v63 = vsel %vm15385_vm11, %v14366_v48, 0.0  ;;  %vm15400_vm11 = vmmov %vm15361_vm0 }
0x1da9   :  { %6941 = vadd.xlane.f32.xlu1 %v6940_v38 }
0x1daa   :  { %6938 = vadd.xlane.f32.xlu0 %v6937_v63 }
0x1dab   :  { %v14372_v28 = vpop.eup %11131 }
0x1dac   :  { %v14374_v62 = vpop.eup %11133  ;;  %v6590_v3 = vsel %vm15386_vm4, %v14372_v28, 0.0  ;;  %vm15401_vm4 = vmmov %vm15361_vm0 }
0x1dad   :  { %v14378_v0 = vpop.eup %11135  ;;  %6591 = vadd.xlane.f32.xlu1 %v6590_v3  ;;  %v6587_v8 = vsel %vm15387_vm9, %v14374_v62, 0.0  ;;  %vm15402_vm9 = vmmov %vm15361_vm0 }
0x1dae   :  { %v14382_v11 = vpop.eup %11137  ;;  %6588 = vadd.xlane.f32.xlu0 %v6587_v8  ;;  %v6946_v29 = vsel %vm15361_vm0, %v14378_v0, 0.0 }
0x1daf   :  { %v14386_v18 = vpop.eup %11139  ;;  %v6943_v33 = vsel %vm15388_vm6, %v14382_v11, 0.0  ;;  %vm15403_vm6 = vmmov %vm15361_vm0 }
0x1db0   :  { %v14390_v2 = vpop.eup %11141  ;;  %v6952_v35 = vsel %vm15389_vm1, %v14386_v18, 0.0  ;;  %vm15404_vm1 = vmmov %vm15361_vm0 }
0x1db1   :  { %6947 = vadd.xlane.f32.xlu1 %v6946_v29  ;;  %v6949_v27 = vsel %vm15390_vm12, %v14390_v2, 0.0  ;;  %vm15405_vm12 = vmmov %vm15361_vm0 }
0x1db2   :  { %6944 = vadd.xlane.f32.xlu0 %v6943_v33 }
0x1db5   :  { %6953 = vadd.xlane.f32.xlu1 %v6952_v35 }
0x1db6   :  { %6950 = vadd.xlane.f32.xlu0 %v6949_v27 }
0x1dc6   :  { %5456 = vperm.xlu1 %10897, %v8821_v4  }
0x1dca   :  { %7080 = vperm.xlu1 %10897, %v8906_v46  }
0x1dcc   :  { %5451 = vperm.xlu0 %10898, %v8820_v54  }
0x1dce   :  { %7090 = vperm.xlu1 %10897, %v8908_v6  }
0x1dd0   :  { %7085 = vperm.xlu0 %10898, %v8907_v1  }
0x1dd2   :  { %7215 = vperm.xlu1 %10897, %v8922_v42  }
0x1dd4   :  { %7095 = vperm.xlu0 %10898, %v8909_v56  }
0x1dd6   :  { %7225 = vperm.xlu1 %10897, %v8924_v10  }
0x1dd8   :  { %7220 = vperm.xlu0 %10898, %v8923_v20  }
0x1dda   :  { %7235 = vperm.xlu1 %10897, %v8926_v40  }
0x1ddc   :  { %7230 = vperm.xlu0 %10898, %v8925_v47  }
0x1dde   :  { %7245 = vperm.xlu1 %10897, %v8928_v16  }
0x1de0   :  { %7240 = vperm.xlu0 %10898, %v8927_v61  }
0x1de2   :  { %7402 = vperm.xlu1 %10897, %v8942_v30  }
0x1de4   :  { %7250 = vperm.xlu0 %10898, %v8929_v17  }
0x1de6   :  { %7412 = vperm.xlu1 %10897, %v8944_v24  }
0x1de8   :  { %7407 = vperm.xlu0 %10898, %v8943_v32  }
0x1dea   :  { %7531 = vperm.xlu1 %10897, %v7525_v44  }
0x1dec   :  { %7417 = vperm.xlu0 %10898, %v8945_v60  }
0x1dee   :  { %7541 = vperm.xlu1 %10897, %v7527_v45  }
0x1df0   :  { %7536 = vperm.xlu0 %10898, %v7526_v39  }
0x1df4   :  { %7546 = vperm.xlu0 %10898, %v7528_v25  }
0x1e22   :  { %v6574_v5 = vpop.xlane.xlu1 %6573 }
0x1e23   :  { %11143 = vrcp.f32 %v6574_v5  ;;  %v6571_v9 = vpop.xlane.xlu0 %6570 }
0x1e24   :  { %11145 = vrcp.f32 %v6571_v9 }
0x1e2a   :  { %v6580_v58 = vpop.xlane.xlu1 %6579 }
0x1e2b   :  { %11147 = vrcp.f32 %v6580_v58  ;;  %v6577_v34 = vpop.xlane.xlu0 %6576 }
0x1e2c   :  { %11149 = vrcp.f32 %v6577_v34 }
0x1e2d   :  { %v11144_v50 = vpop.eup %11143 }
0x1e2e   :  { %v11146_v43 = vpop.eup %11145  ;;  %v6596_v36 = vmul.f32 %v11144_v50, %v14322_v31  ;;  %v6936_v38 = vpop.xlane.xlu1 %6935 }
0x1e2f   :  { %v6594_v63 = vmul.f32 %v11146_v43, %v14325_v21  ;;  %11151 = vrcp.f32 %v6936_v38  ;;  %v6933_v3 = vpop.xlane.xlu0 %6932 }
0x1e30   :  { %11153 = vrcp.f32 %v6933_v3 }
0x1e31   :  { %v10788_v8 = vpack.c.bf16 %v6596_v36, %v6594_v63 }
0x1e32   :  { %v6586_v29 = vpop.xlane.xlu1 %6585 }
0x1e33   :  { %11155 = vrcp.f32 %v6586_v29  ;;  %v6583_v33 = vpop.xlane.xlu0 %6582  ;;  %10790 = vmatpush3.bf16.xpose.msk.msra.mxu0 %vm11655_vm2, %v10788_v8  ;;  %v8905_v8 = vld [vmem:[%s14903_s8 + $0x38] sm:$0xff]  ;;  %v8914_v29 = vld [vmem:[%s14905_s10 + $0x40] sm:$0xff] }
0x1e34   :  { %11157 = vrcp.f32 %v6583_v33  ;;  %10791 = vmatprep.subr.bf16.mxu0 %v15042_v37 }
0x1e35   :  { %v11148_v35 = vpop.eup %11147 }
0x1e36   :  { %v11150_v27 = vpop.eup %11149  ;;  %v6600_v31 = vmul.f32 %v11148_v35, %v14334_v55  ;;  %v6942_v4 = vpop.xlane.xlu1 %6941 }
0x1e37   :  { %v6598_v21 = vmul.f32 %v11150_v27, %v14337_v23  ;;  %11159 = vrcp.f32 %v6942_v4  ;;  %v6939_v46 = vpop.xlane.xlu0 %6938 }
0x1e38   :  { %11161 = vrcp.f32 %v6939_v46 }
0x1e39   :  { %v11152_v54 = vpop.eup %11151  ;;  %v10792_v6 = vpack.c.bf16 %v6600_v31, %v6598_v21 }
0x1e3a   :  { %v11154_v1 = vpop.eup %11153  ;;  %v6958_v42 = vmul.f32 %v11152_v54, %v14342_v41  ;;  %v6592_v56 = vpop.xlane.xlu1 %6591 }
0x1e3b   :  { %v6956_v10 = vmul.f32 %v11154_v1, %v14347_v19  ;;  %11163 = vrcp.f32 %v6592_v56  ;;  %v6589_v20 = vpop.xlane.xlu0 %6588  ;;  %10794 = vmatpush3.bf16.xpose.msk.msra.mxu0 %vm11655_vm2, %v10792_v6 }
0x1e3c   :  { %11165 = vrcp.f32 %v6589_v20  ;;  %10795 = vmatprep.subr.bf16.mxu0 %v15042_v37  ;;  %v8916_v20 = vld [vmem:[%s14905_s10 + $0x50] sm:$0xff] }
0x1e3d   :  { %v11156_v55 = vpop.eup %11155  ;;  %v10804_v23 = vpack.c.bf16 %v6958_v42, %v6956_v10  ;;  %v8915_v10 = vld [vmem:[%s14905_s10 + $0x48] sm:$0xff] }
0x1e3e   :  { %v11158_v40 = vpop.eup %11157  ;;  %v6604_v47 = vmul.f32 %v11156_v55, %v14356_v53  ;;  %v6948_v16 = vpop.xlane.xlu1 %6947  ;;  %v8917_v55 = vld [vmem:[%s14905_s10 + $0x58] sm:$0xff] }
0x1e3f   :  { %v6602_v61 = vmul.f32 %v11158_v40, %v14358_v14  ;;  %11167 = vrcp.f32 %v6948_v16  ;;  %v6945_v41 = vpop.xlane.xlu0 %6944  ;;  %10806 = vmatpush3.bf16.xpose.msk.msra.mxu1 %vm11655_vm2, %v10804_v23  ;;  %v8918_v23 = vld [vmem:[%s14905_s10 + $0x60] sm:$0xff]  ;;  %v8919_v40 = vld [vmem:[%s14905_s10 + $0x68] sm:$0xff]  ;;  %v8921_v16 = vld [vmem:[%s14905_s10 + $0x78] sm:$0xff] }
0x1e40   :  { %11169 = vrcp.f32 %v6945_v41  ;;  %10807 = vmatprep.subr.bf16.mxu1 %v15042_v37 }
0x1e41   :  { %v11160_v19 = vpop.eup %11159  ;;  %v10796_v30 = vpack.c.bf16 %v6604_v47, %v6602_v61  ;;  %v8920_v47 = vld [vmem:[%s14905_s10 + $0x70] sm:$0xff]  ;;  %v8938_v61 = vld [vmem:[%s14907_s12 + $0x20] sm:$0xff] }
0x1e42   :  { %v11162_v17 = vpop.eup %11161  ;;  %v6962_v24 = vmul.f32 %v11160_v19, %v14362_v57  ;;  %v6954_v32 = vpop.xlane.xlu1 %6953 }
0x1e43   :  { %v6960_v44 = vmul.f32 %v11162_v17, %v14366_v48  ;;  %11171 = vrcp.f32 %v6954_v32  ;;  %v6951_v53 = vpop.xlane.xlu0 %6950  ;;  %10798 = vmatpush3.bf16.xpose.msk.msra.mxu0 %vm11655_vm2, %v10796_v30 }
0x1e44   :  { %11173 = vrcp.f32 %v6951_v53  ;;  %10799 = vmatprep.subr.bf16.mxu0 %v15042_v37 }
0x1e45   :  { %v11164_v14 = vpop.eup %11163  ;;  %v10808_v60 = vpack.c.bf16 %v6962_v24, %v6960_v44 }
0x1e46   :  { %v11166_v45 = vpop.eup %11165  ;;  %v6608_v39 = vmul.f32 %v11164_v14, %v14372_v28  ;;  %v5457_v38 = vpop.permute.xlu1 %5456 }
0x1e47   :  { %v6606_v25 = vmul.f32 %v11166_v45, %v14374_v62  ;;  %10810 = vmatpush3.bf16.xpose.msk.msra.mxu1 %vm11655_vm2, %v10808_v60  ;;  %v5617_v63 = vadd.f32 %v14178_v51, %v5457_v38  ;;  %v8904_v51 = vld [vmem:[%s14903_s8 + $0x30] sm:$0xff] }
0x1e48   :  { %10811 = vmatprep.subr.bf16.mxu1 %v15042_v37 }
0x1e49   :  { %v11168_v57 = vpop.eup %11167  ;;  %v10800_v48 = vpack.c.bf16 %v6608_v39, %v6606_v25 }
0x1e4a   :  { %v11170_v5 = vpop.eup %11169  ;;  %v6966_v9 = vmul.f32 %v11168_v57, %v14378_v0 }
0x1e4b   :  { %v6964_v58 = vmul.f32 %v11170_v5, %v14382_v11  ;;  %10802 = vmatpush3.bf16.xpose.msk.msra.mxu0 %vm11655_vm2, %v10800_v48  ;;  %v5452_v34 = vpop.permute.xlu0 %5451 }
0x1e4c   :  { %10820 = vmatprep.subr.bf16.mxu0 %v14202_v26  ;;  %v5612_v43 = vadd.f32 %v14180_v22, %v5452_v34 }
0x1e4d   :  { %v11172_v28 = vpop.eup %11171  ;;  %v10812_v62 = vpack.c.bf16 %v6966_v9, %v6964_v58 }
0x1e4e   :  { %v11174_v50 = vpop.eup %11173  ;;  %v6970_v0 = vmul.f32 %v11172_v28, %v14386_v18 }
0x1e4f   :  { %10814 = vmatpush3.bf16.xpose.msk.msra.mxu1 %vm11655_vm2, %v10812_v62  ;;  %v6968_v11 = vmul.f32 %v11174_v50, %v14390_v2  ;;  %v7086_v33 = vpop.permute.xlu0 %7085 }
0x1e50   :  { %10815 = vmatprep.subr.bf16.mxu1 %v15042_v37  ;;  %v8902_v37 = vld [vmem:[%s14903_s8 + $0x20] sm:$0xff] }
0x1e51   :  { %v10816_v36 = vpack.c.bf16 %v6970_v0, %v6968_v11 }
0x1e52   :  { %10276 = vmatmul.mubr.msk.f32.vlgmr.msra.gmra.mrb[130].mxu0 %vm15391_vm8, %v5612_v43  ;;  %vm15406_vm8 = vmmov %vm15361_vm0 }
0x1e53   :  { %10822 = vmatpush3.bf16.msra.mxu0 %v14202_v26  ;;  %10319 = vmatprep.mubr.msk.f32.mxu0 %vm15393_vm15, %v8902_v37  ;;  %v7096_v21 = vpop.permute.xlu0 %7095 }
0x1e57   :  { %10818 = vmatpush3.bf16.xpose.msk.msra.mxu1 %vm11655_vm2, %v10816_v36  ;;  %vm15394_vm2 = vmmov %vm15393_vm15  ;;  %v7221_v41 = vpop.permute.xlu0 %7220 }
0x1e58   :  { %vm15395_vm3 = vmmov %vm15394_vm2 }
0x1e59   :  { %vm15396_vm14 = vmmov %vm15394_vm2 }
0x1e5a   :  { %vm15408_vm15 = vmmov %vm15394_vm2 }
0x1e5b   :  { %v7231_v30 = vpop.permute.xlu0 %7230 }
0x1e5e   :  { %10309 = vmatmul.mubr.msk.f32.vlgmr.msra.gmra.mrb[138].mxu1 %vm15392_vm7, %v5617_v63  ;;  %vm15407_vm7 = vmmov %vm15361_vm0 }
0x1e5f   :  { %v7241_v57 = vpop.permute.xlu0 %7240 }
0x1e63   :  { %v7251_v36 = vpop.permute.xlu0 %7250 }
0x1f25   :  { %v6702_v22 = vpop.f32.mrb[130].mxu0 }
0x1f26   :  { %v10277_v18 = vpop.f32.mrb[131].mxu0 }
0x1f31   :  { %v7064_v2 = vpop.f32.mrb[138].mxu1 }
0x1f32   :  { %v10823_v3 = vpack.c.bf16 %v7064_v2, %v6702_v22  ;;  %v10310_v26 = vpop.f32.mrb[139].mxu1 }
0x1f34   :  { %10824 = vmatprep.subr.bf16.mxu0 %v10823_v3 }
0x1f35   :  { %10826 = vmatpush3.bf16.msra.mxu0 %v10823_v3 }
0x1f36   :  { %10828 = vmatprep.subr.bf16.mxu0 %v13768_v59 }
0x1f38   :  { %10320 = vmatmul.mubr.msk.f32.vlgmr.msra.gmra.mrb[132].mxu0 %vm15394_vm2, %v8903_v15 }
0x1f39   :  { %10830 = vmatpush3.bf16.msra.mxu0 %v13768_v59  ;;  %10322 = vmatprep.mubr.msk.f32.mxu0 %vm15395_vm3, %v8904_v51  ;;  %v7081_v59 = vpop.permute.xlu1 %7080  ;;  %vm15409_vm3 = vmmov %vm15394_vm2 }
0x1f3a   :  { %10832 = vmatprep.subr.bf16.mxu0 %v13782_v12 }
0x1f3c   :  { %10323 = vmatmul.mubr.msk.f32.gmra.mrb[134].mxu0 %vm15396_vm14, %v8905_v8  ;;  %v8939_v8 = vld [vmem:[%s14907_s12 + $0x28] sm:$0xff]  ;;  %vm15410_vm14 = vmmov %vm15394_vm2 }
0x1f3d   :  { %10834 = vmatpush3.bf16.msra.mxu0 %v13782_v12  ;;  %10341 = vmatprep.mubr.msk.f32.mxu0 %vm15397_vm13, %v8914_v29  ;;  %v7091_v6 = vpop.permute.xlu1 %7090  ;;  %v8940_v29 = vld [vmem:[%s14907_s12 + $0x30] sm:$0xff]  ;;  %vm15411_vm13 = vmmov %vm15394_vm2 }
0x1f41   :  { %v7216_v19 = vpop.permute.xlu1 %7215 }
0x1f45   :  { %v7226_v24 = vpop.permute.xlu1 %7225 }
0x1f49   :  { %v7236_v9 = vpop.permute.xlu1 %7235 }
0x1f4d   :  { %v7246_v37 = vpop.permute.xlu1 %7245 }
0x200b   :  { %v10321_v35 = vpop.f32.mrb[132].mxu0 }
0x200c   :  { %v7182_v27 = vadd.f32 %v10321_v35, %v7086_v33  ;;  %v7176_v31 = vpop.f32.mrb[133].mxu0  ;;  %v8941_v33 = vld [vmem:[%s14907_s12 + $0x38] sm:$0xff]  ;;  %v7408_v35 = vpop.permute.xlu0 %7407 }
0x200d   :  { %v7177_v4 = vadd.f32 %v7176_v31, %v7081_v59  ;;  %v7521_v59 = vld [vmem:[%s14909_s14] sm:$0xff] }
0x200f   :  { %v10835_v46 = vpack.c.bf16 %v7182_v27, %v7177_v4  ;;  %v10324_v54 = vpop.f32.mrb[134].mxu0  ;;  %v7403_v27 = vpop.permute.xlu1 %7402 }
0x2010   :  { %v7192_v1 = vadd.f32 %v10324_v54, %v7096_v21  ;;  %v7186_v42 = vpop.f32.mrb[135].mxu0 }
0x2011   :  { %v7187_v56 = vadd.f32 %v7186_v42, %v7091_v6  ;;  %10836 = vmatprep.subr.bf16.mxu0 %v10835_v46  ;;  %v7418_v6 = vpop.permute.xlu0 %7417 }
0x2012   :  { %10838 = vmatpush3.bf16.msra.mxu0 %v10835_v46 }
0x2013   :  { %v10839_v12 = vpack.c.bf16 %v7192_v1, %v7187_v56  ;;  %v7413_v56 = vpop.permute.xlu1 %7412 }
0x2015   :  { %10840 = vmatprep.subr.bf16.mxu0 %v10839_v12 }
0x2016   :  { %10842 = vmatpush3.bf16.msra.mxu0 %v10839_v12 }
0x2019   :  { %10342 = vmatmul.mubr.msk.f32.vlgmr.msra.gmra.mrb[136].mxu0 %vm15398_vm5, %v8915_v10  ;;  %vm15412_vm5 = vmmov %vm15394_vm2 }
0x201a   :  { %10344 = vmatprep.mubr.msk.f32.mxu0 %vm15399_vm10, %v8916_v20  ;;  %vm15413_vm10 = vmmov %vm15394_vm2 }
0x201d   :  { %10345 = vmatmul.mubr.msk.f32.gmra.mrb[138].mxu0 %vm15400_vm11, %v8917_v55  ;;  %vm15414_vm11 = vmmov %vm15394_vm2 }
0x201e   :  { %10347 = vmatprep.mubr.msk.f32.mxu0 %vm15401_vm4, %v8918_v23  ;;  %vm7777_vm4 = vcmask 130048  }
0x2021   :  { %10348 = vmatmul.mubr.msk.f32.gmra.mrb[140].mxu0 %vm15402_vm9, %v8919_v40  ;;  %vm7780_vm9 = vcmask 138240  }
0x2022   :  { %10350 = vmatprep.mubr.msk.f32.mxu0 %vm15361_vm0, %v8920_v47  ;;  %vm7787_vm0 = vcmask 131072  }
0x2025   :  { %10351 = vmatmul.mubr.msk.f32.gmra.mrb[142].mxu0 %vm15403_vm6, %v8921_v16  ;;  %v7532_v16 = vpop.permute.xlu1 %7531 }
0x2026   :  { %10369 = vmatprep.mubr.msk.f32.mxu0 %vm15404_vm1, %v8938_v61  ;;  %vm8052_vm1 = vcmask 122880  }
0x20ec   :  { %v10343_v17 = vpop.f32.mrb[136].mxu0 }
0x20ed   :  { %v7349_v32 = vadd.f32 %v10343_v17, %v7221_v41  ;;  %v7343_v44 = vpop.f32.mrb[137].mxu0 }
0x20ee   :  { %v7344_v53 = vadd.f32 %v7343_v44, %v7216_v19  ;;  %v7542_v44 = vpop.permute.xlu1 %7541 }
0x20ef   :  { %v7383_v14 = vmax.f32 %v7349_v32, 0.0 }
0x20f0   :  { %v7382_v60 = vmax.f32 %v7344_v53, 0.0  ;;  %v10346_v45 = vpop.f32.mrb[138].mxu0 }
0x20f1   :  { %v7359_v39 = vadd.f32 %v10346_v45, %v7231_v30  ;;  %v7353_v25 = vpop.f32.mrb[139].mxu0 }
0x20f2   :  { %v10843_v48 = vpack.c.bf16 %v7383_v14, %v7382_v60  ;;  %v7354_v5 = vadd.f32 %v7353_v25, %v7226_v24 }
0x20f3   :  { %v7385_v58 = vmax.f32 %v7359_v39, 0.0 }
0x20f4   :  { %v7384_v28 = vmax.f32 %v7354_v5, 0.0  ;;  %v10349_v34 = vpop.f32.mrb[140].mxu0  ;;  %10844 = vmatprep.subr.bf16.mxu0 %v10843_v48 }
0x20f5   :  { %v7369_v62 = vadd.f32 %v10349_v34, %v7241_v57  ;;  %v7363_v50 = vpop.f32.mrb[141].mxu0  ;;  %10846 = vmatpush3.bf16.msra.mxu0 %v10843_v48 }
0x20f6   :  { %v10847_v43 = vpack.c.bf16 %v7385_v58, %v7384_v28  ;;  %v7364_v0 = vadd.f32 %v7363_v50, %v7236_v9 }
0x20f7   :  { %v7387_v11 = vmax.f32 %v7369_v62, 0.0 }
0x20f8   :  { %v7386_v38 = vmax.f32 %v7364_v0, 0.0  ;;  %v10352_v63 = vpop.f32.mrb[142].mxu0  ;;  %10848 = vmatprep.subr.bf16.mxu0 %v10847_v43 }
0x20f9   :  { %v7379_v22 = vadd.f32 %v10352_v63, %v7251_v36  ;;  %v7373_v18 = vpop.f32.mrb[143].mxu0  ;;  %10850 = vmatpush3.bf16.msra.mxu0 %v10847_v43 }
0x20fa   :  { %v10851_v2 = vpack.c.bf16 %v7387_v11, %v7386_v38  ;;  %v7374_v3 = vadd.f32 %v7373_v18, %v7246_v37 }
0x20fb   :  { %v7389_v26 = vmax.f32 %v7379_v22, 0.0 }
0x20fc   :  { %v7388_v15 = vmax.f32 %v7374_v3, 0.0  ;;  %10852 = vmatprep.subr.bf16.mxu0 %v10851_v2 }
0x20fd   :  { %10854 = vmatpush3.bf16.msra.mxu0 %v10851_v2 }
0x20fe   :  { %v10855_v51 = vpack.c.bf16 %v7389_v26, %v7388_v15 }
0x2100   :  { %10856 = vmatprep.subr.bf16.mxu0 %v10855_v51 }
0x2101   :  { %10858 = vmatpush3.bf16.msra.mxu0 %v10855_v51 }
0x2104   :  { %10370 = vmatmul.mubr.msk.f32.vlgmr.msra.gmra.mrb[144].mxu0 %vm15405_vm12, %v8939_v8 }
0x2105   :  { %10372 = vmatprep.mubr.msk.f32.mxu0 %vm15406_vm8, %v8940_v29 }
0x2108   :  { %10373 = vmatmul.mubr.msk.f32.gmra.mrb[146].mxu0 %vm15407_vm7, %v8941_v33 }
0x2109   :  { %10383 = vmatprep.mubr.msk.f32.mxu0 %vm15408_vm15, %v7521_v59 }
0x21d7   :  { %v10371_v31 = vpop.f32.mrb[144].mxu0 }
0x21d8   :  { %v7504_v4 = vadd.f32 %v10371_v31, %v7408_v35  ;;  %v7498_v21 = vpop.f32.mrb[145].mxu0 }
0x21d9   :  { %v7499_v46 = vadd.f32 %v7498_v21, %v7403_v27 }
0x21da   :  { %v7518_v54 = vadd.f32 %v7504_v4, %v13760_v7  ;;  %v7522_v7 = vld [vmem:[%s14909_s14 + $0x8] sm:$0xff] }
0x21db   :  { %v7517_v1 = vadd.f32 %v7499_v46, %v13764_v52  ;;  %v10374_v42 = vpop.f32.mrb[146].mxu0  ;;  %v7523_v52 = vld [vmem:[%s14909_s14 + $0x10] sm:$0xff] }
0x21dc   :  { %v7514_v12 = vadd.f32 %v10374_v42, %v7418_v6  ;;  %v7508_v10 = vpop.f32.mrb[147].mxu0 }
0x21dd   :  { %v7509_v20 = vadd.f32 %v7508_v10, %v7413_v56  ;;  %v10859_v55 = vpack.c.bf16 %v7518_v54, %v7517_v1 }
0x21de   :  { %v7520_v23 = vadd.f32 %v7514_v12, %v13772_v49  ;;  %v7524_v49 = vld [vmem:[%s14909_s14 + $0x18] sm:$0xff]  ;;  %s11360_s14 = smov 80  }
0x21df   :  { %v7519_v40 = vadd.f32 %v7509_v20, %v13776_v13  ;;  %10860 = vmatprep.subr.bf16.mxu0 %v10859_v55  ;;  %v7537_v13 = vpop.permute.xlu0 %7536 }
0x21e0   :  { %10862 = vmatpush3.bf16.msra.mxu0 %v10859_v55 }
0x21e1   :  { %v10863_v47 = vpack.c.bf16 %v7520_v23, %v7519_v40 }
0x21e3   :  { %10864 = vmatprep.subr.bf16.mxu0 %v10863_v47  ;;  %v7547_v17 = vpop.permute.xlu0 %7546 }
0x21e4   :  { %10866 = vmatpush3.bf16.msra.mxu0 %v10863_v47 }
0x21e7   :  { %10384 = vmatmul.mubr.msk.f32.vlgmr.msra.gmra.mrb[148].mxu0 %vm15394_vm2, %v7522_v7 }
0x21e8   :  { %10386 = vmatprep.mubr.msk.f32.mxu0 %vm15409_vm3, %v7523_v52 }
0x21eb   :  { %10387 = vmatmul.mubr.msk.f32.gmra.mrb[150].mxu0 %vm15410_vm14, %v7524_v49 }
0x22ba   :  { %v10385_v61 = vpop.f32.mrb[148].mxu0 }
0x22bb   :  { %v7633_v41 = vadd.f32 %v10385_v61, %v7537_v13  ;;  %v7627_v19 = vpop.f32.mrb[149].mxu0 }
0x22bc   :  { %v7628_v30 = vadd.f32 %v7627_v19, %v7532_v16 }
0x22bd   :  { %8056 = vrot.lane.b32.xlu0 %v7633_v41, %s11359_s1 }
0x22be   :  { %v10388_v24 = vpop.f32.mrb[150].mxu0  ;;  %8054 = vrot.lane.b32.xlu1 %v7628_v30, %s11359_s1  ;;  %v10904_v32 = vpack.i.bf16 %v7633_v41, %v7628_v30 }
0x22bf   :  { %v7643_v53 = vadd.f32 %v10388_v24, %v7547_v17  ;;  %v7637_v14 = vpop.f32.mrb[151].mxu0 }
0x22c0   :  { %v7638_v60 = vadd.f32 %v7637_v14, %v7542_v44 }
0x22c1   :  { %8060 = vrot.lane.b32.xlu0 %v7643_v53, %s11359_s1 }
0x22c2   :  { %8058 = vrot.lane.b32.xlu1 %v7638_v60, %s11359_s1  ;;  %v10914_v45 = vpack.i.bf16 %v7643_v53, %v7638_v60 }
0x22c5   :  { %10905 = vrot.lane.b32.xlu0 %v10904_v32, %s11360_s14 }
0x22c6   :  { %10900 = vrot.lane.b32.xlu1 %v10904_v32, %s11361_s19 }
0x22c9   :  { %10915 = vrot.lane.b32.xlu0 %v10914_v45, %s11360_s14 }
0x22ca   :  { %10910 = vrot.lane.b32.xlu1 %v10914_v45, %s11361_s19 }
0x22f3   :  { %7646 = vxpose.xlu1.b32.start [1/4] (short) (narrow) %v7628_v30, 16 }
0x22f7   :  { %7647 = vxpose.xlu1.b32.cont [2/4] (short) (narrow) %v7633_v41, 16 }
0x22fb   :  { %7648 = vxpose.xlu1.b32.cont [3/4] (short) (narrow) %v7638_v60, 16 }
0x22ff   :  { %7649 = vxpose.xlu1.b32.end [4/4] (short) (narrow) %v7643_v53, 16 }
0x232f   :  { %v8057_v39 = vpop.permute.xlu0 %8056 }
0x2330   :  { %v8055_v25 = vpop.permute.xlu1 %8054 }
0x2331   :  { %8066 = vxpose.xlu0.b32.start [1/4] (short) (narrow) %v8055_v25, 16 }
0x2333   :  { %v8061_v57 = vpop.permute.xlu0 %8060 }
0x2334   :  { %v8059_v48 = vpop.permute.xlu1 %8058 }
0x2335   :  { %8067 = vxpose.xlu0.b32.cont [2/4] (short) (narrow) %v8057_v39, 16 }
0x2337   :  { %v10906_v5 = vpop.permute.xlu0 %10905 }
0x2338   :  { %v10908_v9 = vunpack.i.h.bf16 %v10906_v5  ;;  %v10907_v58 = vunpack.i.l.bf16 %v10906_v5  ;;  %v10901_v28 = vpop.permute.xlu1 %10900 }
0x2339   :  { %v10903_v34 = vunpack.i.h.bf16 %v10901_v28  ;;  %v10902_v62 = vunpack.i.l.bf16 %v10901_v28  ;;  %8068 = vxpose.xlu0.b32.cont [3/4] (short) (narrow) %v8059_v48, 16  ;;  %v11362_v28 = vmov -inf  }
0x233a   :  { %v10875_v50 = vpack.c.bf16 %v10908_v9, %v10907_v58 }
0x233b   :  { %v10867_v43 = vpack.c.bf16 %v10903_v34, %v10902_v62  ;;  %v10916_v0 = vpop.permute.xlu0 %10915  ;;  %v7788_v34 = vsel %vm7787_vm0, 0.0, %v11362_v28 }
0x233c   :  { %v10918_v11 = vunpack.i.h.bf16 %v10916_v0  ;;  %v10917_v36 = vunpack.i.l.bf16 %v10916_v0  ;;  %10876 = vmatprep.subr.bf16.mxu0 %v10875_v50  ;;  %v10911_v38 = vpop.permute.xlu1 %10910 }
0x233d   :  { %v10913_v63 = vunpack.i.h.bf16 %v10911_v38  ;;  %v10912_v37 = vunpack.i.l.bf16 %v10911_v38  ;;  %10878 = vmatpush3.bf16.msra.mxu0 %v10875_v50  ;;  %8069 = vxpose.xlu0.b32.end [4/4] (short) (narrow) %v8061_v57, 16 }
0x233e   :  { %v10879_v22 = vpack.c.bf16 %v10918_v11, %v10917_v36  ;;  %10868 = vmatprep.subr.bf16.mxu1 %v10867_v43 }
0x233f   :  { %v10871_v18 = vpack.c.bf16 %v10913_v63, %v10912_v37  ;;  %10870 = vmatpush3.bf16.msra.mxu1 %v10867_v43 }
0x2340   :  { %10880 = vmatprep.subr.bf16.mxu0 %v10879_v22 }
0x2341   :  { %10872 = vmatprep.subr.bf16.mxu1 %v10871_v18  ;;  %10882 = vmatpush3.bf16.msra.mxu0 %v10879_v22 }
0x2343   :  { %10874 = vmatpush3.bf16.msra.mxu1 %v10871_v18 }
0x2373   :  { %v7662_v2 = vpop.trf.xlu1 }
0x2374   :  { %10397 = vmatprep.mubr.msk.f32.mxu1 %vm15411_vm13, %v7662_v2 }
0x2377   :  { %v7663_v3 = vpop.trf.xlu1 }
0x2378   :  { %10398 = vmatmul.mubr.msk.f32.vlgmr.msra.gmra.mrb[140].mxu1 %vm15412_vm5, %v7663_v3 }
0x23b1   :  { %v8082_v26 = vpop.trf.xlu0 }
0x23b2   :  { %10408 = vmatprep.mubr.msk.f32.mxu0 %vm15413_vm10, %v8082_v26 }
0x23b5   :  { %v8083_v15 = vpop.trf.xlu0 }
0x23b6   :  { %10409 = vmatmul.mubr.msk.f32.vlgmr.msra.gmra.mrb[152].mxu0 %vm15414_vm11, %v8083_v15 }
0x244b   :  { %v10399_v51 = vpop.f32.mrb[140].mxu1 }
0x244c   :  { %v7776_v8 = vmul.f32 0.17677669, %v10399_v51  ;;  %v7766_v29 = vpop.f32.mrb[141].mxu1 }
0x244d   :  { %v7775_v33 = vmul.f32 0.17677669, %v7766_v29 }
0x244e   :  { %v7779_v59 = vsel %vm7777_vm4, %v7776_v8, 0.0 }
0x244f   :  { %v7778_v35 = vsel %vm7777_vm4, %v7775_v33, 0.0  ;;  %v7784_v27 = vsel %vm7780_vm9, %v7779_v59, -inf }
0x2450   :  { %7785 = vmax.xlane.f32.xlu1 %v7784_v27  ;;  %v7781_v31 = vsel %vm7780_vm9, %v7778_v35, -inf }
0x2451   :  { %7782 = vmax.xlane.f32.xlu0 %v7781_v31 }
0x2489   :  { %v10410_v4 = vpop.f32.mrb[152].mxu0 }
0x248a   :  { %v8192_v21 = vmul.f32 0.17677669, %v10410_v4  ;;  %v8182_v46 = vpop.f32.mrb[153].mxu0 }
0x248b   :  { %v8191_v54 = vmul.f32 0.17677669, %v8182_v46 }
0x248c   :  { %v14603_v6 = vsel %vm7777_vm4, %v8192_v21, 0.0 }
0x248d   :  { %v14606_v1 = vsel %vm7777_vm4, %v8191_v54, 0.0  ;;  %v8198_v42 = vsel %vm7780_vm9, %v14603_v6, -inf }
0x248e   :  { %8199 = vmax.xlane.f32.xlu1 %v8198_v42  ;;  %v8195_v56 = vsel %vm7780_vm9, %v14606_v1, -inf }
0x248f   :  { %8196 = vmax.xlane.f32.xlu0 %v8195_v56 }
0x24dd   :  { %v7786_v12 = vpop.xlane.xlu1 %7785 }
0x24de   :  { %v7792_v10 = vsub.f32 %v7779_v59, %v7786_v12  ;;  %v7783_v20 = vpop.xlane.xlu0 %7782 }
0x24df   :  { %v7791_v55 = vsub.f32 %v7778_v35, %v7783_v20 }
0x24e0   :  { %v7796_v23 = vmul.f32 1.442695, %v7792_v10 }
0x24e1   :  { %v7794_v40 = vmul.f32 1.442695, %v7791_v55 }
0x24e2   :  { %11175 = vpow2.f32 %v7796_v23 }
0x24e3   :  { %11177 = vpow2.f32 %v7794_v40 }
0x24ec   :  { %v11176_v47 = vpop.eup %11175 }
0x24ed   :  { %v11178_v7 = vpop.eup %11177  ;;  %v7803_v52 = vsel %vm7780_vm9, %v11176_v47, 0.0 }
0x24ee   :  { %7804 = vadd.xlane.f32.xlu1 %v7803_v52  ;;  %v7800_v49 = vsel %vm7780_vm9, %v11178_v7, 0.0 }
0x24ef   :  { %7801 = vadd.xlane.f32.xlu0 %v7800_v49 }
0x251b   :  { %v14614_v13 = vpop.xlane.xlu1 %8199 }
0x251c   :  { %v8202_v16 = vsub.f32 %v14603_v6, %v14614_v13  ;;  %v14618_v61 = vpop.xlane.xlu0 %8196 }
0x251d   :  { %v8201_v41 = vsub.f32 %v14606_v1, %v14618_v61 }
0x251e   :  { %v8205_v19 = vmul.f32 1.442695, %v8202_v16 }
0x251f   :  { %v8203_v30 = vmul.f32 1.442695, %v8201_v41 }
0x2520   :  { %11179 = vpow2.f32 %v8205_v19 }
0x2521   :  { %11181 = vpow2.f32 %v8203_v30 }
0x252a   :  { %v11180_v17 = vpop.eup %11179 }
0x252b   :  { %v11182_v24 = vpop.eup %11181  ;;  %v8210_v32 = vsel %vm7780_vm9, %v11180_v17, 0.0 }
0x252c   :  { %8211 = vadd.xlane.f32.xlu1 %v8210_v32  ;;  %v8207_v44 = vsel %vm7780_vm9, %v11182_v24, 0.0  ;;  %v15415_v32 = vld [vmem:[#allocation8_spill] sm:$0xff] }
0x252d   :  { %8208 = vadd.xlane.f32.xlu0 %v8207_v44  ;;  %vm7861_vm6 = vcmp.lt.s32.totalorder %v15415_v32, 16 }
0x257b   :  { %v7805_v53 = vpop.xlane.xlu1 %7804 }
0x257c   :  { %11183 = vlog2.f32 %v7805_v53  ;;  %v7802_v14 = vpop.xlane.xlu0 %7801 }
0x257d   :  { %11185 = vlog2.f32 %v7802_v14 }
0x2586   :  { %v11184_v60 = vpop.eup %11183 }
0x2587   :  { %v11186_v45 = vpop.eup %11185  ;;  %v7812_v39 = vmul.f32 0.6931472, %v11184_v60 }
0x2588   :  { %v7810_v25 = vmul.f32 0.6931472, %v11186_v45 }
0x2589   :  { %v7816_v57 = vadd.f32 %v7812_v39, %v7786_v12 }
0x258a   :  { %v7815_v48 = vadd.f32 %v7810_v25, %v7783_v20 }
0x258b   :  { %v14624_v5 = vsub.f32 %v7779_v59, %v7816_v57 }
0x258c   :  { %v7821_v9 = vsub.f32 %v7778_v35, %v7815_v48 }
0x258d   :  { %v7828_v58 = vsel %vm7780_vm9, %v14624_v5, -inf }
0x258e   :  { %v7827_v62 = vsel %vm7780_vm9, %v7821_v9, -inf }
0x258f   :  { %v7830_v50 = vmax.f32 %v7827_v62, %v7828_v58 }
0x2591   :  { %v7831_v43 = vmax.f32 %v7830_v50, %v7788_v34 }
0x2593   :  { %v7832_v0 = vrot.slane %v7831_v43, 4 }
0x2595   :  { %v7833_v11 = vmax.f32 %v7831_v43, %v7832_v0 }
0x2597   :  { %v7834_v36 = vrot.slane %v7833_v11, 2 }
0x2599   :  { %v7835_v38 = vmax.f32 %v7833_v11, %v7834_v36 }
0x259b   :  { %v7836_v63 = vrot.slane %v7835_v38, 1 }
0x259d   :  { %v7837_v37 = vmax.f32 %v7835_v38, %v7836_v63 }
0x259f   :  { %v7838_v22 = vsub.f32 %v7821_v9, %v7837_v37  ;;  %v7839_v18 = vsub.f32 %v14624_v5, %v7837_v37  ;;  %v7840_v2 = vsub.f32 0.0, %v7837_v37 }
0x25a1   :  { %v7841_v3 = vmul.f32 1.442695, %v7838_v22  ;;  %v7843_v26 = vmul.f32 1.442695, %v7839_v18  ;;  %v7845_v15 = vmul.f32 1.442695, %v7840_v2 }
0x25a3   :  { %11187 = vpow2.f32 %v7841_v3 }
0x25a4   :  { %11189 = vpow2.f32 %v7843_v26 }
0x25a5   :  { %11191 = vpow2.f32 %v7845_v15 }
0x25ad   :  { %v11188_v51 = vpop.eup %11187 }
0x25ae   :  { %v11190_v8 = vpop.eup %11189  ;;  %v7847_v29 = vsel %vm7780_vm9, %v11188_v51, 0.0 }
0x25af   :  { %v11192_v33 = vpop.eup %11191  ;;  %v7848_v59 = vsel %vm7780_vm9, %v11190_v8, 0.0 }
0x25b0   :  { %v7849_v35 = vadd.f32 %v7848_v59, %v7847_v29  ;;  %v7850_v27 = vsel %vm7787_vm0, %v11192_v33, 0.0 }
0x25b2   :  { %v7851_v31 = vadd.f32 %v7850_v27, %v7849_v35 }
0x25b4   :  { %v7852_v4 = vrot.slane %v7851_v31, 4 }
0x25b6   :  { %v7853_v21 = vadd.f32 %v7852_v4, %v7851_v31 }
0x25b8   :  { %v7854_v46 = vrot.slane %v7853_v21, 2 }
0x25b9   :  { %v8212_v54 = vpop.xlane.xlu1 %8211 }
0x25ba   :  { %11193 = vlog2.f32 %v8212_v54  ;;  %v8209_v42 = vpop.xlane.xlu0 %8208  ;;  %v7855_v56 = vadd.f32 %v7854_v46, %v7853_v21 }
0x25bb   :  { %11195 = vlog2.f32 %v8209_v42 }
0x25bc   :  { %v7856_v12 = vrot.slane %v7855_v56, 1 }
0x25be   :  { %v7857_v10 = vadd.f32 %v7856_v12, %v7855_v56 }
0x25c0   :  { %11197 = vlog2.f32 %v7857_v10 }
0x25c4   :  { %v11194_v20 = vpop.eup %11193 }
0x25c5   :  { %v11196_v55 = vpop.eup %11195  ;;  %v8216_v23 = vmul.f32 0.6931472, %v11194_v20 }
0x25c6   :  { %v8214_v40 = vmul.f32 0.6931472, %v11196_v55 }
0x25c7   :  { %v8218_v47 = vadd.f32 %v8216_v23, %v14614_v13 }
0x25c8   :  { %v8217_v7 = vadd.f32 %v8214_v40, %v14618_v61 }
0x25c9   :  { %v8220_v52 = vsub.f32 %v14603_v6, %v8218_v47 }
0x25ca   :  { %v11198_v49 = vpop.eup %11197  ;;  %v8219_v16 = vsub.f32 %v14606_v1, %v8217_v7 }
0x25cb   :  { %v8224_v41 = vsel %vm7780_vm9, %v8220_v52, -inf  ;;  %v7859_v19 = vmul.f32 0.6931472, %v11198_v49 }
0x25cc   :  { %v8223_v30 = vsel %vm7780_vm9, %v8219_v16, -inf }
0x25cd   :  { %v8225_v17 = vmax.f32 %v8223_v30, %v8224_v41  ;;  %v14640_v24 = vadd.f32 %v7859_v19, %v7837_v37 }
0x25cf   :  { %v8226_v44 = vmax.f32 %v8225_v17, %v7788_v34  ;;  %v7863_v13 = vsub.f32 %v14624_v5, %v14640_v24  ;;  %v7862_v61 = vsub.f32 %v7821_v9, %v14640_v24 }
0x25d1   :  { %v8227_v6 = vrot.slane %v8226_v44, 4  ;;  %v14649_v1 = vsel %vm7861_vm6, %v7863_v13, %v14624_v5  ;;  %v14653_v53 = vsel %vm7861_vm6, %v7862_v61, %v7821_v9 }
0x25d2   :  { %v7871_v14 = vsel %vm7780_vm9, %v14649_v1, -inf  ;;  %v7868_v60 = vsel %vm7780_vm9, %v14653_v53, -inf }
0x25d3   :  { %v8228_v45 = vmax.f32 %v8226_v44, %v8227_v6  ;;  %7872 = vmax.xlane.f32.xlu1 %v7871_v14  ;;  %7869 = vmax.xlane.f32.xlu0 %v7868_v60 }
0x25d5   :  { %v8229_v39 = vrot.slane %v8228_v45, 2 }
0x25d7   :  { %v8230_v25 = vmax.f32 %v8228_v45, %v8229_v39  ;;  %v7864_v45 = vsub.f32 0.0, %v14640_v24 }
0x25d9   :  { %v8231_v57 = vrot.slane %v8230_v25, 1 }
0x25db   :  { %v8232_v48 = vmax.f32 %v8230_v25, %v8231_v57 }
0x25dd   :  { %v8233_v58 = vsub.f32 %v8219_v16, %v8232_v48  ;;  %v8234_v5 = vsub.f32 %v8220_v52, %v8232_v48  ;;  %v8235_v28 = vsub.f32 0.0, %v8232_v48 }
0x25df   :  { %v8236_v34 = vmul.f32 1.442695, %v8233_v58  ;;  %v8238_v62 = vmul.f32 1.442695, %v8234_v5  ;;  %v8240_v9 = vmul.f32 1.442695, %v8235_v28 }
0x25e0   :  { %v14701_v58 = vsel %vm7861_vm6, %v7864_v45, 0.0 }
0x25e1   :  { %11199 = vpow2.f32 %v8236_v34  ;;  %v7874_v24 = vsel %vm7787_vm0, %v14701_v58, -inf }
0x25e2   :  { %11201 = vpow2.f32 %v8238_v62 }
0x25e3   :  { %11203 = vpow2.f32 %v8240_v9 }
0x25eb   :  { %v11200_v50 = vpop.eup %11199 }
0x25ec   :  { %v11202_v43 = vpop.eup %11201  ;;  %v8242_v0 = vsel %vm7780_vm9, %v11200_v50, 0.0 }
0x25ed   :  { %v11204_v11 = vpop.eup %11203  ;;  %v8243_v36 = vsel %vm7780_vm9, %v11202_v43, 0.0 }
0x25ee   :  { %v8244_v38 = vadd.f32 %v8243_v36, %v8242_v0  ;;  %v8245_v63 = vsel %vm7787_vm0, %v11204_v11, 0.0 }
0x25f0   :  { %v8246_v37 = vadd.f32 %v8245_v63, %v8244_v38 }
0x25f2   :  { %v8247_v22 = vrot.slane %v8246_v37, 4 }
0x25f4   :  { %v8248_v18 = vadd.f32 %v8247_v22, %v8246_v37 }
0x25f6   :  { %v8249_v2 = vrot.slane %v8248_v18, 2 }
0x25f8   :  { %v8250_v3 = vadd.f32 %v8249_v2, %v8248_v18 }
0x25fa   :  { %v8251_v26 = vrot.slane %v8250_v3, 1 }
0x25fc   :  { %v8252_v15 = vadd.f32 %v8251_v26, %v8250_v3 }
0x25fe   :  { %11205 = vlog2.f32 %v8252_v15 }
0x2608   :  { %v11206_v51 = vpop.eup %11205 }
0x2609   :  { %v8254_v8 = vmul.f32 0.6931472, %v11206_v51 }
0x260b   :  { %v14662_v29 = vadd.f32 %v8254_v8, %v8232_v48 }
0x260d   :  { %v8257_v33 = vsub.f32 %v8220_v52, %v14662_v29  ;;  %v8256_v59 = vsub.f32 %v8219_v16, %v14662_v29 }
0x260f   :  { %v14668_v35 = vsel %vm7861_vm6, %v8257_v33, %v8220_v52  ;;  %v14672_v27 = vsel %vm7861_vm6, %v8256_v59, %v8219_v16 }
0x2610   :  { %v8265_v31 = vsel %vm7780_vm9, %v14668_v35, -inf  ;;  %v8262_v4 = vsel %vm7780_vm9, %v14672_v27, -inf }
0x2611   :  { %8266 = vmax.xlane.f32.xlu1 %v8265_v31  ;;  %8263 = vmax.xlane.f32.xlu0 %v8262_v4 }
0x2660   :  { %v7873_v21 = vpop.xlane.xlu1 %7872  ;;  %v7870_v46 = vpop.xlane.xlu0 %7869 }
0x2661   :  { %v7878_v54 = vsub.f32 %v14649_v1, %v7873_v21  ;;  %v7877_v42 = vsub.f32 %v14653_v53, %v7870_v46 }
0x2663   :  { %v7882_v56 = vmul.f32 1.442695, %v7878_v54  ;;  %v7880_v12 = vmul.f32 1.442695, %v7877_v42 }
0x2665   :  { %11207 = vpow2.f32 %v7882_v56 }
0x2666   :  { %11209 = vpow2.f32 %v7880_v12 }
0x266f   :  { %v11208_v10 = vpop.eup %11207 }
0x2670   :  { %v11210_v20 = vpop.eup %11209  ;;  %v7889_v55 = vsel %vm7780_vm9, %v11208_v10, 0.0 }
0x2671   :  { %7890 = vadd.xlane.f32.xlu1 %v7889_v55  ;;  %v7886_v23 = vsel %vm7780_vm9, %v11210_v20, 0.0 }
0x2672   :  { %7887 = vadd.xlane.f32.xlu0 %v7886_v23  ;;  %v8258_v23 = vsub.f32 0.0, %v14662_v29 }
0x269e   :  { %v14682_v40 = vpop.xlane.xlu1 %8266  ;;  %v14684_v47 = vpop.xlane.xlu0 %8263 }
0x269f   :  { %v8272_v7 = vsub.f32 %v14668_v35, %v14682_v40  ;;  %v8271_v52 = vsub.f32 %v14672_v27, %v14684_v47 }
0x26a1   :  { %v8276_v49 = vmul.f32 1.442695, %v8272_v7  ;;  %v8274_v16 = vmul.f32 1.442695, %v8271_v52 }
0x26a3   :  { %11211 = vpow2.f32 %v8276_v49 }
0x26a4   :  { %11213 = vpow2.f32 %v8274_v16 }
0x26ad   :  { %v11212_v41 = vpop.eup %11211 }
0x26ae   :  { %v11214_v19 = vpop.eup %11213  ;;  %v8283_v30 = vsel %vm7780_vm9, %v11212_v41, 0.0 }
0x26af   :  { %8284 = vadd.xlane.f32.xlu1 %v8283_v30  ;;  %v8280_v17 = vsel %vm7780_vm9, %v11214_v19, 0.0  ;;  %v14722_v19 = vsel %vm7861_vm6, %v8258_v23, 0.0 }
0x26b0   :  { %8281 = vadd.xlane.f32.xlu0 %v8280_v17 }
0x26fe   :  { %v7891_v44 = vpop.xlane.xlu1 %7890 }
0x26ff   :  { %11215 = vlog2.f32 %v7891_v44  ;;  %v7888_v13 = vpop.xlane.xlu0 %7887 }
0x2700   :  { %11217 = vlog2.f32 %v7888_v13 }
0x2709   :  { %v11216_v61 = vpop.eup %11215 }
0x270a   :  { %v11218_v6 = vpop.eup %11217  ;;  %v7898_v14 = vmul.f32 0.6931472, %v11216_v61 }
0x270b   :  { %v7896_v60 = vmul.f32 0.6931472, %v11218_v6 }
0x270c   :  { %v7902_v39 = vadd.f32 %v7898_v14, %v7873_v21 }
0x270d   :  { %v7901_v25 = vadd.f32 %v7896_v60, %v7870_v46 }
0x270e   :  { %v14694_v57 = vsub.f32 %v14649_v1, %v7902_v39 }
0x270f   :  { %v14697_v48 = vsub.f32 %v14653_v53, %v7901_v25 }
0x2710   :  { %v7911_v5 = vsel %vm7780_vm9, %v14694_v57, -inf }
0x2711   :  { %v7910_v28 = vsel %vm7780_vm9, %v14697_v48, -inf }
0x2712   :  { %v7913_v34 = vmax.f32 %v7910_v28, %v7911_v5 }
0x2714   :  { %v7914_v62 = vmax.f32 %v7913_v34, %v7874_v24 }
0x2716   :  { %v7915_v1 = vrot.slane %v7914_v62, 4 }
0x2718   :  { %v7916_v9 = vmax.f32 %v7914_v62, %v7915_v1 }
0x271a   :  { %v7917_v50 = vrot.slane %v7916_v9, 2 }
0x271c   :  { %v7918_v53 = vmax.f32 %v7916_v9, %v7917_v50 }
0x271e   :  { %v7919_v43 = vrot.slane %v7918_v53, 1 }
0x2720   :  { %v7920_v0 = vmax.f32 %v7918_v53, %v7919_v43 }
0x2722   :  { %v7921_v11 = vsub.f32 %v14697_v48, %v7920_v0  ;;  %v7922_v36 = vsub.f32 %v14694_v57, %v7920_v0  ;;  %v7923_v38 = vsub.f32 %v14701_v58, %v7920_v0 }
0x2724   :  { %v7924_v63 = vmul.f32 1.442695, %v7921_v11  ;;  %v7926_v37 = vmul.f32 1.442695, %v7922_v36  ;;  %v7928_v22 = vmul.f32 1.442695, %v7923_v38 }
0x2726   :  { %11219 = vpow2.f32 %v7924_v63 }
0x2727   :  { %11221 = vpow2.f32 %v7926_v37 }
0x2728   :  { %11223 = vpow2.f32 %v7928_v22 }
0x2730   :  { %v11220_v18 = vpop.eup %11219 }
0x2731   :  { %v11222_v2 = vpop.eup %11221  ;;  %v7930_v3 = vsel %vm7780_vm9, %v11220_v18, 0.0 }
0x2732   :  { %v11224_v26 = vpop.eup %11223  ;;  %v7931_v15 = vsel %vm7780_vm9, %v11222_v2, 0.0 }
0x2733   :  { %v7932_v51 = vadd.f32 %v7931_v15, %v7930_v3  ;;  %v7933_v8 = vsel %vm7787_vm0, %v11224_v26, 0.0 }
0x2735   :  { %v7934_v33 = vadd.f32 %v7933_v8, %v7932_v51 }
0x2737   :  { %v7935_v59 = vrot.slane %v7934_v33, 4 }
0x2739   :  { %v7936_v31 = vadd.f32 %v7935_v59, %v7934_v33 }
0x273b   :  { %v7937_v4 = vrot.slane %v7936_v31, 2 }
0x273c   :  { %v8285_v21 = vpop.xlane.xlu1 %8284 }
0x273d   :  { %11225 = vlog2.f32 %v8285_v21  ;;  %v8282_v46 = vpop.xlane.xlu0 %8281  ;;  %v7938_v54 = vadd.f32 %v7937_v4, %v7936_v31 }
0x273e   :  { %11227 = vlog2.f32 %v8282_v46 }
0x273f   :  { %v7939_v42 = vrot.slane %v7938_v54, 1 }
0x2741   :  { %v7940_v56 = vadd.f32 %v7939_v42, %v7938_v54 }
0x2743   :  { %11229 = vlog2.f32 %v7940_v56 }
0x2747   :  { %v11226_v12 = vpop.eup %11225 }
0x2748   :  { %v11228_v10 = vpop.eup %11227  ;;  %v8292_v20 = vmul.f32 0.6931472, %v11226_v12 }
0x2749   :  { %v8290_v55 = vmul.f32 0.6931472, %v11228_v10 }
0x274a   :  { %v8296_v7 = vadd.f32 %v8292_v20, %v14682_v40  ;;  %v8268_v40 = vsel %vm7787_vm0, %v14722_v19, -inf }
0x274b   :  { %v8295_v52 = vadd.f32 %v8290_v55, %v14684_v47 }
0x274c   :  { %v8299_v49 = vsub.f32 %v14668_v35, %v8296_v7 }
0x274d   :  { %v11230_v16 = vpop.eup %11229  ;;  %v8298_v41 = vsub.f32 %v14672_v27, %v8295_v52 }
0x274e   :  { %v8305_v30 = vsel %vm7780_vm9, %v8299_v49, -inf  ;;  %v7942_v17 = vmul.f32 0.6931472, %v11230_v16 }
0x274f   :  { %v8304_v44 = vsel %vm7780_vm9, %v8298_v41, -inf }
0x2750   :  { %v8307_v13 = vmax.f32 %v8304_v44, %v8305_v30  ;;  %v14726_v29 = vadd.f32 %v7942_v17, %v7920_v0 }
0x2752   :  { %v8308_v47 = vmax.f32 %v8307_v13, %v8268_v40  ;;  %v7945_v35 = vsub.f32 %v14694_v57, %v14726_v29  ;;  %v7944_v27 = vsub.f32 %v14697_v48, %v14726_v29 }
0x2754   :  { %v8309_v61 = vrot.slane %v8308_v47, 4  ;;  %v14737_v6 = vsel %vm7861_vm6, %v7945_v35, %v14694_v57  ;;  %v14742_v14 = vsel %vm7861_vm6, %v7944_v27, %v14697_v48 }
0x2755   :  { %v7953_v60 = vsel %vm7780_vm9, %v14737_v6, -inf  ;;  %v7950_v45 = vsel %vm7780_vm9, %v14742_v14, -inf }
0x2756   :  { %v8310_v39 = vmax.f32 %v8308_v47, %v8309_v61  ;;  %7954 = vmax.xlane.f32.xlu1 %v7953_v60  ;;  %7951 = vmax.xlane.f32.xlu0 %v7950_v45 }
0x2758   :  { %v8311_v25 = vrot.slane %v8310_v39, 2 }
0x275a   :  { %v8312_v5 = vmax.f32 %v8310_v39, %v8311_v25 }
0x275c   :  { %v8313_v28 = vrot.slane %v8312_v5, 1 }
0x275e   :  { %v8314_v34 = vmax.f32 %v8312_v5, %v8313_v28  ;;  %v7946_v5 = vsub.f32 %v14701_v58, %v14726_v29 }
0x2760   :  { %v8315_v57 = vsub.f32 %v8298_v41, %v8314_v34  ;;  %v8316_v24 = vsub.f32 %v8299_v49, %v8314_v34  ;;  %v8317_v62 = vsub.f32 %v14722_v19, %v8314_v34 }
0x2762   :  { %v8318_v1 = vmul.f32 1.442695, %v8315_v57  ;;  %v8320_v48 = vmul.f32 1.442695, %v8316_v24  ;;  %v8322_v9 = vmul.f32 1.442695, %v8317_v62 }
0x2764   :  { %11231 = vpow2.f32 %v8318_v1  ;;  %v7949_v1 = vsel %vm7861_vm6, %v7946_v5, %v14701_v58 }
0x2765   :  { %11233 = vpow2.f32 %v8320_v48  ;;  %v7956_v29 = vsel %vm7787_vm0, %v7949_v1, -inf }
0x2766   :  { %11235 = vpow2.f32 %v8322_v9 }
0x276e   :  { %v11232_v50 = vpop.eup %11231 }
0x276f   :  { %v11234_v53 = vpop.eup %11233  ;;  %v8324_v43 = vsel %vm7780_vm9, %v11232_v50, 0.0 }
0x2770   :  { %v11236_v0 = vpop.eup %11235  ;;  %v8325_v11 = vsel %vm7780_vm9, %v11234_v53, 0.0 }
0x2771   :  { %v8326_v36 = vadd.f32 %v8325_v11, %v8324_v43  ;;  %v8327_v38 = vsel %vm7787_vm0, %v11236_v0, 0.0 }
0x2773   :  { %v8328_v63 = vadd.f32 %v8327_v38, %v8326_v36 }
0x2775   :  { %v8329_v37 = vrot.slane %v8328_v63, 4 }
0x2777   :  { %v8330_v22 = vadd.f32 %v8329_v37, %v8328_v63 }
0x2779   :  { %v8331_v18 = vrot.slane %v8330_v22, 2 }
0x277b   :  { %v8332_v2 = vadd.f32 %v8331_v18, %v8330_v22 }
0x277d   :  { %v8333_v3 = vrot.slane %v8332_v2, 1 }
0x277f   :  { %v8334_v26 = vadd.f32 %v8333_v3, %v8332_v2 }
0x2781   :  { %11237 = vlog2.f32 %v8334_v26 }
0x278b   :  { %v11238_v15 = vpop.eup %11237 }
0x278c   :  { %v8336_v51 = vmul.f32 0.6931472, %v11238_v15 }
0x278e   :  { %v14752_v8 = vadd.f32 %v8336_v51, %v8314_v34 }
0x2790   :  { %v8339_v33 = vsub.f32 %v8299_v49, %v14752_v8  ;;  %v8338_v59 = vsub.f32 %v8298_v41, %v14752_v8 }
0x2792   :  { %v14758_v31 = vsel %vm7861_vm6, %v8339_v33, %v8299_v49  ;;  %v14762_v4 = vsel %vm7861_vm6, %v8338_v59, %v8298_v41 }
0x2793   :  { %v8347_v21 = vsel %vm7780_vm9, %v14758_v31, -inf  ;;  %v8344_v46 = vsel %vm7780_vm9, %v14762_v4, -inf }
0x2794   :  { %8348 = vmax.xlane.f32.xlu1 %v8347_v21  ;;  %8345 = vmax.xlane.f32.xlu0 %v8344_v46 }
0x27e3   :  { %v7955_v54 = vpop.xlane.xlu1 %7954  ;;  %v7952_v42 = vpop.xlane.xlu0 %7951 }
0x27e4   :  { %v7960_v56 = vsub.f32 %v14737_v6, %v7955_v54  ;;  %v7959_v12 = vsub.f32 %v14742_v14, %v7952_v42 }
0x27e6   :  { %v7964_v10 = vmul.f32 1.442695, %v7960_v56  ;;  %v7962_v20 = vmul.f32 1.442695, %v7959_v12 }
0x27e8   :  { %11239 = vpow2.f32 %v7964_v10 }
0x27e9   :  { %11241 = vpow2.f32 %v7962_v20 }
0x27f2   :  { %v11240_v55 = vpop.eup %11239 }
0x27f3   :  { %v11242_v23 = vpop.eup %11241  ;;  %v7971_v7 = vsel %vm7780_vm9, %v11240_v55, 0.0 }
0x27f4   :  { %7972 = vadd.xlane.f32.xlu1 %v7971_v7  ;;  %v7968_v52 = vsel %vm7780_vm9, %v11242_v23, 0.0 }
0x27f5   :  { %7969 = vadd.xlane.f32.xlu0 %v7968_v52 }
0x2821   :  { %v14772_v49 = vpop.xlane.xlu1 %8348  ;;  %v14774_v16 = vpop.xlane.xlu0 %8345 }
0x2822   :  { %v8354_v41 = vsub.f32 %v14758_v31, %v14772_v49  ;;  %v8353_v30 = vsub.f32 %v14762_v4, %v14774_v16 }
0x2824   :  { %v8358_v17 = vmul.f32 1.442695, %v8354_v41  ;;  %v8356_v44 = vmul.f32 1.442695, %v8353_v30  ;;  %v8340_v41 = vsub.f32 %v14722_v19, %v14752_v8 }
0x2826   :  { %11243 = vpow2.f32 %v8358_v17 }
0x2827   :  { %11245 = vpow2.f32 %v8356_v44 }
0x2830   :  { %v11244_v13 = vpop.eup %11243 }
0x2831   :  { %v11246_v40 = vpop.eup %11245  ;;  %v8365_v47 = vsel %vm7780_vm9, %v11244_v13, 0.0 }
0x2832   :  { %8366 = vadd.xlane.f32.xlu1 %v8365_v47  ;;  %v8362_v35 = vsel %vm7780_vm9, %v11246_v40, 0.0 }
0x2833   :  { %8363 = vadd.xlane.f32.xlu0 %v8362_v35 }
0x2881   :  { %v7973_v27 = vpop.xlane.xlu1 %7972 }
0x2882   :  { %11247 = vlog2.f32 %v7973_v27  ;;  %v7970_v61 = vpop.xlane.xlu0 %7969  ;;  %v8343_v27 = vsel %vm7861_vm6, %v8340_v41, %v14722_v19 }
0x2883   :  { %11249 = vlog2.f32 %v7970_v61 }
0x288c   :  { %v11248_v60 = vpop.eup %11247 }
0x288d   :  { %v11250_v45 = vpop.eup %11249  ;;  %v7980_v39 = vmul.f32 0.6931472, %v11248_v60 }
0x288e   :  { %v7978_v25 = vmul.f32 0.6931472, %v11250_v45 }
0x288f   :  { %v7984_v28 = vadd.f32 %v7980_v39, %v7955_v54 }
0x2890   :  { %v7983_v34 = vadd.f32 %v7978_v25, %v7952_v42 }
0x2891   :  { %v14785_v57 = vsub.f32 %v14737_v6, %v7984_v28 }
0x2892   :  { %v14788_v24 = vsub.f32 %v14742_v14, %v7983_v34 }
0x2893   :  { %v7993_v62 = vsel %vm7780_vm9, %v14785_v57, -inf }
0x2894   :  { %v7992_v48 = vsel %vm7780_vm9, %v14788_v24, -inf }
0x2895   :  { %v7995_v9 = vmax.f32 %v7992_v48, %v7993_v62 }
0x2897   :  { %v7996_v50 = vmax.f32 %v7995_v9, %v7956_v29 }
0x2899   :  { %v7997_v53 = vrot.slane %v7996_v50, 4 }
0x289b   :  { %v7998_v6 = vmax.f32 %v7996_v50, %v7997_v53 }
0x289d   :  { %v7999_v43 = vrot.slane %v7998_v6, 2 }
0x289f   :  { %v8000_v0 = vmax.f32 %v7998_v6, %v7999_v43 }
0x28a1   :  { %v8001_v14 = vrot.slane %v8000_v0, 1 }
0x28a3   :  { %v8002_v11 = vmax.f32 %v8000_v0, %v8001_v14 }
0x28a5   :  { %v8003_v36 = vsub.f32 %v14788_v24, %v8002_v11  ;;  %v8004_v38 = vsub.f32 %v14785_v57, %v8002_v11  ;;  %v8005_v63 = vsub.f32 %v7949_v1, %v8002_v11 }
0x28a7   :  { %v8006_v37 = vmul.f32 1.442695, %v8003_v36  ;;  %v8008_v58 = vmul.f32 1.442695, %v8004_v38  ;;  %v8010_v22 = vmul.f32 1.442695, %v8005_v63 }
0x28a9   :  { %11251 = vpow2.f32 %v8006_v37 }
0x28aa   :  { %11253 = vpow2.f32 %v8008_v58 }
0x28ab   :  { %11255 = vpow2.f32 %v8010_v22 }
0x28b3   :  { %v11252_v18 = vpop.eup %11251 }
0x28b4   :  { %v11254_v2 = vpop.eup %11253  ;;  %v8012_v3 = vsel %vm7780_vm9, %v11252_v18, 0.0 }
0x28b5   :  { %v11256_v26 = vpop.eup %11255  ;;  %v8013_v15 = vsel %vm7780_vm9, %v11254_v2, 0.0 }
0x28b6   :  { %v8014_v51 = vadd.f32 %v8013_v15, %v8012_v3  ;;  %v8015_v33 = vsel %vm7787_vm0, %v11256_v26, 0.0 }
0x28b8   :  { %v8016_v59 = vadd.f32 %v8015_v33, %v8014_v51 }
0x28ba   :  { %v8017_v21 = vrot.slane %v8016_v59, 4 }
0x28bc   :  { %v8018_v46 = vadd.f32 %v8017_v21, %v8016_v59 }
0x28be   :  { %v8019_v54 = vrot.slane %v8018_v46, 2 }
0x28bf   :  { %v8367_v42 = vpop.xlane.xlu1 %8366 }
0x28c0   :  { %v8020_v56 = vadd.f32 %v8019_v54, %v8018_v46  ;;  %11257 = vlog2.f32 %v8367_v42  ;;  %v8364_v12 = vpop.xlane.xlu0 %8363 }
0x28c1   :  { %11259 = vlog2.f32 %v8364_v12 }
0x28c2   :  { %v8021_v10 = vrot.slane %v8020_v56, 1 }
0x28c4   :  { %v8022_v20 = vadd.f32 %v8021_v10, %v8020_v56 }
0x28c6   :  { %11261 = vlog2.f32 %v8022_v20 }
0x28ca   :  { %v11258_v55 = vpop.eup %11257 }
0x28cb   :  { %v11260_v23 = vpop.eup %11259  ;;  %v8374_v7 = vmul.f32 0.6931472, %v11258_v55 }
0x28cc   :  { %v8372_v52 = vmul.f32 0.6931472, %v11260_v23 }
0x28cd   :  { %v8378_v30 = vadd.f32 %v8374_v7, %v14772_v49 }
0x28ce   :  { %v8377_v17 = vadd.f32 %v8372_v52, %v14774_v16 }
0x28cf   :  { %v14808_v44 = vsub.f32 %v14758_v31, %v8378_v30  ;;  %v8350_v31 = vsel %vm7787_vm0, %v8343_v27, -inf }
0x28d0   :  { %v11262_v13 = vpop.eup %11261  ;;  %v14811_v40 = vsub.f32 %v14762_v4, %v8377_v17 }
0x28d1   :  { %v8024_v47 = vmul.f32 0.6931472, %v11262_v13  ;;  %v8387_v35 = vsel %vm7780_vm9, %v14808_v44, -inf }
0x28d2   :  { %v8386_v8 = vsel %vm7780_vm9, %v14811_v40, -inf }
0x28d3   :  { %v8025_v49 = vadd.f32 %v8024_v47, %v8002_v11  ;;  %v8389_v16 = vmax.f32 %v8386_v8, %v8387_v35 }
0x28d5   :  { %v8026_v61 = vsub.f32 %v14788_v24, %v8025_v49  ;;  %v8390_v60 = vmax.f32 %v8389_v16, %v8350_v31  ;;  %v8027_v4 = vsub.f32 %v14785_v57, %v8025_v49 }
0x28d7   :  { %v8391_v45 = vrot.slane %v8390_v60, 4  ;;  %v8029_v39 = vsel %vm7861_vm6, %v8027_v4, %v14785_v57  ;;  %v8028_v19 = vsel %vm7861_vm6, %v8026_v61, %v14788_v24 }
0x28d8   :  { %v8032_v25 = vmul.f32 1.442695, %v8029_v39  ;;  %v8030_v5 = vmul.f32 1.442695, %v8028_v19 }
0x28d9   :  { %v8392_v28 = vmax.f32 %v8390_v60, %v8391_v45 }
0x28da   :  { %11263 = vpow2.f32 %v8032_v25 }
0x28db   :  { %v8393_v34 = vrot.slane %v8392_v28, 2  ;;  %11265 = vpow2.f32 %v8030_v5 }
0x28dd   :  { %v8394_v62 = vmax.f32 %v8392_v28, %v8393_v34 }
0x28df   :  { %v8395_v1 = vrot.slane %v8394_v62, 1 }
0x28e1   :  { %v8396_v48 = vmax.f32 %v8394_v62, %v8395_v1 }
0x28e3   :  { %v8397_v9 = vsub.f32 %v14811_v40, %v8396_v48  ;;  %v8398_v29 = vsub.f32 %v14808_v44, %v8396_v48  ;;  %v8399_v50 = vsub.f32 %v8343_v27, %v8396_v48 }
0x28e4   :  { %v11264_v53 = vpop.eup %11263 }
0x28e5   :  { %v11266_v57 = vpop.eup %11265  ;;  %v8400_v6 = vmul.f32 1.442695, %v8397_v9  ;;  %v8402_v43 = vmul.f32 1.442695, %v8398_v29  ;;  %v8404_v0 = vmul.f32 1.442695, %v8399_v50 }
0x28e6   :  { %8035 = vst.msk [vmem:[#allocation2 + $0x8] sm:$0xff] %vm7777_vm4, %v11264_v53  ;;  %v8039_v24 = vsel %vm7777_vm4, %v11264_v53, 0.0  ;;  %v8036_v14 = vsel %vm7777_vm4, %v11266_v57, 0.0  ;;  %8034 = vst.msk [vmem:[#allocation2] sm:$0xff] %vm7777_vm4, %v11266_v57 }
0x28e7   :  { %11267 = vpow2.f32 %v8400_v6  ;;  %8040 = vadd.xlane.f32.xlu1 %v8039_v24  ;;  %8037 = vadd.xlane.f32.xlu0 %v8036_v14  ;;  %v8045_v11 = vadd.f32 %v8039_v24, %v8036_v14 }
0x28e8   :  { %11269 = vpow2.f32 %v8402_v43 }
0x28e9   :  { %11271 = vpow2.f32 %v8404_v0  ;;  %v8046_v36 = vrot.slane %v8045_v11, 4 }
0x28eb   :  { %v8047_v38 = vadd.f32 %v8046_v36, %v8045_v11 }
0x28ed   :  { %v8048_v63 = vrot.slane %v8047_v38, 2 }
0x28ef   :  { %v8049_v37 = vadd.f32 %v8048_v63, %v8047_v38 }
0x28f1   :  { %v11268_v58 = vpop.eup %11267  ;;  %v8050_v22 = vrot.slane %v8049_v37, 1 }
0x28f2   :  { %v11270_v18 = vpop.eup %11269  ;;  %v8406_v2 = vsel %vm7780_vm9, %v11268_v58, 0.0 }
0x28f3   :  { %v11272_v3 = vpop.eup %11271  ;;  %v8407_v26 = vsel %vm7780_vm9, %v11270_v18, 0.0  ;;  %v8051_v15 = vadd.f32 %v8050_v22, %v8049_v37 }
0x28f4   :  { %v8408_v51 = vadd.f32 %v8407_v26, %v8406_v2  ;;  %v8409_v33 = vsel %vm7787_vm0, %v11272_v3, 0.0 }
0x28f5   :  { %8053 = vst.msk [vmem:[#allocation4] sm:$0x1] %vm8052_vm1, %v8051_v15 }
0x28f6   :  { %v8410_v59 = vadd.f32 %v8409_v33, %v8408_v51 }
0x28f8   :  { %v8411_v21 = vrot.slane %v8410_v59, 4 }
0x28fa   :  { %v8412_v46 = vadd.f32 %v8411_v21, %v8410_v59 }
0x28fc   :  { %v8413_v54 = vrot.slane %v8412_v46, 2 }
0x28fe   :  { %v8414_v42 = vadd.f32 %v8413_v54, %v8412_v46 }
0x2900   :  { %v8415_v56 = vrot.slane %v8414_v42, 1 }
0x2902   :  { %v8416_v12 = vadd.f32 %v8415_v56, %v8414_v42 }
0x2904   :  { %11273 = vlog2.f32 %v8416_v12 }
0x290e   :  { %v11274_v10 = vpop.eup %11273 }
0x290f   :  { %v8418_v20 = vmul.f32 0.6931472, %v11274_v10 }
0x2911   :  { %v8419_v55 = vadd.f32 %v8418_v20, %v8396_v48 }
0x2913   :  { %v8420_v23 = vsub.f32 %v14811_v40, %v8419_v55  ;;  %v8421_v7 = vsub.f32 %v14808_v44, %v8419_v55 }
0x2915   :  { %v8423_v52 = vsel %vm7861_vm6, %v8421_v7, %v14808_v44  ;;  %v8422_v41 = vsel %vm7861_vm6, %v8420_v23, %v14811_v40 }
0x2916   :  { %v8426_v30 = vmul.f32 1.442695, %v8423_v52  ;;  %v8424_v17 = vmul.f32 1.442695, %v8422_v41 }
0x2918   :  { %11275 = vpow2.f32 %v8426_v30 }
0x2919   :  { %11277 = vpow2.f32 %v8424_v17 }
0x2922   :  { %v11276_v13 = vpop.eup %11275 }
0x2923   :  { %v11278_v47 = vpop.eup %11277  ;;  %v8434_v35 = vsel %vm7777_vm4, %v11276_v13, 0.0  ;;  %8430 = vst.msk [vmem:[#allocation2 + $0x18] sm:$0xff] %vm7777_vm4, %v11276_v13 }
0x2924   :  { %8435 = vadd.xlane.f32.xlu1 %v8434_v35  ;;  %v8431_v27 = vsel %vm7777_vm4, %v11278_v47, 0.0  ;;  %8429 = vst.msk [vmem:[#allocation2 + $0x10] sm:$0xff] %vm7777_vm4, %v11278_v47 }
0x2925   :  { %8432 = vadd.xlane.f32.xlu0 %v8431_v27  ;;  %v8440_v44 = vadd.f32 %v8434_v35, %v8431_v27 }
0x2927   :  { %v8441_v8 = vrot.slane %v8440_v44, 4 }
0x2929   :  { %v8442_v32 = vadd.f32 %v8441_v8, %v8440_v44 }
0x292b   :  { %v8443_v40 = vrot.slane %v8442_v32, 2 }
0x292d   :  { %v8444_v49 = vadd.f32 %v8443_v40, %v8442_v32 }
0x292f   :  { %v8445_v16 = vrot.slane %v8444_v49, 1 }
0x2931   :  { %v8446_v31 = vadd.f32 %v8445_v16, %v8444_v49 }
0x2933   :  { %8448 = vst.msk [vmem:[#allocation4 + $0x1] sm:$0x1] %vm8052_vm1, %v8446_v31 }
0x2934   :  { %11318 = shalt.err (!%p11315_p4)
}
0x2935   :  { %s11319_s29 = scalar_lea.hbm %s14911_s16, 512 }
0x2936   :  { %p11320_p5 = scmp.ne.s32.totalorder %s14911_s16, %s11319_s29  ;;  %p11323_p6 = scmp.lt.u32.totalorder %s11319_s29, %s14911_s16 }
0x2938   :  { %p11325_p7 = pnand %p11323_p6, %p11320_p5 }
0x293a   :  { %11328 = shalt.err (!%p11325_p7)
}
0x293b   :  { %s11365_s15 = smov 128   ;;  %s11366_s9 = smov 8  }
0x293c   :  { %8460 = dma.vmem_to_hbm [thread:$0]  %s8455_s7, 512, %s14911_s16, [#allocation3], %s11365_s15, %s11365_s15, %s11366_s9  }
0x293d   :  { %s11329_s3 = scalar_lea.vmem %s14852_s6, 32  ;;  %p11334_p9 = scmp.lt.s32.totalorder %s14852_s6, %s14852_s6 }
0x293e   :  { %p11330_p8 = scmp.ne.s32.totalorder %s14852_s6, %s11329_s3  ;;  %p11335_p10 = scmp.lt.s32.totalorder %s11329_s3, %s11329_s3 }
0x2940   :  { %p11336_p11 = por %p11335_p10, %p11334_p9 }
0x2942   :  { %p11337_p12 = pnand %p11336_p11, %p11330_p8 }
0x2944   :  { %11340 = shalt.err (!%p11337_p12)
}
0x2945   :  { %s11341_s12 = scalar_lea.hbm %s14913_s18, 32 }
0x2946   :  { %p11342_p13 = scmp.ne.s32.totalorder %s14913_s18, %s11341_s12  ;;  %p11345_p0 = scmp.lt.u32.totalorder %s11341_s12, %s14913_s18 }
0x2948   :  { %p11347_p1 = pnand %p11345_p0, %p11342_p13 }
0x294a   :  { %11350 = shalt.err (!%p11347_p1)
}
0x294b   :  { %s11367_s16 = smov 16   ;;  %s11368_s4 = smov 1   ;;  %vm8042_vm12 = vcmask 7168  }
0x294c   :  { %8474 = dma.vmem_to_hbm [thread:$0]  %s14852_s6, 32, %s14913_s18, [#allocation5], %s11367_s16, %s11367_s16, %s11368_s4  }
0x2974   :  { %v8041_v61 = vpop.xlane.xlu1 %8040  ;;  %v8038_v60 = vpop.xlane.xlu0 %8037 }
0x2975   :  { %8044 = vst.msk [vmem:[%s14912_s17 + $0x8] sm:$0xff] %vm8042_vm12, %v8041_v61  ;;  %8043 = vst.msk [vmem:[%s14912_s17] sm:$0xff] %vm8042_vm12, %v8038_v60 }
0x29b1   :  { %v8436_v4 = vpop.xlane.xlu1 %8435 }
0x29b2   :  { %8959 = vst.msk [vmem:[%s14912_s17 + $0x18] sm:$0xff] %vm8042_vm12, %v8436_v4  ;;  %v8433_v45 = vpop.xlane.xlu0 %8432 }
0x29b3   :  { %8958 = vst.msk [vmem:[%s14912_s17 + $0x10] sm:$0xff] %vm8042_vm12, %v8433_v45 }
0x29b4   :  { %11351 = dma.done.wait [#allocation3], 512  }
0x29b5   :  { %11352 = vsyncadd [#allocation3], 4294966784 }
0x29b6   :  { %11353 = dma.done.wait [#allocation5], 32  }
0x29b7   :  { %11354 = vsyncadd [#allocation5], 4294967264 }
0x29b8   :  { %8483 = vsyncpa [#allocation3], 1 }
0x29b9   :  { %8484 = vsyncpa [#allocation5], 1 }

</bundles_post_ra>
